<compile_context>
chip_gen: v7x
topology: tpu7x:2x2x1
jax: 0.10.0
libtpu: 0.0.40
codegen_flags: <defaults>
</compile_context>

<pallas_src>
import functools

import jax
import jax.numpy as jnp
from jax import lax
from jax.experimental import pallas as pl
from jax.experimental.pallas import tpu as pltpu


_CP = 8  # column (sublane) padding inside the VMEM slabs; multiple of 8 >= K//2


def _block_weights(w):
    """OIHW conv weight -> im2col-blocked weight with an extra boxsum column.

    w: (Cout, Cin, K, K) -> (K*K*(Cin+1), Cout+1).  Per tap the input channels are
    [Cin conv channels, 1 mask channel]; the last output column sums the mask
    channel over all taps, i.e. it produces boxsum(mask) (the "sparsity" conv).
    """
    Cout, Cin, K, _ = w.shape
    w_t = jnp.transpose(w, (2, 3, 1, 0)).reshape(K * K, Cin, Cout)   # (KK, Cin, Cout)
    conv_blk = jnp.concatenate(
        [w_t, jnp.zeros((K * K, 1, Cout), w.dtype)], axis=1)          # (KK, Cin+1, Cout)
    sum_col = jnp.concatenate(
        [jnp.zeros((K * K, Cin, 1), w.dtype),
         jnp.ones((K * K, 1, 1), w.dtype)], axis=1)                   # (KK, Cin+1, 1)
    wb = jnp.concatenate([conv_blk, sum_col], axis=2)                 # (KK, Cin+1, Cout+1)
    return wb.reshape(K * K * (Cin + 1), Cout + 1)


def _fused_kernel(x_ref, m_ref, w1_ref, b1_ref, w5_ref, b5_ref, w6_ref, b6_ref,
                  o_ref, slab1, patch1, slab5, patch5,
                  *, H, W, K1, K5, C, eps):
    # x_ref, m_ref : (1, H, W, 1)       one image and its mask
    # w1_ref       : (K1*K1*2, C+1)     blocked [conv | boxsum] weights, layer 1
    # b1_ref       : (1, C)
    # w5_ref       : (K5*K5*(C+1), C+1) blocked weights, layer 5
    # b5_ref       : (1, C)
    # w6_ref       : (C, 1)             1x1 projection, layer 6
    # b6_ref       : (1, 1)
    # o_ref        : (1, H, W, 1)
    # slab1/slab5  : zero-framed padded layer inputs (VMEM scratch)
    # patch1/patch5: im2col patch matrices (VMEM scratch)
    HW = H * W

    def zero_frame(slab_ref, p, ch):
        """Zero only the p-wide padding ring the taps read (cols beyond it are
        never read, so they stay uninitialized — no wasted memset)."""
        zr = jnp.zeros((p, W + 2 * p, ch), jnp.float32)
        zc = jnp.zeros((H, p, ch), jnp.float32)
        slab_ref[0:p, _CP - p:_CP + W + p, :] = zr                     # top
        slab_ref[p + H:2 * p + H, _CP - p:_CP + W + p, :] = zr         # bottom
        slab_ref[p:p + H, _CP - p:_CP, :] = zc                         # left
        slab_ref[p:p + H, _CP + W:_CP + W + p, :] = zc                 # right

    def conv_boxsum_maxpool(slab_ref, patch_ref, k, ct, w_ref):
        """Fused sparse-conv pass over a padded slab.

        slab_ref : (H+2p, W+2*_CP, ct+1); channels [0:ct] = [x*mask, mask] feed the
                   MXU, channel ct is the (shifted) mask used for the max-pool.
        Returns (conv (HW, C), boxsum(mask) (HW, 1), maxpool(shifted mask) (HW, 1)).
        """
        p = k // 2
        mx = None
        t = 0
        for dy in range(k):
            for dx in range(k):
                c0 = _CP - p + dx
                tap = slab_ref[dy:dy + H, c0:c0 + W, :]                # (H, W, ct+1)
                patch_ref[:, t * ct:(t + 1) * ct] = tap[:, :, 0:ct].reshape(HW, ct)
                pool_tap = tap[:, :, ct:ct + 1].reshape(HW, 1)
                mx = pool_tap if mx is None else jnp.maximum(mx, pool_tap)
                t += 1
        # One deep MXU matmul per layer: conv and boxsum(mask) in the same dot.
        out = jnp.dot(patch_ref[...], w_ref[...], preferred_element_type=jnp.float32)
        return out[:, 0:C], out[:, C:C + 1], mx

    # ---------------- SparseLayer1: SparseConv(1, C, K1) ----------------
    p1 = K1 // 2
    m0 = m_ref[0]                                                      # (H, W, 1)
    # Shift so the slab's zero padding can never win the max-pool; exact for any
    # real-valued mask and exactly 0 (a no-op) for non-negative / {0,1} masks.
    mn1 = jnp.minimum(jnp.min(m0.reshape(HW, 1), axis=0, keepdims=True), 0.0)  # (1,1)
    zero_frame(slab1, p1, 3)
    slab1[p1:p1 + H, _CP:_CP + W, 0:1] = x_ref[0] * m0
    slab1[p1:p1 + H, _CP:_CP + W, 1:2] = m0
    slab1[p1:p1 + H, _CP:_CP + W, 2:3] = m0 - mn1
    conv1, s1, mx1 = conv_boxsum_maxpool(slab1, patch1, K1, 2, w1_ref)
    y1 = jnp.maximum(conv1 * pl.reciprocal(s1 + eps) + b1_ref[...], 0.0)  # (HW, C)
    m1 = mx1 + mn1                                                     # maxpool_K1(mask)

    # ---------------- SparseLayer5: SparseConv(C, C, K5) ----------------
    p5 = K5 // 2
    mn5 = jnp.minimum(jnp.min(m1, axis=0, keepdims=True), 0.0)         # (1, 1)
    zero_frame(slab5, p5, C + 2)
    slab5[p5:p5 + H, _CP:_CP + W, 0:C] = (y1 * m1).reshape(H, W, C)
    slab5[p5:p5 + H, _CP:_CP + W, C:C + 1] = m1.reshape(H, W, 1)
    slab5[p5:p5 + H, _CP:_CP + W, C + 1:C + 2] = (m1 - mn5).reshape(H, W, 1)
    conv5, s5, mx5 = conv_boxsum_maxpool(slab5, patch5, K5, C + 1, w5_ref)
    y5 = jnp.maximum(conv5 * pl.reciprocal(s5 + eps) + b5_ref[...], 0.0)  # (HW, C)
    m5 = mx5 + mn5                                                     # maxpool_K5(mask)

    # ---------------- SparseLayer6: SparseConv(C, 1, 1) ----------------
    # K=1: the sparsity conv of the mask is the mask itself, and the max-pooled
    # mask is discarded by the network, so neither is computed.
    y6 = jnp.dot(y5 * m5, w6_ref[...], preferred_element_type=jnp.float32)  # (HW, 1)
    y6 = jnp.maximum(y6 * pl.reciprocal(m5 + eps) + b6_ref[...], 0.0)
    o_ref[0] = y6.reshape(H, W, 1)


def sparse_conv_net(x, mask, params, eps=1e-8):
    """Fused SparseConvNet forward.  x, mask: (N, H, W, 1) float32 (NHWC)."""
    N, H, W, cin = x.shape
    assert cin == 1 and mask.shape == x.shape
    C, _, K1, _ = params["w1"].shape
    K5 = params["w5"].shape[-1]
    assert max(K1, K5) // 2 <= _CP
    P1, P5 = K1 // 2, K5 // 2

    w1b = _block_weights(params["w1"])               # (K1*K1*2,     C+1)
    w5b = _block_weights(params["w5"])               # (K5*K5*(C+1), C+1)
    w6r = params["w6"].reshape(1, C).T               # (C, 1)
    b1 = params["b1"].reshape(1, C)
    b5 = params["b5"].reshape(1, C)
    b6 = params["b6"].reshape(1, 1)

    kern = functools.partial(_fused_kernel, H=H, W=W, K1=K1, K5=K5, C=C, eps=eps)

    return pl.pallas_call(
        kern,
        out_shape=jax.ShapeDtypeStruct((N, H, W, 1), jnp.float32),
        grid=(N,),
        in_specs=[
            pl.BlockSpec((1, H, W, 1), lambda b: (b, 0, 0, 0)),   # x
            pl.BlockSpec((1, H, W, 1), lambda b: (b, 0, 0, 0)),   # mask
            pl.BlockSpec(w1b.shape, lambda b: (0, 0)),
            pl.BlockSpec(b1.shape, lambda b: (0, 0)),
            pl.BlockSpec(w5b.shape, lambda b: (0, 0)),
            pl.BlockSpec(b5.shape, lambda b: (0, 0)),
            pl.BlockSpec(w6r.shape, lambda b: (0, 0)),
            pl.BlockSpec(b6.shape, lambda b: (0, 0)),
        ],
        out_specs=pl.BlockSpec((1, H, W, 1), lambda b: (b, 0, 0, 0)),
        scratch_shapes=[
            pltpu.VMEM((H + 2 * P1, W + 2 * _CP, 3), jnp.float32),       # slab1
            pltpu.VMEM((H * W, K1 * K1 * 2), jnp.float32),               # patch1
            pltpu.VMEM((H + 2 * P5, W + 2 * _CP, C + 2), jnp.float32),   # slab5
            pltpu.VMEM((H * W, K5 * K5 * (C + 1)), jnp.float32),         # patch5
        ],
        compiler_params=pltpu.CompilerParams(
            dimension_semantics=("parallel",)),      # v7x: shard batch over both TCs
    )(x, mask, w1b, b1, w5b, b5, w6r, b6)


def init_params(key, out_channels=32):
    k1, k2, k3 = jax.random.split(key, 3)
    return {
        # SparseLayer1: Conv2d(1, out_channels, 3)
        "w1": jax.random.normal(k1, (out_channels, 1, 3, 3), jnp.float32) * 0.1,
        "b1": jnp.zeros((out_channels,), jnp.float32),
        # SparseLayer5: Conv2d(out_channels, out_channels, 3)
        "w5": jax.random.normal(k2, (out_channels, out_channels, 3, 3), jnp.float32) * 0.1,
        "b5": jnp.zeros((out_channels,), jnp.float32),
        # SparseLayer6: Conv2d(out_channels, 1, 1)
        "w6": jax.random.normal(k3, (1, out_channels, 1, 1), jnp.float32) * 0.1,
        "b6": jnp.zeros((1,), jnp.float32),
    }


# ---------------- pure-JAX reference (for correctness check) ----------------
def _ref_layer(x, mask, w, b, eps=1e-8):
    k = w.shape[-1]
    dn = ("NHWC", "OIHW", "NHWC")
    xm = x * mask
    conv = lax.conv_general_dilated(xm, w, (1, 1), "SAME", dimension_numbers=dn,
                                    precision=lax.Precision.HIGHEST)
    ones_w = jnp.ones((1, 1, k, k), jnp.float32)
    s = lax.conv_general_dilated(mask, ones_w, (1, 1), "SAME", dimension_numbers=dn,
                                 precision=lax.Precision.HIGHEST)
    y = conv * (1.0 / (s + eps)) + b.reshape(1, 1, 1, -1)
    y = jnp.maximum(y, 0.0)
    m = lax.reduce_window(mask, -jnp.inf, lax.max, (1, k, k, 1), (1, 1, 1, 1), "SAME")
    return y, m


def _ref_net(x, mask, params):
    y, m = _ref_layer(x, mask, params["w1"], params["b1"])
    y, m = _ref_layer(y, m, params["w5"], params["b5"])
    y, _ = _ref_layer(y, m, params["w6"], params["b6"])
    return y


if __name__ == "__main__":
    key = jax.random.PRNGKey(0)
    kx, km, kp = jax.random.split(key, 3)

    N, Cin, H, W = 2, 1, 16, 16                 # PyTorch NCHW input shape
    x_nchw = jax.random.normal(kx, (N, Cin, H, W), jnp.float32)
    mask_nchw = (jax.random.uniform(km, (N, Cin, H, W)) > 0.5).astype(jnp.float32)

    # NCHW -> NHWC for the kernel.
    x_nhwc = jnp.transpose(x_nchw, (0, 2, 3, 1))
    mask_nhwc = jnp.transpose(mask_nchw, (0, 2, 3, 1))

    params = init_params(kp, out_channels=32)

    out = jax.jit(sparse_conv_net)(x_nhwc, mask_nhwc, params)
    out = jax.block_until_ready(out)

    ref = _ref_net(x_nhwc, mask_nhwc, params)
    assert out.shape == (N, H, W, 1)
    assert jnp.allclose(out, ref, atol=1e-4, rtol=1e-4), "mismatch vs JAX reference"

    print("KERNEL_OK")
</pallas_src>

<mosaic_0001>
module attributes {stable_mosaic.version = 11 : i64} {
  func.func @_fused_kernel(%arg0: i32, %arg1: memref<1x16x16x1xf32, #tpu.memory_space<vmem>>, %arg2: memref<1x16x16x1xf32, #tpu.memory_space<vmem>>, %arg3: memref<18x33xf32, #tpu.memory_space<vmem>>, %arg4: memref<1x32xf32, #tpu.memory_space<vmem>>, %arg5: memref<297x33xf32, #tpu.memory_space<vmem>>, %arg6: memref<1x32xf32, #tpu.memory_space<vmem>>, %arg7: memref<32x1xf32, #tpu.memory_space<vmem>>, %arg8: memref<1x1xf32, #tpu.memory_space<vmem>>, %arg9: memref<1x16x16x1xf32, #tpu.memory_space<vmem>>, %arg10: memref<18x32x3xf32, #tpu.memory_space<vmem>>, %arg11: memref<256x18xf32, #tpu.memory_space<vmem>>, %arg12: memref<18x32x34xf32, #tpu.memory_space<vmem>>, %arg13: memref<256x297xf32, #tpu.memory_space<vmem>>) attributes {dimension_semantics = [#tpu.dimension_semantics<parallel>], iteration_bounds = array<i64: 2>, scalar_prefetch = 0 : i64, scratch_operands = 4 : i64, tpu.core_type = #tpu.core_type<tc>, window_params = [{transform_indices = @transform_0, window_bounds = array<i64: 1, 16, 16, 1>}, {transform_indices = @transform_1, window_bounds = array<i64: 1, 16, 16, 1>}, {pipeline_mode = #tpu.pipeline_mode<synchronous>, transform_indices = @transform_2, window_bounds = array<i64: 18, 33>}, {pipeline_mode = #tpu.pipeline_mode<synchronous>, transform_indices = @transform_3, window_bounds = array<i64: 1, 32>}, {pipeline_mode = #tpu.pipeline_mode<synchronous>, transform_indices = @transform_4, window_bounds = array<i64: 297, 33>}, {pipeline_mode = #tpu.pipeline_mode<synchronous>, transform_indices = @transform_5, window_bounds = array<i64: 1, 32>}, {pipeline_mode = #tpu.pipeline_mode<synchronous>, transform_indices = @transform_6, window_bounds = array<i64: 32, 1>}, {pipeline_mode = #tpu.pipeline_mode<synchronous>, transform_indices = @transform_7, window_bounds = array<i64: 1, 1>}, {transform_indices = @transform_8, window_bounds = array<i64: 1, 16, 16, 1>}]} {
    %c0 = arith.constant 0 : index
    %c0_0 = arith.constant 0 : index
    %c0_1 = arith.constant 0 : index
    %c0_2 = arith.constant 0 : index
    %0 = vector.load %arg2[%c0, %c0_0, %c0_1, %c0_2] : memref<1x16x16x1xf32, #tpu.memory_space<vmem>>, vector<1x16x16x1xf32>
    %1 = vector.shape_cast %0 : vector<1x16x16x1xf32> to vector<16x16x1xf32>
    %2 = vector.shape_cast %1 : vector<16x16x1xf32> to vector<256x1xf32>
    %cst = arith.constant dense<0x7F800000> : vector<1xf32>
    %3 = vector.multi_reduction <minimumf>, %2, %cst [0] : vector<256x1xf32> to vector<1xf32>
    %4 = vector.shape_cast %3 : vector<1xf32> to vector<1x1xf32>
    %cst_3 = arith.constant 0.000000e+00 : f32
    %5 = vector.broadcast %cst_3 : f32 to vector<1x1xf32>
    %6 = arith.minimumf %4, %5 : vector<1x1xf32>
    %cst_4 = arith.constant 0.000000e+00 : f32
    %7 = vector.broadcast %cst_4 : f32 to vector<1x18x3xf32>
    %cst_5 = arith.constant 0.000000e+00 : f32
    %8 = vector.broadcast %cst_5 : f32 to vector<16x1x3xf32>
    %c0_6 = arith.constant 0 : index
    %c7 = arith.constant 7 : index
    %c0_7 = arith.constant 0 : index
    %9 = vector.load %arg10[%c0_6, %c7, %c0_7] : memref<18x32x3xf32, #tpu.memory_space<vmem>>, vector<1x18x3xf32>
    tpu.vector_store %arg10[%c0_6, %c7, %c0_7], %7 {strides = array<i32>} : memref<18x32x3xf32, #tpu.memory_space<vmem>>, vector<1x18x3xf32>,
    %c17 = arith.constant 17 : index
    %c7_8 = arith.constant 7 : index
    %c0_9 = arith.constant 0 : index
    %10 = vector.load %arg10[%c17, %c7_8, %c0_9] : memref<18x32x3xf32, #tpu.memory_space<vmem>>, vector<1x18x3xf32>
    tpu.vector_store %arg10[%c17, %c7_8, %c0_9], %7 {strides = array<i32>} : memref<18x32x3xf32, #tpu.memory_space<vmem>>, vector<1x18x3xf32>,
    %c1 = arith.constant 1 : index
    %c7_10 = arith.constant 7 : index
    %c0_11 = arith.constant 0 : index
    %11 = vector.load %arg10[%c1, %c7_10, %c0_11] : memref<18x32x3xf32, #tpu.memory_space<vmem>>, vector<16x1x3xf32>
    tpu.vector_store %arg10[%c1, %c7_10, %c0_11], %8 {strides = array<i32>} : memref<18x32x3xf32, #tpu.memory_space<vmem>>, vector<16x1x3xf32>,
    %c1_12 = arith.constant 1 : index
    %c24 = arith.constant 24 : index
    %c0_13 = arith.constant 0 : index
    %12 = vector.load %arg10[%c1_12, %c24, %c0_13] : memref<18x32x3xf32, #tpu.memory_space<vmem>>, vector<16x1x3xf32>
    tpu.vector_store %arg10[%c1_12, %c24, %c0_13], %8 {strides = array<i32>} : memref<18x32x3xf32, #tpu.memory_space<vmem>>, vector<16x1x3xf32>,
    %c0_14 = arith.constant 0 : index
    %c0_15 = arith.constant 0 : index
    %c0_16 = arith.constant 0 : index
    %c0_17 = arith.constant 0 : index
    %13 = vector.load %arg1[%c0_14, %c0_15, %c0_16, %c0_17] : memref<1x16x16x1xf32, #tpu.memory_space<vmem>>, vector<1x16x16x1xf32>
    %14 = vector.shape_cast %13 : vector<1x16x16x1xf32> to vector<16x16x1xf32>
    %15 = arith.mulf %14, %1 : vector<16x16x1xf32>
    %c1_18 = arith.constant 1 : index
    %c8 = arith.constant 8 : index
    %c0_19 = arith.constant 0 : index
    %16 = vector.load %arg10[%c1_18, %c8, %c0_19] : memref<18x32x3xf32, #tpu.memory_space<vmem>>, vector<16x16x1xf32>
    tpu.vector_store %arg10[%c1_18, %c8, %c0_19], %15 {strides = array<i32>} : memref<18x32x3xf32, #tpu.memory_space<vmem>>, vector<16x16x1xf32>,
    %c1_20 = arith.constant 1 : index
    %c8_21 = arith.constant 8 : index
    %c1_22 = arith.constant 1 : index
    %17 = vector.load %arg10[%c1_20, %c8_21, %c1_22] : memref<18x32x3xf32, #tpu.memory_space<vmem>>, vector<16x16x1xf32>
    tpu.vector_store %arg10[%c1_20, %c8_21, %c1_22], %1 {strides = array<i32>} : memref<18x32x3xf32, #tpu.memory_space<vmem>>, vector<16x16x1xf32>,
    %18 = vector.shape_cast %6 : vector<1x1xf32> to vector<1x1x1xf32>
    %19 = vector.broadcast %18 : vector<1x1x1xf32> to vector<16x16x1xf32>
    %20 = arith.subf %1, %19 : vector<16x16x1xf32>
    %c1_23 = arith.constant 1 : index
    %c8_24 = arith.constant 8 : index
    %c2 = arith.constant 2 : index
    %21 = vector.load %arg10[%c1_23, %c8_24, %c2] : memref<18x32x3xf32, #tpu.memory_space<vmem>>, vector<16x16x1xf32>
    tpu.vector_store %arg10[%c1_23, %c8_24, %c2], %20 {strides = array<i32>} : memref<18x32x3xf32, #tpu.memory_space<vmem>>, vector<16x16x1xf32>,
    %c0_25 = arith.constant 0 : index
    %c7_26 = arith.constant 7 : index
    %c0_27 = arith.constant 0 : index
    %22 = vector.load %arg10[%c0_25, %c7_26, %c0_27] : memref<18x32x3xf32, #tpu.memory_space<vmem>>, vector<16x16x3xf32>
    %23 = vector.extract_strided_slice %22 {offsets = [0, 0, 0], sizes = [16, 16, 2], strides = [1, 1, 1]} : vector<16x16x3xf32> to vector<16x16x2xf32>
    %24 = vector.shape_cast %23 : vector<16x16x2xf32> to vector<256x2xf32>
    %c0_28 = arith.constant 0 : index
    %c0_29 = arith.constant 0 : index
    %25 = vector.load %arg11[%c0_28, %c0_29] : memref<256x18xf32, #tpu.memory_space<vmem>>, vector<256x2xf32>
    tpu.vector_store %arg11[%c0_28, %c0_29], %24 {strides = array<i32>} : memref<256x18xf32, #tpu.memory_space<vmem>>, vector<256x2xf32>,
    %26 = vector.extract_strided_slice %22 {offsets = [0, 0, 2], sizes = [16, 16, 1], strides = [1, 1, 1]} : vector<16x16x3xf32> to vector<16x16x1xf32>
    %27 = vector.shape_cast %26 : vector<16x16x1xf32> to vector<256x1xf32>
    %c0_30 = arith.constant 0 : index
    %c8_31 = arith.constant 8 : index
    %c0_32 = arith.constant 0 : index
    %28 = vector.load %arg10[%c0_30, %c8_31, %c0_32] : memref<18x32x3xf32, #tpu.memory_space<vmem>>, vector<16x16x3xf32>
    %29 = vector.extract_strided_slice %28 {offsets = [0, 0, 0], sizes = [16, 16, 2], strides = [1, 1, 1]} : vector<16x16x3xf32> to vector<16x16x2xf32>
    %30 = vector.shape_cast %29 : vector<16x16x2xf32> to vector<256x2xf32>
    %c0_33 = arith.constant 0 : index
    %c2_34 = arith.constant 2 : index
    %31 = vector.load %arg11[%c0_33, %c2_34] : memref<256x18xf32, #tpu.memory_space<vmem>>, vector<256x2xf32>
    tpu.vector_store %arg11[%c0_33, %c2_34], %30 {strides = array<i32>} : memref<256x18xf32, #tpu.memory_space<vmem>>, vector<256x2xf32>,
    %32 = vector.extract_strided_slice %28 {offsets = [0, 0, 2], sizes = [16, 16, 1], strides = [1, 1, 1]} : vector<16x16x3xf32> to vector<16x16x1xf32>
    %33 = vector.shape_cast %32 : vector<16x16x1xf32> to vector<256x1xf32>
    %34 = arith.maximumf %27, %33 : vector<256x1xf32>
    %c0_35 = arith.constant 0 : index
    %c9 = arith.constant 9 : index
    %c0_36 = arith.constant 0 : index
    %35 = vector.load %arg10[%c0_35, %c9, %c0_36] : memref<18x32x3xf32, #tpu.memory_space<vmem>>, vector<16x16x3xf32>
    %36 = vector.extract_strided_slice %35 {offsets = [0, 0, 0], sizes = [16, 16, 2], strides = [1, 1, 1]} : vector<16x16x3xf32> to vector<16x16x2xf32>
    %37 = vector.shape_cast %36 : vector<16x16x2xf32> to vector<256x2xf32>
    %c0_37 = arith.constant 0 : index
    %c4 = arith.constant 4 : index
    %38 = vector.load %arg11[%c0_37, %c4] : memref<256x18xf32, #tpu.memory_space<vmem>>, vector<256x2xf32>
    tpu.vector_store %arg11[%c0_37, %c4], %37 {strides = array<i32>} : memref<256x18xf32, #tpu.memory_space<vmem>>, vector<256x2xf32>,
    %39 = vector.extract_strided_slice %35 {offsets = [0, 0, 2], sizes = [16, 16, 1], strides = [1, 1, 1]} : vector<16x16x3xf32> to vector<16x16x1xf32>
    %40 = vector.shape_cast %39 : vector<16x16x1xf32> to vector<256x1xf32>
    %41 = arith.maximumf %34, %40 : vector<256x1xf32>
    %c1_38 = arith.constant 1 : index
    %c7_39 = arith.constant 7 : index
    %c0_40 = arith.constant 0 : index
    %42 = vector.load %arg10[%c1_38, %c7_39, %c0_40] : memref<18x32x3xf32, #tpu.memory_space<vmem>>, vector<16x16x3xf32>
    %43 = vector.extract_strided_slice %42 {offsets = [0, 0, 0], sizes = [16, 16, 2], strides = [1, 1, 1]} : vector<16x16x3xf32> to vector<16x16x2xf32>
    %44 = vector.shape_cast %43 : vector<16x16x2xf32> to vector<256x2xf32>
    %c0_41 = arith.constant 0 : index
    %c6 = arith.constant 6 : index
    %45 = vector.load %arg11[%c0_41, %c6] : memref<256x18xf32, #tpu.memory_space<vmem>>, vector<256x2xf32>
    tpu.vector_store %arg11[%c0_41, %c6], %44 {strides = array<i32>} : memref<256x18xf32, #tpu.memory_space<vmem>>, vector<256x2xf32>,
    %46 = vector.extract_strided_slice %42 {offsets = [0, 0, 2], sizes = [16, 16, 1], strides = [1, 1, 1]} : vector<16x16x3xf32> to vector<16x16x1xf32>
    %47 = vector.shape_cast %46 : vector<16x16x1xf32> to vector<256x1xf32>
    %48 = arith.maximumf %41, %47 : vector<256x1xf32>
    %c1_42 = arith.constant 1 : index
    %c8_43 = arith.constant 8 : index
    %c0_44 = arith.constant 0 : index
    %49 = vector.load %arg10[%c1_42, %c8_43, %c0_44] : memref<18x32x3xf32, #tpu.memory_space<vmem>>, vector<16x16x3xf32>
    %50 = vector.extract_strided_slice %49 {offsets = [0, 0, 0], sizes = [16, 16, 2], strides = [1, 1, 1]} : vector<16x16x3xf32> to vector<16x16x2xf32>
    %51 = vector.shape_cast %50 : vector<16x16x2xf32> to vector<256x2xf32>
    %c0_45 = arith.constant 0 : index
    %c8_46 = arith.constant 8 : index
    %52 = vector.load %arg11[%c0_45, %c8_46] : memref<256x18xf32, #tpu.memory_space<vmem>>, vector<256x2xf32>
    tpu.vector_store %arg11[%c0_45, %c8_46], %51 {strides = array<i32>} : memref<256x18xf32, #tpu.memory_space<vmem>>, vector<256x2xf32>,
    %53 = vector.extract_strided_slice %49 {offsets = [0, 0, 2], sizes = [16, 16, 1], strides = [1, 1, 1]} : vector<16x16x3xf32> to vector<16x16x1xf32>
    %54 = vector.shape_cast %53 : vector<16x16x1xf32> to vector<256x1xf32>
    %55 = arith.maximumf %48, %54 : vector<256x1xf32>
    %c1_47 = arith.constant 1 : index
    %c9_48 = arith.constant 9 : index
    %c0_49 = arith.constant 0 : index
    %56 = vector.load %arg10[%c1_47, %c9_48, %c0_49] : memref<18x32x3xf32, #tpu.memory_space<vmem>>, vector<16x16x3xf32>
    %57 = vector.extract_strided_slice %56 {offsets = [0, 0, 0], sizes = [16, 16, 2], strides = [1, 1, 1]} : vector<16x16x3xf32> to vector<16x16x2xf32>
    %58 = vector.shape_cast %57 : vector<16x16x2xf32> to vector<256x2xf32>
    %c0_50 = arith.constant 0 : index
    %c10 = arith.constant 10 : index
    %59 = vector.load %arg11[%c0_50, %c10] : memref<256x18xf32, #tpu.memory_space<vmem>>, vector<256x2xf32>
    tpu.vector_store %arg11[%c0_50, %c10], %58 {strides = array<i32>} : memref<256x18xf32, #tpu.memory_space<vmem>>, vector<256x2xf32>,
    %60 = vector.extract_strided_slice %56 {offsets = [0, 0, 2], sizes = [16, 16, 1], strides = [1, 1, 1]} : vector<16x16x3xf32> to vector<16x16x1xf32>
    %61 = vector.shape_cast %60 : vector<16x16x1xf32> to vector<256x1xf32>
    %62 = arith.maximumf %55, %61 : vector<256x1xf32>
    %c2_51 = arith.constant 2 : index
    %c7_52 = arith.constant 7 : index
    %c0_53 = arith.constant 0 : index
    %63 = vector.load %arg10[%c2_51, %c7_52, %c0_53] : memref<18x32x3xf32, #tpu.memory_space<vmem>>, vector<16x16x3xf32>
    %64 = vector.extract_strided_slice %63 {offsets = [0, 0, 0], sizes = [16, 16, 2], strides = [1, 1, 1]} : vector<16x16x3xf32> to vector<16x16x2xf32>
    %65 = vector.shape_cast %64 : vector<16x16x2xf32> to vector<256x2xf32>
    %c0_54 = arith.constant 0 : index
    %c12 = arith.constant 12 : index
    %66 = vector.load %arg11[%c0_54, %c12] : memref<256x18xf32, #tpu.memory_space<vmem>>, vector<256x2xf32>
    tpu.vector_store %arg11[%c0_54, %c12], %65 {strides = array<i32>} : memref<256x18xf32, #tpu.memory_space<vmem>>, vector<256x2xf32>,
    %67 = vector.extract_strided_slice %63 {offsets = [0, 0, 2], sizes = [16, 16, 1], strides = [1, 1, 1]} : vector<16x16x3xf32> to vector<16x16x1xf32>
    %68 = vector.shape_cast %67 : vector<16x16x1xf32> to vector<256x1xf32>
    %69 = arith.maximumf %62, %68 : vector<256x1xf32>
    %c2_55 = arith.constant 2 : index
    %c8_56 = arith.constant 8 : index
    %c0_57 = arith.constant 0 : index
    %70 = vector.load %arg10[%c2_55, %c8_56, %c0_57] : memref<18x32x3xf32, #tpu.memory_space<vmem>>, vector<16x16x3xf32>
    %71 = vector.extract_strided_slice %70 {offsets = [0, 0, 0], sizes = [16, 16, 2], strides = [1, 1, 1]} : vector<16x16x3xf32> to vector<16x16x2xf32>
    %72 = vector.shape_cast %71 : vector<16x16x2xf32> to vector<256x2xf32>
    %c0_58 = arith.constant 0 : index
    %c14 = arith.constant 14 : index
    %73 = vector.load %arg11[%c0_58, %c14] : memref<256x18xf32, #tpu.memory_space<vmem>>, vector<256x2xf32>
    tpu.vector_store %arg11[%c0_58, %c14], %72 {strides = array<i32>} : memref<256x18xf32, #tpu.memory_space<vmem>>, vector<256x2xf32>,
    %74 = vector.extract_strided_slice %70 {offsets = [0, 0, 2], sizes = [16, 16, 1], strides = [1, 1, 1]} : vector<16x16x3xf32> to vector<16x16x1xf32>
    %75 = vector.shape_cast %74 : vector<16x16x1xf32> to vector<256x1xf32>
    %76 = arith.maximumf %69, %75 : vector<256x1xf32>
    %c2_59 = arith.constant 2 : index
    %c9_60 = arith.constant 9 : index
    %c0_61 = arith.constant 0 : index
    %77 = vector.load %arg10[%c2_59, %c9_60, %c0_61] : memref<18x32x3xf32, #tpu.memory_space<vmem>>, vector<16x16x3xf32>
    %78 = vector.extract_strided_slice %77 {offsets = [0, 0, 0], sizes = [16, 16, 2], strides = [1, 1, 1]} : vector<16x16x3xf32> to vector<16x16x2xf32>
    %79 = vector.shape_cast %78 : vector<16x16x2xf32> to vector<256x2xf32>
    %c0_62 = arith.constant 0 : index
    %c16 = arith.constant 16 : index
    %80 = vector.load %arg11[%c0_62, %c16] : memref<256x18xf32, #tpu.memory_space<vmem>>, vector<256x2xf32>
    tpu.vector_store %arg11[%c0_62, %c16], %79 {strides = array<i32>} : memref<256x18xf32, #tpu.memory_space<vmem>>, vector<256x2xf32>,
    %81 = vector.extract_strided_slice %77 {offsets = [0, 0, 2], sizes = [16, 16, 1], strides = [1, 1, 1]} : vector<16x16x3xf32> to vector<16x16x1xf32>
    %82 = vector.shape_cast %81 : vector<16x16x1xf32> to vector<256x1xf32>
    %83 = arith.maximumf %76, %82 : vector<256x1xf32>
    %c0_63 = arith.constant 0 : index
    %c0_64 = arith.constant 0 : index
    %84 = vector.load %arg11[%c0_63, %c0_64] : memref<256x18xf32, #tpu.memory_space<vmem>>, vector<256x18xf32>
    %c0_65 = arith.constant 0 : index
    %c0_66 = arith.constant 0 : index
    %85 = vector.load %arg3[%c0_65, %c0_66] : memref<18x33xf32, #tpu.memory_space<vmem>>, vector<18x33xf32>
    %cst_67 = arith.constant dense<0.000000e+00> : vector<256x33xf32>
    %86 = tpu.matmul %84, %85, %cst_67 {dimension_numbers = #tpu.dot_dimension_numbers<[1], [0], [0], [1], [0, 0, 1, 1], [], []>} : vector<256x18xf32>, vector<18x33xf32>, vector<256x33xf32> -> vector<256x33xf32>
    %87 = vector.extract_strided_slice %86 {offsets = [0, 0], sizes = [256, 32], strides = [1, 1]} : vector<256x33xf32> to vector<256x32xf32>
    %88 = vector.extract_strided_slice %86 {offsets = [0, 32], sizes = [256, 1], strides = [1, 1]} : vector<256x33xf32> to vector<256x1xf32>
    %cst_68 = arith.constant 9.99999993E-9 : f32
    %89 = vector.broadcast %cst_68 : f32 to vector<256x1xf32>
    %90 = arith.addf %88, %89 : vector<256x1xf32>
    %91 = tpu.reciprocal %90 : vector<256x1xf32> -> vector<256x1xf32>
    %92 = vector.broadcast %91 : vector<256x1xf32> to vector<256x32xf32>
    %93 = arith.mulf %87, %92 : vector<256x32xf32>
    %c0_69 = arith.constant 0 : index
    %c0_70 = arith.constant 0 : index
    %94 = vector.load %arg4[%c0_69, %c0_70] : memref<1x32xf32, #tpu.memory_space<vmem>>, vector<1x32xf32>
    %95 = vector.broadcast %94 : vector<1x32xf32> to vector<256x32xf32>
    %96 = arith.addf %93, %95 : vector<256x32xf32>
    %cst_71 = arith.constant 0.000000e+00 : f32
    %97 = vector.broadcast %cst_71 : f32 to vector<256x32xf32>
    %98 = arith.maximumf %96, %97 : vector<256x32xf32>
    %99 = vector.broadcast %6 : vector<1x1xf32> to vector<256x1xf32>
    %100 = arith.addf %83, %99 : vector<256x1xf32>
    %cst_72 = arith.constant dense<0x7F800000> : vector<1xf32>
    %101 = vector.multi_reduction <minimumf>, %100, %cst_72 [0] : vector<256x1xf32> to vector<1xf32>
    %102 = vector.shape_cast %101 : vector<1xf32> to vector<1x1xf32>
    %cst_73 = arith.constant 0.000000e+00 : f32
    %103 = vector.broadcast %cst_73 : f32 to vector<1x1xf32>
    %104 = arith.minimumf %102, %103 : vector<1x1xf32>
    %cst_74 = arith.constant 0.000000e+00 : f32
    %105 = vector.broadcast %cst_74 : f32 to vector<1x18x34xf32>
    %cst_75 = arith.constant 0.000000e+00 : f32
    %106 = vector.broadcast %cst_75 : f32 to vector<16x1x34xf32>
    %c0_76 = arith.constant 0 : index
    %c7_77 = arith.constant 7 : index
    %c0_78 = arith.constant 0 : index
    %107 = vector.load %arg12[%c0_76, %c7_77, %c0_78] : memref<18x32x34xf32, #tpu.memory_space<vmem>>, vector<1x18x34xf32>
    tpu.vector_store %arg12[%c0_76, %c7_77, %c0_78], %105 {strides = array<i32>} : memref<18x32x34xf32, #tpu.memory_space<vmem>>, vector<1x18x34xf32>,
    %c17_79 = arith.constant 17 : index
    %c7_80 = arith.constant 7 : index
    %c0_81 = arith.constant 0 : index
    %108 = vector.load %arg12[%c17_79, %c7_80, %c0_81] : memref<18x32x34xf32, #tpu.memory_space<vmem>>, vector<1x18x34xf32>
    tpu.vector_store %arg12[%c17_79, %c7_80, %c0_81], %105 {strides = array<i32>} : memref<18x32x34xf32, #tpu.memory_space<vmem>>, vector<1x18x34xf32>,
    %c1_82 = arith.constant 1 : index
    %c7_83 = arith.constant 7 : index
    %c0_84 = arith.constant 0 : index
    %109 = vector.load %arg12[%c1_82, %c7_83, %c0_84] : memref<18x32x34xf32, #tpu.memory_space<vmem>>, vector<16x1x34xf32>
    tpu.vector_store %arg12[%c1_82, %c7_83, %c0_84], %106 {strides = array<i32>} : memref<18x32x34xf32, #tpu.memory_space<vmem>>, vector<16x1x34xf32>,
    %c1_85 = arith.constant 1 : index
    %c24_86 = arith.constant 24 : index
    %c0_87 = arith.constant 0 : index
    %110 = vector.load %arg12[%c1_85, %c24_86, %c0_87] : memref<18x32x34xf32, #tpu.memory_space<vmem>>, vector<16x1x34xf32>
    tpu.vector_store %arg12[%c1_85, %c24_86, %c0_87], %106 {strides = array<i32>} : memref<18x32x34xf32, #tpu.memory_space<vmem>>, vector<16x1x34xf32>,
    %111 = vector.broadcast %100 : vector<256x1xf32> to vector<256x32xf32>
    %112 = arith.mulf %98, %111 : vector<256x32xf32>
    %113 = vector.shape_cast %112 : vector<256x32xf32> to vector<16x16x32xf32>
    %c1_88 = arith.constant 1 : index
    %c8_89 = arith.constant 8 : index
    %c0_90 = arith.constant 0 : index
    %114 = vector.load %arg12[%c1_88, %c8_89, %c0_90] : memref<18x32x34xf32, #tpu.memory_space<vmem>>, vector<16x16x32xf32>
    tpu.vector_store %arg12[%c1_88, %c8_89, %c0_90], %113 {strides = array<i32>} : memref<18x32x34xf32, #tpu.memory_space<vmem>>, vector<16x16x32xf32>,
    %115 = vector.shape_cast %100 : vector<256x1xf32> to vector<16x16x1xf32>
    %c1_91 = arith.constant 1 : index
    %c8_92 = arith.constant 8 : index
    %c32 = arith.constant 32 : index
    %116 = vector.load %arg12[%c1_91, %c8_92, %c32] : memref<18x32x34xf32, #tpu.memory_space<vmem>>, vector<16x16x1xf32>
    tpu.vector_store %arg12[%c1_91, %c8_92, %c32], %115 {strides = array<i32>} : memref<18x32x34xf32, #tpu.memory_space<vmem>>, vector<16x16x1xf32>,
    %117 = vector.broadcast %104 : vector<1x1xf32> to vector<256x1xf32>
    %118 = arith.subf %100, %117 : vector<256x1xf32>
    %119 = vector.shape_cast %118 : vector<256x1xf32> to vector<16x16x1xf32>
    %c1_93 = arith.constant 1 : index
    %c8_94 = arith.constant 8 : index
    %c33 = arith.constant 33 : index
    %120 = vector.load %arg12[%c1_93, %c8_94, %c33] : memref<18x32x34xf32, #tpu.memory_space<vmem>>, vector<16x16x1xf32>
    tpu.vector_store %arg12[%c1_93, %c8_94, %c33], %119 {strides = array<i32>} : memref<18x32x34xf32, #tpu.memory_space<vmem>>, vector<16x16x1xf32>,
    %c0_95 = arith.constant 0 : index
    %c7_96 = arith.constant 7 : index
    %c0_97 = arith.constant 0 : index
    %121 = vector.load %arg12[%c0_95, %c7_96, %c0_97] : memref<18x32x34xf32, #tpu.memory_space<vmem>>, vector<16x16x34xf32>
    %122 = vector.extract_strided_slice %121 {offsets = [0, 0, 0], sizes = [16, 16, 33], strides = [1, 1, 1]} : vector<16x16x34xf32> to vector<16x16x33xf32>
    %123 = vector.shape_cast %122 : vector<16x16x33xf32> to vector<256x33xf32>
    %c0_98 = arith.constant 0 : index
    %c0_99 = arith.constant 0 : index
    %124 = vector.load %arg13[%c0_98, %c0_99] : memref<256x297xf32, #tpu.memory_space<vmem>>, vector<256x33xf32>
    tpu.vector_store %arg13[%c0_98, %c0_99], %123 {strides = array<i32>} : memref<256x297xf32, #tpu.memory_space<vmem>>, vector<256x33xf32>,
    %125 = vector.extract_strided_slice %121 {offsets = [0, 0, 33], sizes = [16, 16, 1], strides = [1, 1, 1]} : vector<16x16x34xf32> to vector<16x16x1xf32>
    %126 = vector.shape_cast %125 : vector<16x16x1xf32> to vector<256x1xf32>
    %c0_100 = arith.constant 0 : index
    %c8_101 = arith.constant 8 : index
    %c0_102 = arith.constant 0 : index
    %127 = vector.load %arg12[%c0_100, %c8_101, %c0_102] : memref<18x32x34xf32, #tpu.memory_space<vmem>>, vector<16x16x34xf32>
    %128 = vector.extract_strided_slice %127 {offsets = [0, 0, 0], sizes = [16, 16, 33], strides = [1, 1, 1]} : vector<16x16x34xf32> to vector<16x16x33xf32>
    %129 = vector.shape_cast %128 : vector<16x16x33xf32> to vector<256x33xf32>
    %c0_103 = arith.constant 0 : index
    %c33_104 = arith.constant 33 : index
    %130 = vector.load %arg13[%c0_103, %c33_104] : memref<256x297xf32, #tpu.memory_space<vmem>>, vector<256x33xf32>
    tpu.vector_store %arg13[%c0_103, %c33_104], %129 {strides = array<i32>} : memref<256x297xf32, #tpu.memory_space<vmem>>, vector<256x33xf32>,
    %131 = vector.extract_strided_slice %127 {offsets = [0, 0, 33], sizes = [16, 16, 1], strides = [1, 1, 1]} : vector<16x16x34xf32> to vector<16x16x1xf32>
    %132 = vector.shape_cast %131 : vector<16x16x1xf32> to vector<256x1xf32>
    %133 = arith.maximumf %126, %132 : vector<256x1xf32>
    %c0_105 = arith.constant 0 : index
    %c9_106 = arith.constant 9 : index
    %c0_107 = arith.constant 0 : index
    %134 = vector.load %arg12[%c0_105, %c9_106, %c0_107] : memref<18x32x34xf32, #tpu.memory_space<vmem>>, vector<16x16x34xf32>
    %135 = vector.extract_strided_slice %134 {offsets = [0, 0, 0], sizes = [16, 16, 33], strides = [1, 1, 1]} : vector<16x16x34xf32> to vector<16x16x33xf32>
    %136 = vector.shape_cast %135 : vector<16x16x33xf32> to vector<256x33xf32>
    %c0_108 = arith.constant 0 : index
    %c66 = arith.constant 66 : index
    %137 = vector.load %arg13[%c0_108, %c66] : memref<256x297xf32, #tpu.memory_space<vmem>>, vector<256x33xf32>
    tpu.vector_store %arg13[%c0_108, %c66], %136 {strides = array<i32>} : memref<256x297xf32, #tpu.memory_space<vmem>>, vector<256x33xf32>,
    %138 = vector.extract_strided_slice %134 {offsets = [0, 0, 33], sizes = [16, 16, 1], strides = [1, 1, 1]} : vector<16x16x34xf32> to vector<16x16x1xf32>
    %139 = vector.shape_cast %138 : vector<16x16x1xf32> to vector<256x1xf32>
    %140 = arith.maximumf %133, %139 : vector<256x1xf32>
    %c1_109 = arith.constant 1 : index
    %c7_110 = arith.constant 7 : index
    %c0_111 = arith.constant 0 : index
    %141 = vector.load %arg12[%c1_109, %c7_110, %c0_111] : memref<18x32x34xf32, #tpu.memory_space<vmem>>, vector<16x16x34xf32>
    %142 = vector.extract_strided_slice %141 {offsets = [0, 0, 0], sizes = [16, 16, 33], strides = [1, 1, 1]} : vector<16x16x34xf32> to vector<16x16x33xf32>
    %143 = vector.shape_cast %142 : vector<16x16x33xf32> to vector<256x33xf32>
    %c0_112 = arith.constant 0 : index
    %c99 = arith.constant 99 : index
    %144 = vector.load %arg13[%c0_112, %c99] : memref<256x297xf32, #tpu.memory_space<vmem>>, vector<256x33xf32>
    tpu.vector_store %arg13[%c0_112, %c99], %143 {strides = array<i32>} : memref<256x297xf32, #tpu.memory_space<vmem>>, vector<256x33xf32>,
    %145 = vector.extract_strided_slice %141 {offsets = [0, 0, 33], sizes = [16, 16, 1], strides = [1, 1, 1]} : vector<16x16x34xf32> to vector<16x16x1xf32>
    %146 = vector.shape_cast %145 : vector<16x16x1xf32> to vector<256x1xf32>
    %147 = arith.maximumf %140, %146 : vector<256x1xf32>
    %c1_113 = arith.constant 1 : index
    %c8_114 = arith.constant 8 : index
    %c0_115 = arith.constant 0 : index
    %148 = vector.load %arg12[%c1_113, %c8_114, %c0_115] : memref<18x32x34xf32, #tpu.memory_space<vmem>>, vector<16x16x34xf32>
    %149 = vector.extract_strided_slice %148 {offsets = [0, 0, 0], sizes = [16, 16, 33], strides = [1, 1, 1]} : vector<16x16x34xf32> to vector<16x16x33xf32>
    %150 = vector.shape_cast %149 : vector<16x16x33xf32> to vector<256x33xf32>
    %c0_116 = arith.constant 0 : index
    %c132 = arith.constant 132 : index
    %151 = vector.load %arg13[%c0_116, %c132] : memref<256x297xf32, #tpu.memory_space<vmem>>, vector<256x33xf32>
    tpu.vector_store %arg13[%c0_116, %c132], %150 {strides = array<i32>} : memref<256x297xf32, #tpu.memory_space<vmem>>, vector<256x33xf32>,
    %152 = vector.extract_strided_slice %148 {offsets = [0, 0, 33], sizes = [16, 16, 1], strides = [1, 1, 1]} : vector<16x16x34xf32> to vector<16x16x1xf32>
    %153 = vector.shape_cast %152 : vector<16x16x1xf32> to vector<256x1xf32>
    %154 = arith.maximumf %147, %153 : vector<256x1xf32>
    %c1_117 = arith.constant 1 : index
    %c9_118 = arith.constant 9 : index
    %c0_119 = arith.constant 0 : index
    %155 = vector.load %arg12[%c1_117, %c9_118, %c0_119] : memref<18x32x34xf32, #tpu.memory_space<vmem>>, vector<16x16x34xf32>
    %156 = vector.extract_strided_slice %155 {offsets = [0, 0, 0], sizes = [16, 16, 33], strides = [1, 1, 1]} : vector<16x16x34xf32> to vector<16x16x33xf32>
    %157 = vector.shape_cast %156 : vector<16x16x33xf32> to vector<256x33xf32>
    %c0_120 = arith.constant 0 : index
    %c165 = arith.constant 165 : index
    %158 = vector.load %arg13[%c0_120, %c165] : memref<256x297xf32, #tpu.memory_space<vmem>>, vector<256x33xf32>
    tpu.vector_store %arg13[%c0_120, %c165], %157 {strides = array<i32>} : memref<256x297xf32, #tpu.memory_space<vmem>>, vector<256x33xf32>,
    %159 = vector.extract_strided_slice %155 {offsets = [0, 0, 33], sizes = [16, 16, 1], strides = [1, 1, 1]} : vector<16x16x34xf32> to vector<16x16x1xf32>
    %160 = vector.shape_cast %159 : vector<16x16x1xf32> to vector<256x1xf32>
    %161 = arith.maximumf %154, %160 : vector<256x1xf32>
    %c2_121 = arith.constant 2 : index
    %c7_122 = arith.constant 7 : index
    %c0_123 = arith.constant 0 : index
    %162 = vector.load %arg12[%c2_121, %c7_122, %c0_123] : memref<18x32x34xf32, #tpu.memory_space<vmem>>, vector<16x16x34xf32>
    %163 = vector.extract_strided_slice %162 {offsets = [0, 0, 0], sizes = [16, 16, 33], strides = [1, 1, 1]} : vector<16x16x34xf32> to vector<16x16x33xf32>
    %164 = vector.shape_cast %163 : vector<16x16x33xf32> to vector<256x33xf32>
    %c0_124 = arith.constant 0 : index
    %c198 = arith.constant 198 : index
    %165 = vector.load %arg13[%c0_124, %c198] : memref<256x297xf32, #tpu.memory_space<vmem>>, vector<256x33xf32>
    tpu.vector_store %arg13[%c0_124, %c198], %164 {strides = array<i32>} : memref<256x297xf32, #tpu.memory_space<vmem>>, vector<256x33xf32>,
    %166 = vector.extract_strided_slice %162 {offsets = [0, 0, 33], sizes = [16, 16, 1], strides = [1, 1, 1]} : vector<16x16x34xf32> to vector<16x16x1xf32>
    %167 = vector.shape_cast %166 : vector<16x16x1xf32> to vector<256x1xf32>
    %168 = arith.maximumf %161, %167 : vector<256x1xf32>
    %c2_125 = arith.constant 2 : index
    %c8_126 = arith.constant 8 : index
    %c0_127 = arith.constant 0 : index
    %169 = vector.load %arg12[%c2_125, %c8_126, %c0_127] : memref<18x32x34xf32, #tpu.memory_space<vmem>>, vector<16x16x34xf32>
    %170 = vector.extract_strided_slice %169 {offsets = [0, 0, 0], sizes = [16, 16, 33], strides = [1, 1, 1]} : vector<16x16x34xf32> to vector<16x16x33xf32>
    %171 = vector.shape_cast %170 : vector<16x16x33xf32> to vector<256x33xf32>
    %c0_128 = arith.constant 0 : index
    %c231 = arith.constant 231 : index
    %172 = vector.load %arg13[%c0_128, %c231] : memref<256x297xf32, #tpu.memory_space<vmem>>, vector<256x33xf32>
    tpu.vector_store %arg13[%c0_128, %c231], %171 {strides = array<i32>} : memref<256x297xf32, #tpu.memory_space<vmem>>, vector<256x33xf32>,
    %173 = vector.extract_strided_slice %169 {offsets = [0, 0, 33], sizes = [16, 16, 1], strides = [1, 1, 1]} : vector<16x16x34xf32> to vector<16x16x1xf32>
    %174 = vector.shape_cast %173 : vector<16x16x1xf32> to vector<256x1xf32>
    %175 = arith.maximumf %168, %174 : vector<256x1xf32>
    %c2_129 = arith.constant 2 : index
    %c9_130 = arith.constant 9 : index
    %c0_131 = arith.constant 0 : index
    %176 = vector.load %arg12[%c2_129, %c9_130, %c0_131] : memref<18x32x34xf32, #tpu.memory_space<vmem>>, vector<16x16x34xf32>
    %177 = vector.extract_strided_slice %176 {offsets = [0, 0, 0], sizes = [16, 16, 33], strides = [1, 1, 1]} : vector<16x16x34xf32> to vector<16x16x33xf32>
    %178 = vector.shape_cast %177 : vector<16x16x33xf32> to vector<256x33xf32>
    %c0_132 = arith.constant 0 : index
    %c264 = arith.constant 264 : index
    %179 = vector.load %arg13[%c0_132, %c264] : memref<256x297xf32, #tpu.memory_space<vmem>>, vector<256x33xf32>
    tpu.vector_store %arg13[%c0_132, %c264], %178 {strides = array<i32>} : memref<256x297xf32, #tpu.memory_space<vmem>>, vector<256x33xf32>,
    %180 = vector.extract_strided_slice %176 {offsets = [0, 0, 33], sizes = [16, 16, 1], strides = [1, 1, 1]} : vector<16x16x34xf32> to vector<16x16x1xf32>
    %181 = vector.shape_cast %180 : vector<16x16x1xf32> to vector<256x1xf32>
    %182 = arith.maximumf %175, %181 : vector<256x1xf32>
    %c0_133 = arith.constant 0 : index
    %c0_134 = arith.constant 0 : index
    %183 = vector.load %arg13[%c0_133, %c0_134] : memref<256x297xf32, #tpu.memory_space<vmem>>, vector<256x297xf32>
    %c0_135 = arith.constant 0 : index
    %c0_136 = arith.constant 0 : index
    %184 = vector.load %arg5[%c0_135, %c0_136] : memref<297x33xf32, #tpu.memory_space<vmem>>, vector<297x33xf32>
    %cst_137 = arith.constant dense<0.000000e+00> : vector<256x33xf32>
    %185 = tpu.matmul %183, %184, %cst_137 {dimension_numbers = #tpu.dot_dimension_numbers<[1], [0], [0], [1], [0, 0, 1, 1], [], []>} : vector<256x297xf32>, vector<297x33xf32>, vector<256x33xf32> -> vector<256x33xf32>
    %186 = vector.extract_strided_slice %185 {offsets = [0, 0], sizes = [256, 32], strides = [1, 1]} : vector<256x33xf32> to vector<256x32xf32>
    %187 = vector.extract_strided_slice %185 {offsets = [0, 32], sizes = [256, 1], strides = [1, 1]} : vector<256x33xf32> to vector<256x1xf32>
    %cst_138 = arith.constant 9.99999993E-9 : f32
    %188 = vector.broadcast %cst_138 : f32 to vector<256x1xf32>
    %189 = arith.addf %187, %188 : vector<256x1xf32>
    %190 = tpu.reciprocal %189 : vector<256x1xf32> -> vector<256x1xf32>
    %191 = vector.broadcast %190 : vector<256x1xf32> to vector<256x32xf32>
    %192 = arith.mulf %186, %191 : vector<256x32xf32>
    %c0_139 = arith.constant 0 : index
    %c0_140 = arith.constant 0 : index
    %193 = vector.load %arg6[%c0_139, %c0_140] : memref<1x32xf32, #tpu.memory_space<vmem>>, vector<1x32xf32>
    %194 = vector.broadcast %193 : vector<1x32xf32> to vector<256x32xf32>
    %195 = arith.addf %192, %194 : vector<256x32xf32>
    %cst_141 = arith.constant 0.000000e+00 : f32
    %196 = vector.broadcast %cst_141 : f32 to vector<256x32xf32>
    %197 = arith.maximumf %195, %196 : vector<256x32xf32>
    %198 = vector.broadcast %104 : vector<1x1xf32> to vector<256x1xf32>
    %199 = arith.addf %182, %198 : vector<256x1xf32>
    %200 = vector.broadcast %199 : vector<256x1xf32> to vector<256x32xf32>
    %201 = arith.mulf %197, %200 : vector<256x32xf32>
    %c0_142 = arith.constant 0 : index
    %c0_143 = arith.constant 0 : index
    %202 = vector.load %arg7[%c0_142, %c0_143] : memref<32x1xf32, #tpu.memory_space<vmem>>, vector<32x1xf32>
    %cst_144 = arith.constant dense<0.000000e+00> : vector<256x1xf32>
    %203 = tpu.matmul %201, %202, %cst_144 {dimension_numbers = #tpu.dot_dimension_numbers<[1], [0], [0], [1], [0, 0, 1, 1], [], []>} : vector<256x32xf32>, vector<32x1xf32>, vector<256x1xf32> -> vector<256x1xf32>
    %cst_145 = arith.constant 9.99999993E-9 : f32
    %204 = vector.broadcast %cst_145 : f32 to vector<256x1xf32>
    %205 = arith.addf %199, %204 : vector<256x1xf32>
    %206 = tpu.reciprocal %205 : vector<256x1xf32> -> vector<256x1xf32>
    %207 = arith.mulf %203, %206 : vector<256x1xf32>
    %c0_146 = arith.constant 0 : index
    %c0_147 = arith.constant 0 : index
    %208 = vector.load %arg8[%c0_146, %c0_147] : memref<1x1xf32, #tpu.memory_space<vmem>>, vector<1x1xf32>
    %209 = vector.broadcast %208 : vector<1x1xf32> to vector<256x1xf32>
    %210 = arith.addf %207, %209 : vector<256x1xf32>
    %cst_148 = arith.constant 0.000000e+00 : f32
    %211 = vector.broadcast %cst_148 : f32 to vector<256x1xf32>
    %212 = arith.maximumf %210, %211 : vector<256x1xf32>
    %213 = vector.shape_cast %212 : vector<256x1xf32> to vector<16x16x1xf32>
    %c0_149 = arith.constant 0 : index
    %c0_150 = arith.constant 0 : index
    %c0_151 = arith.constant 0 : index
    %c0_152 = arith.constant 0 : index
    %214 = vector.load %arg9[%c0_149, %c0_150, %c0_151, %c0_152] : memref<1x16x16x1xf32, #tpu.memory_space<vmem>>, vector<1x16x16x1xf32>
    %215 = vector.shape_cast %214 : vector<1x16x16x1xf32> to vector<16x16x1xf32>
    %216 = vector.shape_cast %213 : vector<16x16x1xf32> to vector<1x16x16x1xf32>
    tpu.vector_store %arg9[%c0_149, %c0_150, %c0_151, %c0_152], %216 {strides = array<i32>} : memref<1x16x16x1xf32, #tpu.memory_space<vmem>>, vector<1x16x16x1xf32>,
    return
  }
  func.func @transform_0(%arg0: i32) -> (i32, i32, i32, i32) {
    %c0_i32 = arith.constant 0 : i32
    %c0_i32_0 = arith.constant 0 : i32
    %c0_i32_1 = arith.constant 0 : i32
    %c0_i32_2 = arith.constant 0 : i32
    return %arg0, %c0_i32, %c0_i32_0, %c0_i32_1 : i32, i32, i32, i32
  }
  func.func @transform_1(%arg0: i32) -> (i32, i32, i32, i32) {
    %c0_i32 = arith.constant 0 : i32
    %c0_i32_0 = arith.constant 0 : i32
    %c0_i32_1 = arith.constant 0 : i32
    %c0_i32_2 = arith.constant 0 : i32
    return %arg0, %c0_i32, %c0_i32_0, %c0_i32_1 : i32, i32, i32, i32
  }
  func.func @transform_2(%arg0: i32) -> (i32, i32) {
    %c0_i32 = arith.constant 0 : i32
    %c0_i32_0 = arith.constant 0 : i32
    %c0_i32_1 = arith.constant 0 : i32
    return %c0_i32, %c0_i32_0 : i32, i32
  }
  func.func @transform_3(%arg0: i32) -> (i32, i32) {
    %c0_i32 = arith.constant 0 : i32
    %c0_i32_0 = arith.constant 0 : i32
    %c0_i32_1 = arith.constant 0 : i32
    return %c0_i32, %c0_i32_0 : i32, i32
  }
  func.func @transform_4(%arg0: i32) -> (i32, i32) {
    %c0_i32 = arith.constant 0 : i32
    %c0_i32_0 = arith.constant 0 : i32
    %c0_i32_1 = arith.constant 0 : i32
    return %c0_i32, %c0_i32_0 : i32, i32
  }
  func.func @transform_5(%arg0: i32) -> (i32, i32) {
    %c0_i32 = arith.constant 0 : i32
    %c0_i32_0 = arith.constant 0 : i32
    %c0_i32_1 = arith.constant 0 : i32
    return %c0_i32, %c0_i32_0 : i32, i32
  }
  func.func @transform_6(%arg0: i32) -> (i32, i32) {
    %c0_i32 = arith.constant 0 : i32
    %c0_i32_0 = arith.constant 0 : i32
    %c0_i32_1 = arith.constant 0 : i32
    return %c0_i32, %c0_i32_0 : i32, i32
  }
  func.func @transform_7(%arg0: i32) -> (i32, i32) {
    %c0_i32 = arith.constant 0 : i32
    %c0_i32_0 = arith.constant 0 : i32
    %c0_i32_1 = arith.constant 0 : i32
    return %c0_i32, %c0_i32_0 : i32, i32
  }
  func.func @transform_8(%arg0: i32) -> (i32, i32, i32, i32) {
    %c0_i32 = arith.constant 0 : i32
    %c0_i32_0 = arith.constant 0 : i32
    %c0_i32_1 = arith.constant 0 : i32
    %c0_i32_2 = arith.constant 0 : i32
    return %arg0, %c0_i32, %c0_i32_0, %c0_i32_1 : i32, i32, i32, i32
  }
}

</mosaic_0001>

<bundles_post_ra>
// kernel: sparse_conv_net.1
= control target key start
LH: loop header
LB: loop body
LE: loop exit
PB: predicated region body
PF: predicated region fallthrough
CT: control target
= control target key end

     0   :  { %s9136_s29 = smov 0   ;;  %s14214_s0 = inlined_call_operand.vmem [shape: f32[2,16,16,1], index: 0, kind: input, shape index: {}]   ;;  %s14215_s1 = inlined_call_operand.vmem [shape: f32[2,16,16,1], index: 1, kind: input, shape index: {}]   ;;  %s14216_s2 = inlined_call_operand.vmem [shape: f32[18,33], index: 2, kind: input, shape index: {}]   ;;  %s14217_s3 = inlined_call_operand.vmem [shape: f32[1,32], index: 3, kind: input, shape index: {}]   ;;  %s14218_s4 = inlined_call_operand.vmem [shape: f32[297,33], index: 4, kind: input, shape index: {}]   ;;  %s14219_s5 = inlined_call_operand.vmem [shape: f32[1,32], index: 5, kind: input, shape index: {}]   ;;  %s14220_s6 = inlined_call_operand.vmem [shape: f32[32,1], index: 6, kind: input, shape index: {}]   ;;  %s14221_s7 = inlined_call_operand.<no memory space> [shape: f32[1,1], index: 7, kind: input, shape index: {}]   ;;  %s14222_s8 = inlined_call_operand.vmem [shape: f32[2,16,16,1], index: 8, kind: output, shape index: {}]  }
   0x1   :  { %v13_v0 = vstv %s14221_s7 }
   0x2   :  { %14 = vst [vmem:[#allocation6] sm:$0x1] %v13_v0 }
   0x3 LB: > { %s8065_s30 = sadd.s32 4294967295, %s9062_s29   ;;  %p8069_p0 = scmp.ge.s32.totalorder %s9062_s29, 1  ;;  %s9062_s29 = sphi %s9136_s29, %s20_s29  }
   0x4   : > { %p274_p1 = scmp.lt.s32.totalorder %s9062_s29, 3 }
   0x6   : > { %p275_p2 = pnand %p8069_p0, %p274_p1 }
   0x8   : > { %278 = sbr.rel (%p275_p2) target bundleno = 2746 (0xaba), region = 52 }
   0xf   : > { %p313_p3 = scmp.lt.s32.totalorder %s8065_s30, 1  ;;  %vm360_vm0 = vcmask 7168   ;;  %s9064_s12 = smov 1   ;;  %vm431_vm1 = vcmask 23552   ;;  %vm434_vm2 = vcmask 17408   ;;  %vm441_vm3 = vcmask 16384  }
  0x10   : > { %vm956_vm4 = vcmask 15360   ;;  %s9066_s16 = smov 2   ;;  %vm698_vm5 = vcmask 15368   ;;  %vm891_vm6 = vcmask 23568   ;;  %vm1149_vm7 = vcmask 31760   ;;  %s9067_s17 = smov 4  }
  0x11   : > { %s14703_s30 = smov (!%p313_p3, %s8065_s30), 1  ;;  %s9068_s18 = smov 6   ;;  %vm1374_vm8 = vcmask 48160   ;;  %vm1599_vm9 = vcmask 64560   ;;  %vm1824_vm10 = vcmask 80960   ;;  %vm2049_vm11 = vcmask 97360  }
  0x12   : > { %s9144_s9 = sshll.u32 %s14703_s30, 8  ;;  %s9069_s19 = smov 8   ;;  %vm2275_vm12 = vcmask 113760   ;;  %vm2922_vm13 = vcmask 1041408   ;;  %vm2500_vm14 = vcmask 130160   ;;  %vm2725_vm15 = vcmask 146560  }
  0x13   : > { %s9150_s11 = scalar_lea.vmem %s14215_s1, %s9144_s9  ;;  %s9294_s15 = scalar_lea.vmem %s14214_s0, %s9144_s9 }
  0x14   : > { %v9153_v1 = vld [vmem:[%s9150_s11 + $0x10] sm:$0xff]  ;;  %v9156_v2 = vld [vmem:[%s9150_s11] sm:$0xff]  ;;  %v9159_v3 = vld [vmem:[%s9150_s11 + $0x18] sm:$0xff]  ;;  %s9070_s20 = smov 10   ;;  %s9071_s21 = smov 12  }
  0x15   : > { %606 = vrot.lane.b32.xlu1 %v9153_v1, %s9064_s12  ;;  %v363_v4 = vsel %vm360_vm0, %v9153_v1, inf  ;;  %602 = vrot.lane.b32.xlu0 %v9156_v2, %s9064_s12  ;;  %v361_v5 = vsel %vm360_vm0, %v9156_v2, inf  ;;  %v364_v6 = vsel %vm360_vm0, %v9159_v3, inf  ;;  %v9172_v7 = vld [vmem:[%s9150_s11 + $0x8] sm:$0xff]  ;;  %v9182_v11 = vld [vmem:[%s9150_s11 + $0x20] sm:$0xff]  ;;  %s9072_s22 = smov 14   ;;  %s14114_s24 = scalar_lea.vmem %s14222_s8, %s9144_s9 }
  0x16   : > { %v9175_v8 = vld [vmem:[%s9150_s11 + $0x28] sm:$0xff]  ;;  %v362_v9 = vsel %vm360_vm0, %v9172_v7, inf  ;;  %v9185_v12 = vld [vmem:[%s9150_s11 + $0x38] sm:$0xff]  ;;  %v9188_v13 = vld [vmem:[%s9150_s11 + $0x30] sm:$0xff]  ;;  %v365_v15 = vsel %vm360_vm0, %v9182_v11, inf  ;;  %s9073_s30 = smov 16  }
  0x17   : > { %v367_v10 = vsel %vm360_vm0, %v9175_v8, inf  ;;  %v371_v16 = vsel %vm360_vm0, %v9185_v12, inf  ;;  %v369_v17 = vsel %vm360_vm0, %v9188_v13, inf  ;;  %v9197_v18 = vld [vmem:[%s9150_s11 + $0x48] sm:$0xff]  ;;  %v9200_v19 = vld [vmem:[%s9150_s11 + $0x40] sm:$0xff]  ;;  %v366_v20 = vmin.f32 %v361_v5, %v365_v15  ;;  %v9205_v24 = vld [vmem:[%s9150_s11 + $0x58] sm:$0xff] }
  0x18   : > { %v368_v14 = vmin.f32 %v362_v9, %v367_v10  ;;  %v372_v21 = vmin.f32 %v364_v6, %v371_v16  ;;  %v370_v22 = vmin.f32 %v363_v4, %v369_v17  ;;  %v375_v23 = vsel %vm360_vm0, %v9197_v18, inf  ;;  %v9208_v25 = vld [vmem:[%s9150_s11 + $0x50] sm:$0xff]  ;;  %v9211_v26 = vld [vmem:[%s9150_s11 + $0x68] sm:$0xff]  ;;  %v9224_v31 = vld [vmem:[%s9150_s11 + $0x60] sm:$0xff]  ;;  %s9076_s7 = smov 30   ;;  %s9078_s13 = smov 33  }
  0x19   : > { %608 = vrot.lane.b32.xlu1 %v9159_v3, %s9064_s12  ;;  %604 = vrot.lane.b32.xlu0 %v9172_v7, %s9064_s12  ;;  %v373_v28 = vsel %vm360_vm0, %v9200_v19, inf  ;;  %v379_v29 = vsel %vm360_vm0, %v9205_v24, inf  ;;  %v377_v30 = vsel %vm360_vm0, %v9208_v25, inf  ;;  %v9227_v32 = vld [vmem:[%s9150_s11 + $0x78] sm:$0xff]  ;;  %v383_v36 = vsel %vm360_vm0, %v9211_v26, inf  ;;  %v9232_v37 = vld [vmem:[%s9150_s11 + $0x70] sm:$0xff] }
  0x1a   : > { %v376_v27 = vmin.f32 %v368_v14, %v375_v23  ;;  %v374_v33 = vmin.f32 %v366_v20, %v373_v28  ;;  %v380_v34 = vmin.f32 %v372_v21, %v379_v29  ;;  %v378_v35 = vmin.f32 %v370_v22, %v377_v30  ;;  %v9235_v38 = vld [vmem:[%s9150_s11 + $0x88] sm:$0xff]  ;;  %v9238_v39 = vld [vmem:[%s9150_s11 + $0x98] sm:$0xff]  ;;  %v9247_v44 = vld [vmem:[%s9150_s11 + $0x80] sm:$0xff]  ;;  %s9079_s14 = smov 66   ;;  %s9083_s10 = smov 70  }
  0x1b   : > { %v381_v41 = vsel %vm360_vm0, %v9224_v31, inf  ;;  %v387_v42 = vsel %vm360_vm0, %v9227_v32, inf  ;;  %v385_v43 = vsel %vm360_vm0, %v9232_v37, inf  ;;  %v9250_v45 = vld [vmem:[%s9150_s11 + $0x90] sm:$0xff]  ;;  %v9253_v46 = vld [vmem:[%s9150_s11 + $0xa8] sm:$0xff]  ;;  %v391_v50 = vsel %vm360_vm0, %v9235_v38, inf }
  0x1c   : > { %v384_v40 = vmin.f32 %v376_v27, %v383_v36  ;;  %v382_v47 = vmin.f32 %v374_v33, %v381_v41  ;;  %v388_v48 = vmin.f32 %v380_v34, %v387_v42  ;;  %v386_v49 = vmin.f32 %v378_v35, %v385_v43  ;;  %v9258_v51 = vld [vmem:[%s9150_s11 + $0xa0] sm:$0xff]  ;;  %v9261_v52 = vld [vmem:[%s9150_s11 + $0xb8] sm:$0xff]  ;;  %v9264_v53 = vld [vmem:[%s9150_s11 + $0xb0] sm:$0xff] }
  0x1d   : > { %612 = vrot.lane.b32.xlu1 %v9175_v8, %s9064_s12  ;;  %610 = vrot.lane.b32.xlu0 %v9182_v11, %s9064_s12  ;;  %v389_v55 = vsel %vm360_vm0, %v9247_v44, inf  ;;  %v395_v56 = vsel %vm360_vm0, %v9238_v39, inf  ;;  %v393_v57 = vsel %vm360_vm0, %v9250_v45, inf  ;;  %v9277_v58 = vld [vmem:[%s9150_s11 + $0xc8] sm:$0xff]  ;;  %v399_v62 = vsel %vm360_vm0, %v9253_v46, inf  ;;  %v9282_v63 = vld [vmem:[%s9150_s11 + $0xc0] sm:$0xff] }
  0x1e   : > { %v392_v54 = vmin.f32 %v384_v40, %v391_v50  ;;  %v390_v59 = vmin.f32 %v382_v47, %v389_v55  ;;  %v396_v60 = vmin.f32 %v388_v48, %v395_v56  ;;  %v394_v61 = vmin.f32 %v386_v49, %v393_v57  ;;  %v9285_v0 = vld [vmem:[%s9150_s11 + $0xd8] sm:$0xff]  ;;  %v9288_v4 = vld [vmem:[%s9150_s11 + $0xd0] sm:$0xff]  ;;  %v9303_v14 = vld [vmem:[%s9150_s11 + $0xe8] sm:$0xff] }
  0x1f   : > { %v397_v6 = vsel %vm360_vm0, %v9258_v51, inf  ;;  %v403_v9 = vsel %vm360_vm0, %v9261_v52, inf  ;;  %v401_v10 = vsel %vm360_vm0, %v9264_v53, inf  ;;  %v407_v20 = vsel %vm360_vm0, %v9277_v58, inf  ;;  %v9308_v21 = vld [vmem:[%s9150_s11 + $0xe0] sm:$0xff]  ;;  %v9311_v22 = vld [vmem:[%s9150_s11 + $0xf8] sm:$0xff] }
  0x20   : > { %v400_v5 = vmin.f32 %v392_v54, %v399_v62  ;;  %v398_v15 = vmin.f32 %v390_v59, %v397_v6  ;;  %v404_v16 = vmin.f32 %v396_v60, %v403_v9  ;;  %v402_v17 = vmin.f32 %v394_v61, %v401_v10  ;;  %v9314_v23 = vld [vmem:[%s9150_s11 + $0xf0] sm:$0xff]  ;;  %v474_v34 = vld [vmem:[%s9294_s15] sm:$0xff]  ;;  %v477_v41 = vld [vmem:[%s9294_s15 + $0x18] sm:$0xff] }
  0x21   : > { %616 = vrot.lane.b32.xlu1 %v9185_v12, %s9064_s12  ;;  %614 = vrot.lane.b32.xlu0 %v9188_v13, %s9064_s12  ;;  %v405_v28 = vsel %vm360_vm0, %v9282_v63, inf  ;;  %v411_v29 = vsel %vm360_vm0, %v9285_v0, inf  ;;  %v409_v30 = vsel %vm360_vm0, %v9288_v4, inf  ;;  %v476_v33 = vld [vmem:[%s9294_s15 + $0x10] sm:$0xff]  ;;  %v9336_v40 = vsel %vm360_vm0, %v9303_v14, inf  ;;  %v475_v42 = vld [vmem:[%s9294_s15 + $0x8] sm:$0xff] }
  0x22   : > { %v9320_v27 = vmin.f32 %v400_v5, %v407_v20  ;;  %v9330_v35 = vmin.f32 %v398_v15, %v405_v28  ;;  %v9332_v36 = vmin.f32 %v404_v16, %v411_v29  ;;  %v479_v43 = vld [vmem:[%s9294_s15 + $0x28] sm:$0xff]  ;;  %v9343_v47 = vsel %vm360_vm0, %v9308_v21, inf  ;;  %v478_v49 = vld [vmem:[%s9294_s15 + $0x20] sm:$0xff]  ;;  %v481_v50 = vld [vmem:[%s9294_s15 + $0x38] sm:$0xff] }
  0x23   : > { %v9347_v48 = vsel %vm360_vm0, %v9311_v22, inf  ;;  %v480_v54 = vld [vmem:[%s9294_s15 + $0x30] sm:$0xff]  ;;  %v410_v55 = vmin.f32 %v402_v17, %v409_v30  ;;  %v508_v57 = vmul.f32 %v476_v33, %v9153_v1  ;;  %v483_v59 = vld [vmem:[%s9294_s15 + $0x48] sm:$0xff]  ;;  %v482_v60 = vld [vmem:[%s9294_s15 + $0x40] sm:$0xff]  ;;  %v417_v62 = vsel %vm360_vm0, %v9314_v23, inf }
  0x24   : > { %v416_v56 = vmin.f32 %v9320_v27, %v9336_v40  ;;  %v485_v61 = vld [vmem:[%s9294_s15 + $0x58] sm:$0xff]  ;;  %v506_v5 = vmul.f32 %v474_v34, %v9156_v2  ;;  %v509_v6 = vmul.f32 %v477_v41, %v9159_v3  ;;  %v507_v9 = vmul.f32 %v475_v42, %v9172_v7  ;;  %v484_v10 = vld [vmem:[%s9294_s15 + $0x50] sm:$0xff]  ;;  %v487_v15 = vld [vmem:[%s9294_s15 + $0x68] sm:$0xff] }
  0x25   : > { %620 = vrot.lane.b32.xlu1 %v9197_v18, %s9064_s12  ;;  %618 = vrot.lane.b32.xlu0 %v9200_v19, %s9064_s12  ;;  %v414_v16 = vmin.f32 %v9330_v35, %v9343_v47  ;;  %v420_v17 = vmin.f32 %v9332_v36, %v9347_v48  ;;  %540 = vst.msk [vmem:[#allocation2 + $0x48] sm:$0xff] %vm360_vm0, %v508_v57  ;;  %v486_v28 = vld [vmem:[%s9294_s15 + $0x60] sm:$0xff]  ;;  %v489_v29 = vld [vmem:[%s9294_s15 + $0x78] sm:$0xff] }
  0x26   : > { %v511_v20 = vmul.f32 %v479_v43, %v9175_v8  ;;  %v510_v27 = vmul.f32 %v478_v49, %v9182_v11  ;;  %v488_v30 = vld [vmem:[%s9294_s15 + $0x70] sm:$0xff]  ;;  %538 = vst.msk [vmem:[#allocation2 + $0x28] sm:$0xff] %vm360_vm0, %v506_v5  ;;  %541 = vst.msk [vmem:[#allocation2 + $0x50] sm:$0xff] %vm360_vm0, %v509_v6  ;;  %v513_v33 = vmul.f32 %v481_v50, %v9185_v12  ;;  %v491_v40 = vld [vmem:[%s9294_s15 + $0x88] sm:$0xff] }
  0x27   : > { %539 = vst.msk [vmem:[#allocation2 + $0x30] sm:$0xff] %vm360_vm0, %v507_v9  ;;  %v512_v34 = vmul.f32 %v480_v54, %v9188_v13  ;;  %v515_v35 = vmul.f32 %v483_v59, %v9197_v18  ;;  %v514_v36 = vmul.f32 %v482_v60, %v9200_v19  ;;  %v490_v41 = vld [vmem:[%s9294_s15 + $0x80] sm:$0xff]  ;;  %v418_v42 = vmin.f32 %v410_v55, %v417_v62  ;;  %v492_v49 = vld [vmem:[%s9294_s15 + $0x90] sm:$0xff]  ;;  %v493_v57 = vld [vmem:[%s9294_s15 + $0x98] sm:$0xff] }
  0x28   : > { %543 = vst.msk [vmem:[#allocation2 + $0x70] sm:$0xff] %vm360_vm0, %v511_v20  ;;  %542 = vst.msk [vmem:[#allocation2 + $0x68] sm:$0xff] %vm360_vm0, %v510_v27  ;;  %v517_v43 = vmul.f32 %v485_v61, %v9205_v24  ;;  %v516_v47 = vmul.f32 %v484_v10, %v9208_v25  ;;  %v519_v48 = vmul.f32 %v487_v15, %v9211_v26  ;;  %v494_v9 = vld [vmem:[%s9294_s15 + $0xa0] sm:$0xff]  ;;  %v495_v10 = vld [vmem:[%s9294_s15 + $0xa8] sm:$0xff] }
  0x29   : > { %624 = vrot.lane.b32.xlu1 %v9205_v24, %s9064_s12  ;;  %622 = vrot.lane.b32.xlu0 %v9208_v25, %s9064_s12  ;;  %545 = vst.msk [vmem:[#allocation2 + $0x90] sm:$0xff] %vm360_vm0, %v513_v33  ;;  %544 = vst.msk [vmem:[#allocation2 + $0x88] sm:$0xff] %vm360_vm0, %v512_v34  ;;  %v518_v50 = vmul.f32 %v486_v28, %v9224_v31  ;;  %v521_v54 = vmul.f32 %v489_v29, %v9227_v32  ;;  %v497_v20 = vld [vmem:[%s9294_s15 + $0xb8] sm:$0xff]  ;;  %v499_v33 = vld [vmem:[%s9294_s15 + $0xc8] sm:$0xff] }
  0x2a   : > { %547 = vst.msk [vmem:[#allocation2 + $0xb0] sm:$0xff] %vm360_vm0, %v515_v35  ;;  %546 = vst.msk [vmem:[#allocation2 + $0xa8] sm:$0xff] %vm360_vm0, %v514_v36  ;;  %v520_v55 = vmul.f32 %v488_v30, %v9232_v37  ;;  %v523_v59 = vmul.f32 %v491_v40, %v9235_v38  ;;  %v522_v60 = vmul.f32 %v490_v41, %v9247_v44  ;;  %v498_v30 = vld [vmem:[%s9294_s15 + $0xc0] sm:$0xff]  ;;  %v501_v41 = vld [vmem:[%s9294_s15 + $0xd8] sm:$0xff] }
  0x2b   : > { %549 = vst.msk [vmem:[#allocation2 + $0xd0] sm:$0xff] %vm360_vm0, %v517_v43  ;;  %548 = vst.msk [vmem:[#allocation2 + $0xc8] sm:$0xff] %vm360_vm0, %v516_v47  ;;  %v525_v61 = vmul.f32 %v493_v57, %v9238_v39  ;;  %v524_v62 = vmul.f32 %v492_v49, %v9250_v45  ;;  %v421_v5 = vmin.f32 %v414_v16, %v416_v56  ;;  %v503_v43 = vld [vmem:[%s9294_s15 + $0xe8] sm:$0xff]  ;;  %v502_v47 = vld [vmem:[%s9294_s15 + $0xe0] sm:$0xff] }
  0x2c   : > { %551 = vst.msk [vmem:[#allocation2 + $0xf0] sm:$0xff] %vm360_vm0, %v519_v48  ;;  %550 = vst.msk [vmem:[#allocation2 + $0xe8] sm:$0xff] %vm360_vm0, %v518_v50  ;;  %v422_v6 = vmin.f32 %v418_v42, %v420_v17  ;;  %v526_v56 = vmul.f32 %v494_v9, %v9258_v51  ;;  %v527_v15 = vmul.f32 %v495_v10, %v9253_v46  ;;  %v496_v17 = vld [vmem:[%s9294_s15 + $0xb0] sm:$0xff] }
  0x2d   : > { %553 = vst.msk [vmem:[#allocation2 + $0x110] sm:$0xff] %vm360_vm0, %v521_v54  ;;  %552 = vst.msk [vmem:[#allocation2 + $0x108] sm:$0xff] %vm360_vm0, %v520_v55  ;;  %628 = vrot.lane.b32.xlu1 %v9211_v26, %s9064_s12  ;;  %626 = vrot.lane.b32.xlu0 %v9224_v31, %s9064_s12  ;;  %v528_v27 = vmul.f32 %v496_v17, %v9264_v53  ;;  %v529_v28 = vmul.f32 %v497_v20, %v9261_v52  ;;  %v500_v42 = vld [vmem:[%s9294_s15 + $0xd0] sm:$0xff] }
  0x2e   : > { %555 = vst.msk [vmem:[#allocation2 + $0x130] sm:$0xff] %vm360_vm0, %v523_v59  ;;  %554 = vst.msk [vmem:[#allocation2 + $0x128] sm:$0xff] %vm360_vm0, %v522_v60  ;;  %v423_v16 = vmin.f32 %v421_v5, %v422_v6  ;;  %v530_v34 = vmul.f32 %v498_v30, %v9282_v63  ;;  %v531_v35 = vmul.f32 %v499_v33, %v9277_v58  ;;  %v504_v54 = vld [vmem:[%s9294_s15 + $0xf0] sm:$0xff]  ;;  %v505_v59 = vld [vmem:[%s9294_s15 + $0xf8] sm:$0xff]  ;;  %s9080_s15 = smov 99  }
  0x2f   : > { %557 = vst.msk [vmem:[#allocation2 + $0x150] sm:$0xff] %vm360_vm0, %v525_v61  ;;  %556 = vst.msk [vmem:[#allocation2 + $0x148] sm:$0xff] %vm360_vm0, %v524_v62  ;;  %v533_v49 = vmul.f32 %v501_v41, %v9285_v0  ;;  %v532_v50 = vmul.f32 %v500_v42, %v9288_v4  ;;  %v535_v55 = vmul.f32 %v503_v43, %v9303_v14  ;;  %v14223_v62 = vmov 0.0  }
  0x30   : > { %558 = vst.msk [vmem:[#allocation2 + $0x168] sm:$0xff] %vm360_vm0, %v526_v56  ;;  %559 = vst.msk [vmem:[#allocation2 + $0x170] sm:$0xff] %vm360_vm0, %v527_v15  ;;  %v424_v29 = vrot.slane %v423_v16, 4  ;;  %v534_v57 = vmul.f32 %v502_v47, %v9308_v21  ;;  %v536_v60 = vmul.f32 %v504_v54, %v9314_v23  ;;  %v537_v61 = vmul.f32 %v505_v59, %v9311_v22 }
  0x31   : > { %632 = vrot.lane.b32.xlu1 %v9227_v32, %s9064_s12  ;;  %630 = vrot.lane.b32.xlu0 %v9232_v37, %s9064_s12  ;;  %560 = vst.msk [vmem:[#allocation2 + $0x188] sm:$0xff] %vm360_vm0, %v528_v27  ;;  %561 = vst.msk [vmem:[#allocation2 + $0x190] sm:$0xff] %vm360_vm0, %v529_v28 }
  0x32   : > { %562 = vst.msk [vmem:[#allocation2 + $0x1a8] sm:$0xff] %vm360_vm0, %v530_v34  ;;  %v425_v36 = vmin.f32 %v423_v16, %v424_v29  ;;  %563 = vst.msk [vmem:[#allocation2 + $0x1b0] sm:$0xff] %vm360_vm0, %v531_v35 }
  0x33   : > { %565 = vst.msk [vmem:[#allocation2 + $0x1d0] sm:$0xff] %vm360_vm0, %v533_v49  ;;  %564 = vst.msk [vmem:[#allocation2 + $0x1c8] sm:$0xff] %vm360_vm0, %v532_v50 }
  0x34   : > { %v426_v40 = vrot.slane %v425_v36, 2  ;;  %567 = vst.msk [vmem:[#allocation2 + $0x1f0] sm:$0xff] %vm360_vm0, %v535_v55  ;;  %566 = vst.msk [vmem:[#allocation2 + $0x1e8] sm:$0xff] %vm360_vm0, %v534_v57 }
  0x35   : > { %636 = vrot.lane.b32.xlu1 %v9235_v38, %s9064_s12  ;;  %634 = vrot.lane.b32.xlu0 %v9247_v44, %s9064_s12  ;;  %568 = vst.msk [vmem:[#allocation2 + $0x208] sm:$0xff] %vm360_vm0, %v536_v60  ;;  %569 = vst.msk [vmem:[#allocation2 + $0x210] sm:$0xff] %vm360_vm0, %v537_v61 }
  0x36   : > { %v9462_v48 = vmin.f32 %v425_v36, %v426_v40  ;;  %433 = vst.msk [vmem:[#allocation2 + $0xf] sm:$0xff] %vm431_vm1, %v14223_v62  ;;  %432 = vst.msk [vmem:[#allocation2 + $0x7] sm:$0xff] %vm431_vm1, %v14223_v62 }
  0x37   : > { %435 = vst.msk [vmem:[#allocation2 + $0x17] sm:$0x3] %vm434_vm2, %v14223_v62  ;;  %439 = vst.msk [vmem:[#allocation2 + $0x237] sm:$0x3] %vm434_vm2, %v14223_v62  ;;  %vm3819_vm2 = vcmask 261120  }
  0x38   : > { %437 = vst.msk [vmem:[#allocation2 + $0x227] sm:$0xff] %vm431_vm1, %v14223_v62  ;;  %438 = vst.msk [vmem:[#allocation2 + $0x22f] sm:$0xff] %vm431_vm1, %v14223_v62  ;;  %v428_v5 = vrot.slane %v9462_v48, 1  ;;  %vm2825_vm1 = vcmask 146432  }
  0x39   : > { %640 = vrot.lane.b32.xlu1 %v9238_v39, %s9064_s12  ;;  %638 = vrot.lane.b32.xlu0 %v9250_v45, %s9064_s12  ;;  %442 = vst.msk [vmem:[#allocation2 + $0x27] sm:$0x1] %vm441_vm3, %v14223_v62  ;;  %443 = vst.msk [vmem:[#allocation2 + $0x47] sm:$0x1] %vm441_vm3, %v14223_v62 }
  0x3a   : > { %444 = vst.msk [vmem:[#allocation2 + $0x67] sm:$0x1] %vm441_vm3, %v14223_v62  ;;  %445 = vst.msk [vmem:[#allocation2 + $0x87] sm:$0x1] %vm441_vm3, %v14223_v62  ;;  %v429_v6 = vmin.f32 %v9462_v48, %v428_v5 }
  0x3b   : > { %446 = vst.msk [vmem:[#allocation2 + $0xa7] sm:$0x1] %vm441_vm3, %v14223_v62  ;;  %447 = vst.msk [vmem:[#allocation2 + $0xc7] sm:$0x1] %vm441_vm3, %v14223_v62 }
  0x3c   : > { %448 = vst.msk [vmem:[#allocation2 + $0xe7] sm:$0x1] %vm441_vm3, %v14223_v62  ;;  %449 = vst.msk [vmem:[#allocation2 + $0x107] sm:$0x1] %vm441_vm3, %v14223_v62  ;;  %v9566_v9 = vmin.f32 %v429_v6, 0.0 }
  0x3d   : > { %644 = vrot.lane.b32.xlu1 %v9253_v46, %s9064_s12  ;;  %642 = vrot.lane.b32.xlu0 %v9258_v51, %s9064_s12  ;;  %450 = vst.msk [vmem:[#allocation2 + $0x127] sm:$0x1] %vm441_vm3, %v14223_v62  ;;  %451 = vst.msk [vmem:[#allocation2 + $0x147] sm:$0x1] %vm441_vm3, %v14223_v62  ;;  %v9568_v10 = vld [vmem:[#allocation2 + $0xf] sm:$0xff]  ;;  %v9570_v56 = vld [vmem:[#allocation2 + $0x7] sm:$0xff] }
  0x3e   : > { %452 = vst.msk [vmem:[#allocation2 + $0x167] sm:$0x1] %vm441_vm3, %v14223_v62  ;;  %453 = vst.msk [vmem:[#allocation2 + $0x187] sm:$0x1] %vm441_vm3, %v14223_v62  ;;  %v732_v15 = vsub.f32 %v9172_v7, %v9566_v9  ;;  %v731_v16 = vsub.f32 %v9156_v2, %v9566_v9  ;;  %v734_v17 = vsub.f32 %v9159_v3, %v9566_v9  ;;  %v989_v34 = vld [vmem:[#allocation2 + $0x8] sm:$0xff] }
  0x3f   : > { %454 = vst.msk [vmem:[#allocation2 + $0x1a7] sm:$0x1] %vm441_vm3, %v14223_v62  ;;  %455 = vst.msk [vmem:[#allocation2 + $0x1c7] sm:$0x1] %vm441_vm3, %v14223_v62  ;;  %v733_v7 = vsub.f32 %v9153_v1, %v9566_v9  ;;  %v736_v2 = vsub.f32 %v9175_v8, %v9566_v9  ;;  %v735_v20 = vsub.f32 %v9182_v11, %v9566_v9 }
  0x40   : > { %456 = vst.msk [vmem:[#allocation2 + $0x1e7] sm:$0x1] %vm441_vm3, %v14223_v62  ;;  %457 = vst.msk [vmem:[#allocation2 + $0x207] sm:$0x1] %vm441_vm3, %v14223_v62  ;;  %v738_v3 = vsub.f32 %v9185_v12, %v9566_v9  ;;  %v737_v1 = vsub.f32 %v9188_v13, %v9566_v9  ;;  %v740_v8 = vsub.f32 %v9197_v18, %v9566_v9 }
  0x41   : > { %648 = vrot.lane.b32.xlu1 %v9261_v52, %s9064_s12  ;;  %646 = vrot.lane.b32.xlu0 %v9264_v53, %s9064_s12  ;;  %458 = vst.msk [vmem:[#allocation2 + $0x38] sm:$0x1] %vm441_vm3, %v14223_v62  ;;  %459 = vst.msk [vmem:[#allocation2 + $0x58] sm:$0x1] %vm441_vm3, %v14223_v62  ;;  %v739_v11 = vsub.f32 %v9200_v19, %v9566_v9  ;;  %v742_v12 = vsub.f32 %v9205_v24, %v9566_v9 }
  0x42   : > { %460 = vst.msk [vmem:[#allocation2 + $0x78] sm:$0x1] %vm441_vm3, %v14223_v62  ;;  %461 = vst.msk [vmem:[#allocation2 + $0x98] sm:$0x1] %vm441_vm3, %v14223_v62  ;;  %v741_v13 = vsub.f32 %v9208_v25, %v9566_v9  ;;  %v744_v18 = vsub.f32 %v9211_v26, %v9566_v9  ;;  %v743_v19 = vsub.f32 %v9224_v31, %v9566_v9 }
  0x43   : > { %462 = vst.msk [vmem:[#allocation2 + $0xb8] sm:$0x1] %vm441_vm3, %v14223_v62  ;;  %463 = vst.msk [vmem:[#allocation2 + $0xd8] sm:$0x1] %vm441_vm3, %v14223_v62  ;;  %v746_v24 = vsub.f32 %v9227_v32, %v9566_v9  ;;  %v745_v25 = vsub.f32 %v9232_v37, %v9566_v9  ;;  %v748_v26 = vsub.f32 %v9235_v38, %v9566_v9 }
  0x44   : > { %464 = vst.msk [vmem:[#allocation2 + $0xf8] sm:$0x1] %vm441_vm3, %v14223_v62  ;;  %465 = vst.msk [vmem:[#allocation2 + $0x118] sm:$0x1] %vm441_vm3, %v14223_v62  ;;  %v747_v31 = vsub.f32 %v9247_v44, %v9566_v9  ;;  %v750_v32 = vsub.f32 %v9238_v39, %v9566_v9  ;;  %v749_v37 = vsub.f32 %v9250_v45, %v9566_v9 }
  0x45   : > { %652 = vrot.lane.b32.xlu1 %v9277_v58, %s9064_s12  ;;  %650 = vrot.lane.b32.xlu0 %v9282_v63, %s9064_s12  ;;  %466 = vst.msk [vmem:[#allocation2 + $0x138] sm:$0x1] %vm441_vm3, %v14223_v62  ;;  %467 = vst.msk [vmem:[#allocation2 + $0x158] sm:$0x1] %vm441_vm3, %v14223_v62  ;;  %v752_v38 = vsub.f32 %v9253_v46, %v9566_v9  ;;  %v751_v44 = vsub.f32 %v9258_v51, %v9566_v9 }
  0x46   : > { %468 = vst.msk [vmem:[#allocation2 + $0x178] sm:$0x1] %vm441_vm3, %v14223_v62  ;;  %469 = vst.msk [vmem:[#allocation2 + $0x198] sm:$0x1] %vm441_vm3, %v14223_v62  ;;  %v754_v39 = vsub.f32 %v9261_v52, %v9566_v9  ;;  %v753_v45 = vsub.f32 %v9264_v53, %v9566_v9  ;;  %v756_v46 = vsub.f32 %v9277_v58, %v9566_v9 }
  0x47   : > { %470 = vst.msk [vmem:[#allocation2 + $0x1b8] sm:$0x1] %vm441_vm3, %v14223_v62  ;;  %471 = vst.msk [vmem:[#allocation2 + $0x1d8] sm:$0x1] %vm441_vm3, %v14223_v62  ;;  %v755_v51 = vsub.f32 %v9282_v63, %v9566_v9  ;;  %v758_v52 = vsub.f32 %v9285_v0, %v9566_v9  ;;  %v757_v53 = vsub.f32 %v9288_v4, %v9566_v9 }
  0x48   : > { %472 = vst.msk [vmem:[#allocation2 + $0x1f8] sm:$0x1] %vm441_vm3, %v14223_v62  ;;  %473 = vst.msk [vmem:[#allocation2 + $0x218] sm:$0x1] %vm441_vm3, %v14223_v62  ;;  %v760_v58 = vsub.f32 %v9303_v14, %v9566_v9  ;;  %v759_v63 = vsub.f32 %v9308_v21, %v9566_v9  ;;  %v761_v30 = vsub.f32 %v9314_v23, %v9566_v9  ;;  %vm3584_vm3 = vcmask 277504  }
  0x49   : > { %656 = vrot.lane.b32.xlu1 %v9285_v0, %s9064_s12  ;;  %654 = vrot.lane.b32.xlu0 %v9288_v4, %s9064_s12  ;;  %14370 = vst [vmem:[#allocation7_spill] sm:$0xff] %v9566_v9  ;;  %14371 = vst [vmem:[#allocation8_spill] sm:$0xff] %v9568_v10  ;;  %v762_v4 = vsub.f32 %v9311_v22, %v9566_v9 }
  0x4a   : > { %14372 = vst [vmem:[#allocation9_spill] sm:$0xff] %v9570_v56  ;;  %958 = vst.msk [vmem:[#allocation3 + $0x8] sm:$0xff] %vm956_vm4, %v9568_v10  ;;  %v1214_v10 = vld [vmem:[#allocation2 + $0x9] sm:$0xff] }
  0x4b   : > { %957 = vst.msk [vmem:[#allocation3] sm:$0xff] %vm956_vm4, %v9570_v56  ;;  %v1215_v56 = vld [vmem:[#allocation2 + $0x11] sm:$0xff] }
  0x4d   : > { %660 = vrot.lane.b32.xlu1 %v9303_v14, %s9064_s12  ;;  %658 = vrot.lane.b32.xlu0 %v9308_v21, %s9064_s12  ;;  %v990_v21 = vld [vmem:[#allocation2 + $0x10] sm:$0xff] }
  0x51   : > { %664 = vrot.lane.b32.xlu1 %v9311_v22, %s9064_s12  ;;  %662 = vrot.lane.b32.xlu0 %v9314_v23, %s9064_s12  ;;  %s9077_s12 = smov 31  }
  0x55   : > { %797 = vrot.lane.b32.xlu1 %v732_v15, %s9066_s16  ;;  %795 = vrot.lane.b32.xlu0 %v731_v16, %s9066_s16 }
  0x59   : > { %801 = vrot.lane.b32.xlu1 %v734_v17, %s9066_s16  ;;  %799 = vrot.lane.b32.xlu0 %v733_v7, %s9066_s16 }
  0x5d   : > { %805 = vrot.lane.b32.xlu1 %v736_v2, %s9066_s16  ;;  %803 = vrot.lane.b32.xlu0 %v735_v20, %s9066_s16 }
  0x61   : > { %809 = vrot.lane.b32.xlu1 %v738_v3, %s9066_s16  ;;  %807 = vrot.lane.b32.xlu0 %v737_v1, %s9066_s16 }
  0x65   : > { %813 = vrot.lane.b32.xlu1 %v740_v8, %s9066_s16  ;;  %811 = vrot.lane.b32.xlu0 %v739_v11, %s9066_s16 }
  0x69   : > { %817 = vrot.lane.b32.xlu1 %v742_v12, %s9066_s16  ;;  %815 = vrot.lane.b32.xlu0 %v741_v13, %s9066_s16 }
  0x6d   : > { %821 = vrot.lane.b32.xlu1 %v744_v18, %s9066_s16  ;;  %819 = vrot.lane.b32.xlu0 %v743_v19, %s9066_s16 }
  0x71   : > { %825 = vrot.lane.b32.xlu1 %v746_v24, %s9066_s16  ;;  %823 = vrot.lane.b32.xlu0 %v745_v25, %s9066_s16 }
  0x75   : > { %829 = vrot.lane.b32.xlu1 %v748_v26, %s9066_s16  ;;  %827 = vrot.lane.b32.xlu0 %v747_v31, %s9066_s16 }
  0x79   : > { %833 = vrot.lane.b32.xlu1 %v750_v32, %s9066_s16  ;;  %831 = vrot.lane.b32.xlu0 %v749_v37, %s9066_s16 }
  0x7d   : > { %837 = vrot.lane.b32.xlu1 %v752_v38, %s9066_s16  ;;  %835 = vrot.lane.b32.xlu0 %v751_v44, %s9066_s16 }
  0x81   : > { %841 = vrot.lane.b32.xlu1 %v754_v39, %s9066_s16  ;;  %839 = vrot.lane.b32.xlu0 %v753_v45, %s9066_s16 }
  0x85   : > { %845 = vrot.lane.b32.xlu1 %v756_v46, %s9066_s16  ;;  %843 = vrot.lane.b32.xlu0 %v755_v51, %s9066_s16 }
  0x87   : > { %v607_v27 = vpop.permute.xlu1 %606  ;;  %v603_v28 = vpop.permute.xlu0 %602 }
  0x88   : > { %701 = vst.msk [vmem:[#allocation2 + $0x48] sm:$0xff] %vm698_vm5, %v607_v27  ;;  %699 = vst.msk [vmem:[#allocation2 + $0x28] sm:$0xff] %vm698_vm5, %v603_v28 }
  0x89   : > { %849 = vrot.lane.b32.xlu1 %v758_v52, %s9066_s16  ;;  %847 = vrot.lane.b32.xlu0 %v757_v53, %s9066_s16 }
  0x8b   : > { %v609_v0 = vpop.permute.xlu1 %608  ;;  %v605_v29 = vpop.permute.xlu0 %604 }
  0x8c   : > { %702 = vst.msk [vmem:[#allocation2 + $0x50] sm:$0xff] %vm698_vm5, %v609_v0  ;;  %700 = vst.msk [vmem:[#allocation2 + $0x30] sm:$0xff] %vm698_vm5, %v605_v29 }
  0x8d   : > { %853 = vrot.lane.b32.xlu1 %v760_v58, %s9066_s16  ;;  %851 = vrot.lane.b32.xlu0 %v759_v63, %s9066_s16 }
  0x8f   : > { %v613_v14 = vpop.permute.xlu1 %612  ;;  %v611_v33 = vpop.permute.xlu0 %610 }
  0x90   : > { %704 = vst.msk [vmem:[#allocation2 + $0x70] sm:$0xff] %vm698_vm5, %v613_v14  ;;  %703 = vst.msk [vmem:[#allocation2 + $0x68] sm:$0xff] %vm698_vm5, %v611_v33 }
  0x91   : > { %857 = vrot.lane.b32.xlu1 %v762_v4, %s9066_s16  ;;  %855 = vrot.lane.b32.xlu0 %v761_v30, %s9066_s16 }
  0x93   : > { %v617_v35 = vpop.permute.xlu1 %616  ;;  %v615_v36 = vpop.permute.xlu0 %614 }
  0x94   : > { %706 = vst.msk [vmem:[#allocation2 + $0x90] sm:$0xff] %vm698_vm5, %v617_v35  ;;  %705 = vst.msk [vmem:[#allocation2 + $0x88] sm:$0xff] %vm698_vm5, %v615_v36 }
  0x95   : > { %1055 = vrot.lane.b32.xlu1 %v990_v21, %s9066_s16  ;;  %1053 = vrot.lane.b32.xlu0 %v989_v34, %s9066_s16 }
  0x97   : > { %v621_v22 = vpop.permute.xlu1 %620  ;;  %v619_v23 = vpop.permute.xlu0 %618 }
  0x98   : > { %708 = vst.msk [vmem:[#allocation2 + $0xb0] sm:$0xff] %vm698_vm5, %v621_v22  ;;  %707 = vst.msk [vmem:[#allocation2 + $0xa8] sm:$0xff] %vm698_vm5, %v619_v23 }
  0x9b   : > { %v625_v40 = vpop.permute.xlu1 %624  ;;  %v623_v41 = vpop.permute.xlu0 %622 }
  0x9c   : > { %710 = vst.msk [vmem:[#allocation2 + $0xd0] sm:$0xff] %vm698_vm5, %v625_v40  ;;  %709 = vst.msk [vmem:[#allocation2 + $0xc8] sm:$0xff] %vm698_vm5, %v623_v41 }
  0x9f   : > { %v629_v42 = vpop.permute.xlu1 %628  ;;  %v627_v43 = vpop.permute.xlu0 %626 }
  0xa0   : > { %712 = vst.msk [vmem:[#allocation2 + $0xf0] sm:$0xff] %vm698_vm5, %v629_v42  ;;  %711 = vst.msk [vmem:[#allocation2 + $0xe8] sm:$0xff] %vm698_vm5, %v627_v43 }
  0xa3   : > { %v633_v47 = vpop.permute.xlu1 %632  ;;  %v631_v48 = vpop.permute.xlu0 %630 }
  0xa4   : > { %714 = vst.msk [vmem:[#allocation2 + $0x110] sm:$0xff] %vm698_vm5, %v633_v47  ;;  %713 = vst.msk [vmem:[#allocation2 + $0x108] sm:$0xff] %vm698_vm5, %v631_v48 }
  0xa7   : > { %v637_v49 = vpop.permute.xlu1 %636  ;;  %v635_v50 = vpop.permute.xlu0 %634 }
  0xa8   : > { %716 = vst.msk [vmem:[#allocation2 + $0x130] sm:$0xff] %vm698_vm5, %v637_v49  ;;  %715 = vst.msk [vmem:[#allocation2 + $0x128] sm:$0xff] %vm698_vm5, %v635_v50 }
  0xab   : > { %v641_v54 = vpop.permute.xlu1 %640  ;;  %v639_v55 = vpop.permute.xlu0 %638 }
  0xac   : > { %718 = vst.msk [vmem:[#allocation2 + $0x150] sm:$0xff] %vm698_vm5, %v641_v54  ;;  %717 = vst.msk [vmem:[#allocation2 + $0x148] sm:$0xff] %vm698_vm5, %v639_v55 }
  0xaf   : > { %v645_v57 = vpop.permute.xlu1 %644  ;;  %v643_v59 = vpop.permute.xlu0 %642 }
  0xb0   : > { %720 = vst.msk [vmem:[#allocation2 + $0x170] sm:$0xff] %vm698_vm5, %v645_v57  ;;  %719 = vst.msk [vmem:[#allocation2 + $0x168] sm:$0xff] %vm698_vm5, %v643_v59 }
  0xb3   : > { %v649_v60 = vpop.permute.xlu1 %648  ;;  %v647_v61 = vpop.permute.xlu0 %646 }
  0xb4   : > { %722 = vst.msk [vmem:[#allocation2 + $0x190] sm:$0xff] %vm698_vm5, %v649_v60  ;;  %721 = vst.msk [vmem:[#allocation2 + $0x188] sm:$0xff] %vm698_vm5, %v647_v61 }
  0xb7   : > { %v653_v5 = vpop.permute.xlu1 %652  ;;  %v651_v6 = vpop.permute.xlu0 %650 }
  0xb8   : > { %724 = vst.msk [vmem:[#allocation2 + $0x1b0] sm:$0xff] %vm698_vm5, %v653_v5  ;;  %723 = vst.msk [vmem:[#allocation2 + $0x1a8] sm:$0xff] %vm698_vm5, %v651_v6 }
  0xbb   : > { %v657_v15 = vpop.permute.xlu1 %656  ;;  %v655_v16 = vpop.permute.xlu0 %654 }
  0xbc   : > { %726 = vst.msk [vmem:[#allocation2 + $0x1d0] sm:$0xff] %vm698_vm5, %v657_v15  ;;  %725 = vst.msk [vmem:[#allocation2 + $0x1c8] sm:$0xff] %vm698_vm5, %v655_v16 }
  0xbf   : > { %v661_v17 = vpop.permute.xlu1 %660  ;;  %v659_v7 = vpop.permute.xlu0 %658 }
  0xc0   : > { %728 = vst.msk [vmem:[#allocation2 + $0x1f0] sm:$0xff] %vm698_vm5, %v661_v17  ;;  %727 = vst.msk [vmem:[#allocation2 + $0x1e8] sm:$0xff] %vm698_vm5, %v659_v7 }
  0xc3   : > { %v665_v2 = vpop.permute.xlu1 %664  ;;  %v663_v20 = vpop.permute.xlu0 %662 }
  0xc4   : > { %730 = vst.msk [vmem:[#allocation2 + $0x210] sm:$0xff] %vm698_vm5, %v665_v2  ;;  %729 = vst.msk [vmem:[#allocation2 + $0x208] sm:$0xff] %vm698_vm5, %v663_v20  ;;  %vm4206_vm5 = vcmask 269312  }
  0xc7   : > { %v798_v3 = vpop.permute.xlu1 %797  ;;  %v796_v1 = vpop.permute.xlu0 %795 }
  0xc8   : > { %893 = vst.msk [vmem:[#allocation2 + $0x30] sm:$0xff] %vm891_vm6, %v798_v3  ;;  %892 = vst.msk [vmem:[#allocation2 + $0x28] sm:$0xff] %vm891_vm6, %v796_v1 }
  0xcb   : > { %v802_v8 = vpop.permute.xlu1 %801  ;;  %v800_v11 = vpop.permute.xlu0 %799 }
  0xcc   : > { %895 = vst.msk [vmem:[#allocation2 + $0x50] sm:$0xff] %vm891_vm6, %v802_v8  ;;  %894 = vst.msk [vmem:[#allocation2 + $0x48] sm:$0xff] %vm891_vm6, %v800_v11 }
  0xcf   : > { %v806_v12 = vpop.permute.xlu1 %805  ;;  %v804_v13 = vpop.permute.xlu0 %803  ;;  %v992_v18 = vld [vmem:[#allocation2 + $0x30] sm:$0xff]  ;;  %v9716_v24 = vld [vmem:[#allocation2 + $0x28] sm:$0xff] }
  0xd0   : > { %v9714_v19 = vld [vmem:[#allocation2 + $0x2f] sm:$0xff]  ;;  %897 = vst.msk [vmem:[#allocation2 + $0x70] sm:$0xff] %vm891_vm6, %v806_v12  ;;  %896 = vst.msk [vmem:[#allocation2 + $0x68] sm:$0xff] %vm891_vm6, %v804_v13  ;;  %1059 = vrot.lane.b32.xlu1 %v992_v18, %s9066_s16  ;;  %1057 = vrot.lane.b32.xlu0 %v9716_v24, %s9066_s16  ;;  %v9723_v25 = vld [vmem:[#allocation2 + $0x27] sm:$0xff] }
  0xd1   : > { %960 = vst.msk [vmem:[#allocation3 + $0x18] sm:$0xff] %vm956_vm4, %v9714_v19  ;;  %959 = vst.msk [vmem:[#allocation3 + $0x10] sm:$0xff] %vm956_vm4, %v9723_v25  ;;  %v9983_v9 = vld [vmem:[#allocation2 + $0x31] sm:$0xff] }
  0xd2   : > { %14382 = vst [vmem:[#allocation19_spill] sm:$0xff] %v9983_v9 }
  0xd3   : > { %v810_v26 = vpop.permute.xlu1 %809  ;;  %v808_v31 = vpop.permute.xlu0 %807  ;;  %v9729_v32 = vld [vmem:[#allocation2 + $0x4f] sm:$0xff]  ;;  %v9733_v38 = vld [vmem:[#allocation2 + $0x47] sm:$0xff] }
  0xd4   : > { %v9731_v37 = vld [vmem:[#allocation2 + $0x50] sm:$0xff]  ;;  %899 = vst.msk [vmem:[#allocation2 + $0x90] sm:$0xff] %vm891_vm6, %v810_v26  ;;  %898 = vst.msk [vmem:[#allocation2 + $0x88] sm:$0xff] %vm891_vm6, %v808_v31  ;;  %v9739_v44 = vld [vmem:[#allocation2 + $0x48] sm:$0xff] }
  0xd5   : > { %1063 = vrot.lane.b32.xlu1 %v9731_v37, %s9066_s16  ;;  %961 = vst.msk [vmem:[#allocation3 + $0x20] sm:$0xff] %vm956_vm4, %v9733_v38  ;;  %962 = vst.msk [vmem:[#allocation3 + $0x28] sm:$0xff] %vm956_vm4, %v9729_v32  ;;  %1061 = vrot.lane.b32.xlu0 %v9739_v44, %s9066_s16 }
  0xd7   : > { %v814_v39 = vpop.permute.xlu1 %813  ;;  %v812_v45 = vpop.permute.xlu0 %811  ;;  %v9747_v46 = vld [vmem:[#allocation2 + $0x6f] sm:$0xff]  ;;  %v9751_v52 = vld [vmem:[#allocation2 + $0x67] sm:$0xff] }
  0xd8   : > { %v9749_v51 = vld [vmem:[#allocation2 + $0x70] sm:$0xff]  ;;  %901 = vst.msk [vmem:[#allocation2 + $0xb0] sm:$0xff] %vm891_vm6, %v814_v39  ;;  %900 = vst.msk [vmem:[#allocation2 + $0xa8] sm:$0xff] %vm891_vm6, %v812_v45  ;;  %v9757_v53 = vld [vmem:[#allocation2 + $0x68] sm:$0xff] }
  0xd9   : > { %1067 = vrot.lane.b32.xlu1 %v9749_v51, %s9066_s16  ;;  %963 = vst.msk [vmem:[#allocation3 + $0x30] sm:$0xff] %vm956_vm4, %v9751_v52  ;;  %964 = vst.msk [vmem:[#allocation3 + $0x38] sm:$0xff] %vm956_vm4, %v9747_v46  ;;  %1065 = vrot.lane.b32.xlu0 %v9757_v53, %s9066_s16 }
  0xdb   : > { %v818_v27 = vpop.permute.xlu1 %817  ;;  %v816_v28 = vpop.permute.xlu0 %815  ;;  %v9765_v58 = vld [vmem:[#allocation2 + $0x8f] sm:$0xff]  ;;  %v9769_v0 = vld [vmem:[#allocation2 + $0x87] sm:$0xff] }
  0xdc   : > { %v9767_v63 = vld [vmem:[#allocation2 + $0x90] sm:$0xff]  ;;  %903 = vst.msk [vmem:[#allocation2 + $0xd0] sm:$0xff] %vm891_vm6, %v818_v27  ;;  %902 = vst.msk [vmem:[#allocation2 + $0xc8] sm:$0xff] %vm891_vm6, %v816_v28  ;;  %v9775_v29 = vld [vmem:[#allocation2 + $0x88] sm:$0xff] }
  0xdd   : > { %1071 = vrot.lane.b32.xlu1 %v9767_v63, %s9066_s16  ;;  %965 = vst.msk [vmem:[#allocation3 + $0x40] sm:$0xff] %vm956_vm4, %v9769_v0  ;;  %966 = vst.msk [vmem:[#allocation3 + $0x48] sm:$0xff] %vm956_vm4, %v9765_v58  ;;  %1069 = vrot.lane.b32.xlu0 %v9775_v29, %s9066_s16 }
  0xdf   : > { %v822_v4 = vpop.permute.xlu1 %821  ;;  %v820_v30 = vpop.permute.xlu0 %819  ;;  %v9783_v14 = vld [vmem:[#allocation2 + $0xaf] sm:$0xff]  ;;  %v9787_v21 = vld [vmem:[#allocation2 + $0xa7] sm:$0xff] }
  0xe0   : > { %v9785_v33 = vld [vmem:[#allocation2 + $0xb0] sm:$0xff]  ;;  %905 = vst.msk [vmem:[#allocation2 + $0xf0] sm:$0xff] %vm891_vm6, %v822_v4  ;;  %904 = vst.msk [vmem:[#allocation2 + $0xe8] sm:$0xff] %vm891_vm6, %v820_v30  ;;  %v9793_v34 = vld [vmem:[#allocation2 + $0xa8] sm:$0xff] }
  0xe1   : > { %1075 = vrot.lane.b32.xlu1 %v9785_v33, %s9066_s16  ;;  %967 = vst.msk [vmem:[#allocation3 + $0x50] sm:$0xff] %vm956_vm4, %v9787_v21  ;;  %968 = vst.msk [vmem:[#allocation3 + $0x58] sm:$0xff] %vm956_vm4, %v9783_v14  ;;  %1073 = vrot.lane.b32.xlu0 %v9793_v34, %s9066_s16 }
  0xe3   : > { %v826_v35 = vpop.permute.xlu1 %825  ;;  %v824_v36 = vpop.permute.xlu0 %823  ;;  %v9801_v22 = vld [vmem:[#allocation2 + $0xcf] sm:$0xff]  ;;  %v9805_v40 = vld [vmem:[#allocation2 + $0xc7] sm:$0xff] }
  0xe4   : > { %v9803_v23 = vld [vmem:[#allocation2 + $0xd0] sm:$0xff]  ;;  %907 = vst.msk [vmem:[#allocation2 + $0x110] sm:$0xff] %vm891_vm6, %v826_v35  ;;  %906 = vst.msk [vmem:[#allocation2 + $0x108] sm:$0xff] %vm891_vm6, %v824_v36  ;;  %v9811_v41 = vld [vmem:[#allocation2 + $0xc8] sm:$0xff] }
  0xe5   : > { %1079 = vrot.lane.b32.xlu1 %v9803_v23, %s9066_s16  ;;  %969 = vst.msk [vmem:[#allocation3 + $0x60] sm:$0xff] %vm956_vm4, %v9805_v40  ;;  %970 = vst.msk [vmem:[#allocation3 + $0x68] sm:$0xff] %vm956_vm4, %v9801_v22  ;;  %1077 = vrot.lane.b32.xlu0 %v9811_v41, %s9066_s16 }
  0xe7   : > { %v830_v42 = vpop.permute.xlu1 %829  ;;  %v828_v43 = vpop.permute.xlu0 %827  ;;  %v9819_v47 = vld [vmem:[#allocation2 + $0xef] sm:$0xff]  ;;  %v9823_v49 = vld [vmem:[#allocation2 + $0xe7] sm:$0xff] }
  0xe8   : > { %v9821_v48 = vld [vmem:[#allocation2 + $0xf0] sm:$0xff]  ;;  %909 = vst.msk [vmem:[#allocation2 + $0x130] sm:$0xff] %vm891_vm6, %v830_v42  ;;  %908 = vst.msk [vmem:[#allocation2 + $0x128] sm:$0xff] %vm891_vm6, %v828_v43  ;;  %v9829_v50 = vld [vmem:[#allocation2 + $0xe8] sm:$0xff] }
  0xe9   : > { %1083 = vrot.lane.b32.xlu1 %v9821_v48, %s9066_s16  ;;  %971 = vst.msk [vmem:[#allocation3 + $0x70] sm:$0xff] %vm956_vm4, %v9823_v49  ;;  %972 = vst.msk [vmem:[#allocation3 + $0x78] sm:$0xff] %vm956_vm4, %v9819_v47  ;;  %1081 = vrot.lane.b32.xlu0 %v9829_v50, %s9066_s16 }
  0xeb   : > { %v834_v54 = vpop.permute.xlu1 %833  ;;  %v832_v55 = vpop.permute.xlu0 %831  ;;  %v9837_v57 = vld [vmem:[#allocation2 + $0x10f] sm:$0xff]  ;;  %v9841_v60 = vld [vmem:[#allocation2 + $0x107] sm:$0xff] }
  0xec   : > { %v9839_v59 = vld [vmem:[#allocation2 + $0x110] sm:$0xff]  ;;  %911 = vst.msk [vmem:[#allocation2 + $0x150] sm:$0xff] %vm891_vm6, %v834_v54  ;;  %910 = vst.msk [vmem:[#allocation2 + $0x148] sm:$0xff] %vm891_vm6, %v832_v55  ;;  %v9847_v61 = vld [vmem:[#allocation2 + $0x108] sm:$0xff] }
  0xed   : > { %1087 = vrot.lane.b32.xlu1 %v9839_v59, %s9066_s16  ;;  %973 = vst.msk [vmem:[#allocation3 + $0x80] sm:$0xff] %vm956_vm4, %v9841_v60  ;;  %974 = vst.msk [vmem:[#allocation3 + $0x88] sm:$0xff] %vm956_vm4, %v9837_v57  ;;  %1085 = vrot.lane.b32.xlu0 %v9847_v61, %s9066_s16 }
  0xef   : > { %v838_v5 = vpop.permute.xlu1 %837  ;;  %v836_v6 = vpop.permute.xlu0 %835  ;;  %v9855_v15 = vld [vmem:[#allocation2 + $0x12f] sm:$0xff]  ;;  %v9859_v17 = vld [vmem:[#allocation2 + $0x127] sm:$0xff] }
  0xf0   : > { %v9857_v16 = vld [vmem:[#allocation2 + $0x130] sm:$0xff]  ;;  %913 = vst.msk [vmem:[#allocation2 + $0x170] sm:$0xff] %vm891_vm6, %v838_v5  ;;  %912 = vst.msk [vmem:[#allocation2 + $0x168] sm:$0xff] %vm891_vm6, %v836_v6  ;;  %v9865_v7 = vld [vmem:[#allocation2 + $0x128] sm:$0xff] }
  0xf1   : > { %1091 = vrot.lane.b32.xlu1 %v9857_v16, %s9066_s16  ;;  %975 = vst.msk [vmem:[#allocation3 + $0x90] sm:$0xff] %vm956_vm4, %v9859_v17  ;;  %976 = vst.msk [vmem:[#allocation3 + $0x98] sm:$0xff] %vm956_vm4, %v9855_v15  ;;  %1089 = vrot.lane.b32.xlu0 %v9865_v7, %s9066_s16 }
  0xf3   : > { %v842_v2 = vpop.permute.xlu1 %841  ;;  %v840_v20 = vpop.permute.xlu0 %839  ;;  %v9873_v3 = vld [vmem:[#allocation2 + $0x14f] sm:$0xff]  ;;  %v9877_v8 = vld [vmem:[#allocation2 + $0x147] sm:$0xff] }
  0xf4   : > { %v9875_v1 = vld [vmem:[#allocation2 + $0x150] sm:$0xff]  ;;  %915 = vst.msk [vmem:[#allocation2 + $0x190] sm:$0xff] %vm891_vm6, %v842_v2  ;;  %914 = vst.msk [vmem:[#allocation2 + $0x188] sm:$0xff] %vm891_vm6, %v840_v20  ;;  %v9883_v11 = vld [vmem:[#allocation2 + $0x148] sm:$0xff] }
  0xf5   : > { %1095 = vrot.lane.b32.xlu1 %v9875_v1, %s9066_s16  ;;  %977 = vst.msk [vmem:[#allocation3 + $0xa0] sm:$0xff] %vm956_vm4, %v9877_v8  ;;  %978 = vst.msk [vmem:[#allocation3 + $0xa8] sm:$0xff] %vm956_vm4, %v9873_v3  ;;  %1093 = vrot.lane.b32.xlu0 %v9883_v11, %s9066_s16 }
  0xf7   : > { %v846_v12 = vpop.permute.xlu1 %845  ;;  %v844_v13 = vpop.permute.xlu0 %843  ;;  %v9891_v18 = vld [vmem:[#allocation2 + $0x16f] sm:$0xff]  ;;  %v9895_v31 = vld [vmem:[#allocation2 + $0x167] sm:$0xff] }
  0xf8   : > { %v9893_v26 = vld [vmem:[#allocation2 + $0x170] sm:$0xff]  ;;  %917 = vst.msk [vmem:[#allocation2 + $0x1b0] sm:$0xff] %vm891_vm6, %v846_v12  ;;  %916 = vst.msk [vmem:[#allocation2 + $0x1a8] sm:$0xff] %vm891_vm6, %v844_v13  ;;  %v9901_v39 = vld [vmem:[#allocation2 + $0x168] sm:$0xff] }
  0xf9   : > { %1099 = vrot.lane.b32.xlu1 %v9893_v26, %s9066_s16  ;;  %979 = vst.msk [vmem:[#allocation3 + $0xb0] sm:$0xff] %vm956_vm4, %v9895_v31  ;;  %980 = vst.msk [vmem:[#allocation3 + $0xb8] sm:$0xff] %vm956_vm4, %v9891_v18  ;;  %1097 = vrot.lane.b32.xlu0 %v9901_v39, %s9066_s16 }
  0xfb   : > { %v850_v45 = vpop.permute.xlu1 %849  ;;  %v848_v27 = vpop.permute.xlu0 %847  ;;  %v9909_v28 = vld [vmem:[#allocation2 + $0x18f] sm:$0xff]  ;;  %v9913_v30 = vld [vmem:[#allocation2 + $0x187] sm:$0xff] }
  0xfc   : > { %v9911_v4 = vld [vmem:[#allocation2 + $0x190] sm:$0xff]  ;;  %14373 = vst [vmem:[#allocation10_spill] sm:$0xff] %v9913_v30  ;;  %919 = vst.msk [vmem:[#allocation2 + $0x1d0] sm:$0xff] %vm891_vm6, %v850_v45  ;;  %v9919_v35 = vld [vmem:[#allocation2 + $0x188] sm:$0xff] }
  0xfd   : > { %918 = vst.msk [vmem:[#allocation2 + $0x1c8] sm:$0xff] %vm891_vm6, %v848_v27  ;;  %1103 = vrot.lane.b32.xlu1 %v9911_v4, %s9066_s16  ;;  %1101 = vrot.lane.b32.xlu0 %v9919_v35, %s9066_s16 }
  0xfe   : > { %981 = vst.msk [vmem:[#allocation3 + $0xc0] sm:$0xff] %vm956_vm4, %v9913_v30  ;;  %982 = vst.msk [vmem:[#allocation3 + $0xc8] sm:$0xff] %vm956_vm4, %v9909_v28 }
  0xff   : > { %v854_v36 = vpop.permute.xlu1 %853  ;;  %v852_v42 = vpop.permute.xlu0 %851  ;;  %v9927_v43 = vld [vmem:[#allocation2 + $0x1af] sm:$0xff]  ;;  %v9931_v55 = vld [vmem:[#allocation2 + $0x1a7] sm:$0xff] }
 0x100   : > { %14374 = vst [vmem:[#allocation11_spill] sm:$0xff] %v9927_v43  ;;  %v9929_v54 = vld [vmem:[#allocation2 + $0x1b0] sm:$0xff]  ;;  %14375 = vst [vmem:[#allocation12_spill] sm:$0xff] %v9931_v55  ;;  %v9937_v5 = vld [vmem:[#allocation2 + $0x1a8] sm:$0xff] }
 0x101   : > { %921 = vst.msk [vmem:[#allocation2 + $0x1f0] sm:$0xff] %vm891_vm6, %v854_v36  ;;  %920 = vst.msk [vmem:[#allocation2 + $0x1e8] sm:$0xff] %vm891_vm6, %v852_v42  ;;  %1107 = vrot.lane.b32.xlu1 %v9929_v54, %s9066_s16  ;;  %1105 = vrot.lane.b32.xlu0 %v9937_v5, %s9066_s16 }
 0x102   : > { %983 = vst.msk [vmem:[#allocation3 + $0xd0] sm:$0xff] %vm956_vm4, %v9931_v55  ;;  %984 = vst.msk [vmem:[#allocation3 + $0xd8] sm:$0xff] %vm956_vm4, %v9927_v43 }
 0x103   : > { %v858_v6 = vpop.permute.xlu1 %857  ;;  %v856_v2 = vpop.permute.xlu0 %855  ;;  %v9947_v12 = vld [vmem:[#allocation2 + $0x1d0] sm:$0xff] }
 0x104   : > { %v9945_v20 = vld [vmem:[#allocation2 + $0x1cf] sm:$0xff]  ;;  %v9949_v13 = vld [vmem:[#allocation2 + $0x1c7] sm:$0xff]  ;;  %923 = vst.msk [vmem:[#allocation2 + $0x210] sm:$0xff] %vm891_vm6, %v858_v6  ;;  %922 = vst.msk [vmem:[#allocation2 + $0x208] sm:$0xff] %vm891_vm6, %v856_v2 }
 0x105   : > { %14376 = vst [vmem:[#allocation13_spill] sm:$0xff] %v9945_v20  ;;  %14377 = vst [vmem:[#allocation14_spill] sm:$0xff] %v9949_v13  ;;  %1111 = vrot.lane.b32.xlu1 %v9947_v12, %s9066_s16  ;;  %v9955_v45 = vld [vmem:[#allocation2 + $0x1c8] sm:$0xff] }
 0x106   : > { %985 = vst.msk [vmem:[#allocation3 + $0xe0] sm:$0xff] %vm956_vm4, %v9949_v13  ;;  %986 = vst.msk [vmem:[#allocation3 + $0xe8] sm:$0xff] %vm956_vm4, %v9945_v20  ;;  %1109 = vrot.lane.b32.xlu0 %v9955_v45, %s9066_s16 }
 0x107   : > { %v1056_v6 = vpop.permute.xlu1 %1055  ;;  %v1054_v2 = vpop.permute.xlu0 %1053 }
 0x108   : > { %v9963_v27 = vld [vmem:[#allocation2 + $0x1ef] sm:$0xff]  ;;  %v9967_v42 = vld [vmem:[#allocation2 + $0x1e7] sm:$0xff]  ;;  %1151 = vst.msk [vmem:[#allocation3 + $0x8] sm:$0xff] %vm1149_vm7, %v1056_v6  ;;  %1150 = vst.msk [vmem:[#allocation3] sm:$0xff] %vm1149_vm7, %v1054_v2 }
 0x109   : > { %14378 = vst [vmem:[#allocation15_spill] sm:$0xff] %v9963_v27  ;;  %v9965_v36 = vld [vmem:[#allocation2 + $0x1f0] sm:$0xff]  ;;  %14380 = vst [vmem:[#allocation17_spill] sm:$0xff] %v9967_v42  ;;  %v9971_v62 = vld [vmem:[#allocation2 + $0x1e8] sm:$0xff] }
 0x10a   : > { %14379 = vst [vmem:[#allocation16_spill] sm:$0xff] %v9965_v36  ;;  %1115 = vrot.lane.b32.xlu1 %v9965_v36, %s9066_s16  ;;  %14381 = vst [vmem:[#allocation18_spill] sm:$0xff] %v9971_v62  ;;  %1113 = vrot.lane.b32.xlu0 %v9971_v62, %s9066_s16  ;;  %v9987_v6 = vld [vmem:[#allocation2 + $0x29] sm:$0xff]  ;;  %v9991_v2 = vld [vmem:[#allocation2 + $0x51] sm:$0xff] }
 0x10b   : > { %987 = vst.msk [vmem:[#allocation3 + $0xf0] sm:$0xff] %vm956_vm4, %v9967_v42  ;;  %988 = vst.msk [vmem:[#allocation3 + $0xf8] sm:$0xff] %vm956_vm4, %v9963_v27  ;;  %v9995_v62 = vld [vmem:[#allocation2 + $0x49] sm:$0xff]  ;;  %v10098_v36 = vld [vmem:[#allocation2 + $0x1f1] sm:$0xff]  ;;  %vm3594_vm4 = vcmask 270336  }
 0x10c   : > { %14383 = vst [vmem:[#allocation20_spill] sm:$0xff] %v9987_v6  ;;  %14384 = vst [vmem:[#allocation21_spill] sm:$0xff] %v9991_v2 }
 0x10d   : > { %14385 = vst [vmem:[#allocation22_spill] sm:$0xff] %v9995_v62 }
 0x10e   : > { %1280 = vrot.lane.b32.xlu1 %v1215_v56, %s9067_s17  ;;  %1278 = vrot.lane.b32.xlu0 %v1214_v10, %s9067_s17  ;;  %v9999_v10 = vld [vmem:[#allocation2 + $0x71] sm:$0xff]  ;;  %v10003_v56 = vld [vmem:[#allocation2 + $0x69] sm:$0xff] }
 0x10f   : > { %14386 = vst [vmem:[#allocation23_spill] sm:$0xff] %v9999_v10  ;;  %14387 = vst [vmem:[#allocation24_spill] sm:$0xff] %v10003_v56 }
 0x112   : > { %1284 = vrot.lane.b32.xlu1 %v9983_v9, %s9067_s17  ;;  %1282 = vrot.lane.b32.xlu0 %v9987_v6, %s9067_s17  ;;  %v10007_v6 = vld [vmem:[#allocation2 + $0x91] sm:$0xff] }
 0x113   : > { %14388 = vst [vmem:[#allocation25_spill] sm:$0xff] %v10007_v6 }
 0x116   : > { %1288 = vrot.lane.b32.xlu1 %v9991_v2, %s9067_s17  ;;  %1286 = vrot.lane.b32.xlu0 %v9995_v62, %s9067_s17  ;;  %v10011_v2 = vld [vmem:[#allocation2 + $0x89] sm:$0xff]  ;;  %v10015_v62 = vld [vmem:[#allocation2 + $0xb1] sm:$0xff] }
 0x117   : > { %14389 = vst [vmem:[#allocation26_spill] sm:$0xff] %v10011_v2  ;;  %14390 = vst [vmem:[#allocation27_spill] sm:$0xff] %v10015_v62 }
 0x11a   : > { %1292 = vrot.lane.b32.xlu1 %v9999_v10, %s9067_s17  ;;  %1290 = vrot.lane.b32.xlu0 %v10003_v56, %s9067_s17  ;;  %v10019_v10 = vld [vmem:[#allocation2 + $0xa9] sm:$0xff]  ;;  %v10023_v56 = vld [vmem:[#allocation2 + $0xd1] sm:$0xff] }
 0x11b   : > { %14391 = vst [vmem:[#allocation28_spill] sm:$0xff] %v10019_v10  ;;  %14392 = vst [vmem:[#allocation29_spill] sm:$0xff] %v10023_v56 }
 0x11e   : > { %1296 = vrot.lane.b32.xlu1 %v10007_v6, %s9067_s17  ;;  %1294 = vrot.lane.b32.xlu0 %v10011_v2, %s9067_s17  ;;  %v10027_v6 = vld [vmem:[#allocation2 + $0xc9] sm:$0xff]  ;;  %v10031_v2 = vld [vmem:[#allocation2 + $0xf1] sm:$0xff] }
 0x11f   : > { %14393 = vst [vmem:[#allocation30_spill] sm:$0xff] %v10027_v6  ;;  %14394 = vst [vmem:[#allocation31_spill] sm:$0xff] %v10031_v2 }
 0x122   : > { %1300 = vrot.lane.b32.xlu1 %v10015_v62, %s9067_s17  ;;  %1298 = vrot.lane.b32.xlu0 %v10019_v10, %s9067_s17  ;;  %v10035_v62 = vld [vmem:[#allocation2 + $0xe9] sm:$0xff]  ;;  %v10039_v10 = vld [vmem:[#allocation2 + $0x111] sm:$0xff] }
 0x123   : > { %14395 = vst [vmem:[#allocation32_spill] sm:$0xff] %v10035_v62  ;;  %14396 = vst [vmem:[#allocation33_spill] sm:$0xff] %v10039_v10 }
 0x126   : > { %1304 = vrot.lane.b32.xlu1 %v10023_v56, %s9067_s17  ;;  %1302 = vrot.lane.b32.xlu0 %v10027_v6, %s9067_s17  ;;  %v10043_v56 = vld [vmem:[#allocation2 + $0x109] sm:$0xff]  ;;  %v10047_v6 = vld [vmem:[#allocation2 + $0x131] sm:$0xff] }
 0x127   : > { %14397 = vst [vmem:[#allocation34_spill] sm:$0xff] %v10043_v56  ;;  %14398 = vst [vmem:[#allocation35_spill] sm:$0xff] %v10047_v6 }
 0x12a   : > { %1308 = vrot.lane.b32.xlu1 %v10031_v2, %s9067_s17  ;;  %1306 = vrot.lane.b32.xlu0 %v10035_v62, %s9067_s17  ;;  %v10051_v2 = vld [vmem:[#allocation2 + $0x129] sm:$0xff]  ;;  %v10055_v62 = vld [vmem:[#allocation2 + $0x151] sm:$0xff] }
 0x12b   : > { %14399 = vst [vmem:[#allocation36_spill] sm:$0xff] %v10051_v2  ;;  %14400 = vst [vmem:[#allocation37_spill] sm:$0xff] %v10055_v62 }
 0x12e   : > { %1312 = vrot.lane.b32.xlu1 %v10039_v10, %s9067_s17  ;;  %1310 = vrot.lane.b32.xlu0 %v10043_v56, %s9067_s17  ;;  %v10059_v10 = vld [vmem:[#allocation2 + $0x149] sm:$0xff]  ;;  %v10063_v56 = vld [vmem:[#allocation2 + $0x171] sm:$0xff] }
 0x12f   : > { %14401 = vst [vmem:[#allocation38_spill] sm:$0xff] %v10059_v10  ;;  %14402 = vst [vmem:[#allocation39_spill] sm:$0xff] %v10063_v56 }
 0x132   : > { %1316 = vrot.lane.b32.xlu1 %v10047_v6, %s9067_s17  ;;  %1314 = vrot.lane.b32.xlu0 %v10051_v2, %s9067_s17  ;;  %v10067_v6 = vld [vmem:[#allocation2 + $0x169] sm:$0xff]  ;;  %v10071_v2 = vld [vmem:[#allocation2 + $0x191] sm:$0xff] }
 0x133   : > { %14403 = vst [vmem:[#allocation40_spill] sm:$0xff] %v10067_v6  ;;  %14404 = vst [vmem:[#allocation41_spill] sm:$0xff] %v10071_v2 }
 0x136   : > { %1320 = vrot.lane.b32.xlu1 %v10055_v62, %s9067_s17  ;;  %1318 = vrot.lane.b32.xlu0 %v10059_v10, %s9067_s17  ;;  %v10075_v62 = vld [vmem:[#allocation2 + $0x189] sm:$0xff]  ;;  %v10079_v10 = vld [vmem:[#allocation2 + $0x1b1] sm:$0xff] }
 0x137   : > { %14405 = vst [vmem:[#allocation42_spill] sm:$0xff] %v10075_v62  ;;  %14406 = vst [vmem:[#allocation43_spill] sm:$0xff] %v10079_v10 }
 0x13a   : > { %1324 = vrot.lane.b32.xlu1 %v10063_v56, %s9067_s17  ;;  %1322 = vrot.lane.b32.xlu0 %v10067_v6, %s9067_s17  ;;  %v10083_v56 = vld [vmem:[#allocation2 + $0x1a9] sm:$0xff] }
 0x13b   : > { %14407 = vst [vmem:[#allocation44_spill] sm:$0xff] %v10083_v56 }
 0x13e   : > { %1328 = vrot.lane.b32.xlu1 %v10071_v2, %s9067_s17  ;;  %1326 = vrot.lane.b32.xlu0 %v10075_v62, %s9067_s17  ;;  %v10089_v2 = vld [vmem:[#allocation2 + $0x1d1] sm:$0xff]  ;;  %v10093_v62 = vld [vmem:[#allocation2 + $0x1c9] sm:$0xff] }
 0x13f   : > { %14408 = vst [vmem:[#allocation45_spill] sm:$0xff] %v10093_v62 }
 0x142   : > { %1332 = vrot.lane.b32.xlu1 %v10079_v10, %s9067_s17  ;;  %1330 = vrot.lane.b32.xlu0 %v10083_v56, %s9067_s17  ;;  %v1060_v6 = vpop.permute.xlu1 %1059  ;;  %v1058_v9 = vpop.permute.xlu0 %1057 }
 0x143   : > { %1153 = vst.msk [vmem:[#allocation3 + $0x18] sm:$0xff] %vm1149_vm7, %v1060_v6  ;;  %1152 = vst.msk [vmem:[#allocation3 + $0x10] sm:$0xff] %vm1149_vm7, %v1058_v9  ;;  %v10103_v9 = vld [vmem:[#allocation2 + $0x1e9] sm:$0xff] }
 0x146   : > { %1336 = vrot.lane.b32.xlu1 %v10089_v2, %s9067_s17  ;;  %1334 = vrot.lane.b32.xlu0 %v10093_v62, %s9067_s17 }
 0x147   : > { %v1064_v10 = vpop.permute.xlu1 %1063  ;;  %v1062_v56 = vpop.permute.xlu0 %1061 }
 0x148   : > { %1155 = vst.msk [vmem:[#allocation3 + $0x28] sm:$0xff] %vm1149_vm7, %v1064_v10  ;;  %1154 = vst.msk [vmem:[#allocation3 + $0x20] sm:$0xff] %vm1149_vm7, %v1062_v56 }
 0x14a   : > { %1340 = vrot.lane.b32.xlu1 %v10098_v36, %s9067_s17  ;;  %1338 = vrot.lane.b32.xlu0 %v10103_v9, %s9067_s17 }
 0x14b   : > { %v1068_v6 = vpop.permute.xlu1 %1067  ;;  %v1066_v62 = vpop.permute.xlu0 %1065 }
 0x14c   : > { %1157 = vst.msk [vmem:[#allocation3 + $0x38] sm:$0xff] %vm1149_vm7, %v1068_v6  ;;  %1156 = vst.msk [vmem:[#allocation3 + $0x30] sm:$0xff] %vm1149_vm7, %v1066_v62 }
 0x14e   : > { %1505 = vrot.lane.b32.xlu1 %v9714_v19, %s9068_s18  ;;  %1503 = vrot.lane.b32.xlu0 %v9723_v25, %s9068_s18 }
 0x14f   : > { %v1072_v10 = vpop.permute.xlu1 %1071  ;;  %v1070_v56 = vpop.permute.xlu0 %1069 }
 0x150   : > { %1159 = vst.msk [vmem:[#allocation3 + $0x48] sm:$0xff] %vm1149_vm7, %v1072_v10  ;;  %1158 = vst.msk [vmem:[#allocation3 + $0x40] sm:$0xff] %vm1149_vm7, %v1070_v56 }
 0x152   : > { %1509 = vrot.lane.b32.xlu1 %v9729_v32, %s9068_s18  ;;  %1507 = vrot.lane.b32.xlu0 %v9733_v38, %s9068_s18 }
 0x153   : > { %v1076_v62 = vpop.permute.xlu1 %1075  ;;  %v1074_v6 = vpop.permute.xlu0 %1073 }
 0x154   : > { %1161 = vst.msk [vmem:[#allocation3 + $0x58] sm:$0xff] %vm1149_vm7, %v1076_v62  ;;  %1160 = vst.msk [vmem:[#allocation3 + $0x50] sm:$0xff] %vm1149_vm7, %v1074_v6 }
 0x156   : > { %1513 = vrot.lane.b32.xlu1 %v9747_v46, %s9068_s18  ;;  %1511 = vrot.lane.b32.xlu0 %v9751_v52, %s9068_s18 }
 0x157   : > { %v1080_v10 = vpop.permute.xlu1 %1079  ;;  %v1078_v56 = vpop.permute.xlu0 %1077 }
 0x158   : > { %1163 = vst.msk [vmem:[#allocation3 + $0x68] sm:$0xff] %vm1149_vm7, %v1080_v10  ;;  %1162 = vst.msk [vmem:[#allocation3 + $0x60] sm:$0xff] %vm1149_vm7, %v1078_v56 }
 0x15a   : > { %1517 = vrot.lane.b32.xlu1 %v9765_v58, %s9068_s18  ;;  %1515 = vrot.lane.b32.xlu0 %v9769_v0, %s9068_s18 }
 0x15b   : > { %v1084_v62 = vpop.permute.xlu1 %1083  ;;  %v1082_v6 = vpop.permute.xlu0 %1081 }
 0x15c   : > { %1165 = vst.msk [vmem:[#allocation3 + $0x78] sm:$0xff] %vm1149_vm7, %v1084_v62  ;;  %1164 = vst.msk [vmem:[#allocation3 + $0x70] sm:$0xff] %vm1149_vm7, %v1082_v6 }
 0x15e   : > { %1521 = vrot.lane.b32.xlu1 %v9783_v14, %s9068_s18  ;;  %1519 = vrot.lane.b32.xlu0 %v9787_v21, %s9068_s18 }
 0x15f   : > { %v1088_v10 = vpop.permute.xlu1 %1087  ;;  %v1086_v56 = vpop.permute.xlu0 %1085 }
 0x160   : > { %1167 = vst.msk [vmem:[#allocation3 + $0x88] sm:$0xff] %vm1149_vm7, %v1088_v10  ;;  %1166 = vst.msk [vmem:[#allocation3 + $0x80] sm:$0xff] %vm1149_vm7, %v1086_v56 }
 0x162   : > { %1525 = vrot.lane.b32.xlu1 %v9801_v22, %s9068_s18  ;;  %1523 = vrot.lane.b32.xlu0 %v9805_v40, %s9068_s18 }
 0x163   : > { %v1092_v62 = vpop.permute.xlu1 %1091  ;;  %v1090_v6 = vpop.permute.xlu0 %1089 }
 0x164   : > { %1169 = vst.msk [vmem:[#allocation3 + $0x98] sm:$0xff] %vm1149_vm7, %v1092_v62  ;;  %1168 = vst.msk [vmem:[#allocation3 + $0x90] sm:$0xff] %vm1149_vm7, %v1090_v6 }
 0x166   : > { %1529 = vrot.lane.b32.xlu1 %v9819_v47, %s9068_s18  ;;  %1527 = vrot.lane.b32.xlu0 %v9823_v49, %s9068_s18 }
 0x167   : > { %v1096_v10 = vpop.permute.xlu1 %1095  ;;  %v1094_v56 = vpop.permute.xlu0 %1093 }
 0x168   : > { %1171 = vst.msk [vmem:[#allocation3 + $0xa8] sm:$0xff] %vm1149_vm7, %v1096_v10  ;;  %1170 = vst.msk [vmem:[#allocation3 + $0xa0] sm:$0xff] %vm1149_vm7, %v1094_v56 }
 0x16a   : > { %1533 = vrot.lane.b32.xlu1 %v9837_v57, %s9068_s18  ;;  %1531 = vrot.lane.b32.xlu0 %v9841_v60, %s9068_s18 }
 0x16b   : > { %v1100_v62 = vpop.permute.xlu1 %1099  ;;  %v1098_v6 = vpop.permute.xlu0 %1097 }
 0x16c   : > { %1173 = vst.msk [vmem:[#allocation3 + $0xb8] sm:$0xff] %vm1149_vm7, %v1100_v62  ;;  %1172 = vst.msk [vmem:[#allocation3 + $0xb0] sm:$0xff] %vm1149_vm7, %v1098_v6 }
 0x16e   : > { %1537 = vrot.lane.b32.xlu1 %v9855_v15, %s9068_s18  ;;  %1535 = vrot.lane.b32.xlu0 %v9859_v17, %s9068_s18 }
 0x16f   : > { %v1104_v10 = vpop.permute.xlu1 %1103  ;;  %v1102_v56 = vpop.permute.xlu0 %1101 }
 0x170   : > { %1175 = vst.msk [vmem:[#allocation3 + $0xc8] sm:$0xff] %vm1149_vm7, %v1104_v10  ;;  %1174 = vst.msk [vmem:[#allocation3 + $0xc0] sm:$0xff] %vm1149_vm7, %v1102_v56 }
 0x172   : > { %1541 = vrot.lane.b32.xlu1 %v9873_v3, %s9068_s18  ;;  %1539 = vrot.lane.b32.xlu0 %v9877_v8, %s9068_s18 }
 0x173   : > { %v1108_v62 = vpop.permute.xlu1 %1107  ;;  %v1106_v6 = vpop.permute.xlu0 %1105 }
 0x174   : > { %1177 = vst.msk [vmem:[#allocation3 + $0xd8] sm:$0xff] %vm1149_vm7, %v1108_v62  ;;  %1176 = vst.msk [vmem:[#allocation3 + $0xd0] sm:$0xff] %vm1149_vm7, %v1106_v6 }
 0x176   : > { %1545 = vrot.lane.b32.xlu1 %v9891_v18, %s9068_s18  ;;  %1543 = vrot.lane.b32.xlu0 %v9895_v31, %s9068_s18 }
 0x177   : > { %v1112_v10 = vpop.permute.xlu1 %1111 }
 0x178   : > { %1179 = vst.msk [vmem:[#allocation3 + $0xe8] sm:$0xff] %vm1149_vm7, %v1112_v10  ;;  %v1110_v56 = vpop.permute.xlu0 %1109 }
 0x179   : > { %1178 = vst.msk [vmem:[#allocation3 + $0xe0] sm:$0xff] %vm1149_vm7, %v1110_v56 }
 0x17a   : > { %1549 = vrot.lane.b32.xlu1 %v9909_v28, %s9068_s18  ;;  %1547 = vrot.lane.b32.xlu0 %v9913_v30, %s9068_s18 }
 0x17c   : > { %v1116_v62 = vpop.permute.xlu1 %1115  ;;  %v1114_v6 = vpop.permute.xlu0 %1113 }
 0x17d   : > { %1181 = vst.msk [vmem:[#allocation3 + $0xf8] sm:$0xff] %vm1149_vm7, %v1116_v62  ;;  %1180 = vst.msk [vmem:[#allocation3 + $0xf0] sm:$0xff] %vm1149_vm7, %v1114_v6  ;;  %vm3587_vm7 = vcmask 271360  }
 0x17e   : > { %1553 = vrot.lane.b32.xlu1 %v9927_v43, %s9068_s18  ;;  %1551 = vrot.lane.b32.xlu0 %v9931_v55, %s9068_s18 }
 0x180   : > { %v1281_v10 = vpop.permute.xlu1 %1280  ;;  %v1279_v56 = vpop.permute.xlu0 %1278 }
 0x181   : > { %1376 = vst.msk [vmem:[#allocation3 + $0x8] sm:$0xff] %vm1374_vm8, %v1281_v10  ;;  %1375 = vst.msk [vmem:[#allocation3] sm:$0xff] %vm1374_vm8, %v1279_v56 }
 0x182   : > { %1557 = vrot.lane.b32.xlu1 %v9945_v20, %s9068_s18  ;;  %1555 = vrot.lane.b32.xlu0 %v9949_v13, %s9068_s18  ;;  %v10198_v20 = vld [vmem:[#allocation2 + $0x20f] sm:$0xff] }
 0x183   : > { %v8814_v13 = vld [vmem:[#allocation2 + $0x88] sm:$0xff] }
 0x184   : > { %v1285_v62 = vpop.permute.xlu1 %1284  ;;  %v1283_v6 = vpop.permute.xlu0 %1282  ;;  %v1190_v55 = vmax.f32 %v9769_v0, %v8814_v13 }
 0x185   : > { %1378 = vst.msk [vmem:[#allocation3 + $0x18] sm:$0xff] %vm1374_vm8, %v1285_v62  ;;  %1377 = vst.msk [vmem:[#allocation3 + $0x10] sm:$0xff] %vm1374_vm8, %v1283_v6  ;;  %v10203_v62 = vld [vmem:[#allocation2 + $0x207] sm:$0xff] }
 0x186   : > { %1561 = vrot.lane.b32.xlu1 %v9963_v27, %s9068_s18  ;;  %1559 = vrot.lane.b32.xlu0 %v9967_v42, %s9068_s18  ;;  %v1665_v27 = vld [vmem:[#allocation2 + $0x30] sm:$0xff] }
 0x188   : > { %v1289_v10 = vpop.permute.xlu1 %1288  ;;  %v1287_v56 = vpop.permute.xlu0 %1286 }
 0x189   : > { %1380 = vst.msk [vmem:[#allocation3 + $0x28] sm:$0xff] %vm1374_vm8, %v1289_v10  ;;  %1379 = vst.msk [vmem:[#allocation3 + $0x20] sm:$0xff] %vm1374_vm8, %v1287_v56 }
 0x18a   : > { %1565 = vrot.lane.b32.xlu1 %v10198_v20, %s9068_s18  ;;  %1563 = vrot.lane.b32.xlu0 %v10203_v62, %s9068_s18 }
 0x18c   : > { %v1293_v6 = vpop.permute.xlu1 %1292  ;;  %v1291_v42 = vpop.permute.xlu0 %1290 }
 0x18d   : > { %1382 = vst.msk [vmem:[#allocation3 + $0x38] sm:$0xff] %vm1374_vm8, %v1293_v6  ;;  %1381 = vst.msk [vmem:[#allocation3 + $0x30] sm:$0xff] %vm1374_vm8, %v1291_v42 }
 0x18e   : > { %1730 = vrot.lane.b32.xlu1 %v1665_v27, %s9069_s19  ;;  %1728 = vrot.lane.b32.xlu0 %v9716_v24, %s9069_s19 }
 0x190   : > { %v1297_v10 = vpop.permute.xlu1 %1296  ;;  %v1295_v56 = vpop.permute.xlu0 %1294 }
 0x191   : > { %1384 = vst.msk [vmem:[#allocation3 + $0x48] sm:$0xff] %vm1374_vm8, %v1297_v10  ;;  %1383 = vst.msk [vmem:[#allocation3 + $0x40] sm:$0xff] %vm1374_vm8, %v1295_v56 }
 0x192   : > { %1734 = vrot.lane.b32.xlu1 %v9731_v37, %s9069_s19  ;;  %1732 = vrot.lane.b32.xlu0 %v9739_v44, %s9069_s19 }
 0x194   : > { %v1301_v6 = vpop.permute.xlu1 %1300  ;;  %v1299_v42 = vpop.permute.xlu0 %1298 }
 0x195   : > { %1386 = vst.msk [vmem:[#allocation3 + $0x58] sm:$0xff] %vm1374_vm8, %v1301_v6  ;;  %1385 = vst.msk [vmem:[#allocation3 + $0x50] sm:$0xff] %vm1374_vm8, %v1299_v42 }
 0x196   : > { %1738 = vrot.lane.b32.xlu1 %v9749_v51, %s9069_s19  ;;  %1736 = vrot.lane.b32.xlu0 %v9757_v53, %s9069_s19 }
 0x198   : > { %v1305_v24 = vpop.permute.xlu1 %1304  ;;  %v1303_v27 = vpop.permute.xlu0 %1302 }
 0x199   : > { %1388 = vst.msk [vmem:[#allocation3 + $0x68] sm:$0xff] %vm1374_vm8, %v1305_v24  ;;  %1387 = vst.msk [vmem:[#allocation3 + $0x60] sm:$0xff] %vm1374_vm8, %v1303_v27  ;;  %v14411_v24 = vld [vmem:[#allocation19_spill] sm:$0xff]  ;;  %v14412_v27 = vld [vmem:[#allocation20_spill] sm:$0xff] }
 0x19a   : > { %1742 = vrot.lane.b32.xlu1 %v9767_v63, %s9069_s19  ;;  %1740 = vrot.lane.b32.xlu0 %v9775_v29, %s9069_s19 }
 0x19c   : > { %v1309_v37 = vpop.permute.xlu1 %1308  ;;  %v1307_v44 = vpop.permute.xlu0 %1306 }
 0x19d   : > { %1390 = vst.msk [vmem:[#allocation3 + $0x78] sm:$0xff] %vm1374_vm8, %v1309_v37  ;;  %1389 = vst.msk [vmem:[#allocation3 + $0x70] sm:$0xff] %vm1374_vm8, %v1307_v44 }
 0x19e   : > { %1746 = vrot.lane.b32.xlu1 %v9785_v33, %s9069_s19  ;;  %1744 = vrot.lane.b32.xlu0 %v9793_v34, %s9069_s19 }
 0x1a0   : > { %v1313_v51 = vpop.permute.xlu1 %1312  ;;  %v1311_v53 = vpop.permute.xlu0 %1310 }
 0x1a1   : > { %1392 = vst.msk [vmem:[#allocation3 + $0x88] sm:$0xff] %vm1374_vm8, %v1313_v51  ;;  %1391 = vst.msk [vmem:[#allocation3 + $0x80] sm:$0xff] %vm1374_vm8, %v1311_v53  ;;  %v14413_v51 = vld [vmem:[#allocation21_spill] sm:$0xff]  ;;  %v14414_v53 = vld [vmem:[#allocation22_spill] sm:$0xff] }
 0x1a2   : > { %1750 = vrot.lane.b32.xlu1 %v9803_v23, %s9069_s19  ;;  %1748 = vrot.lane.b32.xlu0 %v9811_v41, %s9069_s19 }
 0x1a4   : > { %v1317_v63 = vpop.permute.xlu1 %1316  ;;  %v1315_v29 = vpop.permute.xlu0 %1314 }
 0x1a5   : > { %1394 = vst.msk [vmem:[#allocation3 + $0x98] sm:$0xff] %vm1374_vm8, %v1317_v63  ;;  %1393 = vst.msk [vmem:[#allocation3 + $0x90] sm:$0xff] %vm1374_vm8, %v1315_v29 }
 0x1a6   : > { %1754 = vrot.lane.b32.xlu1 %v9821_v48, %s9069_s19  ;;  %1752 = vrot.lane.b32.xlu0 %v9829_v50, %s9069_s19 }
 0x1a8   : > { %v1321_v33 = vpop.permute.xlu1 %1320  ;;  %v1319_v34 = vpop.permute.xlu0 %1318 }
 0x1a9   : > { %1396 = vst.msk [vmem:[#allocation3 + $0xa8] sm:$0xff] %vm1374_vm8, %v1321_v33  ;;  %1395 = vst.msk [vmem:[#allocation3 + $0xa0] sm:$0xff] %vm1374_vm8, %v1319_v34  ;;  %v14415_v33 = vld [vmem:[#allocation23_spill] sm:$0xff]  ;;  %v14416_v34 = vld [vmem:[#allocation24_spill] sm:$0xff] }
 0x1aa   : > { %1758 = vrot.lane.b32.xlu1 %v9839_v59, %s9069_s19  ;;  %1756 = vrot.lane.b32.xlu0 %v9847_v61, %s9069_s19 }
 0x1ac   : > { %v1325_v23 = vpop.permute.xlu1 %1324  ;;  %v1323_v41 = vpop.permute.xlu0 %1322 }
 0x1ad   : > { %1398 = vst.msk [vmem:[#allocation3 + $0xb8] sm:$0xff] %vm1374_vm8, %v1325_v23  ;;  %1397 = vst.msk [vmem:[#allocation3 + $0xb0] sm:$0xff] %vm1374_vm8, %v1323_v41 }
 0x1ae   : > { %1762 = vrot.lane.b32.xlu1 %v9857_v16, %s9069_s19  ;;  %1760 = vrot.lane.b32.xlu0 %v9865_v7, %s9069_s19 }
 0x1b0   : > { %v1329_v48 = vpop.permute.xlu1 %1328  ;;  %v1327_v50 = vpop.permute.xlu0 %1326 }
 0x1b1   : > { %1400 = vst.msk [vmem:[#allocation3 + $0xc8] sm:$0xff] %vm1374_vm8, %v1329_v48  ;;  %1399 = vst.msk [vmem:[#allocation3 + $0xc0] sm:$0xff] %vm1374_vm8, %v1327_v50  ;;  %v14417_v48 = vld [vmem:[#allocation25_spill] sm:$0xff]  ;;  %v14418_v50 = vld [vmem:[#allocation26_spill] sm:$0xff] }
 0x1b2   : > { %1766 = vrot.lane.b32.xlu1 %v9875_v1, %s9069_s19  ;;  %1764 = vrot.lane.b32.xlu0 %v9883_v11, %s9069_s19 }
 0x1b4   : > { %v1333_v59 = vpop.permute.xlu1 %1332  ;;  %v1331_v61 = vpop.permute.xlu0 %1330 }
 0x1b5   : > { %1402 = vst.msk [vmem:[#allocation3 + $0xd8] sm:$0xff] %vm1374_vm8, %v1333_v59  ;;  %1401 = vst.msk [vmem:[#allocation3 + $0xd0] sm:$0xff] %vm1374_vm8, %v1331_v61 }
 0x1b6   : > { %1770 = vrot.lane.b32.xlu1 %v9893_v26, %s9069_s19  ;;  %1768 = vrot.lane.b32.xlu0 %v9901_v39, %s9069_s19 }
 0x1b8   : > { %v1337_v16 = vpop.permute.xlu1 %1336  ;;  %v1335_v7 = vpop.permute.xlu0 %1334 }
 0x1b9   : > { %1404 = vst.msk [vmem:[#allocation3 + $0xe8] sm:$0xff] %vm1374_vm8, %v1337_v16  ;;  %1403 = vst.msk [vmem:[#allocation3 + $0xe0] sm:$0xff] %vm1374_vm8, %v1335_v7  ;;  %v14419_v16 = vld [vmem:[#allocation27_spill] sm:$0xff]  ;;  %v14420_v7 = vld [vmem:[#allocation28_spill] sm:$0xff] }
 0x1ba   : > { %1774 = vrot.lane.b32.xlu1 %v9911_v4, %s9069_s19  ;;  %1772 = vrot.lane.b32.xlu0 %v9919_v35, %s9069_s19 }
 0x1bc   : > { %v1341_v1 = vpop.permute.xlu1 %1340  ;;  %v1339_v11 = vpop.permute.xlu0 %1338 }
 0x1bd   : > { %1406 = vst.msk [vmem:[#allocation3 + $0xf8] sm:$0xff] %vm1374_vm8, %v1341_v1  ;;  %1405 = vst.msk [vmem:[#allocation3 + $0xf0] sm:$0xff] %vm1374_vm8, %v1339_v11  ;;  %vm4141_vm8 = vcmask 277768  }
 0x1be   : > { %1778 = vrot.lane.b32.xlu1 %v9929_v54, %s9069_s19  ;;  %1776 = vrot.lane.b32.xlu0 %v9937_v5, %s9069_s19  ;;  %v14409_v54 = vld [vmem:[#allocation16_spill] sm:$0xff]  ;;  %v14410_v5 = vld [vmem:[#allocation18_spill] sm:$0xff] }
 0x1c0   : > { %v1506_v26 = vpop.permute.xlu1 %1505  ;;  %v1504_v39 = vpop.permute.xlu0 %1503 }
 0x1c1   : > { %1601 = vst.msk [vmem:[#allocation3 + $0x8] sm:$0xff] %vm1599_vm9, %v1506_v26  ;;  %1600 = vst.msk [vmem:[#allocation3] sm:$0xff] %vm1599_vm9, %v1504_v39  ;;  %v14421_v26 = vld [vmem:[#allocation29_spill] sm:$0xff]  ;;  %v14422_v39 = vld [vmem:[#allocation30_spill] sm:$0xff] }
 0x1c2   : > { %1782 = vrot.lane.b32.xlu1 %v9947_v12, %s9069_s19  ;;  %1780 = vrot.lane.b32.xlu0 %v9955_v45, %s9069_s19  ;;  %v10297_v12 = vld [vmem:[#allocation2 + $0x210] sm:$0xff]  ;;  %v10302_v45 = vld [vmem:[#allocation2 + $0x208] sm:$0xff] }
 0x1c4   : > { %v1510_v4 = vpop.permute.xlu1 %1509  ;;  %v1508_v35 = vpop.permute.xlu0 %1507 }
 0x1c5   : > { %1603 = vst.msk [vmem:[#allocation3 + $0x18] sm:$0xff] %vm1599_vm9, %v1510_v4  ;;  %1602 = vst.msk [vmem:[#allocation3 + $0x10] sm:$0xff] %vm1599_vm9, %v1508_v35 }
 0x1c6   : > { %1786 = vrot.lane.b32.xlu1 %v14409_v54, %s9069_s19  ;;  %1784 = vrot.lane.b32.xlu0 %v14410_v5, %s9069_s19  ;;  %v14423_v54 = vld [vmem:[#allocation31_spill] sm:$0xff]  ;;  %v14424_v5 = vld [vmem:[#allocation32_spill] sm:$0xff] }
 0x1c8   : > { %v1514_v10 = vpop.permute.xlu1 %1513  ;;  %v1512_v56 = vpop.permute.xlu0 %1511 }
 0x1c9   : > { %1605 = vst.msk [vmem:[#allocation3 + $0x28] sm:$0xff] %vm1599_vm9, %v1514_v10  ;;  %1604 = vst.msk [vmem:[#allocation3 + $0x20] sm:$0xff] %vm1599_vm9, %v1512_v56 }
 0x1ca   : > { %1790 = vrot.lane.b32.xlu1 %v10297_v12, %s9069_s19  ;;  %1788 = vrot.lane.b32.xlu0 %v10302_v45, %s9069_s19 }
 0x1cc   : > { %v1518_v6 = vpop.permute.xlu1 %1517  ;;  %v1516_v42 = vpop.permute.xlu0 %1515 }
 0x1cd   : > { %1607 = vst.msk [vmem:[#allocation3 + $0x38] sm:$0xff] %vm1599_vm9, %v1518_v6  ;;  %1606 = vst.msk [vmem:[#allocation3 + $0x30] sm:$0xff] %vm1599_vm9, %v1516_v42  ;;  %v14425_v6 = vld [vmem:[#allocation33_spill] sm:$0xff]  ;;  %v14426_v42 = vld [vmem:[#allocation34_spill] sm:$0xff] }
 0x1ce   : > { %1955 = vrot.lane.b32.xlu1 %v14411_v24, %s9070_s20  ;;  %1953 = vrot.lane.b32.xlu0 %v14412_v27, %s9070_s20 }
 0x1d0   : > { %v1522_v37 = vpop.permute.xlu1 %1521  ;;  %v1520_v44 = vpop.permute.xlu0 %1519 }
 0x1d1   : > { %1609 = vst.msk [vmem:[#allocation3 + $0x48] sm:$0xff] %vm1599_vm9, %v1522_v37  ;;  %1608 = vst.msk [vmem:[#allocation3 + $0x40] sm:$0xff] %vm1599_vm9, %v1520_v44  ;;  %v14427_v37 = vld [vmem:[#allocation35_spill] sm:$0xff]  ;;  %v14428_v44 = vld [vmem:[#allocation36_spill] sm:$0xff] }
 0x1d2   : > { %1959 = vrot.lane.b32.xlu1 %v14413_v51, %s9070_s20  ;;  %1957 = vrot.lane.b32.xlu0 %v14414_v53, %s9070_s20 }
 0x1d4   : > { %v1526_v63 = vpop.permute.xlu1 %1525  ;;  %v1524_v29 = vpop.permute.xlu0 %1523 }
 0x1d5   : > { %1611 = vst.msk [vmem:[#allocation3 + $0x58] sm:$0xff] %vm1599_vm9, %v1526_v63  ;;  %1610 = vst.msk [vmem:[#allocation3 + $0x50] sm:$0xff] %vm1599_vm9, %v1524_v29  ;;  %v14429_v63 = vld [vmem:[#allocation37_spill] sm:$0xff]  ;;  %v14430_v29 = vld [vmem:[#allocation38_spill] sm:$0xff] }
 0x1d6   : > { %1963 = vrot.lane.b32.xlu1 %v14415_v33, %s9070_s20  ;;  %1961 = vrot.lane.b32.xlu0 %v14416_v34, %s9070_s20 }
 0x1d8   : > { %v1530_v23 = vpop.permute.xlu1 %1529  ;;  %v1528_v41 = vpop.permute.xlu0 %1527 }
 0x1d9   : > { %1613 = vst.msk [vmem:[#allocation3 + $0x68] sm:$0xff] %vm1599_vm9, %v1530_v23  ;;  %1612 = vst.msk [vmem:[#allocation3 + $0x60] sm:$0xff] %vm1599_vm9, %v1528_v41  ;;  %v14431_v23 = vld [vmem:[#allocation39_spill] sm:$0xff]  ;;  %v14432_v41 = vld [vmem:[#allocation40_spill] sm:$0xff] }
 0x1da   : > { %1967 = vrot.lane.b32.xlu1 %v14417_v48, %s9070_s20  ;;  %1965 = vrot.lane.b32.xlu0 %v14418_v50, %s9070_s20 }
 0x1dc   : > { %v1534_v59 = vpop.permute.xlu1 %1533  ;;  %v1532_v61 = vpop.permute.xlu0 %1531 }
 0x1dd   : > { %1615 = vst.msk [vmem:[#allocation3 + $0x78] sm:$0xff] %vm1599_vm9, %v1534_v59  ;;  %1614 = vst.msk [vmem:[#allocation3 + $0x70] sm:$0xff] %vm1599_vm9, %v1532_v61  ;;  %v14433_v59 = vld [vmem:[#allocation41_spill] sm:$0xff]  ;;  %v14434_v61 = vld [vmem:[#allocation42_spill] sm:$0xff] }
 0x1de   : > { %1971 = vrot.lane.b32.xlu1 %v14419_v16, %s9070_s20  ;;  %1969 = vrot.lane.b32.xlu0 %v14420_v7, %s9070_s20 }
 0x1e0   : > { %v1538_v1 = vpop.permute.xlu1 %1537  ;;  %v1536_v11 = vpop.permute.xlu0 %1535 }
 0x1e1   : > { %1617 = vst.msk [vmem:[#allocation3 + $0x88] sm:$0xff] %vm1599_vm9, %v1538_v1  ;;  %1616 = vst.msk [vmem:[#allocation3 + $0x80] sm:$0xff] %vm1599_vm9, %v1536_v11  ;;  %v14435_v1 = vld [vmem:[#allocation43_spill] sm:$0xff]  ;;  %v14436_v11 = vld [vmem:[#allocation44_spill] sm:$0xff] }
 0x1e2   : > { %1975 = vrot.lane.b32.xlu1 %v14421_v26, %s9070_s20  ;;  %1973 = vrot.lane.b32.xlu0 %v14422_v39, %s9070_s20 }
 0x1e4   : > { %v1542_v4 = vpop.permute.xlu1 %1541  ;;  %v1540_v35 = vpop.permute.xlu0 %1539 }
 0x1e5   : > { %1619 = vst.msk [vmem:[#allocation3 + $0x98] sm:$0xff] %vm1599_vm9, %v1542_v4  ;;  %1618 = vst.msk [vmem:[#allocation3 + $0x90] sm:$0xff] %vm1599_vm9, %v1540_v35  ;;  %v14437_v4 = vld [vmem:[#allocation45_spill] sm:$0xff] }
 0x1e6   : > { %1979 = vrot.lane.b32.xlu1 %v14423_v54, %s9070_s20  ;;  %1977 = vrot.lane.b32.xlu0 %v14424_v5, %s9070_s20 }
 0x1e8   : > { %v1546_v10 = vpop.permute.xlu1 %1545  ;;  %v1544_v56 = vpop.permute.xlu0 %1543 }
 0x1e9   : > { %1621 = vst.msk [vmem:[#allocation3 + $0xa8] sm:$0xff] %vm1599_vm9, %v1546_v10  ;;  %1620 = vst.msk [vmem:[#allocation3 + $0xa0] sm:$0xff] %vm1599_vm9, %v1544_v56  ;;  %v10402_v56 = vld [vmem:[#allocation2 + $0x209] sm:$0xff] }
 0x1ea   : > { %1983 = vrot.lane.b32.xlu1 %v14425_v6, %s9070_s20  ;;  %1981 = vrot.lane.b32.xlu0 %v14426_v42, %s9070_s20  ;;  %v2116_v6 = vld [vmem:[#allocation2 + $0x4f] sm:$0xff]  ;;  %v2115_v42 = vld [vmem:[#allocation2 + $0x47] sm:$0xff] }
 0x1ec   : > { %v1550_v24 = vpop.permute.xlu1 %1549  ;;  %v1548_v27 = vpop.permute.xlu0 %1547 }
 0x1ed   : > { %1623 = vst.msk [vmem:[#allocation3 + $0xb8] sm:$0xff] %vm1599_vm9, %v1550_v24  ;;  %1622 = vst.msk [vmem:[#allocation3 + $0xb0] sm:$0xff] %vm1599_vm9, %v1548_v27 }
 0x1ee   : > { %1987 = vrot.lane.b32.xlu1 %v14427_v37, %s9070_s20  ;;  %1985 = vrot.lane.b32.xlu0 %v14428_v44, %s9070_s20  ;;  %v2118_v37 = vld [vmem:[#allocation2 + $0x6f] sm:$0xff]  ;;  %v2117_v44 = vld [vmem:[#allocation2 + $0x67] sm:$0xff] }
 0x1f0   : > { %v1554_v51 = vpop.permute.xlu1 %1553  ;;  %v1552_v53 = vpop.permute.xlu0 %1551 }
 0x1f1   : > { %1625 = vst.msk [vmem:[#allocation3 + $0xc8] sm:$0xff] %vm1599_vm9, %v1554_v51  ;;  %1624 = vst.msk [vmem:[#allocation3 + $0xc0] sm:$0xff] %vm1599_vm9, %v1552_v53 }
 0x1f2   : > { %1991 = vrot.lane.b32.xlu1 %v14429_v63, %s9070_s20  ;;  %1989 = vrot.lane.b32.xlu0 %v14430_v29, %s9070_s20  ;;  %v2120_v63 = vld [vmem:[#allocation2 + $0x8f] sm:$0xff]  ;;  %v2119_v29 = vld [vmem:[#allocation2 + $0x87] sm:$0xff] }
 0x1f4   : > { %v1558_v33 = vpop.permute.xlu1 %1557  ;;  %v1556_v34 = vpop.permute.xlu0 %1555 }
 0x1f5   : > { %1627 = vst.msk [vmem:[#allocation3 + $0xd8] sm:$0xff] %vm1599_vm9, %v1558_v33  ;;  %1626 = vst.msk [vmem:[#allocation3 + $0xd0] sm:$0xff] %vm1599_vm9, %v1556_v34 }
 0x1f6   : > { %1995 = vrot.lane.b32.xlu1 %v14431_v23, %s9070_s20  ;;  %1993 = vrot.lane.b32.xlu0 %v14432_v41, %s9070_s20  ;;  %v2122_v23 = vld [vmem:[#allocation2 + $0xaf] sm:$0xff]  ;;  %v2121_v41 = vld [vmem:[#allocation2 + $0xa7] sm:$0xff] }
 0x1f8   : > { %v1562_v48 = vpop.permute.xlu1 %1561  ;;  %v1560_v50 = vpop.permute.xlu0 %1559 }
 0x1f9   : > { %1629 = vst.msk [vmem:[#allocation3 + $0xe8] sm:$0xff] %vm1599_vm9, %v1562_v48  ;;  %1628 = vst.msk [vmem:[#allocation3 + $0xe0] sm:$0xff] %vm1599_vm9, %v1560_v50 }
 0x1fa   : > { %1999 = vrot.lane.b32.xlu1 %v14433_v59, %s9070_s20  ;;  %1997 = vrot.lane.b32.xlu0 %v14434_v61, %s9070_s20  ;;  %v2124_v59 = vld [vmem:[#allocation2 + $0xcf] sm:$0xff]  ;;  %v2123_v61 = vld [vmem:[#allocation2 + $0xc7] sm:$0xff] }
 0x1fc   : > { %v1566_v16 = vpop.permute.xlu1 %1565  ;;  %v1564_v7 = vpop.permute.xlu0 %1563 }
 0x1fd   : > { %1631 = vst.msk [vmem:[#allocation3 + $0xf8] sm:$0xff] %vm1599_vm9, %v1566_v16  ;;  %1630 = vst.msk [vmem:[#allocation3 + $0xf0] sm:$0xff] %vm1599_vm9, %v1564_v7  ;;  %vm4399_vm9 = vcmask 539912  }
 0x1fe   : > { %2003 = vrot.lane.b32.xlu1 %v14435_v1, %s9070_s20  ;;  %2001 = vrot.lane.b32.xlu0 %v14436_v11, %s9070_s20  ;;  %v2126_v1 = vld [vmem:[#allocation2 + $0xef] sm:$0xff]  ;;  %v2125_v11 = vld [vmem:[#allocation2 + $0xe7] sm:$0xff] }
 0x200   : > { %v1731_v26 = vpop.permute.xlu1 %1730  ;;  %v1729_v39 = vpop.permute.xlu0 %1728 }
 0x201   : > { %1826 = vst.msk [vmem:[#allocation3 + $0x8] sm:$0xff] %vm1824_vm10, %v1731_v26  ;;  %1825 = vst.msk [vmem:[#allocation3] sm:$0xff] %vm1824_vm10, %v1729_v39 }
 0x202   : > { %2007 = vrot.lane.b32.xlu1 %v10089_v2, %s9070_s20  ;;  %2005 = vrot.lane.b32.xlu0 %v14437_v4, %s9070_s20  ;;  %v10397_v2 = vld [vmem:[#allocation2 + $0x211] sm:$0xff] }
 0x203   : > { %v2128_v4 = vld [vmem:[#allocation2 + $0x10f] sm:$0xff] }
 0x204   : > { %v1735_v35 = vpop.permute.xlu1 %1734  ;;  %v1733_v54 = vpop.permute.xlu0 %1732 }
 0x205   : > { %1828 = vst.msk [vmem:[#allocation3 + $0x18] sm:$0xff] %vm1824_vm10, %v1735_v35  ;;  %1827 = vst.msk [vmem:[#allocation3 + $0x10] sm:$0xff] %vm1824_vm10, %v1733_v54  ;;  %v2127_v35 = vld [vmem:[#allocation2 + $0x107] sm:$0xff] }
 0x206   : > { %2011 = vrot.lane.b32.xlu1 %v10098_v36, %s9070_s20  ;;  %2009 = vrot.lane.b32.xlu0 %v10103_v9, %s9070_s20 }
 0x208   : > { %v1739_v5 = vpop.permute.xlu1 %1738  ;;  %v1737_v10 = vpop.permute.xlu0 %1736 }
 0x209   : > { %1830 = vst.msk [vmem:[#allocation3 + $0x28] sm:$0xff] %vm1824_vm10, %v1739_v5  ;;  %1829 = vst.msk [vmem:[#allocation3 + $0x20] sm:$0xff] %vm1824_vm10, %v1737_v10  ;;  %v2130_v10 = vld [vmem:[#allocation2 + $0x12f] sm:$0xff] }
 0x20a   : > { %2015 = vrot.lane.b32.xlu1 %v10397_v2, %s9070_s20  ;;  %2013 = vrot.lane.b32.xlu0 %v10402_v56, %s9070_s20 }
 0x20c   : > { %v1743_v36 = vpop.permute.xlu1 %1742  ;;  %v1741_v9 = vpop.permute.xlu0 %1740 }
 0x20d   : > { %1832 = vst.msk [vmem:[#allocation3 + $0x38] sm:$0xff] %vm1824_vm10, %v1743_v36  ;;  %1831 = vst.msk [vmem:[#allocation3 + $0x30] sm:$0xff] %vm1824_vm10, %v1741_v9  ;;  %v2129_v36 = vld [vmem:[#allocation2 + $0x127] sm:$0xff] }
 0x20e   : > { %2181 = vrot.lane.b32.xlu1 %v2116_v6, %s9071_s21  ;;  %2179 = vrot.lane.b32.xlu0 %v2115_v42, %s9071_s21  ;;  %v2132_v42 = vld [vmem:[#allocation2 + $0x14f] sm:$0xff] }
 0x210   : > { %v1747_v24 = vpop.permute.xlu1 %1746  ;;  %v1745_v27 = vpop.permute.xlu0 %1744 }
 0x211   : > { %1834 = vst.msk [vmem:[#allocation3 + $0x48] sm:$0xff] %vm1824_vm10, %v1747_v24  ;;  %1833 = vst.msk [vmem:[#allocation3 + $0x40] sm:$0xff] %vm1824_vm10, %v1745_v27  ;;  %v2131_v24 = vld [vmem:[#allocation2 + $0x147] sm:$0xff] }
 0x212   : > { %2185 = vrot.lane.b32.xlu1 %v2118_v37, %s9071_s21  ;;  %2183 = vrot.lane.b32.xlu0 %v2117_v44, %s9071_s21  ;;  %v2134_v44 = vld [vmem:[#allocation2 + $0x16f] sm:$0xff] }
 0x214   : > { %v1751_v51 = vpop.permute.xlu1 %1750  ;;  %v1749_v53 = vpop.permute.xlu0 %1748 }
 0x215   : > { %1836 = vst.msk [vmem:[#allocation3 + $0x58] sm:$0xff] %vm1824_vm10, %v1751_v51  ;;  %1835 = vst.msk [vmem:[#allocation3 + $0x50] sm:$0xff] %vm1824_vm10, %v1749_v53  ;;  %v2133_v51 = vld [vmem:[#allocation2 + $0x167] sm:$0xff] }
 0x216   : > { %2189 = vrot.lane.b32.xlu1 %v2120_v63, %s9071_s21  ;;  %2187 = vrot.lane.b32.xlu0 %v2119_v29, %s9071_s21  ;;  %v2136_v29 = vld [vmem:[#allocation2 + $0x18f] sm:$0xff] }
 0x218   : > { %v1755_v33 = vpop.permute.xlu1 %1754  ;;  %v1753_v34 = vpop.permute.xlu0 %1752 }
 0x219   : > { %1838 = vst.msk [vmem:[#allocation3 + $0x68] sm:$0xff] %vm1824_vm10, %v1755_v33  ;;  %1837 = vst.msk [vmem:[#allocation3 + $0x60] sm:$0xff] %vm1824_vm10, %v1753_v34  ;;  %v2135_v33 = vld [vmem:[#allocation2 + $0x187] sm:$0xff] }
 0x21a   : > { %2193 = vrot.lane.b32.xlu1 %v2122_v23, %s9071_s21  ;;  %2191 = vrot.lane.b32.xlu0 %v2121_v41, %s9071_s21  ;;  %v2138_v41 = vld [vmem:[#allocation2 + $0x1af] sm:$0xff] }
 0x21c   : > { %v1759_v48 = vpop.permute.xlu1 %1758  ;;  %v1757_v50 = vpop.permute.xlu0 %1756 }
 0x21d   : > { %1840 = vst.msk [vmem:[#allocation3 + $0x78] sm:$0xff] %vm1824_vm10, %v1759_v48  ;;  %1839 = vst.msk [vmem:[#allocation3 + $0x70] sm:$0xff] %vm1824_vm10, %v1757_v50  ;;  %v2137_v48 = vld [vmem:[#allocation2 + $0x1a7] sm:$0xff] }
 0x21e   : > { %2197 = vrot.lane.b32.xlu1 %v2124_v59, %s9071_s21  ;;  %2195 = vrot.lane.b32.xlu0 %v2123_v61, %s9071_s21  ;;  %v2140_v61 = vld [vmem:[#allocation2 + $0x1cf] sm:$0xff] }
 0x220   : > { %v1763_v16 = vpop.permute.xlu1 %1762  ;;  %v1761_v7 = vpop.permute.xlu0 %1760 }
 0x221   : > { %1842 = vst.msk [vmem:[#allocation3 + $0x88] sm:$0xff] %vm1824_vm10, %v1763_v16  ;;  %1841 = vst.msk [vmem:[#allocation3 + $0x80] sm:$0xff] %vm1824_vm10, %v1761_v7  ;;  %v2139_v16 = vld [vmem:[#allocation2 + $0x1c7] sm:$0xff] }
 0x222   : > { %2201 = vrot.lane.b32.xlu1 %v2126_v1, %s9071_s21  ;;  %2199 = vrot.lane.b32.xlu0 %v2125_v11, %s9071_s21  ;;  %v2142_v11 = vld [vmem:[#allocation2 + $0x1ef] sm:$0xff] }
 0x224   : > { %v1767_v26 = vpop.permute.xlu1 %1766  ;;  %v1765_v39 = vpop.permute.xlu0 %1764 }
 0x225   : > { %1844 = vst.msk [vmem:[#allocation3 + $0x98] sm:$0xff] %vm1824_vm10, %v1767_v26  ;;  %1843 = vst.msk [vmem:[#allocation3 + $0x90] sm:$0xff] %vm1824_vm10, %v1765_v39  ;;  %v2141_v26 = vld [vmem:[#allocation2 + $0x1e7] sm:$0xff] }
 0x226   : > { %2205 = vrot.lane.b32.xlu1 %v2128_v4, %s9071_s21  ;;  %2203 = vrot.lane.b32.xlu0 %v2127_v35, %s9071_s21 }
 0x228   : > { %v1771_v54 = vpop.permute.xlu1 %1770  ;;  %v1769_v5 = vpop.permute.xlu0 %1768 }
 0x229   : > { %1846 = vst.msk [vmem:[#allocation3 + $0xa8] sm:$0xff] %vm1824_vm10, %v1771_v54  ;;  %1845 = vst.msk [vmem:[#allocation3 + $0xa0] sm:$0xff] %vm1824_vm10, %v1769_v5  ;;  %v2146_v5 = vld [vmem:[#allocation2 + $0x22f] sm:$0xff] }
 0x22a   : > { %2209 = vrot.lane.b32.xlu1 %v2130_v10, %s9071_s21  ;;  %2207 = vrot.lane.b32.xlu0 %v2129_v36, %s9071_s21  ;;  %v2145_v10 = vld [vmem:[#allocation2 + $0x227] sm:$0xff] }
 0x22c   : > { %v1775_v9 = vpop.permute.xlu1 %1774  ;;  %v1773_v6 = vpop.permute.xlu0 %1772 }
 0x22d   : > { %1848 = vst.msk [vmem:[#allocation3 + $0xb8] sm:$0xff] %vm1824_vm10, %v1775_v9  ;;  %1847 = vst.msk [vmem:[#allocation3 + $0xb0] sm:$0xff] %vm1824_vm10, %v1773_v6 }
 0x22e   : > { %2213 = vrot.lane.b32.xlu1 %v2132_v42, %s9071_s21  ;;  %2211 = vrot.lane.b32.xlu0 %v2131_v24, %s9071_s21  ;;  %v2343_v24 = vld [vmem:[#allocation2 + $0x70] sm:$0xff] }
 0x230   : > { %v1779_v27 = vpop.permute.xlu1 %1778  ;;  %v1777_v37 = vpop.permute.xlu0 %1776 }
 0x231   : > { %1850 = vst.msk [vmem:[#allocation3 + $0xc8] sm:$0xff] %vm1824_vm10, %v1779_v27  ;;  %1849 = vst.msk [vmem:[#allocation3 + $0xc0] sm:$0xff] %vm1824_vm10, %v1777_v37  ;;  %v2342_v27 = vld [vmem:[#allocation2 + $0x68] sm:$0xff] }
 0x232   : > { %2217 = vrot.lane.b32.xlu1 %v2134_v44, %s9071_s21  ;;  %2215 = vrot.lane.b32.xlu0 %v2133_v51, %s9071_s21  ;;  %v2345_v51 = vld [vmem:[#allocation2 + $0x90] sm:$0xff] }
 0x234   : > { %v1783_v53 = vpop.permute.xlu1 %1782  ;;  %v1781_v63 = vpop.permute.xlu0 %1780 }
 0x235   : > { %1852 = vst.msk [vmem:[#allocation3 + $0xd8] sm:$0xff] %vm1824_vm10, %v1783_v53  ;;  %1851 = vst.msk [vmem:[#allocation3 + $0xd0] sm:$0xff] %vm1824_vm10, %v1781_v63  ;;  %v2344_v53 = vld [vmem:[#allocation2 + $0x88] sm:$0xff] }
 0x236   : > { %2221 = vrot.lane.b32.xlu1 %v2136_v29, %s9071_s21  ;;  %2219 = vrot.lane.b32.xlu0 %v2135_v33, %s9071_s21  ;;  %v2347_v33 = vld [vmem:[#allocation2 + $0xb0] sm:$0xff] }
 0x238   : > { %v1787_v34 = vpop.permute.xlu1 %1786  ;;  %v1785_v23 = vpop.permute.xlu0 %1784 }
 0x239   : > { %1854 = vst.msk [vmem:[#allocation3 + $0xe8] sm:$0xff] %vm1824_vm10, %v1787_v34  ;;  %1853 = vst.msk [vmem:[#allocation3 + $0xe0] sm:$0xff] %vm1824_vm10, %v1785_v23  ;;  %v2346_v34 = vld [vmem:[#allocation2 + $0xa8] sm:$0xff] }
 0x23a   : > { %2225 = vrot.lane.b32.xlu1 %v2138_v41, %s9071_s21  ;;  %2223 = vrot.lane.b32.xlu0 %v2137_v48, %s9071_s21  ;;  %v2349_v48 = vld [vmem:[#allocation2 + $0xd0] sm:$0xff] }
 0x23c   : > { %v1791_v50 = vpop.permute.xlu1 %1790  ;;  %v1789_v59 = vpop.permute.xlu0 %1788 }
 0x23d   : > { %1856 = vst.msk [vmem:[#allocation3 + $0xf8] sm:$0xff] %vm1824_vm10, %v1791_v50  ;;  %1855 = vst.msk [vmem:[#allocation3 + $0xf0] sm:$0xff] %vm1824_vm10, %v1789_v59  ;;  %v2348_v50 = vld [vmem:[#allocation2 + $0xc8] sm:$0xff]  ;;  %vm4624_vm10 = vcmask 810512  }
 0x23e   : > { %2229 = vrot.lane.b32.xlu1 %v2140_v61, %s9071_s21  ;;  %2227 = vrot.lane.b32.xlu0 %v2139_v16, %s9071_s21  ;;  %v2351_v16 = vld [vmem:[#allocation2 + $0xf0] sm:$0xff] }
 0x240   : > { %v1956_v7 = vpop.permute.xlu1 %1955  ;;  %v1954_v1 = vpop.permute.xlu0 %1953 }
 0x241   : > { %2051 = vst.msk [vmem:[#allocation3 + $0x8] sm:$0xff] %vm2049_vm11, %v1956_v7  ;;  %2050 = vst.msk [vmem:[#allocation3] sm:$0xff] %vm2049_vm11, %v1954_v1  ;;  %v2350_v7 = vld [vmem:[#allocation2 + $0xe8] sm:$0xff] }
 0x242   : > { %2233 = vrot.lane.b32.xlu1 %v2142_v11, %s9071_s21  ;;  %2231 = vrot.lane.b32.xlu0 %v2141_v26, %s9071_s21  ;;  %v2353_v26 = vld [vmem:[#allocation2 + $0x110] sm:$0xff] }
 0x244   : > { %v1960_v39 = vpop.permute.xlu1 %1959  ;;  %v1958_v4 = vpop.permute.xlu0 %1957 }
 0x245   : > { %2053 = vst.msk [vmem:[#allocation3 + $0x18] sm:$0xff] %vm2049_vm11, %v1960_v39  ;;  %2052 = vst.msk [vmem:[#allocation3 + $0x10] sm:$0xff] %vm2049_vm11, %v1958_v4  ;;  %v2352_v39 = vld [vmem:[#allocation2 + $0x108] sm:$0xff] }
 0x246   : > { %2237 = vrot.lane.b32.xlu1 %v10198_v20, %s9071_s21  ;;  %2235 = vrot.lane.b32.xlu0 %v10203_v62, %s9071_s21  ;;  %v2341_v20 = vld [vmem:[#allocation2 + $0x50] sm:$0xff]  ;;  %v2340_v62 = vld [vmem:[#allocation2 + $0x48] sm:$0xff] }
 0x248   : > { %v1964_v35 = vpop.permute.xlu1 %1963  ;;  %v1962_v54 = vpop.permute.xlu0 %1961 }
 0x249   : > { %2055 = vst.msk [vmem:[#allocation3 + $0x28] sm:$0xff] %vm2049_vm11, %v1964_v35  ;;  %2054 = vst.msk [vmem:[#allocation3 + $0x20] sm:$0xff] %vm2049_vm11, %v1962_v54  ;;  %v2355_v54 = vld [vmem:[#allocation2 + $0x130] sm:$0xff] }
 0x24a   : > { %2241 = vrot.lane.b32.xlu1 %v2146_v5, %s9071_s21  ;;  %2239 = vrot.lane.b32.xlu0 %v2145_v10, %s9071_s21  ;;  %v2354_v5 = vld [vmem:[#allocation2 + $0x128] sm:$0xff]  ;;  %s9084_s21 = smov 103  }
 0x24c   : > { %v1968_v36 = vpop.permute.xlu1 %1967  ;;  %v1966_v9 = vpop.permute.xlu0 %1965 }
 0x24d   : > { %2057 = vst.msk [vmem:[#allocation3 + $0x38] sm:$0xff] %vm2049_vm11, %v1968_v36  ;;  %2056 = vst.msk [vmem:[#allocation3 + $0x30] sm:$0xff] %vm2049_vm11, %v1966_v9  ;;  %v2357_v9 = vld [vmem:[#allocation2 + $0x150] sm:$0xff] }
 0x24e   : > { %2406 = vrot.lane.b32.xlu1 %v2341_v20, %s9072_s22  ;;  %2404 = vrot.lane.b32.xlu0 %v2340_v62, %s9072_s22  ;;  %v2356_v20 = vld [vmem:[#allocation2 + $0x148] sm:$0xff] }
 0x250   : > { %v1972_v6 = vpop.permute.xlu1 %1971  ;;  %v1970_v42 = vpop.permute.xlu0 %1969 }
 0x251   : > { %2059 = vst.msk [vmem:[#allocation3 + $0x48] sm:$0xff] %vm2049_vm11, %v1972_v6  ;;  %2058 = vst.msk [vmem:[#allocation3 + $0x40] sm:$0xff] %vm2049_vm11, %v1970_v42  ;;  %v2359_v42 = vld [vmem:[#allocation2 + $0x170] sm:$0xff] }
 0x252   : > { %2410 = vrot.lane.b32.xlu1 %v2343_v24, %s9072_s22  ;;  %2408 = vrot.lane.b32.xlu0 %v2342_v27, %s9072_s22  ;;  %v2358_v24 = vld [vmem:[#allocation2 + $0x168] sm:$0xff] }
 0x254   : > { %v1976_v37 = vpop.permute.xlu1 %1975  ;;  %v1974_v44 = vpop.permute.xlu0 %1973 }
 0x255   : > { %2061 = vst.msk [vmem:[#allocation3 + $0x58] sm:$0xff] %vm2049_vm11, %v1976_v37  ;;  %2060 = vst.msk [vmem:[#allocation3 + $0x50] sm:$0xff] %vm2049_vm11, %v1974_v44  ;;  %v2361_v44 = vld [vmem:[#allocation2 + $0x190] sm:$0xff] }
 0x256   : > { %2414 = vrot.lane.b32.xlu1 %v2345_v51, %s9072_s22  ;;  %2412 = vrot.lane.b32.xlu0 %v2344_v53, %s9072_s22  ;;  %v2360_v51 = vld [vmem:[#allocation2 + $0x188] sm:$0xff] }
 0x258   : > { %v1980_v63 = vpop.permute.xlu1 %1979  ;;  %v1978_v29 = vpop.permute.xlu0 %1977 }
 0x259   : > { %2063 = vst.msk [vmem:[#allocation3 + $0x68] sm:$0xff] %vm2049_vm11, %v1980_v63  ;;  %2062 = vst.msk [vmem:[#allocation3 + $0x60] sm:$0xff] %vm2049_vm11, %v1978_v29  ;;  %v2363_v29 = vld [vmem:[#allocation2 + $0x1b0] sm:$0xff] }
 0x25a   : > { %2418 = vrot.lane.b32.xlu1 %v2347_v33, %s9072_s22  ;;  %2416 = vrot.lane.b32.xlu0 %v2346_v34, %s9072_s22  ;;  %v2362_v33 = vld [vmem:[#allocation2 + $0x1a8] sm:$0xff] }
 0x25c   : > { %v1984_v23 = vpop.permute.xlu1 %1983  ;;  %v1982_v41 = vpop.permute.xlu0 %1981 }
 0x25d   : > { %2065 = vst.msk [vmem:[#allocation3 + $0x78] sm:$0xff] %vm2049_vm11, %v1984_v23  ;;  %2064 = vst.msk [vmem:[#allocation3 + $0x70] sm:$0xff] %vm2049_vm11, %v1982_v41  ;;  %v2365_v41 = vld [vmem:[#allocation2 + $0x1d0] sm:$0xff] }
 0x25e   : > { %2422 = vrot.lane.b32.xlu1 %v2349_v48, %s9072_s22  ;;  %2420 = vrot.lane.b32.xlu0 %v2348_v50, %s9072_s22  ;;  %v2364_v48 = vld [vmem:[#allocation2 + $0x1c8] sm:$0xff] }
 0x260   : > { %v1988_v59 = vpop.permute.xlu1 %1987  ;;  %v1986_v61 = vpop.permute.xlu0 %1985 }
 0x261   : > { %2067 = vst.msk [vmem:[#allocation3 + $0x88] sm:$0xff] %vm2049_vm11, %v1988_v59  ;;  %2066 = vst.msk [vmem:[#allocation3 + $0x80] sm:$0xff] %vm2049_vm11, %v1986_v61  ;;  %v2367_v61 = vld [vmem:[#allocation2 + $0x1f0] sm:$0xff] }
 0x262   : > { %2426 = vrot.lane.b32.xlu1 %v2351_v16, %s9072_s22  ;;  %2424 = vrot.lane.b32.xlu0 %v2350_v7, %s9072_s22  ;;  %v2366_v16 = vld [vmem:[#allocation2 + $0x1e8] sm:$0xff]  ;;  %v2822_v7 = vld [vmem:[%s14216_s2] sm:$0xff] }
 0x264   : > { %v1992_v1 = vpop.permute.xlu1 %1991  ;;  %v1990_v11 = vpop.permute.xlu0 %1989 }
 0x265   : > { %2069 = vst.msk [vmem:[#allocation3 + $0x98] sm:$0xff] %vm2049_vm11, %v1992_v1  ;;  %2068 = vst.msk [vmem:[#allocation3 + $0x90] sm:$0xff] %vm2049_vm11, %v1990_v11  ;;  %v2823_v1 = vld [vmem:[%s14216_s2 + $0x8] sm:$0xff] }
 0x266   : > { %2430 = vrot.lane.b32.xlu1 %v2353_v26, %s9072_s22  ;;  %2428 = vrot.lane.b32.xlu0 %v2352_v39, %s9072_s22  ;;  %v8461_v11 = vpack.c.bf16 %v2823_v1, %v2822_v7  ;;  %v2578_v1 = vld [vmem:[#allocation2 + $0x111] sm:$0xff] }
 0x268   : > { %v1996_v4 = vpop.permute.xlu1 %1995  ;;  %v1994_v35 = vpop.permute.xlu0 %1993  ;;  %8462 = vmatprep.subr.bf16.mxu0 %v8461_v11 }
 0x269   : > { %2071 = vst.msk [vmem:[#allocation3 + $0xa8] sm:$0xff] %vm2049_vm11, %v1996_v4  ;;  %2070 = vst.msk [vmem:[#allocation3 + $0xa0] sm:$0xff] %vm2049_vm11, %v1994_v35  ;;  %8464 = vmatpush3.bf16.msra.mxu0 %v8461_v11  ;;  %v2824_v4 = vld [vmem:[%s14216_s2 + $0x10] sm:$0x3] }
 0x26a   : > { %2434 = vrot.lane.b32.xlu1 %v2355_v54, %s9072_s22  ;;  %2432 = vrot.lane.b32.xlu0 %v2354_v5, %s9072_s22  ;;  %v2371_v5 = vld [vmem:[#allocation2 + $0x230] sm:$0xff] }
 0x26b   : > { %8295 = vmatprep.subr.msk.mxu0 %vm2922_vm13, %v2824_v4  ;;  %v2577_v11 = vld [vmem:[#allocation2 + $0x109] sm:$0xff] }
 0x26c   : > { %v2000_v10 = vpop.permute.xlu1 %1999  ;;  %v1998_v36 = vpop.permute.xlu0 %1997 }
 0x26d   : > { %2073 = vst.msk [vmem:[#allocation3 + $0xb8] sm:$0xff] %vm2049_vm11, %v2000_v10  ;;  %2072 = vst.msk [vmem:[#allocation3 + $0xb0] sm:$0xff] %vm2049_vm11, %v1998_v36  ;;  %8296 = vmatpush3.msk.msra.mxu0 %vm2922_vm13, %v2824_v4  ;;  %v2580_v4 = vld [vmem:[#allocation2 + $0x131] sm:$0xff]  ;;  %vm5107_vm13 = vcmask 302112  }
 0x26e   : > { %2438 = vrot.lane.b32.xlu1 %v2357_v9, %s9072_s22  ;;  %2436 = vrot.lane.b32.xlu0 %v2356_v20, %s9072_s22  ;;  %v10548_v9 = vld [vmem:[#allocation2 + $0x51] sm:$0xff] }
 0x270   : > { %v2004_v62 = vpop.permute.xlu1 %2003  ;;  %v2002_v6 = vpop.permute.xlu0 %2001 }
 0x271   : > { %2075 = vst.msk [vmem:[#allocation3 + $0xc8] sm:$0xff] %vm2049_vm11, %v2004_v62  ;;  %2074 = vst.msk [vmem:[#allocation3 + $0xc0] sm:$0xff] %vm2049_vm11, %v2002_v6  ;;  %v10558_v6 = vld [vmem:[#allocation2 + $0x71] sm:$0xff] }
 0x272   : > { %2442 = vrot.lane.b32.xlu1 %v2359_v42, %s9072_s22  ;;  %2440 = vrot.lane.b32.xlu0 %v2358_v24, %s9072_s22  ;;  %v10563_v42 = vld [vmem:[#allocation2 + $0x69] sm:$0xff] }
 0x274   : > { %v2008_v27 = vpop.permute.xlu1 %2007  ;;  %v2006_v37 = vpop.permute.xlu0 %2005 }
 0x275   : > { %2077 = vst.msk [vmem:[#allocation3 + $0xd8] sm:$0xff] %vm2049_vm11, %v2008_v27  ;;  %2076 = vst.msk [vmem:[#allocation3 + $0xd0] sm:$0xff] %vm2049_vm11, %v2006_v37  ;;  %v10568_v37 = vld [vmem:[#allocation2 + $0x91] sm:$0xff] }
 0x276   : > { %2446 = vrot.lane.b32.xlu1 %v2361_v44, %s9072_s22  ;;  %2444 = vrot.lane.b32.xlu0 %v2360_v51, %s9072_s22  ;;  %v10573_v44 = vld [vmem:[#allocation2 + $0x89] sm:$0xff] }
 0x278   : > { %v2012_v53 = vpop.permute.xlu1 %2011  ;;  %v2010_v63 = vpop.permute.xlu0 %2009 }
 0x279   : > { %2079 = vst.msk [vmem:[#allocation3 + $0xe8] sm:$0xff] %vm2049_vm11, %v2012_v53  ;;  %2078 = vst.msk [vmem:[#allocation3 + $0xe0] sm:$0xff] %vm2049_vm11, %v2010_v63  ;;  %v10578_v63 = vld [vmem:[#allocation2 + $0xb1] sm:$0xff] }
 0x27a   : > { %2450 = vrot.lane.b32.xlu1 %v2363_v29, %s9072_s22  ;;  %2448 = vrot.lane.b32.xlu0 %v2362_v33, %s9072_s22  ;;  %v10583_v29 = vld [vmem:[#allocation2 + $0xa9] sm:$0xff] }
 0x27c   : > { %v2016_v34 = vpop.permute.xlu1 %2015  ;;  %v2014_v23 = vpop.permute.xlu0 %2013 }
 0x27d   : > { %2081 = vst.msk [vmem:[#allocation3 + $0xf8] sm:$0xff] %vm2049_vm11, %v2016_v34  ;;  %2080 = vst.msk [vmem:[#allocation3 + $0xf0] sm:$0xff] %vm2049_vm11, %v2014_v23  ;;  %v10588_v23 = vld [vmem:[#allocation2 + $0xd1] sm:$0xff]  ;;  %vm4849_vm11 = vcmask 1048344  }
 0x27e   : > { %2454 = vrot.lane.b32.xlu1 %v2365_v41, %s9072_s22  ;;  %2452 = vrot.lane.b32.xlu0 %v2364_v48, %s9072_s22  ;;  %v2573_v41 = vld [vmem:[#allocation2 + $0xc9] sm:$0xff] }
 0x280   : > { %v2182_v50 = vpop.permute.xlu1 %2181  ;;  %v2180_v59 = vpop.permute.xlu0 %2179 }
 0x281   : > { %2277 = vst.msk [vmem:[#allocation3 + $0x8] sm:$0xff] %vm2275_vm12, %v2182_v50  ;;  %2276 = vst.msk [vmem:[#allocation3] sm:$0xff] %vm2275_vm12, %v2180_v59  ;;  %v2576_v59 = vld [vmem:[#allocation2 + $0xf1] sm:$0xff] }
 0x282   : > { %2458 = vrot.lane.b32.xlu1 %v2367_v61, %s9072_s22  ;;  %2456 = vrot.lane.b32.xlu0 %v2366_v16, %s9072_s22  ;;  %v2575_v61 = vld [vmem:[#allocation2 + $0xe9] sm:$0xff] }
 0x284   : > { %v2186_v26 = vpop.permute.xlu1 %2185  ;;  %v2184_v39 = vpop.permute.xlu0 %2183 }
 0x285   : > { %2279 = vst.msk [vmem:[#allocation3 + $0x18] sm:$0xff] %vm2275_vm12, %v2186_v26  ;;  %2278 = vst.msk [vmem:[#allocation3 + $0x10] sm:$0xff] %vm2275_vm12, %v2184_v39 }
 0x286   : > { %2462 = vrot.lane.b32.xlu1 %v10297_v12, %s9072_s22  ;;  %2460 = vrot.lane.b32.xlu0 %v10302_v45, %s9072_s22  ;;  %v2370_v12 = vld [vmem:[#allocation2 + $0x228] sm:$0xff] }
 0x287   : > { %v10553_v45 = vld [vmem:[#allocation2 + $0x49] sm:$0xff] }
 0x288   : > { %v2190_v35 = vpop.permute.xlu1 %2189  ;;  %v2188_v54 = vpop.permute.xlu0 %2187 }
 0x289   : > { %2281 = vst.msk [vmem:[#allocation3 + $0x28] sm:$0xff] %vm2275_vm12, %v2190_v35  ;;  %2280 = vst.msk [vmem:[#allocation3 + $0x20] sm:$0xff] %vm2275_vm12, %v2188_v54  ;;  %v2579_v35 = vld [vmem:[#allocation2 + $0x129] sm:$0xff] }
 0x28a   : > { %2466 = vrot.lane.b32.xlu1 %v2371_v5, %s9072_s22  ;;  %2464 = vrot.lane.b32.xlu0 %v2370_v12, %s9072_s22  ;;  %v2582_v12 = vld [vmem:[#allocation2 + $0x151] sm:$0xff] }
 0x28c   : > { %v2194_v10 = vpop.permute.xlu1 %2193  ;;  %v2192_v36 = vpop.permute.xlu0 %2191 }
 0x28d   : > { %2283 = vst.msk [vmem:[#allocation3 + $0x38] sm:$0xff] %vm2275_vm12, %v2194_v10  ;;  %2282 = vst.msk [vmem:[#allocation3 + $0x30] sm:$0xff] %vm2275_vm12, %v2192_v36  ;;  %v2581_v10 = vld [vmem:[#allocation2 + $0x149] sm:$0xff] }
 0x28e   : > { %2631 = vrot.lane.b32.xlu1 %v10548_v9, %s9073_s30  ;;  %2629 = vrot.lane.b32.xlu0 %v10553_v45, %s9073_s30 }
 0x290   : > { %v2198_v20 = vpop.permute.xlu1 %2197  ;;  %v2196_v62 = vpop.permute.xlu0 %2195 }
 0x291   : > { %2285 = vst.msk [vmem:[#allocation3 + $0x48] sm:$0xff] %vm2275_vm12, %v2198_v20  ;;  %2284 = vst.msk [vmem:[#allocation3 + $0x40] sm:$0xff] %vm2275_vm12, %v2196_v62  ;;  %v2584_v62 = vld [vmem:[#allocation2 + $0x171] sm:$0xff] }
 0x292   : > { %2635 = vrot.lane.b32.xlu1 %v10558_v6, %s9073_s30  ;;  %2633 = vrot.lane.b32.xlu0 %v10563_v42, %s9073_s30 }
 0x294   : > { %v2202_v24 = vpop.permute.xlu1 %2201  ;;  %v2200_v27 = vpop.permute.xlu0 %2199 }
 0x295   : > { %2287 = vst.msk [vmem:[#allocation3 + $0x58] sm:$0xff] %vm2275_vm12, %v2202_v24  ;;  %2286 = vst.msk [vmem:[#allocation3 + $0x50] sm:$0xff] %vm2275_vm12, %v2200_v27  ;;  %v2583_v24 = vld [vmem:[#allocation2 + $0x169] sm:$0xff] }
 0x296   : > { %2639 = vrot.lane.b32.xlu1 %v10568_v37, %s9073_s30  ;;  %2637 = vrot.lane.b32.xlu0 %v10573_v44, %s9073_s30 }
 0x298   : > { %v2206_v51 = vpop.permute.xlu1 %2205  ;;  %v2204_v53 = vpop.permute.xlu0 %2203 }
 0x299   : > { %2289 = vst.msk [vmem:[#allocation3 + $0x68] sm:$0xff] %vm2275_vm12, %v2206_v51  ;;  %2288 = vst.msk [vmem:[#allocation3 + $0x60] sm:$0xff] %vm2275_vm12, %v2204_v53  ;;  %v2586_v53 = vld [vmem:[#allocation2 + $0x191] sm:$0xff] }
 0x29a   : > { %2643 = vrot.lane.b32.xlu1 %v10578_v63, %s9073_s30  ;;  %2641 = vrot.lane.b32.xlu0 %v10583_v29, %s9073_s30 }
 0x29c   : > { %v2210_v33 = vpop.permute.xlu1 %2209  ;;  %v2208_v34 = vpop.permute.xlu0 %2207 }
 0x29d   : > { %2291 = vst.msk [vmem:[#allocation3 + $0x78] sm:$0xff] %vm2275_vm12, %v2210_v33  ;;  %2290 = vst.msk [vmem:[#allocation3 + $0x70] sm:$0xff] %vm2275_vm12, %v2208_v34  ;;  %v2585_v33 = vld [vmem:[#allocation2 + $0x189] sm:$0xff] }
 0x29e   : > { %2647 = vrot.lane.b32.xlu1 %v10588_v23, %s9073_s30  ;;  %2645 = vrot.lane.b32.xlu0 %v2573_v41, %s9073_s30 }
 0x2a0   : > { %v2214_v48 = vpop.permute.xlu1 %2213  ;;  %v2212_v50 = vpop.permute.xlu0 %2211 }
 0x2a1   : > { %2293 = vst.msk [vmem:[#allocation3 + $0x88] sm:$0xff] %vm2275_vm12, %v2214_v48  ;;  %2292 = vst.msk [vmem:[#allocation3 + $0x80] sm:$0xff] %vm2275_vm12, %v2212_v50  ;;  %v2588_v48 = vld [vmem:[#allocation2 + $0x1b1] sm:$0xff]  ;;  %v2587_v50 = vld [vmem:[#allocation2 + $0x1a9] sm:$0xff] }
 0x2a2   : > { %2651 = vrot.lane.b32.xlu1 %v2576_v59, %s9073_s30  ;;  %2649 = vrot.lane.b32.xlu0 %v2575_v61, %s9073_s30 }
 0x2a4   : > { %v2218_v16 = vpop.permute.xlu1 %2217  ;;  %v2216_v7 = vpop.permute.xlu0 %2215 }
 0x2a5   : > { %2295 = vst.msk [vmem:[#allocation3 + $0x98] sm:$0xff] %vm2275_vm12, %v2218_v16  ;;  %2294 = vst.msk [vmem:[#allocation3 + $0x90] sm:$0xff] %vm2275_vm12, %v2216_v7  ;;  %v2590_v16 = vld [vmem:[#allocation2 + $0x1d1] sm:$0xff]  ;;  %v2589_v7 = vld [vmem:[#allocation2 + $0x1c9] sm:$0xff] }
 0x2a6   : > { %2655 = vrot.lane.b32.xlu1 %v2578_v1, %s9073_s30  ;;  %2653 = vrot.lane.b32.xlu0 %v2577_v11, %s9073_s30 }
 0x2a8   : > { %v2222_v26 = vpop.permute.xlu1 %2221  ;;  %v2220_v39 = vpop.permute.xlu0 %2219 }
 0x2a9   : > { %2297 = vst.msk [vmem:[#allocation3 + $0xa8] sm:$0xff] %vm2275_vm12, %v2222_v26  ;;  %2296 = vst.msk [vmem:[#allocation3 + $0xa0] sm:$0xff] %vm2275_vm12, %v2220_v39  ;;  %v2592_v26 = vld [vmem:[#allocation2 + $0x1f1] sm:$0xff]  ;;  %v2591_v39 = vld [vmem:[#allocation2 + $0x1e9] sm:$0xff] }
 0x2aa   : > { %2659 = vrot.lane.b32.xlu1 %v2580_v4, %s9073_s30  ;;  %2657 = vrot.lane.b32.xlu0 %v2579_v35, %s9073_s30 }
 0x2ac   : > { %v2226_v54 = vpop.permute.xlu1 %2225  ;;  %v2224_v5 = vpop.permute.xlu0 %2223 }
 0x2ad   : > { %2299 = vst.msk [vmem:[#allocation3 + $0xb8] sm:$0xff] %vm2275_vm12, %v2226_v54  ;;  %2298 = vst.msk [vmem:[#allocation3 + $0xb0] sm:$0xff] %vm2275_vm12, %v2224_v5 }
 0x2ae   : > { %2663 = vrot.lane.b32.xlu1 %v2582_v12, %s9073_s30  ;;  %2661 = vrot.lane.b32.xlu0 %v2581_v10, %s9073_s30  ;;  %v2596_v12 = vld [vmem:[#allocation2 + $0x231] sm:$0xff]  ;;  %v2595_v10 = vld [vmem:[#allocation2 + $0x229] sm:$0xff] }
 0x2b0   : > { %v2230_v36 = vpop.permute.xlu1 %2229  ;;  %v2228_v20 = vpop.permute.xlu0 %2227 }
 0x2b1   : > { %2301 = vst.msk [vmem:[#allocation3 + $0xc8] sm:$0xff] %vm2275_vm12, %v2230_v36  ;;  %2300 = vst.msk [vmem:[#allocation3 + $0xc0] sm:$0xff] %vm2275_vm12, %v2228_v20 }
 0x2b2   : > { %2667 = vrot.lane.b32.xlu1 %v2584_v62, %s9073_s30  ;;  %2665 = vrot.lane.b32.xlu0 %v2583_v24, %s9073_s30 }
 0x2b4   : > { %v2234_v27 = vpop.permute.xlu1 %2233  ;;  %v2232_v51 = vpop.permute.xlu0 %2231 }
 0x2b5   : > { %2303 = vst.msk [vmem:[#allocation3 + $0xd8] sm:$0xff] %vm2275_vm12, %v2234_v27  ;;  %2302 = vst.msk [vmem:[#allocation3 + $0xd0] sm:$0xff] %vm2275_vm12, %v2232_v51 }
 0x2b6   : > { %2671 = vrot.lane.b32.xlu1 %v2586_v53, %s9073_s30  ;;  %2669 = vrot.lane.b32.xlu0 %v2585_v33, %s9073_s30 }
 0x2b8   : > { %v2238_v34 = vpop.permute.xlu1 %2237  ;;  %v2236_v41 = vpop.permute.xlu0 %2235 }
 0x2b9   : > { %2305 = vst.msk [vmem:[#allocation3 + $0xe8] sm:$0xff] %vm2275_vm12, %v2238_v34  ;;  %2304 = vst.msk [vmem:[#allocation3 + $0xe0] sm:$0xff] %vm2275_vm12, %v2236_v41 }
 0x2ba   : > { %2675 = vrot.lane.b32.xlu1 %v2588_v48, %s9073_s30  ;;  %2673 = vrot.lane.b32.xlu0 %v2587_v50, %s9073_s30 }
 0x2bc   : > { %v2242_v59 = vpop.permute.xlu1 %2241  ;;  %v2240_v61 = vpop.permute.xlu0 %2239 }
 0x2bd   : > { %2307 = vst.msk [vmem:[#allocation3 + $0xf8] sm:$0xff] %vm2275_vm12, %v2242_v59  ;;  %2306 = vst.msk [vmem:[#allocation3 + $0xf0] sm:$0xff] %vm2275_vm12, %v2240_v61  ;;  %vm4851_vm12 = vcmask 31744  }
 0x2be   : > { %2679 = vrot.lane.b32.xlu1 %v2590_v16, %s9073_s30  ;;  %2677 = vrot.lane.b32.xlu0 %v2589_v7, %s9073_s30 }
 0x2c0   : > { %v2407_v1 = vpop.permute.xlu1 %2406  ;;  %v2405_v11 = vpop.permute.xlu0 %2404 }
 0x2c1   : > { %2502 = vst.msk [vmem:[#allocation3 + $0x8] sm:$0xff] %vm2500_vm14, %v2407_v1  ;;  %2501 = vst.msk [vmem:[#allocation3] sm:$0xff] %vm2500_vm14, %v2405_v11 }
 0x2c2   : > { %2683 = vrot.lane.b32.xlu1 %v2592_v26, %s9073_s30  ;;  %2681 = vrot.lane.b32.xlu0 %v2591_v39, %s9073_s30 }
 0x2c4   : > { %v2411_v4 = vpop.permute.xlu1 %2410  ;;  %v2409_v35 = vpop.permute.xlu0 %2408 }
 0x2c5   : > { %2504 = vst.msk [vmem:[#allocation3 + $0x18] sm:$0xff] %vm2500_vm14, %v2411_v4  ;;  %2503 = vst.msk [vmem:[#allocation3 + $0x10] sm:$0xff] %vm2500_vm14, %v2409_v35 }
 0x2c6   : > { %2687 = vrot.lane.b32.xlu1 %v10397_v2, %s9073_s30  ;;  %2685 = vrot.lane.b32.xlu0 %v10402_v56, %s9073_s30 }
 0x2c8   : > { %v2415_v54 = vpop.permute.xlu1 %2414  ;;  %v2413_v5 = vpop.permute.xlu0 %2412 }
 0x2c9   : > { %2506 = vst.msk [vmem:[#allocation3 + $0x28] sm:$0xff] %vm2500_vm14, %v2415_v54  ;;  %2505 = vst.msk [vmem:[#allocation3 + $0x20] sm:$0xff] %vm2500_vm14, %v2413_v5 }
 0x2ca   : > { %2691 = vrot.lane.b32.xlu1 %v2596_v12, %s9073_s30  ;;  %2689 = vrot.lane.b32.xlu0 %v2595_v10, %s9073_s30 }
 0x2cc   : > { %v2419_v36 = vpop.permute.xlu1 %2418  ;;  %v2417_v20 = vpop.permute.xlu0 %2416 }
 0x2cd   : > { %2508 = vst.msk [vmem:[#allocation3 + $0x38] sm:$0xff] %vm2500_vm14, %v2419_v36  ;;  %2507 = vst.msk [vmem:[#allocation3 + $0x30] sm:$0xff] %vm2500_vm14, %v2417_v20 }
 0x2d0   : > { %v2423_v2 = vpop.permute.xlu1 %2422  ;;  %v2421_v56 = vpop.permute.xlu0 %2420 }
 0x2d1   : > { %2510 = vst.msk [vmem:[#allocation3 + $0x48] sm:$0xff] %vm2500_vm14, %v2423_v2  ;;  %2509 = vst.msk [vmem:[#allocation3 + $0x40] sm:$0xff] %vm2500_vm14, %v2421_v56 }
 0x2d4   : > { %v2427_v62 = vpop.permute.xlu1 %2426  ;;  %v2425_v24 = vpop.permute.xlu0 %2424 }
 0x2d5   : > { %2512 = vst.msk [vmem:[#allocation3 + $0x58] sm:$0xff] %vm2500_vm14, %v2427_v62  ;;  %2511 = vst.msk [vmem:[#allocation3 + $0x50] sm:$0xff] %vm2500_vm14, %v2425_v24 }
 0x2d8   : > { %v2431_v27 = vpop.permute.xlu1 %2430  ;;  %v2429_v51 = vpop.permute.xlu0 %2428 }
 0x2d9   : > { %2514 = vst.msk [vmem:[#allocation3 + $0x68] sm:$0xff] %vm2500_vm14, %v2431_v27  ;;  %2513 = vst.msk [vmem:[#allocation3 + $0x60] sm:$0xff] %vm2500_vm14, %v2429_v51 }
 0x2dc   : > { %v2435_v53 = vpop.permute.xlu1 %2434  ;;  %v2433_v33 = vpop.permute.xlu0 %2432 }
 0x2dd   : > { %2516 = vst.msk [vmem:[#allocation3 + $0x78] sm:$0xff] %vm2500_vm14, %v2435_v53  ;;  %2515 = vst.msk [vmem:[#allocation3 + $0x70] sm:$0xff] %vm2500_vm14, %v2433_v33 }
 0x2e0   : > { %v2439_v34 = vpop.permute.xlu1 %2438  ;;  %v2437_v41 = vpop.permute.xlu0 %2436 }
 0x2e1   : > { %2518 = vst.msk [vmem:[#allocation3 + $0x88] sm:$0xff] %vm2500_vm14, %v2439_v34  ;;  %2517 = vst.msk [vmem:[#allocation3 + $0x80] sm:$0xff] %vm2500_vm14, %v2437_v41 }
 0x2e4   : > { %v2443_v48 = vpop.permute.xlu1 %2442  ;;  %v2441_v50 = vpop.permute.xlu0 %2440 }
 0x2e5   : > { %2520 = vst.msk [vmem:[#allocation3 + $0x98] sm:$0xff] %vm2500_vm14, %v2443_v48  ;;  %2519 = vst.msk [vmem:[#allocation3 + $0x90] sm:$0xff] %vm2500_vm14, %v2441_v50 }
 0x2e8   : > { %v2447_v59 = vpop.permute.xlu1 %2446  ;;  %v2445_v61 = vpop.permute.xlu0 %2444 }
 0x2e9   : > { %2522 = vst.msk [vmem:[#allocation3 + $0xa8] sm:$0xff] %vm2500_vm14, %v2447_v59  ;;  %2521 = vst.msk [vmem:[#allocation3 + $0xa0] sm:$0xff] %vm2500_vm14, %v2445_v61 }
 0x2ec   : > { %v2451_v16 = vpop.permute.xlu1 %2450  ;;  %v2449_v7 = vpop.permute.xlu0 %2448 }
 0x2ed   : > { %2524 = vst.msk [vmem:[#allocation3 + $0xb8] sm:$0xff] %vm2500_vm14, %v2451_v16  ;;  %2523 = vst.msk [vmem:[#allocation3 + $0xb0] sm:$0xff] %vm2500_vm14, %v2449_v7 }
 0x2f0   : > { %v2455_v1 = vpop.permute.xlu1 %2454  ;;  %v2453_v11 = vpop.permute.xlu0 %2452 }
 0x2f1   : > { %2526 = vst.msk [vmem:[#allocation3 + $0xc8] sm:$0xff] %vm2500_vm14, %v2455_v1  ;;  %2525 = vst.msk [vmem:[#allocation3 + $0xc0] sm:$0xff] %vm2500_vm14, %v2453_v11 }
 0x2f4   : > { %v2459_v26 = vpop.permute.xlu1 %2458  ;;  %v2457_v39 = vpop.permute.xlu0 %2456 }
 0x2f5   : > { %2528 = vst.msk [vmem:[#allocation3 + $0xd8] sm:$0xff] %vm2500_vm14, %v2459_v26  ;;  %2527 = vst.msk [vmem:[#allocation3 + $0xd0] sm:$0xff] %vm2500_vm14, %v2457_v39 }
 0x2f8   : > { %v2463_v4 = vpop.permute.xlu1 %2462  ;;  %v2461_v35 = vpop.permute.xlu0 %2460 }
 0x2f9   : > { %2530 = vst.msk [vmem:[#allocation3 + $0xe8] sm:$0xff] %vm2500_vm14, %v2463_v4  ;;  %2529 = vst.msk [vmem:[#allocation3 + $0xe0] sm:$0xff] %vm2500_vm14, %v2461_v35 }
 0x2fc   : > { %v2467_v54 = vpop.permute.xlu1 %2466  ;;  %v2465_v5 = vpop.permute.xlu0 %2464 }
 0x2fd   : > { %2532 = vst.msk [vmem:[#allocation3 + $0xf8] sm:$0xff] %vm2500_vm14, %v2467_v54  ;;  %2531 = vst.msk [vmem:[#allocation3 + $0xf0] sm:$0xff] %vm2500_vm14, %v2465_v5  ;;  %vm5785_vm14 = vcmask 64512  }
 0x300   : > { %v2632_v12 = vpop.permute.xlu1 %2631  ;;  %v2630_v10 = vpop.permute.xlu0 %2629 }
 0x301   : > { %2727 = vst.msk [vmem:[#allocation3 + $0x8] sm:$0xff] %vm2725_vm15, %v2632_v12  ;;  %2726 = vst.msk [vmem:[#allocation3] sm:$0xff] %vm2725_vm15, %v2630_v10 }
 0x304   : > { %v2636_v36 = vpop.permute.xlu1 %2635  ;;  %v2634_v20 = vpop.permute.xlu0 %2633 }
 0x305   : > { %2729 = vst.msk [vmem:[#allocation3 + $0x18] sm:$0xff] %vm2725_vm15, %v2636_v36  ;;  %2728 = vst.msk [vmem:[#allocation3 + $0x10] sm:$0xff] %vm2725_vm15, %v2634_v20 }
 0x308   : > { %v2640_v2 = vpop.permute.xlu1 %2639  ;;  %v2791_v56 = vld [vmem:[#allocation3 + $0x8] sm:$0xff]  ;;  %v2638_v62 = vpop.permute.xlu0 %2637  ;;  %v2790_v24 = vld [vmem:[#allocation3] sm:$0xff] }
 0x309   : > { %2731 = vst.msk [vmem:[#allocation3 + $0x28] sm:$0xff] %vm2725_vm15, %v2640_v2  ;;  %2730 = vst.msk [vmem:[#allocation3 + $0x20] sm:$0xff] %vm2725_vm15, %v2638_v62  ;;  %8297 = vmatprep.mubr.msk.f32.mxu0 %vm2825_vm1, %v2790_v24 }
 0x30a   : > { %8298 = vmatmul.mubr.msk.f32.vlgmr.msra.gmra.mrb[0].mxu0 %vm2825_vm1, %v2791_v56 }
 0x30c   : > { %v2644_v27 = vpop.permute.xlu1 %2643  ;;  %v2793_v51 = vld [vmem:[#allocation3 + $0x18] sm:$0xff]  ;;  %v2642_v53 = vpop.permute.xlu0 %2641  ;;  %v2792_v33 = vld [vmem:[#allocation3 + $0x10] sm:$0xff] }
 0x30d   : > { %2733 = vst.msk [vmem:[#allocation3 + $0x38] sm:$0xff] %vm2725_vm15, %v2644_v27  ;;  %2732 = vst.msk [vmem:[#allocation3 + $0x30] sm:$0xff] %vm2725_vm15, %v2642_v53  ;;  %8300 = vmatprep.mubr.msk.f32.mxu0 %vm2825_vm1, %v2792_v33 }
 0x30e   : > { %8301 = vmatmul.mubr.msk.f32.gmra.mrb[2].mxu0 %vm2825_vm1, %v2793_v51 }
 0x310   : > { %v2648_v34 = vpop.permute.xlu1 %2647  ;;  %v2795_v41 = vld [vmem:[#allocation3 + $0x28] sm:$0xff]  ;;  %v2646_v48 = vpop.permute.xlu0 %2645  ;;  %v2794_v50 = vld [vmem:[#allocation3 + $0x20] sm:$0xff] }
 0x311   : > { %2735 = vst.msk [vmem:[#allocation3 + $0x48] sm:$0xff] %vm2725_vm15, %v2648_v34  ;;  %2734 = vst.msk [vmem:[#allocation3 + $0x40] sm:$0xff] %vm2725_vm15, %v2646_v48  ;;  %8303 = vmatprep.mubr.msk.f32.mxu0 %vm2825_vm1, %v2794_v50 }
 0x312   : > { %8304 = vmatmul.mubr.msk.f32.gmra.mrb[4].mxu0 %vm2825_vm1, %v2795_v41 }
 0x314   : > { %v2652_v59 = vpop.permute.xlu1 %2651  ;;  %v2797_v61 = vld [vmem:[#allocation3 + $0x38] sm:$0xff]  ;;  %v2650_v16 = vpop.permute.xlu0 %2649  ;;  %v2796_v7 = vld [vmem:[#allocation3 + $0x30] sm:$0xff] }
 0x315   : > { %2737 = vst.msk [vmem:[#allocation3 + $0x58] sm:$0xff] %vm2725_vm15, %v2652_v59  ;;  %2736 = vst.msk [vmem:[#allocation3 + $0x50] sm:$0xff] %vm2725_vm15, %v2650_v16  ;;  %8306 = vmatprep.mubr.msk.f32.mxu0 %vm2825_vm1, %v2796_v7 }
 0x316   : > { %8307 = vmatmul.mubr.msk.f32.gmra.mrb[6].mxu0 %vm2825_vm1, %v2797_v61 }
 0x318   : > { %v2656_v1 = vpop.permute.xlu1 %2655  ;;  %v2799_v11 = vld [vmem:[#allocation3 + $0x48] sm:$0xff]  ;;  %v2654_v26 = vpop.permute.xlu0 %2653  ;;  %v2798_v39 = vld [vmem:[#allocation3 + $0x40] sm:$0xff] }
 0x319   : > { %2739 = vst.msk [vmem:[#allocation3 + $0x68] sm:$0xff] %vm2725_vm15, %v2656_v1  ;;  %2738 = vst.msk [vmem:[#allocation3 + $0x60] sm:$0xff] %vm2725_vm15, %v2654_v26  ;;  %8309 = vmatprep.mubr.msk.f32.mxu0 %vm2825_vm1, %v2798_v39 }
 0x31a   : > { %8310 = vmatmul.mubr.msk.f32.gmra.mrb[8].mxu0 %vm2825_vm1, %v2799_v11 }
 0x31c   : > { %v2660_v4 = vpop.permute.xlu1 %2659  ;;  %v2801_v35 = vld [vmem:[#allocation3 + $0x58] sm:$0xff]  ;;  %v2658_v54 = vpop.permute.xlu0 %2657  ;;  %v2800_v5 = vld [vmem:[#allocation3 + $0x50] sm:$0xff] }
 0x31d   : > { %2741 = vst.msk [vmem:[#allocation3 + $0x78] sm:$0xff] %vm2725_vm15, %v2660_v4  ;;  %2740 = vst.msk [vmem:[#allocation3 + $0x70] sm:$0xff] %vm2725_vm15, %v2658_v54  ;;  %8312 = vmatprep.mubr.msk.f32.mxu0 %vm2825_vm1, %v2800_v5 }
 0x31e   : > { %8313 = vmatmul.mubr.msk.f32.gmra.mrb[10].mxu0 %vm2825_vm1, %v2801_v35 }
 0x320   : > { %v2664_v12 = vpop.permute.xlu1 %2663  ;;  %v2803_v10 = vld [vmem:[#allocation3 + $0x68] sm:$0xff]  ;;  %v2662_v36 = vpop.permute.xlu0 %2661  ;;  %v2802_v20 = vld [vmem:[#allocation3 + $0x60] sm:$0xff] }
 0x321   : > { %2743 = vst.msk [vmem:[#allocation3 + $0x88] sm:$0xff] %vm2725_vm15, %v2664_v12  ;;  %2742 = vst.msk [vmem:[#allocation3 + $0x80] sm:$0xff] %vm2725_vm15, %v2662_v36  ;;  %8315 = vmatprep.mubr.msk.f32.mxu0 %vm2825_vm1, %v2802_v20 }
 0x322   : > { %8316 = vmatmul.mubr.msk.f32.gmra.mrb[12].mxu0 %vm2825_vm1, %v2803_v10 }
 0x324   : > { %v2668_v2 = vpop.permute.xlu1 %2667  ;;  %v2805_v56 = vld [vmem:[#allocation3 + $0x78] sm:$0xff]  ;;  %v2666_v62 = vpop.permute.xlu0 %2665  ;;  %v2804_v24 = vld [vmem:[#allocation3 + $0x70] sm:$0xff] }
 0x325   : > { %2745 = vst.msk [vmem:[#allocation3 + $0x98] sm:$0xff] %vm2725_vm15, %v2668_v2  ;;  %2744 = vst.msk [vmem:[#allocation3 + $0x90] sm:$0xff] %vm2725_vm15, %v2666_v62  ;;  %8318 = vmatprep.mubr.msk.f32.mxu0 %vm2825_vm1, %v2804_v24 }
 0x326   : > { %8319 = vmatmul.mubr.msk.f32.gmra.mrb[14].mxu0 %vm2825_vm1, %v2805_v56 }
 0x328   : > { %v2672_v27 = vpop.permute.xlu1 %2671  ;;  %v2807_v51 = vld [vmem:[#allocation3 + $0x88] sm:$0xff]  ;;  %v2670_v53 = vpop.permute.xlu0 %2669  ;;  %v2806_v33 = vld [vmem:[#allocation3 + $0x80] sm:$0xff] }
 0x329   : > { %2747 = vst.msk [vmem:[#allocation3 + $0xa8] sm:$0xff] %vm2725_vm15, %v2672_v27  ;;  %2746 = vst.msk [vmem:[#allocation3 + $0xa0] sm:$0xff] %vm2725_vm15, %v2670_v53  ;;  %8321 = vmatprep.mubr.msk.f32.mxu0 %vm2825_vm1, %v2806_v33  ;;  %v14263_v27 = vmov 32  }
 0x32a   : > { %8322 = vmatmul.mubr.msk.f32.gmra.mrb[16].mxu0 %vm2825_vm1, %v2807_v51  ;;  %8567 = vset.pattern.permute.xlu1 %v14263_v27 }
 0x32c   : > { %v2676_v34 = vpop.permute.xlu1 %2675  ;;  %v2809_v41 = vld [vmem:[#allocation3 + $0x98] sm:$0xff]  ;;  %v2674_v48 = vpop.permute.xlu0 %2673  ;;  %v2808_v50 = vld [vmem:[#allocation3 + $0x90] sm:$0xff] }
 0x32d   : > { %2749 = vst.msk [vmem:[#allocation3 + $0xb8] sm:$0xff] %vm2725_vm15, %v2676_v34  ;;  %2748 = vst.msk [vmem:[#allocation3 + $0xb0] sm:$0xff] %vm2725_vm15, %v2674_v48  ;;  %8324 = vmatprep.mubr.msk.f32.mxu0 %vm2825_vm1, %v2808_v50 }
 0x32e   : > { %8325 = vmatmul.mubr.msk.f32.gmra.mrb[18].mxu0 %vm2825_vm1, %v2809_v41 }
 0x330   : > { %v2680_v59 = vpop.permute.xlu1 %2679  ;;  %v2811_v61 = vld [vmem:[#allocation3 + $0xa8] sm:$0xff]  ;;  %v2678_v16 = vpop.permute.xlu0 %2677  ;;  %v2810_v7 = vld [vmem:[#allocation3 + $0xa0] sm:$0xff] }
 0x331   : > { %2751 = vst.msk [vmem:[#allocation3 + $0xc8] sm:$0xff] %vm2725_vm15, %v2680_v59  ;;  %2750 = vst.msk [vmem:[#allocation3 + $0xc0] sm:$0xff] %vm2725_vm15, %v2678_v16  ;;  %8327 = vmatprep.mubr.msk.f32.mxu0 %vm2825_vm1, %v2810_v7 }
 0x332   : > { %8328 = vmatmul.mubr.msk.f32.gmra.mrb[20].mxu0 %vm2825_vm1, %v2811_v61 }
 0x334   : > { %v2684_v1 = vpop.permute.xlu1 %2683  ;;  %v2813_v11 = vld [vmem:[#allocation3 + $0xb8] sm:$0xff]  ;;  %v2682_v26 = vpop.permute.xlu0 %2681  ;;  %v2812_v39 = vld [vmem:[#allocation3 + $0xb0] sm:$0xff] }
 0x335   : > { %2753 = vst.msk [vmem:[#allocation3 + $0xd8] sm:$0xff] %vm2725_vm15, %v2684_v1  ;;  %2752 = vst.msk [vmem:[#allocation3 + $0xd0] sm:$0xff] %vm2725_vm15, %v2682_v26  ;;  %8330 = vmatprep.mubr.msk.f32.mxu0 %vm2825_vm1, %v2812_v39 }
 0x336   : > { %8331 = vmatmul.mubr.msk.f32.gmra.mrb[22].mxu0 %vm2825_vm1, %v2813_v11 }
 0x338   : > { %v2688_v4 = vpop.permute.xlu1 %2687  ;;  %v2815_v35 = vld [vmem:[#allocation3 + $0xc8] sm:$0xff]  ;;  %v2686_v54 = vpop.permute.xlu0 %2685  ;;  %v2814_v5 = vld [vmem:[#allocation3 + $0xc0] sm:$0xff] }
 0x339   : > { %2755 = vst.msk [vmem:[#allocation3 + $0xe8] sm:$0xff] %vm2725_vm15, %v2688_v4  ;;  %2754 = vst.msk [vmem:[#allocation3 + $0xe0] sm:$0xff] %vm2725_vm15, %v2686_v54  ;;  %8333 = vmatprep.mubr.msk.f32.mxu0 %vm2825_vm1, %v2814_v5 }
 0x33a   : > { %8334 = vmatmul.mubr.msk.f32.gmra.mrb[24].mxu0 %vm2825_vm1, %v2815_v35 }
 0x33c   : > { %v2692_v12 = vpop.permute.xlu1 %2691  ;;  %v2817_v10 = vld [vmem:[#allocation3 + $0xd8] sm:$0xff]  ;;  %v2690_v36 = vpop.permute.xlu0 %2689  ;;  %v2816_v20 = vld [vmem:[#allocation3 + $0xd0] sm:$0xff] }
 0x33d   : > { %2757 = vst.msk [vmem:[#allocation3 + $0xf8] sm:$0xff] %vm2725_vm15, %v2692_v12  ;;  %2756 = vst.msk [vmem:[#allocation3 + $0xf0] sm:$0xff] %vm2725_vm15, %v2690_v36  ;;  %8336 = vmatprep.mubr.msk.f32.mxu0 %vm2825_vm1, %v2816_v20  ;;  %vm5332_vm15 = vcmask 572712  }
 0x33e   : > { %8337 = vmatmul.mubr.msk.f32.gmra.mrb[26].mxu0 %vm2825_vm1, %v2817_v10 }
 0x340   : > { %v2819_v2 = vld [vmem:[#allocation3 + $0xe8] sm:$0xff]  ;;  %v2818_v56 = vld [vmem:[#allocation3 + $0xe0] sm:$0xff] }
 0x341   : > { %8339 = vmatprep.mubr.msk.f32.mxu0 %vm2825_vm1, %v2818_v56 }
 0x342   : > { %8340 = vmatmul.mubr.msk.f32.gmra.mrb[28].mxu0 %vm2825_vm1, %v2819_v2 }
 0x344   : > { %v2821_v62 = vld [vmem:[#allocation3 + $0xf8] sm:$0xff]  ;;  %v2820_v24 = vld [vmem:[#allocation3 + $0xf0] sm:$0xff] }
 0x345   : > { %8342 = vmatprep.mubr.msk.f32.mxu0 %vm2825_vm1, %v2820_v24 }
 0x346   : > { %8343 = vmatmul.mubr.msk.f32.gmra.mrb[30].mxu0 %vm2825_vm1, %v2821_v62  ;;  %vm5558_vm1 = vcmask 843312  }
 0x3dd   : > { %v10731_v51 = vpop.f32.mrb[0].mxu0 }
 0x3de   : > { %14438 = vst [vmem:[#allocation16_spill] sm:$0xff] %v10731_v51  ;;  %v3152_v53 = vadd.f32 1e-08, %v10731_v51  ;;  %v10734_v33 = vpop.f32.mrb[1].mxu0 }
 0x3df   : > { %14439 = vst [vmem:[#allocation18_spill] sm:$0xff] %v10734_v33 }
 0x3e0   : > { %8604 = vrcp.f32 %v3152_v53 }
 0x3e1   : > { %v10736_v34 = vpop.f32.mrb[2].mxu0 }
 0x3e2   : > { %14440 = vst [vmem:[#allocation19_spill] sm:$0xff] %v10736_v34  ;;  %v10738_v41 = vpop.f32.mrb[3].mxu0 }
 0x3e3   : > { %14441 = vst [vmem:[#allocation20_spill] sm:$0xff] %v10738_v41  ;;  %v3153_v48 = vadd.f32 1e-08, %v10738_v41 }
 0x3e5   : > { %8606 = vrcp.f32 %v3153_v48  ;;  %v10741_v50 = vpop.f32.mrb[4].mxu0 }
 0x3e6   : > { %14442 = vst [vmem:[#allocation21_spill] sm:$0xff] %v10741_v50  ;;  %v10743_v59 = vpop.f32.mrb[5].mxu0 }
 0x3e7   : > { %14443 = vst [vmem:[#allocation22_spill] sm:$0xff] %v10743_v59  ;;  %v3155_v61 = vadd.f32 1e-08, %v10743_v59  ;;  %v14470_v59 = vld [vmem:[#allocation7_spill] sm:$0xff] }
 0x3e9   : > { %8608 = vrcp.f32 %v3155_v61  ;;  %v10746_v16 = vpop.f32.mrb[6].mxu0 }
 0x3ea   : > { %14444 = vst [vmem:[#allocation23_spill] sm:$0xff] %v10746_v16  ;;  %v8605_v7 = vpop.eup %8604  ;;  %v10748_v1 = vpop.f32.mrb[7].mxu0  ;;  %v10850_v16 = vld [vmem:[#allocation2 + $0x71] sm:$0xff] }
 0x3eb   : > { %14445 = vst [vmem:[#allocation24_spill] sm:$0xff] %v10748_v1  ;;  %v3157_v11 = vadd.f32 1e-08, %v10748_v1  ;;  %3222 = vperm.xlu1 %8567, %v8605_v7  }
 0x3ed   : > { %8610 = vrcp.f32 %v3157_v11  ;;  %v10751_v26 = vpop.f32.mrb[8].mxu0 }
 0x3ee   : > { %14446 = vst [vmem:[#allocation25_spill] sm:$0xff] %v10751_v26  ;;  %v10753_v39 = vpop.f32.mrb[9].mxu0  ;;  %v10845_v26 = vld [vmem:[#allocation2 + $0x49] sm:$0xff] }
 0x3ef   : > { %14447 = vst [vmem:[#allocation26_spill] sm:$0xff] %v10753_v39  ;;  %v8607_v4 = vpop.eup %8606  ;;  %v3159_v35 = vadd.f32 1e-08, %v10753_v39 }
 0x3f0   : > { %3227 = vperm.xlu1 %8567, %v8607_v4  }
 0x3f1   : > { %8612 = vrcp.f32 %v3159_v35  ;;  %v10756_v54 = vpop.f32.mrb[10].mxu0 }
 0x3f2   : > { %14448 = vst [vmem:[#allocation27_spill] sm:$0xff] %v10756_v54  ;;  %v10758_v5 = vpop.f32.mrb[11].mxu0 }
 0x3f3   : > { %14449 = vst [vmem:[#allocation28_spill] sm:$0xff] %v10758_v5  ;;  %v8609_v12 = vpop.eup %8608  ;;  %v3161_v10 = vadd.f32 1e-08, %v10758_v5 }
 0x3f4   : > { %3237 = vperm.xlu1 %8567, %v8609_v12  }
 0x3f5   : > { %8614 = vrcp.f32 %v3161_v10  ;;  %v10761_v36 = vpop.f32.mrb[12].mxu0 }
 0x3f6   : > { %14450 = vst [vmem:[#allocation29_spill] sm:$0xff] %v10761_v36  ;;  %v10763_v20 = vpop.f32.mrb[13].mxu0  ;;  %v8808_v36 = vld [vmem:[#allocation2 + $0x68] sm:$0xff] }
 0x3f7   : > { %14451 = vst [vmem:[#allocation30_spill] sm:$0xff] %v10763_v20  ;;  %v8611_v2 = vpop.eup %8610  ;;  %v3163_v56 = vadd.f32 1e-08, %v10763_v20  ;;  %v1188_v54 = vmax.f32 %v9751_v52, %v8808_v36 }
 0x3f8   : > { %3247 = vperm.xlu1 %8567, %v8611_v2  }
 0x3f9   : > { %8616 = vrcp.f32 %v3163_v56  ;;  %v10766_v62 = vpop.f32.mrb[14].mxu0 }
 0x3fa   : > { %14452 = vst [vmem:[#allocation31_spill] sm:$0xff] %v10766_v62  ;;  %v10768_v24 = vpop.f32.mrb[15].mxu0 }
 0x3fb   : > { %14453 = vst [vmem:[#allocation32_spill] sm:$0xff] %v10768_v24  ;;  %v8613_v53 = vpop.eup %8612  ;;  %v3165_v48 = vadd.f32 1e-08, %v10768_v24 }
 0x3fc   : > { %3257 = vperm.xlu1 %8567, %v8613_v53  }
 0x3fd   : > { %8618 = vrcp.f32 %v3165_v48  ;;  %v10771_v61 = vpop.f32.mrb[16].mxu0 }
 0x3fe   : > { %14454 = vst [vmem:[#allocation33_spill] sm:$0xff] %v10771_v61  ;;  %v10773_v7 = vpop.f32.mrb[17].mxu0  ;;  %v10841_v61 = vld [vmem:[#allocation2 + $0x51] sm:$0xff] }
 0x3ff   : > { %14455 = vst [vmem:[#allocation34_spill] sm:$0xff] %v10773_v7  ;;  %v8615_v11 = vpop.eup %8614  ;;  %v3167_v4 = vadd.f32 1e-08, %v10773_v7 }
 0x400   : > { %3267 = vperm.xlu1 %8567, %v8615_v11  }
 0x401   : > { %8620 = vrcp.f32 %v3167_v4  ;;  %v10776_v35 = vpop.f32.mrb[18].mxu0 }
 0x402   : > { %14456 = vst [vmem:[#allocation35_spill] sm:$0xff] %v10776_v35  ;;  %v10778_v12 = vpop.f32.mrb[19].mxu0 }
 0x403   : > { %14457 = vst [vmem:[#allocation36_spill] sm:$0xff] %v10778_v12  ;;  %v8617_v10 = vpop.eup %8616  ;;  %v3169_v2 = vadd.f32 1e-08, %v10778_v12 }
 0x404   : > { %3277 = vperm.xlu1 %8567, %v8617_v10  }
 0x405   : > { %8622 = vrcp.f32 %v3169_v2  ;;  %v10781_v56 = vpop.f32.mrb[20].mxu0 }
 0x406   : > { %14458 = vst [vmem:[#allocation37_spill] sm:$0xff] %v10781_v56  ;;  %v10783_v53 = vpop.f32.mrb[21].mxu0  ;;  %v8806_v56 = vld [vmem:[#allocation2 + $0x29] sm:$0xff] }
 0x407   : > { %14459 = vst [vmem:[#allocation38_spill] sm:$0xff] %v10783_v53  ;;  %v8619_v48 = vpop.eup %8618  ;;  %v3171_v27 = vadd.f32 1e-08, %v10783_v53 }
 0x408   : > { %3287 = vperm.xlu1 %8567, %v8619_v48  }
 0x409   : > { %8624 = vrcp.f32 %v3171_v27  ;;  %v10786_v11 = vpop.f32.mrb[22].mxu0 }
 0x40a   : > { %14460 = vst [vmem:[#allocation39_spill] sm:$0xff] %v10786_v11  ;;  %v10788_v4 = vpop.f32.mrb[23].mxu0  ;;  %v8802_v11 = vld [vmem:[#allocation2 + $0x48] sm:$0xff] }
 0x40b   : > { %14461 = vst [vmem:[#allocation40_spill] sm:$0xff] %v10788_v4  ;;  %v8621_v7 = vpop.eup %8620  ;;  %v3173_v24 = vadd.f32 1e-08, %v10788_v4 }
 0x40c   : > { %3297 = vperm.xlu1 %8567, %v8621_v7  }
 0x40d   : > { %8626 = vrcp.f32 %v3173_v24  ;;  %v10791_v10 = vpop.f32.mrb[24].mxu0 }
 0x40e   : > { %14462 = vst [vmem:[#allocation41_spill] sm:$0xff] %v10791_v10  ;;  %v10793_v2 = vpop.f32.mrb[25].mxu0  ;;  %v8801_v10 = vld [vmem:[#allocation2 + $0x50] sm:$0xff] }
 0x40f   : > { %14463 = vst [vmem:[#allocation42_spill] sm:$0xff] %v10793_v2  ;;  %v8623_v12 = vpop.eup %8622  ;;  %v3175_v20 = vadd.f32 1e-08, %v10793_v2 }
 0x410   : > { %3307 = vperm.xlu1 %8567, %v8623_v12  }
 0x411   : > { %8628 = vrcp.f32 %v3175_v20  ;;  %v10796_v48 = vpop.f32.mrb[26].mxu0 }
 0x412   : > { %14464 = vst [vmem:[#allocation43_spill] sm:$0xff] %v10796_v48  ;;  %v10798_v27 = vpop.f32.mrb[27].mxu0 }
 0x413   : > { %14465 = vst [vmem:[#allocation44_spill] sm:$0xff] %v10798_v27  ;;  %v8625_v53 = vpop.eup %8624  ;;  %v3177_v5 = vadd.f32 1e-08, %v10798_v27 }
 0x414   : > { %3317 = vperm.xlu1 %8567, %v8625_v53  }
 0x415   : > { %8630 = vrcp.f32 %v3177_v5  ;;  %v10801_v7 = vpop.f32.mrb[28].mxu0 }
 0x416   : > { %14466 = vst [vmem:[#allocation45_spill] sm:$0xff] %v10801_v7  ;;  %v10803_v24 = vpop.f32.mrb[29].mxu0  ;;  %v8798_v7 = vld [vmem:[#allocation2 + $0x11] sm:$0xff] }
 0x417   : > { %14467 = vst [vmem:[#allocation46_spill] sm:$0xff] %v10803_v24  ;;  %v8627_v4 = vpop.eup %8626  ;;  %v3179_v39 = vadd.f32 1e-08, %v10803_v24 }
 0x418   : > { %3327 = vperm.xlu1 %8567, %v8627_v4   ;;  %v9075_v4 = vmov 2  }
 0x419   : > { %8632 = vrcp.f32 %v3179_v39  ;;  %v10806_v12 = vpop.f32.mrb[30].mxu0  ;;  %8568 = vset.pattern.permute.xlu0 %v9075_v4 }
 0x41a   : > { %14468 = vst [vmem:[#allocation47_spill] sm:$0xff] %v10806_v12  ;;  %v10808_v20 = vpop.f32.mrb[31].mxu0  ;;  %v14480_v12 = vld [vmem:[#allocation9_spill] sm:$0xff] }
 0x41b   : > { %14469 = vst [vmem:[#allocation48_spill] sm:$0xff] %v10808_v20  ;;  %v8629_v2 = vpop.eup %8628  ;;  %v3181_v1 = vadd.f32 1e-08, %v10808_v20  ;;  %v14478_v20 = vld [vmem:[#allocation8_spill] sm:$0xff] }
 0x41c   : > { %3337 = vperm.xlu1 %8567, %v8629_v2  }
 0x41d   : > { %8634 = vrcp.f32 %v3181_v1 }
 0x41f   : > { %v8631_v53 = vpop.eup %8630 }
 0x420   : > { %3347 = vperm.xlu1 %8567, %v8631_v53  }
 0x423   : > { %v8633_v5 = vpop.eup %8632 }
 0x424   : > { %3357 = vperm.xlu1 %8567, %v8633_v5  }
 0x427   : > { %v8635_v27 = vpop.eup %8634 }
 0x428   : > { %3367 = vperm.xlu1 %8567, %v8635_v27   ;;  %v8796_v27 = vld [vmem:[#allocation2 + $0x10] sm:$0xff] }
 0x42c   : > { %3479 = vrot.lane.b32.xlu1 %v14470_v59, %s9066_s16  ;;  %v1183_v59 = vmax.f32 %v14478_v20, %v8796_v27  ;;  %v1186_v20 = vmax.f32 %v9733_v38, %v8802_v11  ;;  %v8803_v27 = vld [vmem:[#allocation2 + $0x9] sm:$0xff]  ;;  %s9081_s16 = smov 37  }
 0x42d   : > { %8569 = vset.pattern.permute.xlu1 %v9075_v4  ;;  %v8797_v4 = vld [vmem:[#allocation2 + $0x8] sm:$0xff] }
 0x46a   : > { %v10813_v39 = vpop.permute.xlu1 %3222 }
 0x46b   : > { %14471 = vst [vmem:[#allocation7_spill] sm:$0xff] %v10813_v39  ;;  %v1182_v39 = vmax.f32 %v14480_v12, %v8797_v4  ;;  %v8804_v4 = vld [vmem:[#allocation2 + $0x70] sm:$0xff] }
 0x46f   : > { %v10815_v24 = vpop.permute.xlu1 %3227 }
 0x470   : > { %14472 = vst [vmem:[#allocation49_spill] sm:$0xff] %v10815_v24  ;;  %v1408_v24 = vmax.f32 %v1183_v59, %v8798_v7  ;;  %v1189_v7 = vmax.f32 %v9747_v46, %v8804_v4 }
 0x472   : > { %v1633_v12 = vmax.f32 %v1408_v24, %v9714_v19 }
 0x473   : > { %v10817_v41 = vpop.permute.xlu1 %3237 }
 0x474   : > { %14473 = vst [vmem:[#allocation50_spill] sm:$0xff] %v10817_v41  ;;  %v8799_v41 = vld [vmem:[#allocation2 + $0x30] sm:$0xff] }
 0x477   : > { %v10819_v2 = vpop.permute.xlu1 %3247 }
 0x478   : > { %14474 = vst [vmem:[#allocation51_spill] sm:$0xff] %v10819_v2  ;;  %v1185_v2 = vmax.f32 %v9714_v19, %v8799_v41  ;;  %v1411_v19 = vmax.f32 %v1186_v20, %v10845_v26  ;;  %v10858_v20 = vld [vmem:[#allocation2 + $0x69] sm:$0xff] }
 0x47b   : > { %v10821_v1 = vpop.permute.xlu1 %3257 }
 0x47c   : > { %14475 = vst [vmem:[#allocation52_spill] sm:$0xff] %v10821_v1  ;;  %v8800_v1 = vld [vmem:[#allocation2 + $0x28] sm:$0xff] }
 0x47f   : > { %v10823_v53 = vpop.permute.xlu1 %3267 }
 0x480   : > { %14476 = vst [vmem:[#allocation53_spill] sm:$0xff] %v10823_v53  ;;  %v1184_v53 = vmax.f32 %v9723_v25, %v8800_v1 }
 0x482   : > { %v1409_v35 = vmax.f32 %v1184_v53, %v8806_v56  ;;  %v1414_v53 = vmax.f32 %v1189_v7, %v10850_v16  ;;  %v10863_v7 = vld [vmem:[#allocation2 + $0x91] sm:$0xff] }
 0x483   : > { %v10825_v5 = vpop.permute.xlu1 %3277 }
 0x484   : > { %14477 = vst [vmem:[#allocation54_spill] sm:$0xff] %v10825_v5  ;;  %v1187_v5 = vmax.f32 %v9729_v32, %v8801_v10  ;;  %v1634_v34 = vmax.f32 %v1409_v35, %v9733_v38 }
 0x486   : > { %v1412_v62 = vmax.f32 %v1187_v5, %v10841_v61 }
 0x487   : > { %v10828_v51 = vpop.permute.xlu1 %3287 }
 0x488   : > { %14479 = vst [vmem:[#allocation8_spill] sm:$0xff] %v10828_v51  ;;  %v1407_v51 = vmax.f32 %v1182_v39, %v8803_v27  ;;  %v8810_v39 = vld [vmem:[#allocation2 + $0x30] sm:$0xff]  ;;  %v1637_v33 = vmax.f32 %v1412_v62, %v9747_v46 }
 0x489   : > { %v1858_v27 = vmax.f32 %v1633_v12, %v8810_v39  ;;  %v8816_v46 = vld [vmem:[#allocation2 + $0xb0] sm:$0xff] }
 0x48a   : > { %v1632_v24 = vmax.f32 %v1407_v51, %v9723_v25  ;;  %v1413_v25 = vmax.f32 %v1188_v54, %v10858_v20  ;;  %v1636_v51 = vmax.f32 %v1411_v19, %v9751_v52  ;;  %v1193_v62 = vmax.f32 %v9783_v14, %v8816_v46  ;;  %v8817_v19 = vld [vmem:[#allocation2 + $0x4f] sm:$0xff] }
 0x48b   : > { %v10831_v48 = vpop.permute.xlu1 %3297  ;;  %v1859_v54 = vmax.f32 %v1634_v34, %v8802_v11  ;;  %v10878_v34 = vld [vmem:[#allocation2 + $0xb1] sm:$0xff] }
 0x48c   : > { %14481 = vst [vmem:[#allocation9_spill] sm:$0xff] %v10831_v48  ;;  %v8805_v48 = vld [vmem:[#allocation2 + $0x31] sm:$0xff]  ;;  %v1857_v12 = vmax.f32 %v1632_v24, %v8800_v1  ;;  %v1638_v52 = vmax.f32 %v1413_v25, %v9769_v0  ;;  %v1418_v0 = vmax.f32 %v1193_v62, %v10878_v34  ;;  %v10886_v25 = vld [vmem:[#allocation2 + $0xa9] sm:$0xff] }
 0x48d   : > { %v1410_v41 = vmax.f32 %v1185_v2, %v8805_v48  ;;  %v2083_v39 = vmax.f32 %v1858_v27, %v8805_v48  ;;  %v1861_v48 = vmax.f32 %v1636_v51, %v8808_v36  ;;  %v8818_v27 = vld [vmem:[#allocation2 + $0xa8] sm:$0xff]  ;;  %v2084_v36 = vmax.f32 %v1859_v54, %v10845_v26 }
 0x48e   : > { %v2082_v1 = vmax.f32 %v1857_v12, %v8806_v56  ;;  %v1192_v43 = vmax.f32 %v9787_v21, %v8818_v27  ;;  %v8821_v56 = vld [vmem:[#allocation2 + $0xd0] sm:$0xff] }
 0x48f   : > { %v10839_v59 = vpop.permute.xlu1 %3307  ;;  %v1635_v5 = vmax.f32 %v1410_v41, %v9729_v32  ;;  %v1639_v32 = vmax.f32 %v1414_v53, %v9765_v58  ;;  %v1862_v41 = vmax.f32 %v1637_v33, %v8804_v4  ;;  %v2309_v24 = vmax.f32 %v2083_v39, %v8817_v19  ;;  %v8832_v19 = vld [vmem:[#allocation2 + $0x48] sm:$0xff] }
 0x490   : > { %14482 = vst [vmem:[#allocation55_spill] sm:$0xff] %v10839_v59  ;;  %v8811_v59 = vld [vmem:[#allocation2 + $0x90] sm:$0xff]  ;;  %v1195_v11 = vmax.f32 %v9801_v22, %v8821_v56  ;;  %v1863_v4 = vmax.f32 %v1638_v52, %v8814_v13  ;;  %v1417_v51 = vmax.f32 %v1192_v43, %v10886_v25 }
 0x491   : > { %v1191_v2 = vmax.f32 %v9765_v58, %v8811_v59  ;;  %v1860_v35 = vmax.f32 %v1635_v5, %v8801_v10  ;;  %v2087_v10 = vmax.f32 %v1862_v41, %v10850_v16  ;;  %v1643_v16 = vmax.f32 %v1418_v0, %v9801_v22  ;;  %v8828_v41 = vld [vmem:[#allocation2 + $0xf0] sm:$0xff] }
 0x492   : > { %v1197_v52 = vmax.f32 %v9819_v47, %v8828_v41  ;;  %v10896_v43 = vld [vmem:[#allocation2 + $0xd1] sm:$0xff] }
 0x493   : > { %v10853_v50 = vpop.permute.xlu1 %3317  ;;  %v2085_v33 = vmax.f32 %v1860_v35, %v10841_v61  ;;  %v8827_v35 = vld [vmem:[#allocation2 + $0x67] sm:$0xff] }
 0x494   : > { %14483 = vst [vmem:[#allocation56_spill] sm:$0xff] %v10853_v50  ;;  %v1416_v50 = vmax.f32 %v1191_v2, %v10863_v7  ;;  %v10872_v2 = vld [vmem:[#allocation2 + $0x89] sm:$0xff]  ;;  %v2310_v54 = vmax.f32 %v2084_v36, %v8827_v35 }
 0x495   : > { %v1415_v58 = vmax.f32 %v1190_v55, %v10872_v2  ;;  %v2086_v55 = vmax.f32 %v1861_v48, %v10858_v20  ;;  %v8826_v20 = vld [vmem:[#allocation2 + $0x6f] sm:$0xff]  ;;  %v8831_v48 = vld [vmem:[#allocation2 + $0x87] sm:$0xff] }
 0x496   : > { %v1641_v53 = vmax.f32 %v1416_v50, %v9783_v14  ;;  %v8822_v14 = vld [vmem:[#allocation2 + $0x47] sm:$0xff]  ;;  %v2311_v62 = vmax.f32 %v2085_v33, %v8826_v20  ;;  %v8833_v33 = vld [vmem:[#allocation2 + $0xaf] sm:$0xff] }
 0x497   : > { %v10867_v38 = vpop.permute.xlu1 %3327  ;;  %v2308_v50 = vmax.f32 %v2082_v1, %v8822_v14  ;;  %v1640_v61 = vmax.f32 %v1415_v58, %v9787_v21  ;;  %v1420_v21 = vmax.f32 %v1195_v11, %v10896_v43  ;;  %v2312_v1 = vmax.f32 %v2086_v55, %v8831_v48  ;;  %v10905_v11 = vld [vmem:[#allocation2 + $0xc9] sm:$0xff] }
 0x498   : > { %14484 = vst [vmem:[#allocation57_spill] sm:$0xff] %v10867_v38  ;;  %v1864_v38 = vmax.f32 %v1639_v32, %v8811_v59  ;;  %v8823_v59 = vld [vmem:[#allocation2 + $0x50] sm:$0xff]  ;;  %v1866_v12 = vmax.f32 %v1641_v53, %v8816_v46  ;;  %v8825_v32 = vld [vmem:[#allocation2 + $0xc8] sm:$0xff]  ;;  %v1642_v58 = vmax.f32 %v1417_v51, %v9805_v40 }
 0x499   : > { %v2534_v5 = vmax.f32 %v2309_v24, %v8823_v59  ;;  %v1194_v13 = vmax.f32 %v9805_v40, %v8825_v32  ;;  %v8830_v46 = vld [vmem:[#allocation2 + $0x8f] sm:$0xff]  ;;  %v2533_v24 = vmax.f32 %v2308_v50, %v8832_v19  ;;  %v1865_v53 = vmax.f32 %v1640_v61, %v8818_v27 }
 0x49a   : > { %v2089_v26 = vmax.f32 %v1864_v38, %v10863_v7  ;;  %v2313_v7 = vmax.f32 %v2087_v10, %v8830_v46  ;;  %v2088_v38 = vmax.f32 %v1863_v4, %v10872_v2  ;;  %v2091_v0 = vmax.f32 %v1866_v12, %v10878_v34  ;;  %v8835_v4 = vld [vmem:[#allocation2 + $0x70] sm:$0xff]  ;;  %v8836_v59 = vld [vmem:[#allocation2 + $0x68] sm:$0xff] }
 0x49b   : > { %v10876_v30 = vpop.permute.xlu1 %3337  ;;  %v2759_v22 = vmax.f32 %v2534_v5, %v10548_v9  ;;  %v1419_v10 = vmax.f32 %v1194_v13, %v10905_v11  ;;  %v1868_v2 = vmax.f32 %v1643_v16, %v8821_v56  ;;  %v2536_v55 = vmax.f32 %v2311_v62, %v8835_v4  ;;  %v8837_v20 = vld [vmem:[#allocation2 + $0xe8] sm:$0xff]  ;;  %v10909_v40 = vld [vmem:[#allocation2 + $0xf1] sm:$0xff] }
 0x49c   : > { %v2315_v36 = vmax.f32 %v2089_v26, %v8833_v33  ;;  %v2535_v50 = vmax.f32 %v2310_v54, %v8836_v59  ;;  %v1196_v9 = vmax.f32 %v9823_v49, %v8837_v20  ;;  %v1422_v27 = vmax.f32 %v1197_v52, %v10909_v40  ;;  %v8839_v5 = vld [vmem:[#allocation2 + $0x90] sm:$0xff]  ;;  %v8841_v26 = vld [vmem:[#allocation2 + $0xa7] sm:$0xff] }
 0x49d   : > { %v1645_v34 = vmax.f32 %v1420_v21, %v9819_v47  ;;  %v2538_v51 = vmax.f32 %v2313_v7, %v8839_v5  ;;  %v8840_v61 = vld [vmem:[#allocation2 + $0x110] sm:$0xff]  ;;  %v2314_v56 = vmax.f32 %v2088_v38, %v8841_v26  ;;  %v8842_v13 = vld [vmem:[#allocation2 + $0x88] sm:$0xff]  ;;  %v2758_v62 = vmax.f32 %v2533_v24, %v10553_v45 }
 0x49e   : > { %v1199_v12 = vmax.f32 %v9837_v57, %v8840_v61  ;;  %v2537_v16 = vmax.f32 %v2312_v1, %v8842_v13  ;;  %v1867_v35 = vmax.f32 %v1642_v58, %v8825_v32  ;;  %v2090_v54 = vmax.f32 %v1865_v53, %v10886_v25  ;;  %v8843_v46 = vld [vmem:[#allocation2 + $0xcf] sm:$0xff] }
 0x49f   : > { %v10891_v39 = vpop.permute.xlu1 %3347  ;;  %v2317_v48 = vmax.f32 %v2091_v0, %v8843_v46  ;;  %v8844_v19 = vld [vmem:[#allocation2 + $0xb0] sm:$0xff]  ;;  %v1644_v47 = vmax.f32 %v1419_v10, %v9823_v49  ;;  %v2093_v21 = vmax.f32 %v1868_v2, %v10896_v43  ;;  %v2761_v7 = vmax.f32 %v2536_v55, %v10558_v6  ;;  %v8846_v58 = vld [vmem:[#allocation2 + $0x108] sm:$0xff] }
 0x4a0   : > { %v2540_v52 = vmax.f32 %v2315_v36, %v8844_v19  ;;  %v2760_v38 = vmax.f32 %v2535_v50, %v10563_v42  ;;  %v10922_v1 = vld [vmem:[#allocation2 + $0xe9] sm:$0xff]  ;;  %v1647_v25 = vmax.f32 %v1422_v27, %v9837_v57  ;;  %v1870_v32 = vmax.f32 %v1645_v34, %v8828_v41  ;;  %v10930_v49 = vld [vmem:[#allocation2 + $0x111] sm:$0xff] }
 0x4a1   : > { %v1421_v45 = vmax.f32 %v1196_v9, %v10922_v1  ;;  %v10927_v24 = vmax.f32 %v2538_v51, %v10568_v37  ;;  %v1198_v53 = vmax.f32 %v9841_v60, %v8846_v58  ;;  %v1424_v43 = vmax.f32 %v1199_v12, %v10930_v49  ;;  %v8848_v6 = vld [vmem:[#allocation2 + $0xa8] sm:$0xff]  ;;  %v8850_v57 = vld [vmem:[#allocation2 + $0xd0] sm:$0xff] }
 0x4a2   : > { %v2539_v0 = vmax.f32 %v2314_v56, %v8848_v6  ;;  %v2762_v42 = vmax.f32 %v2537_v16, %v10573_v44  ;;  %v2092_v36 = vmax.f32 %v1867_v35, %v10905_v11  ;;  %v8849_v10 = vld [vmem:[#allocation2 + $0xc7] sm:$0xff]  ;;  %v2542_v41 = vmax.f32 %v2317_v48, %v8850_v57  ;;  %v8851_v59 = vld [vmem:[#allocation2 + $0xef] sm:$0xff] }
 0x4a3   : > { %v10903_v14 = vpop.permute.xlu1 %3357  ;;  %v2316_v2 = vmax.f32 %v2090_v54, %v8849_v10  ;;  %v10936_v37 = vmax.f32 %v2540_v52, %v10578_v63  ;;  %v1869_v55 = vmax.f32 %v1644_v47, %v8837_v20  ;;  %v2319_v50 = vmax.f32 %v2093_v21, %v8851_v59  ;;  %v8852_v44 = vld [vmem:[#allocation2 + $0x130] sm:$0xff]  ;;  %v8854_v26 = vld [vmem:[#allocation2 + $0x128] sm:$0xff] }
 0x4a4   : > { %v1201_v11 = vmax.f32 %v9855_v15, %v8852_v44  ;;  %v1646_v34 = vmax.f32 %v1421_v45, %v9841_v60  ;;  %v1872_v5 = vmax.f32 %v1647_v25, %v8840_v61  ;;  %v2095_v63 = vmax.f32 %v1870_v32, %v10909_v40  ;;  %v10949_v51 = vld [vmem:[#allocation2 + $0x109] sm:$0xff]  ;;  %v8858_v46 = vld [vmem:[#allocation2 + $0x131] sm:$0xff] }
 0x4a5   : > { %v1423_v20 = vmax.f32 %v1198_v53, %v10949_v51  ;;  %v1649_v12 = vmax.f32 %v1424_v43, %v9855_v15  ;;  %v1200_v56 = vmax.f32 %v9859_v17, %v8854_v26  ;;  %v8855_v60 = vld [vmem:[#allocation2 + $0xe7] sm:$0xff]  ;;  %v10960_v16 = vmax.f32 %v2542_v41, %v10588_v23  ;;  %v8857_v15 = vld [vmem:[#allocation2 + $0xf0] sm:$0xff] }
 0x4a6   : > { %v2318_v61 = vmax.f32 %v2092_v36, %v8855_v60  ;;  %v8856_v13 = vld [vmem:[#allocation2 + $0xc8] sm:$0xff]  ;;  %v2544_v35 = vmax.f32 %v2319_v50, %v8857_v15  ;;  %v1426_v48 = vmax.f32 %v1201_v11, %v8858_v46  ;;  %v1871_v19 = vmax.f32 %v1646_v34, %v8846_v58  ;;  %v8860_v45 = vld [vmem:[#allocation2 + $0x150] sm:$0xff] }
 0x4a7   : > { %v10916_v33 = vpop.permute.xlu1 %3367  ;;  %v2541_v40 = vmax.f32 %v2316_v2, %v8856_v13  ;;  %v2097_v52 = vmax.f32 %v1872_v5, %v10930_v49  ;;  %v8859_v47 = vld [vmem:[#allocation2 + $0x10f] sm:$0xff]  ;;  %v1203_v23 = vmax.f32 %v9873_v3, %v8860_v45  ;;  %v1874_v25 = vmax.f32 %v1649_v12, %v8852_v44 }
 0x4a8   : > { %v2321_v21 = vmax.f32 %v2095_v63, %v8859_v47  ;;  %v10975_v32 = vld [vmem:[#allocation2 + $0x129] sm:$0xff]  ;;  %v8866_v10 = vld [vmem:[#allocation2 + $0xf1] sm:$0xff]  ;;  %v1651_v41 = vmax.f32 %v1426_v48, %v9873_v3 }
 0x4a9   : > { %v1425_v58 = vmax.f32 %v1200_v56, %v10975_v32  ;;  %v8863_v53 = vld [vmem:[#allocation2 + $0xe8] sm:$0xff]  ;;  %v8868_v44 = vld [vmem:[#allocation2 + $0x110] sm:$0xff] }
 0x4aa   : > { %v2543_v49 = vmax.f32 %v2318_v61, %v8863_v53  ;;  %v8864_v43 = vld [vmem:[#allocation2 + $0xc9] sm:$0xff]  ;;  %v2546_v11 = vmax.f32 %v2321_v21, %v8868_v44  ;;  %v10989_v34 = vld [vmem:[#allocation2 + $0x151] sm:$0xff] }
 0x4ab   : > { %v10938_v4 = vpop.permute.xlu1 %3479  ;;  %v2766_v6 = vmax.f32 %v2541_v40, %v8864_v43  ;;  %v8867_v59 = vld [vmem:[#allocation2 + $0x12f] sm:$0xff]  ;;  %v1428_v5 = vmax.f32 %v1203_v23, %v10989_v34  ;;  %v1650_v60 = vmax.f32 %v1425_v58, %v9877_v8  ;;  %v14485_v43 = vld [vmem:[#allocation10_spill] sm:$0xff] }
 0x4ac   : > { %v10941_v9 = vadd.f32 %v10938_v4, %v2759_v22  ;;  %v10944_v27 = vadd.f32 %v10938_v4, %v2758_v62  ;;  %v10954_v22 = vmax.f32 %v2539_v0, %v10583_v29  ;;  %v2094_v62 = vmax.f32 %v1869_v55, %v10922_v1  ;;  %v8865_v0 = vld [vmem:[#allocation2 + $0x107] sm:$0xff]  ;;  %v8877_v47 = vld [vmem:[#allocation2 + $0x111] sm:$0xff] }
 0x4ad   : > { %v10964_v29 = vadd.f32 %v10938_v4, %v2760_v38  ;;  %v10967_v54 = vadd.f32 %v10938_v4, %v2761_v7  ;;  %v1648_v1 = vmax.f32 %v1423_v20, %v9859_v17  ;;  %v8861_v38 = vld [vmem:[#allocation2 + $0x148] sm:$0xff]  ;;  %v10978_v17 = vmax.f32 %v2544_v35, %v8866_v10 }
 0x4ae   : > { %3634 = vperm.xlu1 %8569, %v10941_v9   ;;  %3629 = vperm.xlu0 %8568, %v10944_v27   ;;  %v1202_v7 = vmax.f32 %v9877_v8, %v8861_v38  ;;  %v2320_v36 = vmax.f32 %v2094_v62, %v8865_v0  ;;  %v10981_v2 = vadd.f32 %v10938_v4, %v2762_v42  ;;  %v8871_v3 = vld [vmem:[#allocation2 + $0x168] sm:$0xff] }
 0x4af   : > { %v10985_v57 = vadd.f32 %v10938_v4, %v10927_v24  ;;  %v2096_v55 = vmax.f32 %v1871_v19, %v10949_v51  ;;  %v2323_v50 = vmax.f32 %v2097_v52, %v8867_v59  ;;  %v1873_v63 = vmax.f32 %v1648_v1, %v8854_v26  ;;  %v8870_v24 = vld [vmem:[#allocation2 + $0x170] sm:$0xff]  ;;  %v8873_v61 = vld [vmem:[#allocation2 + $0x108] sm:$0xff] }
 0x4b0   : > { %v2099_v20 = vmax.f32 %v1874_v25, %v8858_v46  ;;  %v1205_v42 = vmax.f32 %v9891_v18, %v8870_v24  ;;  %v1204_v51 = vmax.f32 %v9895_v31, %v8871_v3  ;;  %v10996_v12 = vld [vmem:[#allocation2 + $0x149] sm:$0xff]  ;;  %v2545_v13 = vmax.f32 %v2320_v36, %v8873_v61 }
 0x4b1   : > { %v1427_v56 = vmax.f32 %v1202_v7, %v10996_v12  ;;  %v8874_v26 = vld [vmem:[#allocation2 + $0xe9] sm:$0xff]  ;;  %v11002_v62 = vadd.f32 %v10938_v4, %v10954_v22  ;;  %v11006_v15 = vadd.f32 %v10938_v4, %v10936_v37  ;;  %v1876_v35 = vmax.f32 %v1651_v41, %v8860_v45  ;;  %v11014_v37 = vld [vmem:[#allocation2 + $0x171] sm:$0xff] }
 0x4b2   : > { %3639 = vperm.xlu1 %8569, %v10964_v29   ;;  %3644 = vperm.xlu0 %8568, %v10967_v54   ;;  %v2768_v40 = vmax.f32 %v2543_v49, %v8874_v26  ;;  %v8875_v46 = vld [vmem:[#allocation2 + $0x127] sm:$0xff]  ;;  %v8876_v19 = vld [vmem:[#allocation2 + $0x130] sm:$0xff]  ;;  %v11008_v21 = vmax.f32 %v2546_v11, %v8877_v47  ;;  %v1653_v8 = vmax.f32 %v1428_v5, %v9891_v18 }
 0x4b3   : > { %v2322_v48 = vmax.f32 %v2096_v55, %v8875_v46  ;;  %v2548_v52 = vmax.f32 %v2323_v50, %v8876_v19  ;;  %v2098_v23 = vmax.f32 %v1873_v63, %v10975_v32  ;;  %v8878_v1 = vld [vmem:[#allocation2 + $0x14f] sm:$0xff]  ;;  %v1430_v22 = vmax.f32 %v1205_v42, %v11014_v37  ;;  %v8886_v5 = vld [vmem:[#allocation2 + $0x147] sm:$0xff] }
 0x4b4   : > { %v2325_v25 = vmax.f32 %v2099_v20, %v8878_v1  ;;  %v11017_v45 = vld [vmem:[#allocation2 + $0x169] sm:$0xff]  ;;  %v1652_v58 = vmax.f32 %v1427_v56, %v9895_v31  ;;  %v1875_v53 = vmax.f32 %v1650_v60, %v8861_v38  ;;  %v11024_v36 = vadd.f32 %v10938_v4, %v2766_v6  ;;  %v8885_v38 = vld [vmem:[#allocation2 + $0x131] sm:$0xff] }
 0x4b5   : > { %v1429_v7 = vmax.f32 %v1204_v51, %v11017_v45  ;;  %v8881_v18 = vld [vmem:[#allocation2 + $0x190] sm:$0xff]  ;;  %v8882_v49 = vld [vmem:[#allocation2 + $0x188] sm:$0xff]  ;;  %v11028_v10 = vadd.f32 %v10938_v4, %v10960_v16  ;;  %v2101_v41 = vmax.f32 %v1876_v35, %v10989_v34  ;;  %v11031_v44 = vmax.f32 %v2548_v52, %v8885_v38 }
 0x4b6   : > { %3649 = vperm.xlu1 %8569, %v10981_v2   ;;  %3654 = vperm.xlu0 %8568, %v10985_v57   ;;  %v1207_v32 = vmax.f32 %v9909_v28, %v8881_v18  ;;  %v1206_v0 = vmax.f32 %v14485_v43, %v8882_v49  ;;  %v8883_v55 = vld [vmem:[#allocation2 + $0x128] sm:$0xff]  ;;  %v1878_v11 = vmax.f32 %v1653_v8, %v8870_v24  ;;  %v8887_v20 = vld [vmem:[#allocation2 + $0x150] sm:$0xff] }
 0x4b7   : > { %v2547_v59 = vmax.f32 %v2322_v48, %v8883_v55  ;;  %v8884_v50 = vld [vmem:[#allocation2 + $0x109] sm:$0xff]  ;;  %v2324_v63 = vmax.f32 %v2098_v23, %v8886_v5  ;;  %v2550_v42 = vmax.f32 %v2325_v25, %v8887_v20  ;;  %v1655_v16 = vmax.f32 %v1430_v22, %v9909_v28  ;;  %v11038_v56 = vld [vmem:[#allocation2 + $0x191] sm:$0xff]  ;;  %v14486_v35 = vld [vmem:[#allocation11_spill] sm:$0xff] }
 0x4b8   : > { %v2770_v31 = vmax.f32 %v2545_v13, %v8884_v50  ;;  %v1654_v6 = vmax.f32 %v1429_v7, %v14485_v43  ;;  %v1877_v34 = vmax.f32 %v1652_v58, %v8871_v3  ;;  %v2100_v51 = vmax.f32 %v1875_v53, %v10996_v12  ;;  %v11041_v24 = vld [vmem:[#allocation2 + $0x189] sm:$0xff] }
 0x4b9   : > { %v1432_v60 = vmax.f32 %v1207_v32, %v11038_v56  ;;  %v1431_v61 = vmax.f32 %v1206_v0, %v11041_v24  ;;  %v11045_v13 = vadd.f32 %v10938_v4, %v2768_v40  ;;  %v11049_v26 = vadd.f32 %v10938_v4, %v10978_v17  ;;  %v8890_v28 = vld [vmem:[#allocation2 + $0x1b0] sm:$0xff]  ;;  %v8891_v46 = vld [vmem:[#allocation2 + $0x1a8] sm:$0xff] }
 0x4ba   : > { %3659 = vperm.xlu1 %8569, %v11002_v62   ;;  %3664 = vperm.xlu0 %8568, %v11006_v15   ;;  %v1209_v3 = vmax.f32 %v14486_v35, %v8890_v28  ;;  %v14487_v12 = vld [vmem:[#allocation12_spill] sm:$0xff]  ;;  %v2103_v23 = vmax.f32 %v1878_v11, %v11014_v37  ;;  %v8895_v40 = vld [vmem:[#allocation2 + $0x151] sm:$0xff]  ;;  %v1880_v17 = vmax.f32 %v1655_v16, %v8881_v18 }
 0x4bb   : > { %v1208_v48 = vmax.f32 %v14487_v12, %v8891_v46  ;;  %v8892_v19 = vld [vmem:[#allocation2 + $0x16f] sm:$0xff]  ;;  %v11054_v22 = vmax.f32 %v2550_v42, %v8895_v40  ;;  %v1879_v7 = vmax.f32 %v1654_v6, %v8882_v49  ;;  %v2102_v58 = vmax.f32 %v1877_v34, %v11017_v45  ;;  %v8896_v53 = vld [vmem:[#allocation2 + $0x167] sm:$0xff] }
 0x4bc   : > { %v2327_v52 = vmax.f32 %v2101_v41, %v8892_v19  ;;  %v8893_v47 = vld [vmem:[#allocation2 + $0x129] sm:$0xff]  ;;  %v2326_v32 = vmax.f32 %v2100_v51, %v8896_v53  ;;  %v1657_v43 = vmax.f32 %v1432_v60, %v14486_v35  ;;  %v1656_v0 = vmax.f32 %v1431_v61, %v14487_v12  ;;  %v11069_v18 = vld [vmem:[#allocation2 + $0x1b1] sm:$0xff] }
 0x4bd   : > { %v2772_v8 = vmax.f32 %v2547_v59, %v8893_v47  ;;  %v8894_v1 = vld [vmem:[#allocation2 + $0x148] sm:$0xff]  ;;  %v11062_v37 = vadd.f32 %v10938_v4, %v2770_v31  ;;  %v11066_v41 = vadd.f32 %v10938_v4, %v11008_v21  ;;  %v8897_v55 = vld [vmem:[#allocation2 + $0x1d0] sm:$0xff]  ;;  %v1434_v45 = vmax.f32 %v1209_v3, %v11069_v18  ;;  %v14489_v31 = vld [vmem:[#allocation14_spill] sm:$0xff] }
 0x4be   : > { %3669 = vperm.xlu1 %8569, %v11024_v36   ;;  %3674 = vperm.xlu0 %8568, %v11028_v10   ;;  %v2549_v25 = vmax.f32 %v2324_v63, %v8894_v1  ;;  %v14488_v59 = vld [vmem:[#allocation13_spill] sm:$0xff]  ;;  %v11072_v49 = vld [vmem:[#allocation2 + $0x1a9] sm:$0xff]  ;;  %v2105_v34 = vmax.f32 %v1880_v17, %v11038_v56  ;;  %v2104_v51 = vmax.f32 %v1879_v7, %v11041_v24 }
 0x4bf   : > { %v1211_v50 = vmax.f32 %v14488_v59, %v8897_v55  ;;  %v1433_v38 = vmax.f32 %v1208_v48, %v11072_v49  ;;  %v8900_v11 = vld [vmem:[#allocation2 + $0x170] sm:$0xff]  ;;  %v8901_v63 = vld [vmem:[#allocation2 + $0x1c8] sm:$0xff]  ;;  %v1882_v12 = vmax.f32 %v1657_v43, %v8890_v28  ;;  %v1881_v48 = vmax.f32 %v1656_v0, %v8891_v46 }
 0x4c0   : > { %v2552_v5 = vmax.f32 %v2327_v52, %v8900_v11  ;;  %v1210_v20 = vmax.f32 %v14489_v31, %v8901_v63  ;;  %v8902_v42 = vld [vmem:[#allocation2 + $0x18f] sm:$0xff]  ;;  %v8904_v60 = vld [vmem:[#allocation2 + $0x187] sm:$0xff]  ;;  %v11081_v19 = vadd.f32 %v10938_v4, %v2772_v8  ;;  %v11085_v52 = vadd.f32 %v10938_v4, %v11031_v44 }
 0x4c1   : > { %v2329_v16 = vmax.f32 %v2103_v23, %v8902_v42  ;;  %v8903_v21 = vld [vmem:[#allocation2 + $0x149] sm:$0xff]  ;;  %v2328_v61 = vmax.f32 %v2102_v58, %v8904_v60  ;;  %v11087_v47 = vld [vmem:[#allocation2 + $0x1d1] sm:$0xff]  ;;  %v1659_v56 = vmax.f32 %v1434_v45, %v14488_v59  ;;  %v1658_v24 = vmax.f32 %v1433_v38, %v14489_v31  ;;  %v14490_v28 = vld [vmem:[#allocation15_spill] sm:$0xff] }
 0x4c2   : > { %3679 = vperm.xlu1 %8569, %v11045_v13   ;;  %3684 = vperm.xlu0 %8568, %v11049_v26   ;;  %v2774_v6 = vmax.f32 %v2549_v25, %v8903_v21  ;;  %v8905_v35 = vld [vmem:[#allocation2 + $0x168] sm:$0xff]  ;;  %v1436_v23 = vmax.f32 %v1211_v50, %v11087_v47  ;;  %v8907_v1 = vld [vmem:[#allocation2 + $0x171] sm:$0xff]  ;;  %v2107_v11 = vmax.f32 %v1882_v12, %v11069_v18 }
 0x4c3   : > { %v2551_v3 = vmax.f32 %v2326_v32, %v8905_v35  ;;  %v2777_v25 = vmax.f32 %v2552_v5, %v8907_v1  ;;  %v8908_v40 = vld [vmem:[#allocation2 + $0x1f0] sm:$0xff]  ;;  %v8909_v17 = vld [vmem:[#allocation2 + $0x1e8] sm:$0xff]  ;;  %v2106_v5 = vmax.f32 %v1881_v48, %v11072_v49  ;;  %v1884_v21 = vmax.f32 %v1659_v56, %v8897_v55 }
 0x4c4   : > { %v1213_v46 = vmax.f32 %v14490_v28, %v8908_v40  ;;  %v14491_v8 = vld [vmem:[#allocation17_spill] sm:$0xff]  ;;  %v11094_v58 = vld [vmem:[#allocation2 + $0x1c9] sm:$0xff]  ;;  %v11102_v31 = vadd.f32 %v10938_v4, %v2774_v6  ;;  %v1661_v42 = vmax.f32 %v1436_v23, %v14490_v28 }
 0x4c5   : > { %v1212_v7 = vmax.f32 %v14491_v8, %v8909_v17  ;;  %v1435_v44 = vmax.f32 %v1210_v20, %v11094_v58  ;;  %v8911_v53 = vld [vmem:[#allocation2 + $0x1af] sm:$0xff]  ;;  %v8912_v43 = vld [vmem:[#allocation2 + $0x1a7] sm:$0xff]  ;;  %v11106_v20 = vadd.f32 %v10938_v4, %v11054_v22  ;;  %v11119_v28 = vadd.f32 %v10938_v4, %v2777_v25 }
 0x4c6   : > { %3689 = vperm.xlu1 %8569, %v11062_v37   ;;  %3694 = vperm.xlu0 %8568, %v11066_v41   ;;  %v2331_v32 = vmax.f32 %v2105_v34, %v8911_v53  ;;  %v2330_v0 = vmax.f32 %v2104_v51, %v8912_v43  ;;  %v8913_v59 = vld [vmem:[#allocation2 + $0x190] sm:$0xff]  ;;  %v8914_v45 = vld [vmem:[#allocation2 + $0x188] sm:$0xff]  ;;  %v1883_v34 = vmax.f32 %v1658_v24, %v8901_v63 }
 0x4c7   : > { %v2554_v50 = vmax.f32 %v2329_v16, %v8913_v59  ;;  %v2553_v38 = vmax.f32 %v2328_v61, %v8914_v45  ;;  %v8915_v51 = vld [vmem:[#allocation2 + $0x169] sm:$0xff]  ;;  %v8916_v16 = vld [vmem:[#allocation2 + $0x1f1] sm:$0xff]  ;;  %v1660_v49 = vmax.f32 %v1435_v44, %v14491_v8  ;;  %v2109_v8 = vmax.f32 %v1884_v21, %v11087_v47 }
 0x4c8   : > { %v2776_v60 = vmax.f32 %v2551_v3, %v8915_v51  ;;  %v1438_v35 = vmax.f32 %v1213_v46, %v8916_v16  ;;  %v11109_v61 = vld [vmem:[#allocation2 + $0x1e9] sm:$0xff]  ;;  %v8920_v55 = vld [vmem:[#allocation2 + $0x191] sm:$0xff]  ;;  %v1886_v46 = vmax.f32 %v1661_v42, %v8908_v40 }
 0x4c9   : > { %v1437_v18 = vmax.f32 %v1212_v7, %v11109_v61  ;;  %v8918_v22 = vld [vmem:[#allocation2 + $0x1b0] sm:$0xff]  ;;  %v8919_v12 = vld [vmem:[#allocation2 + $0x1a8] sm:$0xff]  ;;  %v2779_v63 = vmax.f32 %v2554_v50, %v8920_v55  ;;  %v2108_v7 = vmax.f32 %v1883_v34, %v11094_v58  ;;  %v1885_v50 = vmax.f32 %v1660_v49, %v8909_v17 }
 0x4ca   : > { %3699 = vperm.xlu1 %8569, %v11081_v19   ;;  %3704 = vperm.xlu0 %8568, %v11085_v52   ;;  %v2556_v6 = vmax.f32 %v2331_v32, %v8918_v22  ;;  %v2555_v48 = vmax.f32 %v2330_v0, %v8919_v12  ;;  %v8921_v23 = vld [vmem:[#allocation2 + $0x1cf] sm:$0xff]  ;;  %v8922_v56 = vld [vmem:[#allocation2 + $0x1c7] sm:$0xff]  ;;  %v11116_v1 = vadd.f32 %v10938_v4, %v2776_v60 }
 0x4cb   : > { %v2333_v3 = vmax.f32 %v2107_v11, %v8921_v23  ;;  %v2332_v24 = vmax.f32 %v2106_v5, %v8922_v56  ;;  %v8923_v44 = vld [vmem:[#allocation2 + $0x189] sm:$0xff]  ;;  %v8926_v45 = vld [vmem:[#allocation2 + $0x1b1] sm:$0xff]  ;;  %v11129_v58 = vadd.f32 %v10938_v4, %v2779_v63  ;;  %v2110_v12 = vmax.f32 %v1885_v50, %v11109_v61 }
 0x4cc   : > { %v2778_v53 = vmax.f32 %v2553_v38, %v8923_v44  ;;  %v8924_v32 = vld [vmem:[#allocation2 + $0x20f] sm:$0xff]  ;;  %v8925_v0 = vld [vmem:[#allocation2 + $0x207] sm:$0xff]  ;;  %v2781_v11 = vmax.f32 %v2556_v6, %v8926_v45  ;;  %v2111_v38 = vmax.f32 %v1886_v46, %v8916_v16 }
 0x4cd   : > { %v1663_v43 = vmax.f32 %v1438_v35, %v8924_v32  ;;  %v1662_v59 = vmax.f32 %v1437_v18, %v8925_v0  ;;  %v8927_v25 = vld [vmem:[#allocation2 + $0x1d0] sm:$0xff]  ;;  %v8928_v40 = vld [vmem:[#allocation2 + $0x1c8] sm:$0xff] }
 0x4ce   : > { %3709 = vperm.xlu1 %8569, %v11102_v31   ;;  %3714 = vperm.xlu0 %8568, %v11106_v20   ;;  %v2558_v5 = vmax.f32 %v2333_v3, %v8927_v25  ;;  %v2557_v42 = vmax.f32 %v2332_v24, %v8928_v40  ;;  %v11126_v47 = vadd.f32 %v10938_v4, %v2778_v53  ;;  %v8929_v21 = vld [vmem:[#allocation2 + $0x1ef] sm:$0xff]  ;;  %v8930_v17 = vld [vmem:[#allocation2 + $0x1e7] sm:$0xff] }
 0x4cf   : > { %v2335_v34 = vmax.f32 %v2109_v8, %v8929_v21  ;;  %v2334_v51 = vmax.f32 %v2108_v7, %v8930_v17  ;;  %v8931_v60 = vld [vmem:[#allocation2 + $0x1a9] sm:$0xff]  ;;  %v8934_v55 = vld [vmem:[#allocation2 + $0x1d1] sm:$0xff]  ;;  %v11138_v23 = vadd.f32 %v10938_v4, %v2781_v11  ;;  %v2337_v3 = vmax.f32 %v2111_v38, %v8924_v32  ;;  %v14492_v17 = vld [vmem:[#allocation18_spill] sm:$0xff] }
 0x4d0   : > { %v2780_v35 = vmax.f32 %v2555_v48, %v8931_v60  ;;  %v8932_v18 = vld [vmem:[#allocation2 + $0x210] sm:$0xff]  ;;  %v8933_v22 = vld [vmem:[#allocation2 + $0x208] sm:$0xff]  ;;  %v2783_v63 = vmax.f32 %v2558_v5, %v8934_v55 }
 0x4d1   : > { %v1888_v49 = vmax.f32 %v1663_v43, %v8932_v18  ;;  %v1887_v6 = vmax.f32 %v1662_v59, %v8933_v22  ;;  %v8935_v48 = vld [vmem:[#allocation2 + $0x1f0] sm:$0xff]  ;;  %v8936_v24 = vld [vmem:[#allocation2 + $0x1e8] sm:$0xff]  ;;  %v2336_v59 = vmax.f32 %v2110_v12, %v8925_v0  ;;  %v2562_v45 = vmax.f32 %v2337_v3, %v8932_v18 }
 0x4d2   : > { %3719 = vperm.xlu1 %8569, %v11116_v1   ;;  %3724 = vperm.xlu0 %8568, %v11119_v28   ;;  %v11135_v16 = vadd.f32 %v10938_v4, %v2780_v35  ;;  %v2560_v56 = vmax.f32 %v2335_v34, %v8935_v48  ;;  %v2559_v46 = vmax.f32 %v2334_v51, %v8936_v24  ;;  %v8937_v8 = vld [vmem:[#allocation2 + $0x1c9] sm:$0xff]  ;;  %v8938_v61 = vld [vmem:[#allocation2 + $0x211] sm:$0xff]  ;;  %v3151_v51 = vadd.f32 1e-08, %v14492_v17 }
 0x4d3   : > { %v2782_v7 = vmax.f32 %v2557_v42, %v8937_v8  ;;  %v2113_v44 = vmax.f32 %v1888_v49, %v8938_v61  ;;  %v8939_v53 = vld [vmem:[#allocation2 + $0x209] sm:$0xff]  ;;  %v11146_v32 = vadd.f32 %v10938_v4, %v2783_v63  ;;  %v8940_v11 = vld [vmem:[#allocation2 + $0x1f1] sm:$0xff]  ;;  %v2561_v0 = vmax.f32 %v2336_v59, %v8933_v22  ;;  %v14493_v22 = vld [vmem:[#allocation19_spill] sm:$0xff] }
 0x4d4   : > { %v2112_v43 = vmax.f32 %v1887_v6, %v8939_v53  ;;  %v2785_v25 = vmax.f32 %v2560_v56, %v8940_v11  ;;  %v8941_v5 = vld [vmem:[#allocation2 + $0x1e9] sm:$0xff]  ;;  %v2787_v18 = vmax.f32 %v2562_v45, %v8938_v61  ;;  %v3154_v3 = vadd.f32 1e-08, %v14493_v22  ;;  %v8947_v8 = vld [vmem:[#allocation2 + $0x231] sm:$0xff] }
 0x4d5   : > { %v11143_v50 = vadd.f32 %v10938_v4, %v2782_v7  ;;  %v2784_v40 = vmax.f32 %v2559_v46, %v8941_v5  ;;  %v8942_v42 = vld [vmem:[#allocation2 + $0x22f] sm:$0xff]  ;;  %v8943_v21 = vld [vmem:[#allocation2 + $0x227] sm:$0xff]  ;;  %v2786_v63 = vmax.f32 %v2561_v0, %v8939_v53  ;;  %8636 = vrcp.f32 %v3151_v51 }
 0x4d6   : > { %3729 = vperm.xlu1 %8569, %v11126_v47   ;;  %3734 = vperm.xlu0 %8568, %v11129_v58   ;;  %v2339_v38 = vmax.f32 %v2113_v44, %v8942_v42  ;;  %v2338_v34 = vmax.f32 %v2112_v43, %v8943_v21  ;;  %v11155_v35 = vadd.f32 %v10938_v4, %v2785_v25  ;;  %v8944_v49 = vld [vmem:[#allocation2 + $0x230] sm:$0xff]  ;;  %v8945_v12 = vld [vmem:[#allocation2 + $0x228] sm:$0xff]  ;;  %8638 = vrcp.f32 %v3154_v3 }
 0x4d7   : > { %v11152_v60 = vadd.f32 %v10938_v4, %v2784_v40  ;;  %v11161_v48 = vadd.f32 %v10938_v4, %v2786_v63  ;;  %v11164_v56 = vadd.f32 %v10938_v4, %v2787_v18  ;;  %v8946_v24 = vld [vmem:[#allocation2 + $0x229] sm:$0xff]  ;;  %v14494_v61 = vld [vmem:[#allocation21_spill] sm:$0xff]  ;;  %v3515_v53 = vsel %vm891_vm6, %v10941_v9, inf  ;;  %v14495_v21 = vld [vmem:[#allocation23_spill] sm:$0xff] }
 0x4d8   : > { %v2564_v6 = vmax.f32 %v2339_v38, %v8944_v49  ;;  %v2563_v55 = vmax.f32 %v2338_v34, %v8945_v12  ;;  %v3156_v44 = vadd.f32 1e-08, %v14494_v61  ;;  %v3514_v43 = vsel %vm891_vm6, %v10944_v27, inf }
 0x4d9   : > { %v3516_v59 = vsel %vm891_vm6, %v10964_v29, inf  ;;  %v3517_v45 = vsel %vm891_vm6, %v10967_v54, inf  ;;  %v3518_v5 = vsel %vm891_vm6, %v10981_v2, inf  ;;  %v3520_v40 = vsel %vm891_vm6, %v10985_v57, inf }
 0x4da   : > { %3739 = vperm.xlu1 %8569, %v11135_v16   ;;  %3744 = vperm.xlu0 %8568, %v11138_v23   ;;  %v2788_v46 = vmax.f32 %v2563_v55, %v8946_v24  ;;  %v2789_v7 = vmax.f32 %v2564_v6, %v8947_v8  ;;  %v3522_v42 = vsel %vm891_vm6, %v11002_v62, inf  ;;  %v3524_v38 = vsel %vm891_vm6, %v11006_v15, inf  ;;  %v14496_v6 = vld [vmem:[#allocation25_spill] sm:$0xff] }
 0x4db   : > { %v3158_v34 = vadd.f32 1e-08, %v14495_v21  ;;  %8640 = vrcp.f32 %v3156_v44  ;;  %v3521_v0 = vmin.f32 %v3515_v53, %v3520_v40  ;;  %v3523_v51 = vmin.f32 %v3516_v59, %v3522_v42  ;;  %v14498_v59 = vld [vmem:[#allocation27_spill] sm:$0xff] }
 0x4dc   : > { %v11178_v11 = vadd.f32 %v10938_v4, %v2788_v46  ;;  %v11181_v25 = vadd.f32 %v10938_v4, %v2789_v7  ;;  %v3519_v4 = vmin.f32 %v3514_v43, %v3518_v5  ;;  %v3525_v18 = vmin.f32 %v3517_v45, %v3524_v38 }
 0x4dd   : > { %8642 = vrcp.f32 %v3158_v34  ;;  %v3160_v12 = vadd.f32 1e-08, %v14496_v6  ;;  %v14497_v55 = vmov 32   ;;  %v3526_v63 = vsel %vm891_vm6, %v11024_v36, inf }
 0x4de   : > { %3749 = vperm.xlu1 %8569, %v11143_v50   ;;  %3754 = vperm.xlu0 %8568, %v11146_v32   ;;  %v3528_v3 = vsel %vm891_vm6, %v11028_v10, inf  ;;  %v3530_v24 = vsel %vm891_vm6, %v11045_v13, inf  ;;  %v3532_v46 = vsel %vm891_vm6, %v11049_v26, inf  ;;  %v3527_v8 = vmin.f32 %v3519_v4, %v3526_v63 }
 0x4df   : > { %v8637_v49 = vpop.eup %8636  ;;  %v3529_v7 = vmin.f32 %v3521_v0, %v3528_v3  ;;  %v3531_v44 = vmin.f32 %v3523_v51, %v3530_v24  ;;  %v3533_v53 = vmin.f32 %v3525_v18, %v3532_v46  ;;  %8644 = vrcp.f32 %v3160_v12 }
 0x4e0   : > { %v8639_v43 = vpop.eup %8638  ;;  %v3162_v45 = vadd.f32 1e-08, %v14498_v59  ;;  %v3534_v5 = vsel %vm891_vm6, %v11062_v37, inf  ;;  %v3536_v40 = vsel %vm891_vm6, %v11066_v41, inf  ;;  %v3538_v42 = vsel %vm891_vm6, %v11081_v19, inf }
 0x4e1   : > { %v3540_v38 = vsel %vm891_vm6, %v11085_v52, inf  ;;  %v3535_v34 = vmin.f32 %v3527_v8, %v3534_v5  ;;  %v3537_v4 = vmin.f32 %v3529_v7, %v3536_v40  ;;  %v3539_v0 = vmin.f32 %v3531_v44, %v3538_v42 }
 0x4e2   : > { %3759 = vperm.xlu1 %8569, %v11152_v60   ;;  %3764 = vperm.xlu0 %8568, %v11155_v35   ;;  %v3541_v51 = vmin.f32 %v3533_v53, %v3540_v38  ;;  %8646 = vrcp.f32 %v3162_v45  ;;  %v3542_v63 = vsel %vm891_vm6, %v11102_v31, inf  ;;  %v3544_v3 = vsel %vm891_vm6, %v11106_v20, inf  ;;  %v14500_v45 = vld [vmem:[#allocation31_spill] sm:$0xff] }
 0x4e3   : > { %v3546_v24 = vsel %vm891_vm6, %v11116_v1, inf  ;;  %v3548_v46 = vsel %vm891_vm6, %v11119_v28, inf  ;;  %v3543_v7 = vmin.f32 %v3535_v34, %v3542_v63  ;;  %v3545_v44 = vmin.f32 %v3537_v4, %v3544_v3  ;;  %v14501_v63 = vld [vmem:[#allocation33_spill] sm:$0xff] }
 0x4e4   : > { %v3547_v53 = vmin.f32 %v3539_v0, %v3546_v24  ;;  %v3166_v5 = vadd.f32 1e-08, %v14500_v45  ;;  %v3550_v40 = vsel %vm891_vm6, %v11126_v47, inf  ;;  %v3552_v42 = vsel %vm891_vm6, %v11129_v58, inf }
 0x4e5   : > { %v8641_v18 = vpop.eup %8640  ;;  %v3554_v38 = vsel %vm891_vm6, %v11135_v16, inf  ;;  %v3556_v34 = vsel %vm891_vm6, %v11138_v23, inf  ;;  %v3551_v0 = vmin.f32 %v3543_v7, %v3550_v40  ;;  %v3168_v3 = vadd.f32 1e-08, %v14501_v63 }
 0x4e6   : > { %3769 = vperm.xlu1 %8569, %v11161_v48   ;;  %3774 = vperm.xlu0 %8568, %v11164_v56   ;;  %v3558_v24 = vsel %vm891_vm6, %v11143_v50, inf  ;;  %v3564_v7 = vsel %vm891_vm6, %v11155_v35, inf }
 0x4e7   : > { %v8643_v8 = vpop.eup %8642 }
 0x4e9   : > { %v8645_v4 = vpop.eup %8644 }
 0x4ea   : > { %3779 = vperm.xlu1 %8569, %v11178_v11   ;;  %3784 = vperm.xlu0 %8568, %v11181_v25  }
 0x4ee   : > { %3852 = vrot.lane.b32.xlu1 %v10944_v27, %s9076_s7  ;;  %8570 = vset.pattern.permute.xlu0 %v14497_v55 }
 0x4ef   : > { %3217 = vperm.xlu0 %8570, %v8637_v49   ;;  %8571 = vset.pattern.permute.xlu1 %v14497_v55  ;;  %v14499_v49 = vld [vmem:[#allocation29_spill] sm:$0xff]  ;;  %v3568_v55 = vsel %vm891_vm6, %v11164_v56, inf }
 0x4f0   : > { %v3164_v12 = vadd.f32 1e-08, %v14499_v49 }
 0x4f2   : > { %3856 = vrot.lane.b32.xlu1 %v10964_v29, %s9076_s7  ;;  %8648 = vrcp.f32 %v3164_v12 }
 0x4f3   : > { %3232 = vperm.xlu0 %8570, %v8639_v43   ;;  %v3549_v43 = vmin.f32 %v3541_v51, %v3548_v46  ;;  %v3553_v51 = vmin.f32 %v3545_v44, %v3552_v42  ;;  %8650 = vrcp.f32 %v3166_v5  ;;  %v3560_v46 = vsel %vm891_vm6, %v11146_v32, inf  ;;  %v8647_v44 = vpop.eup %8646  ;;  %v14502_v42 = vld [vmem:[#allocation35_spill] sm:$0xff] }
 0x4f4   : > { %8652 = vrcp.f32 %v3168_v3 }
 0x4f5   : > { %v3557_v12 = vmin.f32 %v3549_v43, %v3556_v34  ;;  %v3561_v43 = vmin.f32 %v3553_v51, %v3560_v46  ;;  %v3566_v34 = vsel %vm891_vm6, %v11161_v48, inf }
 0x4f6   : > { %3860 = vrot.lane.b32.xlu1 %v10981_v2, %s9076_s7 }
 0x4f7   : > { %3242 = vperm.xlu0 %8570, %v8641_v18   ;;  %v3555_v18 = vmin.f32 %v3547_v53, %v3554_v38  ;;  %v3559_v53 = vmin.f32 %v3551_v0, %v3558_v24  ;;  %v3565_v40 = vmin.f32 %v3557_v12, %v3564_v7  ;;  %v3170_v38 = vadd.f32 1e-08, %v14502_v42 }
 0x4f8   : > { %v3572_v0 = vsel %vm891_vm6, %v11181_v25, inf  ;;  %v3569_v12 = vmin.f32 %v3561_v43, %v3568_v55 }
 0x4f9   : > { %v3573_v24 = vmin.f32 %v3565_v40, %v3572_v0  ;;  %8654 = vrcp.f32 %v3170_v38 }
 0x4fa   : > { %3864 = vrot.lane.b32.xlu1 %v11002_v62, %s9076_s7 }
 0x4fb   : > { %3252 = vperm.xlu0 %8570, %v8643_v8   ;;  %v3562_v8 = vsel %vm891_vm6, %v11152_v60, inf }
 0x4fc   : > { %v3563_v5 = vmin.f32 %v3555_v18, %v3562_v8  ;;  %v8649_v51 = vpop.eup %8648  ;;  %v3567_v18 = vmin.f32 %v3559_v53, %v3566_v34  ;;  %v14503_v8 = vld [vmem:[#allocation37_spill] sm:$0xff]  ;;  %v14504_v53 = vld [vmem:[#allocation39_spill] sm:$0xff] }
 0x4fd   : > { %v8651_v46 = vpop.eup %8650  ;;  %v3172_v7 = vadd.f32 1e-08, %v14503_v8  ;;  %v3174_v55 = vadd.f32 1e-08, %v14504_v53 }
 0x4fe   : > { %3868 = vrot.lane.b32.xlu1 %v11024_v36, %s9076_s7  ;;  %v3574_v42 = vmin.f32 %v3567_v18, %v3569_v12 }
 0x4ff   : > { %3262 = vperm.xlu0 %8570, %v8645_v4   ;;  %v3570_v4 = vsel %vm891_vm6, %v11178_v11, inf  ;;  %8656 = vrcp.f32 %v3172_v7  ;;  %vm3948_vm6 = vcmask 269568  }
 0x500   : > { %v3571_v3 = vmin.f32 %v3563_v5, %v3570_v4  ;;  %8658 = vrcp.f32 %v3174_v55  ;;  %v14505_v5 = vld [vmem:[#allocation41_spill] sm:$0xff]  ;;  %v14506_v4 = vld [vmem:[#allocation43_spill] sm:$0xff] }
 0x501   : > { %v3176_v40 = vadd.f32 1e-08, %v14505_v5  ;;  %v3178_v0 = vadd.f32 1e-08, %v14506_v4 }
 0x502   : > { %3872 = vrot.lane.b32.xlu1 %v11045_v13, %s9076_s7  ;;  %v3575_v63 = vmin.f32 %v3571_v3, %v3573_v24  ;;  %v14508_v24 = vld [vmem:[#allocation47_spill] sm:$0xff] }
 0x503   : > { %3272 = vperm.xlu0 %8570, %v8647_v44   ;;  %v8653_v44 = vpop.eup %8652  ;;  %8660 = vrcp.f32 %v3176_v40  ;;  %v14509_v40 = vld [vmem:[#allocation7_spill] sm:$0xff] }
 0x504   : > { %v3576_v43 = vmin.f32 %v3574_v42, %v3575_v63  ;;  %v8655_v34 = vpop.eup %8654  ;;  %8662 = vrcp.f32 %v3178_v0  ;;  %v14507_v63 = vld [vmem:[#allocation45_spill] sm:$0xff] }
 0x505   : > { %v3180_v42 = vadd.f32 1e-08, %v14507_v63 }
 0x506   : > { %3876 = vrot.lane.b32.xlu1 %v11062_v37, %s9076_s7  ;;  %v3577_v38 = vrot.slane %v3576_v43, 4 }
 0x507   : > { %3282 = vperm.xlu0 %8570, %v8649_v51   ;;  %8664 = vrcp.f32 %v3180_v42 }
 0x508   : > { %v3578_v51 = vmin.f32 %v3576_v43, %v3577_v38  ;;  %v14510_v38 = vld [vmem:[#allocation16_spill] sm:$0xff] }
 0x509   : > { %v8657_v18 = vpop.eup %8656 }
 0x50a   : > { %3880 = vrot.lane.b32.xlu1 %v11081_v19, %s9076_s7  ;;  %v3579_v12 = vrot.slane %v3578_v51, 2  ;;  %v8659_v3 = vpop.eup %8658 }
 0x50b   : > { %3292 = vperm.xlu0 %8570, %v8651_v46   ;;  %v3182_v46 = vadd.f32 1e-08, %v14508_v24 }
 0x50c   : > { %v3580_v7 = vmin.f32 %v3578_v51, %v3579_v12  ;;  %v11289_v51 = vld [vmem:[%s14217_s3] ss:$0 sm:$0xff]  ;;  %v14511_v12 = vld [vmem:[#allocation20_spill] sm:$0xff] }
 0x50d   : > { %8666 = vrcp.f32 %v3182_v46 }
 0x50e   : > { %3884 = vrot.lane.b32.xlu1 %v11102_v31, %s9076_s7  ;;  %v3581_v55 = vrot.slane %v3580_v7, 1 }
 0x50f   : > { %3302 = vperm.xlu0 %8570, %v8653_v44   ;;  %v8661_v44 = vpop.eup %8660 }
 0x510   : > { %v8663_v43 = vpop.eup %8662  ;;  %v3582_v0 = vmin.f32 %v3580_v7, %v3581_v55  ;;  %v14513_v55 = vld [vmem:[#allocation22_spill] sm:$0xff] }
 0x512   : > { %3888 = vrot.lane.b32.xlu1 %v11116_v1, %s9076_s7 }
 0x513   : > { %3312 = vperm.xlu0 %8570, %v8655_v34   ;;  %v3376_v34 = vmul.f32 %v14510_v38, %v14509_v40  ;;  %v14514_v40 = vld [vmem:[#allocation50_spill] sm:$0xff] }
 0x514   : > { %v3379_v38 = vmul.f32 %v14514_v40, %v14513_v55 }
 0x515   : > { %v3415_v42 = vadd.f32 %v11289_v51, %v3376_v34 }
 0x516   : > { %3892 = vrot.lane.b32.xlu1 %v11126_v47, %s9076_s7 }
 0x517   : > { %3322 = vperm.xlu0 %8570, %v8657_v18   ;;  %v8665_v18 = vpop.eup %8664  ;;  %v3447_v24 = vmax.f32 %v3415_v42, 0.0 }
 0x51a   : > { %3896 = vrot.lane.b32.xlu1 %v11135_v16, %s9076_s7 }
 0x51b   : > { %3332 = vperm.xlu0 %8570, %v8659_v3   ;;  %v14512_v3 = vld [vmem:[#allocation49_spill] sm:$0xff] }
 0x51c   : > { %v3377_v46 = vmul.f32 %v14512_v3, %v14511_v12  ;;  %v3418_v12 = vadd.f32 %v11289_v51, %v3379_v38  ;;  %v14515_v3 = vld [vmem:[#allocation24_spill] sm:$0xff] }
 0x51e   : > { %3900 = vrot.lane.b32.xlu1 %v11143_v50, %s9076_s7  ;;  %v3416_v7 = vadd.f32 %v11289_v51, %v3377_v46  ;;  %v14516_v46 = vld [vmem:[#allocation51_spill] sm:$0xff] }
 0x51f   : > { %3342 = vperm.xlu0 %8570, %v8661_v44   ;;  %v11296_v44 = vmin.f32 %v3582_v0, 0.0 }
 0x520   : > { %v3448_v42 = vmax.f32 %v3416_v7, 0.0  ;;  %v3450_v7 = vmax.f32 %v3418_v12, 0.0  ;;  %v14521_v12 = vld [vmem:[#allocation53_spill] sm:$0xff] }
 0x522   : > { %3904 = vrot.lane.b32.xlu1 %v11152_v60, %s9076_s7 }
 0x523   : > { %3352 = vperm.xlu0 %8570, %v8663_v43   ;;  %v8667_v43 = vpop.eup %8666 }
 0x526   : > { %3908 = vrot.lane.b32.xlu1 %v11161_v48, %s9076_s7 }
 0x527   : > { %3362 = vperm.xlu0 %8570, %v8665_v18   ;;  %v3981_v18 = vsub.f32 %v10944_v27, %v11296_v44  ;;  %v3983_v27 = vsub.f32 %v10964_v29, %v11296_v44  ;;  %v3985_v29 = vsub.f32 %v10981_v2, %v11296_v44  ;;  %v14520_v2 = vld [vmem:[#allocation28_spill] sm:$0xff] }
 0x52a   : > { %3912 = vrot.lane.b32.xlu1 %v11178_v11, %s9076_s7 }
 0x52b   : > { %3372 = vperm.xlu0 %8570, %v8667_v43   ;;  %v3381_v43 = vmul.f32 %v14516_v46, %v14515_v3 }
 0x52d   : > { %v3635_v34 = vpop.permute.xlu1 %3634  ;;  %v11305_v63 = vpop.permute.xlu0 %3629  ;;  %v3420_v38 = vadd.f32 %v11289_v51, %v3381_v43 }
 0x52e   : > { %v3788_v0 = vmul.f32 %v3635_v34, %v3447_v24  ;;  %4045 = vrot.lane.b32.xlu1 %v3981_v18, %s9077_s12  ;;  %v14517_v18 = vld [vmem:[#allocation26_spill] sm:$0xff]  ;;  %v14518_v34 = vld [vmem:[#allocation52_spill] sm:$0xff] }
 0x52f   : > { %3854 = vrot.lane.b32.xlu0 %v10941_v9, %s9076_s7  ;;  %v3383_v4 = vmul.f32 %v14518_v34, %v14517_v18 }
 0x530   : > { %3821 = vst.msk [vmem:[#allocation4 + $0x30] sm:$0xff] %vm3819_vm2, %v3788_v0  ;;  %v14519_v0 = vmov 0.0  }
 0x531   : > { %v3640_v55 = vpop.permute.xlu1 %3639  ;;  %v11316_v40 = vpop.permute.xlu0 %3644  ;;  %3585 = vst.msk [vmem:[#allocation4 + $0x7] sm:$0xff] %vm3584_vm3, %v14519_v0  ;;  %3586 = vst.msk [vmem:[#allocation4 + $0xf] sm:$0xff] %vm3584_vm3, %v14519_v0  ;;  %v3422_v43 = vadd.f32 %v11289_v51, %v3383_v4 }
 0x532   : > { %v3789_v24 = vmul.f32 %v3640_v55, %v3448_v42  ;;  %4049 = vrot.lane.b32.xlu1 %v3983_v27, %s9077_s12  ;;  %3590 = vst.msk [vmem:[#allocation4 + $0x227] sm:$0xff] %vm3584_vm3, %v14519_v0  ;;  %3591 = vst.msk [vmem:[#allocation4 + $0x22f] sm:$0xff] %vm3584_vm3, %v14519_v0  ;;  %v3385_v27 = vmul.f32 %v14521_v12, %v14520_v2  ;;  %v3452_v55 = vmax.f32 %v3420_v38, 0.0  ;;  %vm5783_vm3 = vcmask 1048376  }
 0x533   : > { %3858 = vrot.lane.b32.xlu0 %v10967_v54, %s9076_s7  ;;  %3595 = vst.msk [vmem:[#allocation4 + $0x27] sm:$0x1] %vm3594_vm4, %v14519_v0  ;;  %3596 = vst.msk [vmem:[#allocation4 + $0x47] sm:$0x1] %vm3594_vm4, %v14519_v0  ;;  %v3454_v34 = vmax.f32 %v3422_v43, 0.0  ;;  %v3989_v12 = vsub.f32 %v11024_v36, %v11296_v44 }
 0x534   : > { %3822 = vst.msk [vmem:[#allocation4 + $0x48] sm:$0xff] %vm3819_vm2, %v3789_v24  ;;  %v3987_v24 = vsub.f32 %v11002_v62, %v11296_v44 }
 0x535   : > { %v3650_v3 = vpop.permute.xlu1 %3649  ;;  %v11331_v46 = vpop.permute.xlu0 %3654  ;;  %3597 = vst.msk [vmem:[#allocation4 + $0x67] sm:$0x1] %vm3594_vm4, %v14519_v0  ;;  %3598 = vst.msk [vmem:[#allocation4 + $0x87] sm:$0x1] %vm3594_vm4, %v14519_v0 }
 0x536   : > { %v3791_v42 = vmul.f32 %v3650_v3, %v3450_v7  ;;  %4053 = vrot.lane.b32.xlu1 %v3985_v29, %s9077_s12  ;;  %3599 = vst.msk [vmem:[#allocation4 + $0xa7] sm:$0x1] %vm3594_vm4, %v14519_v0  ;;  %3600 = vst.msk [vmem:[#allocation4 + $0xc7] sm:$0x1] %vm3594_vm4, %v14519_v0  ;;  %v3424_v29 = vadd.f32 %v11289_v51, %v3385_v27  ;;  %v14522_v3 = vld [vmem:[#allocation30_spill] sm:$0xff] }
 0x537   : > { %3862 = vrot.lane.b32.xlu0 %v10985_v57, %s9076_s7  ;;  %3601 = vst.msk [vmem:[#allocation4 + $0xe7] sm:$0x1] %vm3594_vm4, %v14519_v0  ;;  %3602 = vst.msk [vmem:[#allocation4 + $0x107] sm:$0x1] %vm3594_vm4, %v14519_v0 }
 0x538   : > { %3824 = vst.msk [vmem:[#allocation4 + $0x68] sm:$0xff] %vm3819_vm2, %v3791_v42  ;;  %v11411_v38 = vld [vmem:[#allocation4 + $0x7] sm:$0xff]  ;;  %v14523_v42 = vld [vmem:[#allocation54_spill] sm:$0xff]  ;;  %v3456_v36 = vmax.f32 %v3424_v29, 0.0 }
 0x539   : > { %3603 = vst.msk [vmem:[#allocation4 + $0x127] sm:$0x1] %vm3594_vm4, %v14519_v0  ;;  %3604 = vst.msk [vmem:[#allocation4 + $0x147] sm:$0x1] %vm3594_vm4, %v14519_v0  ;;  %v3660_v62 = vpop.permute.xlu1 %3659  ;;  %v11406_v4 = vpop.permute.xlu0 %3664  ;;  %v11413_v7 = vld [vmem:[#allocation4 + $0x8] sm:$0xff]  ;;  %v3387_v2 = vmul.f32 %v14523_v42, %v14522_v3 }
 0x53a   : > { %3605 = vst.msk [vmem:[#allocation4 + $0x167] sm:$0x1] %vm3594_vm4, %v14519_v0  ;;  %3606 = vst.msk [vmem:[#allocation4 + $0x187] sm:$0x1] %vm3594_vm4, %v14519_v0  ;;  %v3793_v18 = vmul.f32 %v3660_v62, %v3452_v55  ;;  %4057 = vrot.lane.b32.xlu1 %v3987_v24, %s9077_s12  ;;  %v14524_v3 = vld [vmem:[#allocation32_spill] sm:$0xff]  ;;  %v3991_v55 = vsub.f32 %v11045_v13, %v11296_v44  ;;  %v3993_v13 = vsub.f32 %v11062_v37, %v11296_v44 }
 0x53b   : > { %3607 = vst.msk [vmem:[#allocation4 + $0x1a7] sm:$0x1] %vm3594_vm4, %v14519_v0  ;;  %3608 = vst.msk [vmem:[#allocation4 + $0x1c7] sm:$0x1] %vm3594_vm4, %v14519_v0  ;;  %3866 = vrot.lane.b32.xlu0 %v11006_v15, %s9076_s7  ;;  %v3426_v27 = vadd.f32 %v11289_v51, %v3387_v2  ;;  %v14525_v42 = vld [vmem:[#allocation8_spill] sm:$0xff]  ;;  %v3995_v37 = vsub.f32 %v11081_v19, %v11296_v44  ;;  %v3997_v19 = vsub.f32 %v11102_v31, %v11296_v44 }
 0x53c   : > { %3609 = vst.msk [vmem:[#allocation4 + $0x1e7] sm:$0x1] %vm3594_vm4, %v14519_v0  ;;  %3610 = vst.msk [vmem:[#allocation4 + $0x207] sm:$0x1] %vm3594_vm4, %v14519_v0 }
 0x53d   : > { %3611 = vst.msk [vmem:[#allocation4 + $0x38] sm:$0x1] %vm3594_vm4, %v14519_v0  ;;  %3612 = vst.msk [vmem:[#allocation4 + $0x58] sm:$0x1] %vm3594_vm4, %v14519_v0  ;;  %v3670_v24 = vpop.permute.xlu1 %3669  ;;  %v11423_v62 = vpop.permute.xlu0 %3674  ;;  %v3458_v29 = vmax.f32 %v3426_v27, 0.0 }
 0x53e   : > { %3613 = vst.msk [vmem:[#allocation4 + $0x78] sm:$0x1] %vm3594_vm4, %v14519_v0  ;;  %3614 = vst.msk [vmem:[#allocation4 + $0x98] sm:$0x1] %vm3594_vm4, %v14519_v0  ;;  %v3795_v43 = vmul.f32 %v3670_v24, %v3454_v34  ;;  %4061 = vrot.lane.b32.xlu1 %v3989_v12, %s9077_s12  ;;  %v14526_v12 = vld [vmem:[#allocation34_spill] sm:$0xff]  ;;  %v14527_v24 = vld [vmem:[#allocation9_spill] sm:$0xff] }
 0x53f   : > { %3615 = vst.msk [vmem:[#allocation4 + $0xb8] sm:$0x1] %vm3594_vm4, %v14519_v0  ;;  %3616 = vst.msk [vmem:[#allocation4 + $0xd8] sm:$0x1] %vm3594_vm4, %v14519_v0  ;;  %3870 = vrot.lane.b32.xlu0 %v11028_v10, %s9076_s7  ;;  %v3391_v8 = vmul.f32 %v14527_v24, %v14526_v12 }
 0x540   : > { %3617 = vst.msk [vmem:[#allocation4 + $0xf8] sm:$0x1] %vm3594_vm4, %v14519_v0  ;;  %3618 = vst.msk [vmem:[#allocation4 + $0x118] sm:$0x1] %vm3594_vm4, %v14519_v0 }
 0x541   : > { %3619 = vst.msk [vmem:[#allocation4 + $0x138] sm:$0x1] %vm3594_vm4, %v14519_v0  ;;  %3620 = vst.msk [vmem:[#allocation4 + $0x158] sm:$0x1] %vm3594_vm4, %v14519_v0  ;;  %v3680_v5 = vpop.permute.xlu1 %3679  ;;  %v11434_v53 = vpop.permute.xlu0 %3684 }
 0x542   : > { %3621 = vst.msk [vmem:[#allocation4 + $0x178] sm:$0x1] %vm3594_vm4, %v14519_v0  ;;  %3622 = vst.msk [vmem:[#allocation4 + $0x198] sm:$0x1] %vm3594_vm4, %v14519_v0  ;;  %v3797_v34 = vmul.f32 %v3680_v5, %v3456_v36  ;;  %4065 = vrot.lane.b32.xlu1 %v3991_v55, %s9077_s12  ;;  %v3430_v55 = vadd.f32 %v11289_v51, %v3391_v8  ;;  %v14529_v36 = vld [vmem:[#allocation55_spill] sm:$0xff] }
 0x543   : > { %3623 = vst.msk [vmem:[#allocation4 + $0x1b8] sm:$0x1] %vm3594_vm4, %v14519_v0  ;;  %3624 = vst.msk [vmem:[#allocation4 + $0x1d8] sm:$0x1] %vm3594_vm4, %v14519_v0  ;;  %3874 = vrot.lane.b32.xlu0 %v11049_v26, %s9076_s7 }
 0x544   : > { %3625 = vst.msk [vmem:[#allocation4 + $0x1f8] sm:$0x1] %vm3594_vm4, %v14519_v0  ;;  %3626 = vst.msk [vmem:[#allocation4 + $0x218] sm:$0x1] %vm3594_vm4, %v14519_v0  ;;  %v3462_v8 = vmax.f32 %v3430_v55, 0.0  ;;  %vm6337_vm4 = vcmask 1040384  }
 0x545   : > { %3826 = vst.msk [vmem:[#allocation4 + $0x88] sm:$0xff] %vm3819_vm2, %v3793_v18  ;;  %v3389_v18 = vmul.f32 %v14525_v42, %v14524_v3  ;;  %3828 = vst.msk [vmem:[#allocation4 + $0xa8] sm:$0xff] %vm3819_vm2, %v3795_v43  ;;  %v3690_v43 = vpop.permute.xlu1 %3689  ;;  %v11445_v3 = vpop.permute.xlu0 %3694  ;;  %v14528_v42 = vld [vmem:[#allocation36_spill] sm:$0xff] }
 0x546   : > { %3830 = vst.msk [vmem:[#allocation4 + $0xc8] sm:$0xff] %vm3819_vm2, %v3797_v34  ;;  %v3799_v5 = vmul.f32 %v3690_v43, %v3458_v29  ;;  %4069 = vrot.lane.b32.xlu1 %v3993_v13, %s9077_s12  ;;  %v14530_v13 = vld [vmem:[#allocation38_spill] sm:$0xff]  ;;  %v14531_v43 = vld [vmem:[#allocation56_spill] sm:$0xff] }
 0x547   : > { %v3428_v2 = vadd.f32 %v11289_v51, %v3389_v18  ;;  %3878 = vrot.lane.b32.xlu0 %v11066_v41, %s9076_s7  ;;  %v3393_v18 = vmul.f32 %v14529_v36, %v14528_v42  ;;  %v3395_v42 = vmul.f32 %v14531_v43, %v14530_v13  ;;  %4207 = vst.msk [vmem:[#allocation5] sm:$0xff] %vm4206_vm5, %v11411_v38 }
 0x548   : > { %3832 = vst.msk [vmem:[#allocation4 + $0xe8] sm:$0xff] %vm3819_vm2, %v3799_v5 }
 0x549   : > { %v3460_v27 = vmax.f32 %v3428_v2, 0.0  ;;  %v3700_v34 = vpop.permute.xlu1 %3699  ;;  %v11456_v12 = vpop.permute.xlu0 %3704  ;;  %v3432_v29 = vadd.f32 %v11289_v51, %v3393_v18  ;;  %v3434_v55 = vadd.f32 %v11289_v51, %v3395_v42  ;;  %v14532_v18 = vld [vmem:[#allocation40_spill] sm:$0xff]  ;;  %v14534_v42 = vld [vmem:[#allocation42_spill] sm:$0xff]  ;;  %3588 = vst.msk [vmem:[#allocation4 + $0x17] sm:$0x3] %vm3587_vm7, %v14519_v0 }
 0x54a   : > { %4073 = vrot.lane.b32.xlu1 %v3995_v37, %s9077_s12  ;;  %3592 = vst.msk [vmem:[#allocation4 + $0x237] sm:$0x3] %vm3587_vm7, %v14519_v0  ;;  %vm6041_vm7 = vcmask 334912  }
 0x54b   : > { %v3801_v24 = vmul.f32 %v3700_v34, %v3460_v27  ;;  %3882 = vrot.lane.b32.xlu0 %v11085_v52, %s9076_s7  ;;  %v14533_v27 = vld [vmem:[#allocation57_spill] sm:$0xff]  ;;  %v3464_v31 = vmax.f32 %v3432_v29, 0.0  ;;  %v3999_v34 = vsub.f32 %v11116_v1, %v11296_v44  ;;  %v3466_v29 = vmax.f32 %v3434_v55, 0.0 }
 0x54c   : > { %v3397_v37 = vmul.f32 %v14533_v27, %v14532_v18  ;;  %v4001_v1 = vsub.f32 %v11126_v47, %v11296_v44  ;;  %v4003_v47 = vsub.f32 %v11135_v16, %v11296_v44  ;;  %v4005_v16 = vsub.f32 %v11143_v50, %v11296_v44 }
 0x54d   : > { %3834 = vst.msk [vmem:[#allocation4 + $0x108] sm:$0xff] %vm3819_vm2, %v3801_v24  ;;  %v3710_v2 = vpop.permute.xlu1 %3709  ;;  %v11467_v5 = vpop.permute.xlu0 %3714  ;;  %v4007_v50 = vsub.f32 %v11152_v60, %v11296_v44 }
 0x54e   : > { %v3803_v36 = vmul.f32 %v3710_v2, %v3462_v8  ;;  %4077 = vrot.lane.b32.xlu1 %v3997_v19, %s9077_s12  ;;  %v3436_v43 = vadd.f32 %v11289_v51, %v3397_v37  ;;  %v3399_v19 = vmul.f32 %v10876_v30, %v14534_v42  ;;  %v14535_v37 = vld [vmem:[#allocation44_spill] sm:$0xff]  ;;  %v14536_v42 = vld [vmem:[#allocation46_spill] sm:$0xff] }
 0x54f   : > { %3886 = vrot.lane.b32.xlu0 %v11106_v20, %s9076_s7  ;;  %v3401_v30 = vmul.f32 %v10891_v39, %v14535_v37  ;;  %v3403_v39 = vmul.f32 %v10903_v14, %v14536_v42 }
 0x550   : > { %3836 = vst.msk [vmem:[#allocation4 + $0x128] sm:$0xff] %vm3819_vm2, %v3803_v36  ;;  %v3438_v27 = vadd.f32 %v11289_v51, %v3399_v19  ;;  %v3468_v55 = vmax.f32 %v3436_v43, 0.0 }
 0x551   : > { %v3720_v24 = vpop.permute.xlu1 %3719  ;;  %v11480_v13 = vpop.permute.xlu0 %3724 }
 0x552   : > { %v3805_v8 = vmul.f32 %v3720_v24, %v3464_v31  ;;  %4081 = vrot.lane.b32.xlu1 %v3999_v34, %s9077_s12  ;;  %v3470_v43 = vmax.f32 %v3438_v27, 0.0 }
 0x553   : > { %3890 = vrot.lane.b32.xlu0 %v11119_v28, %s9076_s7 }
 0x554   : > { %3838 = vst.msk [vmem:[#allocation4 + $0x148] sm:$0xff] %vm3819_vm2, %v3805_v8  ;;  %v3440_v8 = vadd.f32 %v11289_v51, %v3401_v30 }
 0x555   : > { %v3730_v2 = vpop.permute.xlu1 %3729  ;;  %v11491_v36 = vpop.permute.xlu0 %3734 }
 0x556   : > { %v3807_v18 = vmul.f32 %v3730_v2, %v3466_v29  ;;  %4085 = vrot.lane.b32.xlu1 %v4001_v1, %s9077_s12  ;;  %v3442_v2 = vadd.f32 %v11289_v51, %v3403_v39  ;;  %v3472_v27 = vmax.f32 %v3440_v8, 0.0  ;;  %v4011_v39 = vsub.f32 %v11178_v11, %v11296_v44 }
 0x557   : > { %3894 = vrot.lane.b32.xlu0 %v11129_v58, %s9076_s7 }
 0x558   : > { %3840 = vst.msk [vmem:[#allocation4 + $0x168] sm:$0xff] %vm3819_vm2, %v3807_v18  ;;  %v14537_v18 = vld [vmem:[#allocation48_spill] sm:$0xff] }
 0x559   : > { %v3740_v31 = vpop.permute.xlu1 %3739  ;;  %v11502_v34 = vpop.permute.xlu0 %3744  ;;  %v3405_v14 = vmul.f32 %v10916_v33, %v14537_v18  ;;  %v3474_v33 = vmax.f32 %v3442_v2, 0.0 }
 0x55a   : > { %v3809_v24 = vmul.f32 %v3740_v31, %v3468_v55  ;;  %4089 = vrot.lane.b32.xlu1 %v4003_v47, %s9077_s12  ;;  %v4009_v31 = vsub.f32 %v11161_v48, %v11296_v44 }
 0x55b   : > { %3898 = vrot.lane.b32.xlu0 %v11138_v23, %s9076_s7  ;;  %v3444_v47 = vadd.f32 %v11289_v51, %v3405_v14 }
 0x55c   : > { %3842 = vst.msk [vmem:[#allocation4 + $0x188] sm:$0xff] %vm3819_vm2, %v3809_v24 }
 0x55d   : > { %v3750_v19 = vpop.permute.xlu1 %3749  ;;  %v11513_v29 = vpop.permute.xlu0 %3754  ;;  %v3476_v42 = vmax.f32 %v3444_v47, 0.0 }
 0x55e   : > { %v3811_v1 = vmul.f32 %v3750_v19, %v3470_v43  ;;  %4093 = vrot.lane.b32.xlu1 %v4005_v16, %s9077_s12 }
 0x55f   : > { %3902 = vrot.lane.b32.xlu0 %v11146_v32, %s9076_s7 }
 0x560   : > { %3844 = vst.msk [vmem:[#allocation4 + $0x1a8] sm:$0xff] %vm3819_vm2, %v3811_v1  ;;  %v3982_v1 = vsub.f32 %v10941_v9, %v11296_v44 }
 0x561   : > { %v3760_v37 = vpop.permute.xlu1 %3759  ;;  %v11524_v30 = vpop.permute.xlu0 %3764 }
 0x562   : > { %v3813_v55 = vmul.f32 %v3760_v37, %v3472_v27  ;;  %4097 = vrot.lane.b32.xlu1 %v4007_v50, %s9077_s12  ;;  %v3984_v27 = vsub.f32 %v10967_v54, %v11296_v44 }
 0x563   : > { %3906 = vrot.lane.b32.xlu0 %v11155_v35, %s9076_s7 }
 0x564   : > { %3846 = vst.msk [vmem:[#allocation4 + $0x1c8] sm:$0xff] %vm3819_vm2, %v3813_v55  ;;  %v11559_v55 = vld [vmem:[#allocation4 + $0xf] sm:$0xff] }
 0x565   : > { %v3770_v24 = vpop.permute.xlu1 %3769  ;;  %v11533_v8 = vpop.permute.xlu0 %3774  ;;  %4208 = vst.msk [vmem:[#allocation5 + $0x18] sm:$0xff] %vm4206_vm5, %v11559_v55 }
 0x566   : > { %v3815_v60 = vmul.f32 %v3770_v24, %v3474_v33  ;;  %4101 = vrot.lane.b32.xlu1 %v4009_v31, %s9077_s12 }
 0x567   : > { %3910 = vrot.lane.b32.xlu0 %v11164_v56, %s9076_s7 }
 0x568   : > { %3848 = vst.msk [vmem:[#allocation4 + $0x1e8] sm:$0xff] %vm3819_vm2, %v3815_v60  ;;  %v3988_v60 = vsub.f32 %v11006_v15, %v11296_v44 }
 0x569   : > { %v3780_v43 = vpop.permute.xlu1 %3779  ;;  %v11541_v16 = vpop.permute.xlu0 %3784 }
 0x56a   : > { %v3817_v19 = vmul.f32 %v3780_v43, %v3476_v42  ;;  %4105 = vrot.lane.b32.xlu1 %v4011_v39, %s9077_s12 }
 0x56b   : > { %3914 = vrot.lane.b32.xlu0 %v11181_v25, %s9076_s7 }
 0x56c   : > { %3850 = vst.msk [vmem:[#allocation4 + $0x208] sm:$0xff] %vm3819_vm2, %v3817_v19 }
 0x56d   : > { %v3853_v48 = vpop.permute.xlu1 %3852 }
 0x56e   : > { %v3218_v2 = vpop.permute.xlu0 %3217  ;;  %4303 = vrot.lane.b32.xlu1 %v11413_v7, %s9078_s13 }
 0x56f   : > { %v3375_v11 = vmul.f32 %v3218_v2, %v14492_v17  ;;  %4047 = vrot.lane.b32.xlu0 %v3982_v1, %s9077_s12 }
 0x571   : > { %v3414_v18 = vadd.f32 %v11289_v51, %v3375_v11  ;;  %v3857_v14 = vpop.permute.xlu1 %3856 }
 0x572   : > { %3951 = vst.msk [vmem:[#allocation4 + $0x48] sm:$0xff] %vm3948_vm6, %v3857_v14  ;;  %v3233_v50 = vpop.permute.xlu0 %3232 }
 0x573   : > { %v3446_v9 = vmax.f32 %v3414_v18, 0.0  ;;  %v3378_v37 = vmul.f32 %v14493_v22, %v3233_v50  ;;  %4051 = vrot.lane.b32.xlu0 %v3984_v27, %s9077_s12  ;;  %v3986_v22 = vsub.f32 %v10985_v57, %v11296_v44  ;;  %v3992_v27 = vsub.f32 %v11049_v26, %v11296_v44 }
 0x575   : > { %v3787_v54 = vmul.f32 %v11305_v63, %v3446_v9  ;;  %v3417_v17 = vadd.f32 %v11289_v51, %v3378_v37  ;;  %v3861_v47 = vpop.permute.xlu1 %3860 }
 0x576   : > { %3953 = vst.msk [vmem:[#allocation4 + $0x68] sm:$0xff] %vm3948_vm6, %v3861_v47  ;;  %v3243_v33 = vpop.permute.xlu0 %3242 }
 0x577   : > { %3820 = vst.msk [vmem:[#allocation4 + $0x28] sm:$0xff] %vm3819_vm2, %v3787_v54  ;;  %v3449_v31 = vmax.f32 %v3417_v17, 0.0  ;;  %v3380_v24 = vmul.f32 %v14494_v61, %v3243_v33  ;;  %4055 = vrot.lane.b32.xlu0 %v3986_v22, %s9077_s12  ;;  %v11582_v61 = vld [vmem:[#allocation4 + $0x10] sm:$0xff]  ;;  %v3994_v54 = vsub.f32 %v11066_v41, %v11296_v44  ;;  %v3996_v33 = vsub.f32 %v11085_v52, %v11296_v44 }
 0x578   : > { %3949 = vst.msk [vmem:[#allocation4 + $0x28] sm:$0xff] %vm3948_vm6, %v3853_v48  ;;  %v4433_v19 = vmax.f32 %v11559_v55, %v11582_v61 }
 0x579   : > { %v3419_v63 = vadd.f32 %v11289_v51, %v3380_v24  ;;  %v3865_v0 = vpop.permute.xlu1 %3864  ;;  %v3790_v57 = vmul.f32 %v11316_v40, %v3449_v31  ;;  %v3990_v40 = vsub.f32 %v11028_v10, %v11296_v44 }
 0x57a   : > { %3955 = vst.msk [vmem:[#allocation4 + $0x88] sm:$0xff] %vm3948_vm6, %v3865_v0  ;;  %v3253_v42 = vpop.permute.xlu0 %3252  ;;  %v3998_v0 = vsub.f32 %v11106_v20, %v11296_v44 }
 0x57b   : > { %v3451_v39 = vmax.f32 %v3419_v63, 0.0  ;;  %v3382_v43 = vmul.f32 %v14495_v21, %v3253_v42  ;;  %4059 = vrot.lane.b32.xlu0 %v3988_v60, %s9077_s12  ;;  %3823 = vst.msk [vmem:[#allocation4 + $0x50] sm:$0xff] %vm3819_vm2, %v3790_v57  ;;  %v14538_v57 = vld [vmem:[#allocation33_spill] sm:$0xff] }
 0x57d   : > { %v3421_v48 = vadd.f32 %v11289_v51, %v3382_v43  ;;  %v3869_v15 = vpop.permute.xlu1 %3868  ;;  %v3792_v1 = vmul.f32 %v11331_v46, %v3451_v39  ;;  %v4000_v43 = vsub.f32 %v11119_v28, %v11296_v44 }
 0x57e   : > { %3957 = vst.msk [vmem:[#allocation4 + $0xa8] sm:$0xff] %vm3948_vm6, %v3869_v15  ;;  %v3263_v21 = vpop.permute.xlu0 %3262  ;;  %v14539_v15 = vld [vmem:[#allocation35_spill] sm:$0xff] }
 0x57f   : > { %v3453_v2 = vmax.f32 %v3421_v48, 0.0  ;;  %v3384_v11 = vmul.f32 %v14496_v6, %v3263_v21  ;;  %4063 = vrot.lane.b32.xlu0 %v3990_v40, %s9077_s12  ;;  %3825 = vst.msk [vmem:[#allocation4 + $0x70] sm:$0xff] %vm3819_vm2, %v3792_v1 }
 0x581   : > { %v3423_v18 = vadd.f32 %v11289_v51, %v3384_v11  ;;  %v3873_v14 = vpop.permute.xlu1 %3872  ;;  %v3794_v10 = vmul.f32 %v11406_v4, %v3453_v2  ;;  %v4002_v2 = vsub.f32 %v11129_v58, %v11296_v44 }
 0x582   : > { %3959 = vst.msk [vmem:[#allocation4 + $0xc8] sm:$0xff] %vm3948_vm6, %v3873_v14  ;;  %v3273_v46 = vpop.permute.xlu0 %3272 }
 0x583   : > { %v3455_v50 = vmax.f32 %v3423_v18, 0.0  ;;  %v3386_v9 = vmul.f32 %v14498_v59, %v3273_v46  ;;  %4067 = vrot.lane.b32.xlu0 %v3992_v27, %s9077_s12  ;;  %3827 = vst.msk [vmem:[#allocation4 + $0x90] sm:$0xff] %vm3819_vm2, %v3794_v10  ;;  %v14540_v18 = vld [vmem:[#allocation37_spill] sm:$0xff]  ;;  %v4004_v46 = vsub.f32 %v11138_v23, %v11296_v44 }
 0x585   : > { %v3425_v6 = vadd.f32 %v11289_v51, %v3386_v9  ;;  %v3877_v37 = vpop.permute.xlu1 %3876  ;;  %v3796_v26 = vmul.f32 %v11423_v62, %v3455_v50  ;;  %v14541_v9 = vld [vmem:[#allocation39_spill] sm:$0xff] }
 0x586   : > { %3961 = vst.msk [vmem:[#allocation4 + $0xe8] sm:$0xff] %vm3948_vm6, %v3877_v37  ;;  %v3283_v4 = vpop.permute.xlu0 %3282 }
 0x587   : > { %v3457_v17 = vmax.f32 %v3425_v6, 0.0  ;;  %v3388_v47 = vmul.f32 %v14499_v49, %v3283_v4  ;;  %4071 = vrot.lane.b32.xlu0 %v3994_v54, %s9077_s12  ;;  %3829 = vst.msk [vmem:[#allocation4 + $0xb0] sm:$0xff] %vm3819_vm2, %v3796_v26  ;;  %v4006_v26 = vsub.f32 %v11146_v32, %v11296_v44 }
 0x589   : > { %v3427_v59 = vadd.f32 %v11289_v51, %v3388_v47  ;;  %v3881_v22 = vpop.permute.xlu1 %3880  ;;  %v3798_v41 = vmul.f32 %v11434_v53, %v3457_v17  ;;  %v14542_v17 = vld [vmem:[#allocation41_spill] sm:$0xff] }
 0x58a   : > { %3963 = vst.msk [vmem:[#allocation4 + $0x108] sm:$0xff] %vm3948_vm6, %v3881_v22  ;;  %v3293_v62 = vpop.permute.xlu0 %3292 }
 0x58b   : > { %v3459_v31 = vmax.f32 %v3427_v59, 0.0  ;;  %v3390_v24 = vmul.f32 %v14500_v45, %v3293_v62  ;;  %4075 = vrot.lane.b32.xlu0 %v3996_v33, %s9077_s12  ;;  %3831 = vst.msk [vmem:[#allocation4 + $0xd0] sm:$0xff] %vm3819_vm2, %v3798_v41  ;;  %v4008_v33 = vsub.f32 %v11155_v35, %v11296_v44  ;;  %v14543_v62 = vld [vmem:[#allocation43_spill] sm:$0xff] }
 0x58d   : > { %v3429_v49 = vadd.f32 %v11289_v51, %v3390_v24  ;;  %v3885_v63 = vpop.permute.xlu1 %3884  ;;  %v3800_v52 = vmul.f32 %v11445_v3, %v3459_v31 }
 0x58e   : > { %3965 = vst.msk [vmem:[#allocation4 + $0x128] sm:$0xff] %vm3948_vm6, %v3885_v63  ;;  %v3303_v53 = vpop.permute.xlu0 %3302  ;;  %v4010_v63 = vsub.f32 %v11164_v56, %v11296_v44 }
 0x58f   : > { %v3461_v60 = vmax.f32 %v3429_v49, 0.0  ;;  %v3392_v42 = vmul.f32 %v14538_v57, %v3303_v53  ;;  %4079 = vrot.lane.b32.xlu0 %v3998_v0, %s9077_s12  ;;  %3833 = vst.msk [vmem:[#allocation4 + $0xf0] sm:$0xff] %vm3819_vm2, %v3800_v52  ;;  %v14544_v52 = vld [vmem:[#allocation45_spill] sm:$0xff] }
 0x591   : > { %v3431_v45 = vadd.f32 %v11289_v51, %v3392_v42  ;;  %v3889_v39 = vpop.permute.xlu1 %3888  ;;  %v3802_v20 = vmul.f32 %v11456_v12, %v3461_v60  ;;  %v4012_v42 = vsub.f32 %v11181_v25, %v11296_v44 }
 0x592   : > { %3967 = vst.msk [vmem:[#allocation4 + $0x148] sm:$0xff] %vm3948_vm6, %v3889_v39  ;;  %v3313_v3 = vpop.permute.xlu0 %3312  ;;  %v14545_v39 = vld [vmem:[#allocation47_spill] sm:$0xff] }
 0x593   : > { %v3463_v48 = vmax.f32 %v3431_v45, 0.0  ;;  %v3394_v40 = vmul.f32 %v14539_v15, %v3313_v3  ;;  %4083 = vrot.lane.b32.xlu0 %v4000_v43, %s9077_s12  ;;  %3835 = vst.msk [vmem:[#allocation4 + $0x110] sm:$0xff] %vm3819_vm2, %v3802_v20 }
 0x595   : > { %v3433_v1 = vadd.f32 %v11289_v51, %v3394_v40  ;;  %v3893_v21 = vpop.permute.xlu1 %3892  ;;  %v3804_v28 = vmul.f32 %v11467_v5, %v3463_v48 }
 0x596   : > { %3969 = vst.msk [vmem:[#allocation4 + $0x168] sm:$0xff] %vm3948_vm6, %v3893_v21  ;;  %v3323_v12 = vpop.permute.xlu0 %3322 }
 0x597   : > { %v3465_v11 = vmax.f32 %v3433_v1, 0.0  ;;  %v3396_v14 = vmul.f32 %v14540_v18, %v3323_v12  ;;  %4087 = vrot.lane.b32.xlu0 %v4002_v2, %s9077_s12  ;;  %3837 = vst.msk [vmem:[#allocation4 + $0x130] sm:$0xff] %vm3819_vm2, %v3804_v28 }
 0x599   : > { %v3435_v27 = vadd.f32 %v11289_v51, %v3396_v14  ;;  %v3897_v10 = vpop.permute.xlu1 %3896  ;;  %v3806_v58 = vmul.f32 %v11480_v13, %v3465_v11 }
 0x59a   : > { %3971 = vst.msk [vmem:[#allocation4 + $0x188] sm:$0xff] %vm3948_vm6, %v3897_v10  ;;  %v3333_v5 = vpop.permute.xlu0 %3332 }
 0x59b   : > { %v3467_v50 = vmax.f32 %v3435_v27, 0.0  ;;  %v3398_v6 = vmul.f32 %v14541_v9, %v3333_v5  ;;  %4091 = vrot.lane.b32.xlu0 %v4004_v46, %s9077_s12  ;;  %3839 = vst.msk [vmem:[#allocation4 + $0x150] sm:$0xff] %vm3819_vm2, %v3806_v58 }
 0x59d   : > { %v3437_v37 = vadd.f32 %v11289_v51, %v3398_v6  ;;  %v3901_v54 = vpop.permute.xlu1 %3900  ;;  %v3808_v23 = vmul.f32 %v11491_v36, %v3467_v50 }
 0x59e   : > { %3973 = vst.msk [vmem:[#allocation4 + $0x1a8] sm:$0xff] %vm3948_vm6, %v3901_v54  ;;  %v3343_v13 = vpop.permute.xlu0 %3342 }
 0x59f   : > { %v3469_v4 = vmax.f32 %v3437_v37, 0.0  ;;  %v3400_v47 = vmul.f32 %v14542_v17, %v3343_v13  ;;  %4095 = vrot.lane.b32.xlu0 %v4006_v26, %s9077_s12  ;;  %3841 = vst.msk [vmem:[#allocation4 + $0x170] sm:$0xff] %vm3819_vm2, %v3808_v23 }
 0x5a1   : > { %v3439_v59 = vadd.f32 %v11289_v51, %v3400_v47  ;;  %v3905_v22 = vpop.permute.xlu1 %3904  ;;  %v3810_v32 = vmul.f32 %v11502_v34, %v3469_v4 }
 0x5a2   : > { %3975 = vst.msk [vmem:[#allocation4 + $0x1c8] sm:$0xff] %vm3948_vm6, %v3905_v22  ;;  %v3353_v36 = vpop.permute.xlu0 %3352 }
 0x5a3   : > { %v3471_v41 = vmax.f32 %v3439_v59, 0.0  ;;  %v3402_v31 = vmul.f32 %v14543_v62, %v3353_v36  ;;  %4099 = vrot.lane.b32.xlu0 %v4008_v33, %s9077_s12  ;;  %3843 = vst.msk [vmem:[#allocation4 + $0x190] sm:$0xff] %vm3819_vm2, %v3810_v32 }
 0x5a5   : > { %v3441_v24 = vadd.f32 %v11289_v51, %v3402_v31  ;;  %v3909_v49 = vpop.permute.xlu1 %3908  ;;  %v3812_v35 = vmul.f32 %v11513_v29, %v3471_v41 }
 0x5a6   : > { %3977 = vst.msk [vmem:[#allocation4 + $0x1e8] sm:$0xff] %vm3948_vm6, %v3909_v49  ;;  %v3363_v34 = vpop.permute.xlu0 %3362 }
 0x5a7   : > { %v3473_v0 = vmax.f32 %v3441_v24, 0.0  ;;  %v3404_v53 = vmul.f32 %v14544_v52, %v3363_v34  ;;  %4103 = vrot.lane.b32.xlu0 %v4010_v63, %s9077_s12  ;;  %3845 = vst.msk [vmem:[#allocation4 + $0x1b0] sm:$0xff] %vm3819_vm2, %v3812_v35 }
 0x5a9   : > { %v3443_v60 = vadd.f32 %v11289_v51, %v3404_v53  ;;  %v3913_v57 = vpop.permute.xlu1 %3912  ;;  %v3814_v56 = vmul.f32 %v11524_v30, %v3473_v0 }
 0x5aa   : > { %3979 = vst.msk [vmem:[#allocation4 + $0x208] sm:$0xff] %vm3948_vm6, %v3913_v57  ;;  %v3373_v29 = vpop.permute.xlu0 %3372 }
 0x5ab   : > { %v3475_v45 = vmax.f32 %v3443_v60, 0.0  ;;  %v3406_v43 = vmul.f32 %v14545_v39, %v3373_v29  ;;  %4107 = vrot.lane.b32.xlu0 %v4012_v42, %s9077_s12  ;;  %3847 = vst.msk [vmem:[#allocation4 + $0x1d0] sm:$0xff] %vm3819_vm2, %v3814_v56 }
 0x5ad   : > { %v3445_v20 = vadd.f32 %v11289_v51, %v3406_v43  ;;  %v4046_v3 = vpop.permute.xlu1 %4045  ;;  %v3816_v48 = vmul.f32 %v11533_v8, %v3475_v45 }
 0x5ae   : > { %4142 = vst.msk [vmem:[#allocation4 + $0x28] sm:$0xff] %vm4141_vm8, %v4046_v3  ;;  %v3855_v25 = vpop.permute.xlu0 %3854 }
 0x5af   : > { %v3477_v30 = vmax.f32 %v3445_v20, 0.0  ;;  %3950 = vst.msk [vmem:[#allocation4 + $0x30] sm:$0xff] %vm3948_vm6, %v3855_v25  ;;  %4305 = vrot.lane.b32.xlu0 %v11582_v61, %s9078_s13 }
 0x5b0   : > { %3849 = vst.msk [vmem:[#allocation4 + $0x1f0] sm:$0xff] %vm3819_vm2, %v3816_v48 }
 0x5b1   : > { %v4050_v15 = vpop.permute.xlu1 %4049  ;;  %v3818_v40 = vmul.f32 %v11541_v16, %v3477_v30 }
 0x5b2   : > { %4144 = vst.msk [vmem:[#allocation4 + $0x48] sm:$0xff] %vm4141_vm8, %v4050_v15  ;;  %v3859_v51 = vpop.permute.xlu0 %3858 }
 0x5b3   : > { %3952 = vst.msk [vmem:[#allocation4 + $0x50] sm:$0xff] %vm3948_vm6, %v3859_v51 }
 0x5b4   : > { %3851 = vst.msk [vmem:[#allocation4 + $0x210] sm:$0xff] %vm3819_vm2, %v3818_v40 }
 0x5b5   : > { %v4054_v8 = vpop.permute.xlu1 %4053  ;;  %v11693_v1 = vld [vmem:[#allocation4 + $0x28] sm:$0xff] }
 0x5b6   : > { %v11695_v21 = vld [vmem:[#allocation4 + $0x27] sm:$0xff]  ;;  %4146 = vst.msk [vmem:[#allocation4 + $0x68] sm:$0xff] %vm4141_vm8, %v4054_v8  ;;  %v3863_v2 = vpop.permute.xlu0 %3862  ;;  %4307 = vrot.lane.b32.xlu1 %v11693_v1, %s9078_s13 }
 0x5b7   : > { %4209 = vst.msk [vmem:[#allocation5 + $0x30] sm:$0xff] %vm4206_vm5, %v11695_v21 }
 0x5b8   : > { %3954 = vst.msk [vmem:[#allocation4 + $0x70] sm:$0xff] %vm3948_vm6, %v3863_v2 }
 0x5b9   : > { %v4058_v16 = vpop.permute.xlu1 %4057  ;;  %v11703_v28 = vld [vmem:[#allocation4 + $0x48] sm:$0xff] }
 0x5ba   : > { %v11705_v12 = vld [vmem:[#allocation4 + $0x47] sm:$0xff]  ;;  %4148 = vst.msk [vmem:[#allocation4 + $0x88] sm:$0xff] %vm4141_vm8, %v4058_v16  ;;  %v3867_v11 = vpop.permute.xlu0 %3866  ;;  %4311 = vrot.lane.b32.xlu1 %v11703_v28, %s9078_s13 }
 0x5bb   : > { %4211 = vst.msk [vmem:[#allocation5 + $0x60] sm:$0xff] %vm4206_vm5, %v11705_v12 }
 0x5bc   : > { %3956 = vst.msk [vmem:[#allocation4 + $0x90] sm:$0xff] %vm3948_vm6, %v3867_v11 }
 0x5bd   : > { %v4062_v18 = vpop.permute.xlu1 %4061  ;;  %v11713_v14 = vld [vmem:[#allocation4 + $0x68] sm:$0xff] }
 0x5be   : > { %v11715_v27 = vld [vmem:[#allocation4 + $0x67] sm:$0xff]  ;;  %4150 = vst.msk [vmem:[#allocation4 + $0xa8] sm:$0xff] %vm4141_vm8, %v4062_v18  ;;  %v3871_v10 = vpop.permute.xlu0 %3870  ;;  %4315 = vrot.lane.b32.xlu1 %v11713_v14, %s9078_s13 }
 0x5bf   : > { %4213 = vst.msk [vmem:[#allocation5 + $0x90] sm:$0xff] %vm4206_vm5, %v11715_v27 }
 0x5c0   : > { %3958 = vst.msk [vmem:[#allocation4 + $0xb0] sm:$0xff] %vm3948_vm6, %v3871_v10 }
 0x5c1   : > { %v4066_v46 = vpop.permute.xlu1 %4065  ;;  %v11723_v58 = vld [vmem:[#allocation4 + $0x88] sm:$0xff] }
 0x5c2   : > { %v11725_v5 = vld [vmem:[#allocation4 + $0x87] sm:$0xff]  ;;  %4152 = vst.msk [vmem:[#allocation4 + $0xc8] sm:$0xff] %vm4141_vm8, %v4066_v46  ;;  %v3875_v50 = vpop.permute.xlu0 %3874  ;;  %4319 = vrot.lane.b32.xlu1 %v11723_v58, %s9078_s13 }
 0x5c3   : > { %4215 = vst.msk [vmem:[#allocation5 + $0xc0] sm:$0xff] %vm4206_vm5, %v11725_v5 }
 0x5c4   : > { %3960 = vst.msk [vmem:[#allocation4 + $0xd0] sm:$0xff] %vm3948_vm6, %v3875_v50 }
 0x5c5   : > { %v4070_v6 = vpop.permute.xlu1 %4069  ;;  %v11735_v37 = vld [vmem:[#allocation4 + $0xa8] sm:$0xff] }
 0x5c6   : > { %14546 = vst [vmem:[#allocation10_spill] sm:$0xff] %v11735_v37  ;;  %v11737_v54 = vld [vmem:[#allocation4 + $0xa7] sm:$0xff]  ;;  %4154 = vst.msk [vmem:[#allocation4 + $0xe8] sm:$0xff] %vm4141_vm8, %v4070_v6  ;;  %v3879_v26 = vpop.permute.xlu0 %3878  ;;  %4323 = vrot.lane.b32.xlu1 %v11735_v37, %s9078_s13 }
 0x5c7   : > { %4217 = vst.msk [vmem:[#allocation5 + $0xf0] sm:$0xff] %vm4206_vm5, %v11737_v54 }
 0x5c8   : > { %3962 = vst.msk [vmem:[#allocation4 + $0xf0] sm:$0xff] %vm3948_vm6, %v3879_v26  ;;  %v4464_v26 = vld [vmem:[#allocation4 + $0x9] sm:$0xff] }
 0x5c9   : > { %v4074_v13 = vpop.permute.xlu1 %4073  ;;  %v11747_v4 = vld [vmem:[#allocation4 + $0xc8] sm:$0xff] }
 0x5ca   : > { %v11749_v17 = vld [vmem:[#allocation4 + $0xc7] sm:$0xff]  ;;  %4156 = vst.msk [vmem:[#allocation4 + $0x108] sm:$0xff] %vm4141_vm8, %v4074_v13  ;;  %v3883_v47 = vpop.permute.xlu0 %3882  ;;  %4327 = vrot.lane.b32.xlu1 %v11747_v4, %s9078_s13 }
 0x5cb   : > { %4219 = vst.msk [vmem:[#allocation5 + $0x120] sm:$0xff] %vm4206_vm5, %v11749_v17 }
 0x5cc   : > { %3964 = vst.msk [vmem:[#allocation4 + $0x110] sm:$0xff] %vm3948_vm6, %v3883_v47 }
 0x5cd   : > { %v4078_v22 = vpop.permute.xlu1 %4077  ;;  %v11759_v33 = vld [vmem:[#allocation4 + $0xe8] sm:$0xff] }
 0x5ce   : > { %14547 = vst [vmem:[#allocation11_spill] sm:$0xff] %v11759_v33  ;;  %v11761_v32 = vld [vmem:[#allocation4 + $0xe7] sm:$0xff]  ;;  %4158 = vst.msk [vmem:[#allocation4 + $0x128] sm:$0xff] %vm4141_vm8, %v4078_v22  ;;  %v3887_v36 = vpop.permute.xlu0 %3886  ;;  %4331 = vrot.lane.b32.xlu1 %v11759_v33, %s9078_s13 }
 0x5cf   : > { %14548 = vst [vmem:[#allocation12_spill] sm:$0xff] %v11761_v32  ;;  %4221 = vst.msk [vmem:[#allocation5 + $0x150] sm:$0xff] %vm4206_vm5, %v11761_v32 }
 0x5d0   : > { %3966 = vst.msk [vmem:[#allocation4 + $0x130] sm:$0xff] %vm3948_vm6, %v3887_v36 }
 0x5d1   : > { %v4082_v62 = vpop.permute.xlu1 %4081  ;;  %v11771_v31 = vld [vmem:[#allocation4 + $0x108] sm:$0xff] }
 0x5d2   : > { %v11773_v24 = vld [vmem:[#allocation4 + $0x107] sm:$0xff]  ;;  %4160 = vst.msk [vmem:[#allocation4 + $0x148] sm:$0xff] %vm4141_vm8, %v4082_v62  ;;  %v3891_v49 = vpop.permute.xlu0 %3890  ;;  %4335 = vrot.lane.b32.xlu1 %v11771_v31, %s9078_s13 }
 0x5d3   : > { %4223 = vst.msk [vmem:[#allocation5 + $0x180] sm:$0xff] %vm4206_vm5, %v11773_v24 }
 0x5d4   : > { %3968 = vst.msk [vmem:[#allocation4 + $0x150] sm:$0xff] %vm3948_vm6, %v3891_v49  ;;  %v14555_v49 = vmax.f32 %v11411_v38, %v11413_v7 }
 0x5d5   : > { %v4086_v35 = vpop.permute.xlu1 %4085  ;;  %v11783_v34 = vld [vmem:[#allocation4 + $0x128] sm:$0xff] }
 0x5d6   : > { %14549 = vst [vmem:[#allocation13_spill] sm:$0xff] %v11783_v34  ;;  %v11785_v0 = vld [vmem:[#allocation4 + $0x127] sm:$0xff]  ;;  %4162 = vst.msk [vmem:[#allocation4 + $0x168] sm:$0xff] %vm4141_vm8, %v4086_v35  ;;  %v3895_v52 = vpop.permute.xlu0 %3894  ;;  %4339 = vrot.lane.b32.xlu1 %v11783_v34, %s9078_s13  ;;  %v4657_v35 = vmax.f32 %v14555_v49, %v4464_v26 }
 0x5d7   : > { %14550 = vst [vmem:[#allocation14_spill] sm:$0xff] %v11785_v0  ;;  %4225 = vst.msk [vmem:[#allocation5 + $0x1b0] sm:$0xff] %vm4206_vm5, %v11785_v0 }
 0x5d8   : > { %3970 = vst.msk [vmem:[#allocation4 + $0x170] sm:$0xff] %vm3948_vm6, %v3895_v52  ;;  %v11870_v52 = vld [vmem:[#allocation4 + $0x11] sm:$0xff] }
 0x5d9   : > { %v4090_v60 = vpop.permute.xlu1 %4089  ;;  %v11795_v57 = vld [vmem:[#allocation4 + $0x148] sm:$0xff]  ;;  %v4658_v38 = vmax.f32 %v4433_v19, %v11870_v52 }
 0x5da   : > { %v11797_v42 = vld [vmem:[#allocation4 + $0x147] sm:$0xff]  ;;  %4164 = vst.msk [vmem:[#allocation4 + $0x188] sm:$0xff] %vm4141_vm8, %v4090_v60  ;;  %v3899_v56 = vpop.permute.xlu0 %3898  ;;  %4343 = vrot.lane.b32.xlu1 %v11795_v57, %s9078_s13 }
 0x5db   : > { %4227 = vst.msk [vmem:[#allocation5 + $0x1e0] sm:$0xff] %vm4206_vm5, %v11797_v42 }
 0x5dc   : > { %3972 = vst.msk [vmem:[#allocation4 + $0x190] sm:$0xff] %vm3948_vm6, %v3899_v56  ;;  %v4915_v56 = vmax.f32 %v4657_v35, %v11695_v21 }
 0x5dd   : > { %v4094_v45 = vpop.permute.xlu1 %4093  ;;  %v11807_v39 = vld [vmem:[#allocation4 + $0x168] sm:$0xff] }
 0x5de   : > { %v11809_v43 = vld [vmem:[#allocation4 + $0x167] sm:$0xff]  ;;  %4166 = vst.msk [vmem:[#allocation4 + $0x1a8] sm:$0xff] %vm4141_vm8, %v4094_v45  ;;  %v3903_v20 = vpop.permute.xlu0 %3902  ;;  %4347 = vrot.lane.b32.xlu1 %v11807_v39, %s9078_s13 }
 0x5df   : > { %4229 = vst.msk [vmem:[#allocation5 + $0x210] sm:$0xff] %vm4206_vm5, %v11809_v43 }
 0x5e0   : > { %3974 = vst.msk [vmem:[#allocation4 + $0x1b0] sm:$0xff] %vm3948_vm6, %v3903_v20 }
 0x5e1   : > { %v4098_v48 = vpop.permute.xlu1 %4097  ;;  %v11819_v25 = vld [vmem:[#allocation4 + $0x188] sm:$0xff] }
 0x5e2   : > { %v11821_v30 = vld [vmem:[#allocation4 + $0x187] sm:$0xff]  ;;  %4168 = vst.msk [vmem:[#allocation4 + $0x1c8] sm:$0xff] %vm4141_vm8, %v4098_v48  ;;  %v3907_v15 = vpop.permute.xlu0 %3906  ;;  %4351 = vrot.lane.b32.xlu1 %v11819_v25, %s9078_s13 }
 0x5e3   : > { %4231 = vst.msk [vmem:[#allocation5 + $0x240] sm:$0xff] %vm4206_vm5, %v11821_v30 }
 0x5e4   : > { %3976 = vst.msk [vmem:[#allocation4 + $0x1d0] sm:$0xff] %vm3948_vm6, %v3907_v15  ;;  %v11886_v15 = vmax.f32 %v4915_v56, %v11693_v1 }
 0x5e5   : > { %v4102_v51 = vpop.permute.xlu1 %4101  ;;  %v11831_v8 = vld [vmem:[#allocation4 + $0x1a8] sm:$0xff] }
 0x5e6   : > { %v11833_v2 = vld [vmem:[#allocation4 + $0x1a7] sm:$0xff]  ;;  %4170 = vst.msk [vmem:[#allocation4 + $0x1e8] sm:$0xff] %vm4141_vm8, %v4102_v51  ;;  %v3911_v16 = vpop.permute.xlu0 %3910  ;;  %4355 = vrot.lane.b32.xlu1 %v11831_v8, %s9078_s13 }
 0x5e7   : > { %4233 = vst.msk [vmem:[#allocation5 + $0x270] sm:$0xff] %vm4206_vm5, %v11833_v2 }
 0x5e8   : > { %3978 = vst.msk [vmem:[#allocation4 + $0x1f0] sm:$0xff] %vm3948_vm6, %v3911_v16 }
 0x5e9   : > { %v4106_v18 = vpop.permute.xlu1 %4105  ;;  %v11843_v10 = vld [vmem:[#allocation4 + $0x1c8] sm:$0xff] }
 0x5ea   : > { %14551 = vst [vmem:[#allocation15_spill] sm:$0xff] %v11843_v10  ;;  %v11845_v46 = vld [vmem:[#allocation4 + $0x1c7] sm:$0xff]  ;;  %4172 = vst.msk [vmem:[#allocation4 + $0x208] sm:$0xff] %vm4141_vm8, %v4106_v18  ;;  %v3915_v50 = vpop.permute.xlu0 %3914  ;;  %4359 = vrot.lane.b32.xlu1 %v11843_v10, %s9078_s13 }
 0x5eb   : > { %14552 = vst [vmem:[#allocation17_spill] sm:$0xff] %v11845_v46  ;;  %4235 = vst.msk [vmem:[#allocation5 + $0x2a0] sm:$0xff] %vm4206_vm5, %v11845_v46 }
 0x5ec   : > { %3980 = vst.msk [vmem:[#allocation4 + $0x210] sm:$0xff] %vm3948_vm6, %v3915_v50 }
 0x5ed   : > { %v11855_v13 = vld [vmem:[#allocation4 + $0x1e8] sm:$0xff]  ;;  %v4304_v22 = vpop.permute.xlu1 %4303 }
 0x5ee   : > { %14553 = vst [vmem:[#allocation18_spill] sm:$0xff] %v11855_v13  ;;  %v11857_v47 = vld [vmem:[#allocation4 + $0x1e7] sm:$0xff]  ;;  %v4048_v36 = vpop.permute.xlu0 %4047  ;;  %4363 = vrot.lane.b32.xlu1 %v11855_v13, %s9078_s13  ;;  %4400 = vst.msk [vmem:[#allocation5] sm:$0xff] %vm4399_vm9, %v4304_v22 }
 0x5ef   : > { %14554 = vst [vmem:[#allocation19_spill] sm:$0xff] %v11857_v47  ;;  %4237 = vst.msk [vmem:[#allocation5 + $0x2d0] sm:$0xff] %vm4206_vm5, %v11857_v47 }
 0x5f0   : > { %4143 = vst.msk [vmem:[#allocation4 + $0x30] sm:$0xff] %vm4141_vm8, %v4048_v36 }
 0x5f2   : > { %v4052_v60 = vpop.permute.xlu0 %4051  ;;  %4528 = vrot.lane.b32.xlu1 %v4464_v26, %s9079_s14 }
 0x5f3   : > { %4145 = vst.msk [vmem:[#allocation4 + $0x50] sm:$0xff] %vm4141_vm8, %v4052_v60 }
 0x5f6   : > { %v4056_v7 = vpop.permute.xlu0 %4055 }
 0x5f7   : > { %v11879_v45 = vld [vmem:[#allocation4 + $0x30] sm:$0xff]  ;;  %4147 = vst.msk [vmem:[#allocation4 + $0x70] sm:$0xff] %vm4141_vm8, %v4056_v7 }
 0x5f8   : > { %v11881_v20 = vld [vmem:[#allocation4 + $0x2f] sm:$0xff]  ;;  %4309 = vrot.lane.b32.xlu0 %v11879_v45, %s9078_s13 }
 0x5f9   : > { %v11883_v48 = vld [vmem:[#allocation4 + $0x29] sm:$0xff]  ;;  %4210 = vst.msk [vmem:[#allocation5 + $0x48] sm:$0xff] %vm4206_vm5, %v11881_v20  ;;  %v4916_v55 = vmax.f32 %v4658_v38, %v11881_v20 }
 0x5fa   : > { %4532 = vrot.lane.b32.xlu1 %v11883_v48, %s9079_s14  ;;  %v4060_v16 = vpop.permute.xlu0 %4059  ;;  %v11903_v18 = vld [vmem:[#allocation4 + $0x50] sm:$0xff] }
 0x5fb   : > { %v11901_v19 = vmax.f32 %v4916_v55, %v11879_v45  ;;  %v11905_v50 = vld [vmem:[#allocation4 + $0x4f] sm:$0xff]  ;;  %4149 = vst.msk [vmem:[#allocation4 + $0x90] sm:$0xff] %vm4141_vm8, %v4060_v16 }
 0x5fc   : > { %v11907_v26 = vld [vmem:[#allocation4 + $0x49] sm:$0xff]  ;;  %4313 = vrot.lane.b32.xlu0 %v11903_v18, %s9078_s13  ;;  %4212 = vst.msk [vmem:[#allocation5 + $0x78] sm:$0xff] %vm4206_vm5, %v11905_v50 }
 0x5fe   : > { %4536 = vrot.lane.b32.xlu1 %v11907_v26, %s9079_s14  ;;  %v4064_v22 = vpop.permute.xlu0 %4063  ;;  %v11916_v36 = vld [vmem:[#allocation4 + $0x70] sm:$0xff] }
 0x5ff   : > { %v11918_v49 = vld [vmem:[#allocation4 + $0x6f] sm:$0xff]  ;;  %4151 = vst.msk [vmem:[#allocation4 + $0xb0] sm:$0xff] %vm4141_vm8, %v4064_v22 }
 0x600   : > { %v11920_v35 = vld [vmem:[#allocation4 + $0x69] sm:$0xff]  ;;  %4317 = vrot.lane.b32.xlu0 %v11916_v36, %s9078_s13  ;;  %4214 = vst.msk [vmem:[#allocation5 + $0xa8] sm:$0xff] %vm4206_vm5, %v11918_v49 }
 0x602   : > { %4540 = vrot.lane.b32.xlu1 %v11920_v35, %s9079_s14  ;;  %v4068_v60 = vpop.permute.xlu0 %4067  ;;  %v11929_v56 = vld [vmem:[#allocation4 + $0x90] sm:$0xff] }
 0x603   : > { %v11931_v38 = vld [vmem:[#allocation4 + $0x8f] sm:$0xff]  ;;  %4153 = vst.msk [vmem:[#allocation4 + $0xd0] sm:$0xff] %vm4141_vm8, %v4068_v60 }
 0x604   : > { %v11933_v7 = vld [vmem:[#allocation4 + $0x89] sm:$0xff]  ;;  %4321 = vrot.lane.b32.xlu0 %v11929_v56, %s9078_s13  ;;  %4216 = vst.msk [vmem:[#allocation5 + $0xd8] sm:$0xff] %vm4206_vm5, %v11931_v38 }
 0x606   : > { %4544 = vrot.lane.b32.xlu1 %v11933_v7, %s9079_s14  ;;  %v4072_v55 = vpop.permute.xlu0 %4071  ;;  %v11942_v16 = vld [vmem:[#allocation4 + $0xb0] sm:$0xff] }
 0x607   : > { %v11944_v22 = vld [vmem:[#allocation4 + $0xaf] sm:$0xff]  ;;  %4155 = vst.msk [vmem:[#allocation4 + $0xf0] sm:$0xff] %vm4141_vm8, %v4072_v55 }
 0x608   : > { %v11946_v62 = vld [vmem:[#allocation4 + $0xa9] sm:$0xff]  ;;  %4325 = vrot.lane.b32.xlu0 %v11942_v16, %s9078_s13  ;;  %4218 = vst.msk [vmem:[#allocation5 + $0x108] sm:$0xff] %vm4206_vm5, %v11944_v22 }
 0x60a   : > { %4548 = vrot.lane.b32.xlu1 %v11946_v62, %s9079_s14  ;;  %v4076_v60 = vpop.permute.xlu0 %4075  ;;  %v11955_v6 = vld [vmem:[#allocation4 + $0xd0] sm:$0xff] }
 0x60b   : > { %v11957_v53 = vld [vmem:[#allocation4 + $0xcf] sm:$0xff]  ;;  %4157 = vst.msk [vmem:[#allocation4 + $0x110] sm:$0xff] %vm4141_vm8, %v4076_v60 }
 0x60c   : > { %v11959_v41 = vld [vmem:[#allocation4 + $0xc9] sm:$0xff]  ;;  %4329 = vrot.lane.b32.xlu0 %v11955_v6, %s9078_s13  ;;  %4220 = vst.msk [vmem:[#allocation5 + $0x138] sm:$0xff] %vm4206_vm5, %v11957_v53 }
 0x60e   : > { %4552 = vrot.lane.b32.xlu1 %v11959_v41, %s9079_s14  ;;  %v4080_v55 = vpop.permute.xlu0 %4079  ;;  %v11968_v23 = vld [vmem:[#allocation4 + $0xf0] sm:$0xff] }
 0x60f   : > { %v11970_v63 = vld [vmem:[#allocation4 + $0xef] sm:$0xff]  ;;  %4159 = vst.msk [vmem:[#allocation4 + $0x130] sm:$0xff] %vm4141_vm8, %v4080_v55 }
 0x610   : > { %v11972_v59 = vld [vmem:[#allocation4 + $0xe9] sm:$0xff]  ;;  %4333 = vrot.lane.b32.xlu0 %v11968_v23, %s9078_s13  ;;  %4222 = vst.msk [vmem:[#allocation5 + $0x168] sm:$0xff] %vm4206_vm5, %v11970_v63 }
 0x612   : > { %4556 = vrot.lane.b32.xlu1 %v11972_v59, %s9079_s14  ;;  %v4084_v60 = vpop.permute.xlu0 %4083  ;;  %v11981_v9 = vld [vmem:[#allocation4 + $0x110] sm:$0xff] }
 0x613   : > { %v11983_v51 = vld [vmem:[#allocation4 + $0x10f] sm:$0xff]  ;;  %4161 = vst.msk [vmem:[#allocation4 + $0x150] sm:$0xff] %vm4141_vm8, %v4084_v60 }
 0x614   : > { %v11985_v61 = vld [vmem:[#allocation4 + $0x109] sm:$0xff]  ;;  %4337 = vrot.lane.b32.xlu0 %v11981_v9, %s9078_s13  ;;  %4224 = vst.msk [vmem:[#allocation5 + $0x198] sm:$0xff] %vm4206_vm5, %v11983_v51 }
 0x616   : > { %4560 = vrot.lane.b32.xlu1 %v11985_v61, %s9079_s14  ;;  %v4088_v55 = vpop.permute.xlu0 %4087  ;;  %v11994_v11 = vld [vmem:[#allocation4 + $0x130] sm:$0xff] }
 0x617   : > { %v11996_v40 = vld [vmem:[#allocation4 + $0x12f] sm:$0xff]  ;;  %4163 = vst.msk [vmem:[#allocation4 + $0x170] sm:$0xff] %vm4141_vm8, %v4088_v55  ;;  %v14556_v55 = vmax.f32 %v11797_v42, %v11795_v57  ;;  %v14558_v42 = vmax.f32 %v11809_v43, %v11807_v39  ;;  %v14561_v39 = vmax.f32 %v11821_v30, %v11819_v25 }
 0x618   : > { %v11998_v3 = vld [vmem:[#allocation4 + $0x129] sm:$0xff]  ;;  %4341 = vrot.lane.b32.xlu0 %v11994_v11, %s9078_s13  ;;  %4226 = vst.msk [vmem:[#allocation5 + $0x1c8] sm:$0xff] %vm4206_vm5, %v11996_v40 }
 0x61a   : > { %4564 = vrot.lane.b32.xlu1 %v11998_v3, %s9079_s14  ;;  %v4092_v60 = vpop.permute.xlu0 %4091  ;;  %v4260_v29 = vld [vmem:[#allocation4 + $0x150] sm:$0xff] }
 0x61b   : > { %v4195_v13 = vld [vmem:[#allocation4 + $0x14f] sm:$0xff]  ;;  %4165 = vst.msk [vmem:[#allocation4 + $0x190] sm:$0xff] %vm4141_vm8, %v4092_v60 }
 0x61c   : > { %v4484_v47 = vld [vmem:[#allocation4 + $0x149] sm:$0xff]  ;;  %4345 = vrot.lane.b32.xlu0 %v4260_v29, %s9078_s13  ;;  %v4453_v10 = vmax.f32 %v4195_v13, %v4260_v29  ;;  %4228 = vst.msk [vmem:[#allocation5 + $0x1f8] sm:$0xff] %vm4206_vm5, %v4195_v13  ;;  %v12016_v34 = vld [vmem:[#allocation4 + $0x151] sm:$0xff] }
 0x61d   : > { %v12012_v46 = vmax.f32 %v14556_v55, %v4484_v47 }
 0x61e   : > { %4568 = vrot.lane.b32.xlu1 %v4484_v47, %s9079_s14  ;;  %v12019_v0 = vmax.f32 %v4453_v10, %v12016_v34  ;;  %v4096_v33 = vpop.permute.xlu0 %4095  ;;  %v4262_v32 = vld [vmem:[#allocation4 + $0x170] sm:$0xff] }
 0x61f   : > { %v4197_v60 = vld [vmem:[#allocation4 + $0x16f] sm:$0xff]  ;;  %4167 = vst.msk [vmem:[#allocation4 + $0x1b0] sm:$0xff] %vm4141_vm8, %v4096_v33 }
 0x620   : > { %14557 = vst [vmem:[#allocation21_spill] sm:$0xff] %v12019_v0  ;;  %v4486_v37 = vld [vmem:[#allocation4 + $0x169] sm:$0xff]  ;;  %4349 = vrot.lane.b32.xlu0 %v4262_v32, %s9078_s13  ;;  %v4455_v57 = vmax.f32 %v4197_v60, %v4262_v32  ;;  %4230 = vst.msk [vmem:[#allocation5 + $0x228] sm:$0xff] %vm4206_vm5, %v4197_v60  ;;  %v12030_v10 = vld [vmem:[#allocation4 + $0x171] sm:$0xff] }
 0x621   : > { %v12026_v29 = vmax.f32 %v14558_v42, %v4486_v37 }
 0x622   : > { %4572 = vrot.lane.b32.xlu1 %v4486_v37, %s9079_s14  ;;  %v12033_v13 = vmax.f32 %v4455_v57, %v12030_v10  ;;  %v4100_v47 = vpop.permute.xlu0 %4099  ;;  %v4264_v55 = vld [vmem:[#allocation4 + $0x190] sm:$0xff] }
 0x623   : > { %14559 = vst [vmem:[#allocation23_spill] sm:$0xff] %v12026_v29  ;;  %v4199_v33 = vld [vmem:[#allocation4 + $0x18f] sm:$0xff]  ;;  %4169 = vst.msk [vmem:[#allocation4 + $0x1d0] sm:$0xff] %vm4141_vm8, %v4100_v47 }
 0x624   : > { %14560 = vst [vmem:[#allocation25_spill] sm:$0xff] %v12033_v13  ;;  %v4488_v0 = vld [vmem:[#allocation4 + $0x189] sm:$0xff]  ;;  %4353 = vrot.lane.b32.xlu0 %v4264_v55, %s9078_s13  ;;  %v4457_v32 = vmax.f32 %v4199_v33, %v4264_v55  ;;  %4232 = vst.msk [vmem:[#allocation5 + $0x258] sm:$0xff] %vm4206_vm5, %v4199_v33  ;;  %v12044_v43 = vld [vmem:[#allocation4 + $0x191] sm:$0xff] }
 0x625   : > { %v12040_v37 = vmax.f32 %v14561_v39, %v4488_v0 }
 0x626   : > { %4576 = vrot.lane.b32.xlu1 %v4488_v0, %s9079_s14  ;;  %v12047_v60 = vmax.f32 %v4457_v32, %v12044_v43  ;;  %v4104_v57 = vpop.permute.xlu0 %4103  ;;  %v4266_v42 = vld [vmem:[#allocation4 + $0x1b0] sm:$0xff]  ;;  %v14564_v0 = vmax.f32 %v11833_v2, %v11831_v8  ;;  %v14318_v8 = vmov 0.0|0.0  }
 0x627   : > { %14562 = vst [vmem:[#allocation27_spill] sm:$0xff] %v12040_v37  ;;  %v4201_v47 = vld [vmem:[#allocation4 + $0x1af] sm:$0xff]  ;;  %4171 = vst.msk [vmem:[#allocation4 + $0x1f0] sm:$0xff] %vm4141_vm8, %v4104_v57  ;;  %8465 = vmatprep.subr.bf16.mxu1 %v14318_v8 }
 0x628   : > { %14563 = vst [vmem:[#allocation29_spill] sm:$0xff] %v12047_v60  ;;  %v4490_v29 = vld [vmem:[#allocation4 + $0x1a9] sm:$0xff]  ;;  %4357 = vrot.lane.b32.xlu0 %v4266_v42, %s9078_s13  ;;  %v4459_v25 = vmax.f32 %v4201_v47, %v4266_v42  ;;  %4234 = vst.msk [vmem:[#allocation5 + $0x288] sm:$0xff] %vm4206_vm5, %v4201_v47  ;;  %v4308_v55 = vpop.permute.xlu1 %4307  ;;  %v12058_v33 = vld [vmem:[#allocation4 + $0x1b1] sm:$0xff] }
 0x629   : > { %v12055_v30 = vmax.f32 %v14564_v0, %v4490_v29  ;;  %4402 = vst.msk [vmem:[#allocation5 + $0x30] sm:$0xff] %vm4399_vm9, %v4308_v55  ;;  %v6202_v55 = vld [vmem:[%s14218_s4] sm:$0xff] }
 0x62a   : > { %4580 = vrot.lane.b32.xlu1 %v4490_v29, %s9079_s14  ;;  %v12062_v32 = vmax.f32 %v4459_v25, %v12058_v33  ;;  %v4108_v39 = vpop.permute.xlu0 %4107  ;;  %v12064_v57 = vld [vmem:[#allocation4 + $0x1d0] sm:$0xff] }
 0x62b   : > { %14565 = vst [vmem:[#allocation31_spill] sm:$0xff] %v12055_v30  ;;  %14567 = vst [vmem:[#allocation16_spill] sm:$0xff] %v12064_v57  ;;  %v12066_v42 = vld [vmem:[#allocation4 + $0x1cf] sm:$0xff]  ;;  %v6221_v30 = vld [vmem:[%s14218_s4 + $0x98] sm:$0xff] }
 0x62c   : > { %14566 = vst [vmem:[#allocation7_spill] sm:$0xff] %v12062_v32  ;;  %14568 = vst [vmem:[#allocation20_spill] sm:$0xff] %v12066_v42  ;;  %4361 = vrot.lane.b32.xlu0 %v12064_v57, %s9078_s13  ;;  %v4312_v2 = vpop.permute.xlu1 %4311  ;;  %v6212_v57 = vld [vmem:[%s14218_s4 + $0x50] sm:$0xff]  ;;  %v6217_v32 = vld [vmem:[%s14218_s4 + $0x78] sm:$0xff] }
 0x62d   : > { %4173 = vst.msk [vmem:[#allocation4 + $0x210] sm:$0xff] %vm4141_vm8, %v4108_v39  ;;  %v6203_v39 = vld [vmem:[%s14218_s4 + $0x8] sm:$0xff]  ;;  %vm6240_vm8 = vcmask 334848  }
 0x62e   : > { %4236 = vst.msk [vmem:[#allocation5 + $0x2b8] sm:$0xff] %vm4206_vm5, %v12066_v42  ;;  %4753 = vrot.lane.b32.xlu1 %v11695_v21, %s9080_s15  ;;  %v12078_v29 = vld [vmem:[#allocation4 + $0x1f0] sm:$0xff]  ;;  %v4306_v25 = vpop.permute.xlu0 %4305  ;;  %v8466_v0 = vpack.c.bf16 %v6203_v39, %v6202_v55  ;;  %v6207_v39 = vld [vmem:[%s14218_s4 + $0x28] sm:$0xff] }
 0x62f   : > { %4404 = vst.msk [vmem:[#allocation5 + $0x60] sm:$0xff] %vm4399_vm9, %v4312_v2  ;;  %14569 = vst [vmem:[#allocation49_spill] sm:$0xff] %v12078_v29  ;;  %v12080_v47 = vld [vmem:[#allocation4 + $0x1ef] sm:$0xff] }
 0x630   : > { %14570 = vst [vmem:[#allocation22_spill] sm:$0xff] %v12080_v47  ;;  %4365 = vrot.lane.b32.xlu0 %v12078_v29, %s9078_s13  ;;  %4238 = vst.msk [vmem:[#allocation5 + $0x2e8] sm:$0xff] %vm4206_vm5, %v12080_v47  ;;  %v4316_v2 = vpop.permute.xlu1 %4315  ;;  %8467 = vmatpush1.bf16.msra.mxu1 %v8466_v0  ;;  %v6205_v29 = vld [vmem:[%s14218_s4 + $0x18] sm:$0xff]  ;;  %v6215_v42 = vld [vmem:[%s14218_s4 + $0x68] sm:$0xff]  ;;  %vm9085_vm5 = vmmov 1   ;;  %s9087_s13 = smov 95  }
 0x631   : > { %4401 = vst.msk [vmem:[#allocation5 + $0x18] sm:$0xff] %vm4399_vm9, %v4306_v25  ;;  %4406 = vst.msk [vmem:[#allocation5 + $0x90] sm:$0xff] %vm4399_vm9, %v4316_v2  ;;  %v6204_v25 = vld [vmem:[%s14218_s4 + $0x10] sm:$0xff]  ;;  %8468 = vmatprep.subr.bf16.mxu1 %v14318_v8 }
 0x632   : > { %5236 = vrot.lane.b32.xlu1 %v11883_v48, %s9081_s16  ;;  %v8469_v55 = vpack.c.bf16 %v6205_v29, %v6204_v25  ;;  %v12111_v0 = vld [vmem:[#allocation4 + $0x31] sm:$0xff]  ;;  %vm8522_vm6 = vmpackc.low %vm6337_vm4, %vm9085_vm5 }
 0x633   : > { %v12125_v2 = vld [vmem:[#allocation4 + $0x51] sm:$0xff] }
 0x634   : > { %4530 = vrot.lane.b32.xlu0 %v11870_v52, %s9079_s14  ;;  %v4320_v47 = vpop.permute.xlu1 %4319  ;;  %8470 = vmatpush1.bf16.msra.mxu1 %v8469_v55  ;;  %v6206_v52 = vld [vmem:[%s14218_s4 + $0x20] sm:$0xff]  ;;  %v6208_v25 = vld [vmem:[%s14218_s4 + $0x30] sm:$0xff]  ;;  %v6209_v55 = vld [vmem:[%s14218_s4 + $0x38] sm:$0xff] }
 0x635   : > { %4408 = vst.msk [vmem:[#allocation5 + $0xc0] sm:$0xff] %vm4399_vm9, %v4320_v47  ;;  %8471 = vmatprep.subr.bf16.mxu1 %v14318_v8  ;;  %v8472_v47 = vpack.c.bf16 %v6207_v39, %v6206_v52  ;;  %v8475_v39 = vpack.c.bf16 %v6209_v55, %v6208_v25  ;;  %v6211_v25 = vld [vmem:[%s14218_s4 + $0x48] sm:$0xff] }
 0x636   : > { %4755 = vrot.lane.b32.xlu1 %v11881_v20, %s9080_s15 }
 0x638   : > { %4534 = vrot.lane.b32.xlu0 %v12111_v0, %s9079_s14  ;;  %v4324_v29 = vpop.permute.xlu1 %4323  ;;  %8473 = vmatpush1.bf16.msra.mxu1 %v8472_v47  ;;  %v6210_v47 = vld [vmem:[%s14218_s4 + $0x40] sm:$0xff] }
 0x639   : > { %4410 = vst.msk [vmem:[#allocation5 + $0xf0] sm:$0xff] %vm4399_vm9, %v4324_v29  ;;  %8474 = vmatprep.subr.bf16.mxu1 %v14318_v8  ;;  %v12139_v29 = vld [vmem:[#allocation4 + $0x71] sm:$0xff] }
 0x63a   : > { %5013 = vrot.lane.b32.xlu1 %v11879_v45, %s9067_s17 }
 0x63c   : > { %4538 = vrot.lane.b32.xlu0 %v12125_v2, %s9079_s14  ;;  %v4328_v52 = vpop.permute.xlu1 %4327  ;;  %8476 = vmatpush1.bf16.msra.mxu1 %v8475_v39  ;;  %v12153_v39 = vld [vmem:[#allocation4 + $0x91] sm:$0xff] }
 0x63d   : > { %4412 = vst.msk [vmem:[#allocation5 + $0x120] sm:$0xff] %vm4399_vm9, %v4328_v52  ;;  %8477 = vmatprep.subr.bf16.mxu1 %v14318_v8  ;;  %v8478_v52 = vpack.c.bf16 %v6211_v25, %v6210_v47  ;;  %v6213_v8 = vld [vmem:[%s14218_s4 + $0x58] sm:$0xff]  ;;  %v14571_v25 = vmov 0.0|0.0  }
 0x63e   : > { %5464 = vrot.lane.b32.xlu1 %v11905_v50, %s9083_s10 }
 0x640   : > { %4542 = vrot.lane.b32.xlu0 %v12139_v29, %s9079_s14  ;;  %v4332_v55 = vpop.permute.xlu1 %4331  ;;  %8479 = vmatpush1.bf16.msra.mxu1 %v8478_v52  ;;  %v12167_v52 = vld [vmem:[#allocation4 + $0xb1] sm:$0xff] }
 0x641   : > { %4414 = vst.msk [vmem:[#allocation5 + $0x150] sm:$0xff] %vm4399_vm9, %v4332_v55  ;;  %8480 = vmatprep.subr.bf16.mxu1 %v14571_v25  ;;  %v8481_v55 = vpack.c.bf16 %v6213_v8, %v6212_v57 }
 0x642   : > { %5689 = vrot.lane.b32.xlu1 %v11903_v18, %s9084_s21 }
 0x644   : > { %4546 = vrot.lane.b32.xlu0 %v12153_v39, %s9079_s14  ;;  %v4336_v47 = vpop.permute.xlu1 %4335  ;;  %8482 = vmatpush1.bf16.msra.mxu1 %v8481_v55  ;;  %v6216_v55 = vld [vmem:[%s14218_s4 + $0x70] sm:$0xff] }
 0x645   : > { %4416 = vst.msk [vmem:[#allocation5 + $0x180] sm:$0xff] %vm4399_vm9, %v4336_v47  ;;  %8483 = vmatprep.subr.bf16.mxu1 %v14571_v25  ;;  %v12181_v47 = vld [vmem:[#allocation4 + $0xd1] sm:$0xff] }
 0x646   : > { %5240 = vrot.lane.b32.xlu1 %v11907_v26, %s9081_s16  ;;  %v6214_v26 = vld [vmem:[%s14218_s4 + $0x60] sm:$0xff] }
 0x647   : > { %v8484_v8 = vpack.c.bf16 %v6215_v42, %v6214_v26  ;;  %v8487_v26 = vpack.c.bf16 %v6217_v32, %v6216_v55 }
 0x648   : > { %4550 = vrot.lane.b32.xlu0 %v12167_v52, %s9079_s14  ;;  %v4340_v57 = vpop.permute.xlu1 %4339 }
 0x649   : > { %4418 = vst.msk [vmem:[#allocation5 + $0x1b0] sm:$0xff] %vm4399_vm9, %v4340_v57  ;;  %8485 = vmatpush1.bf16.msra.mxu1 %v8484_v8  ;;  %v12195_v57 = vld [vmem:[#allocation4 + $0xf1] sm:$0xff]  ;;  %v6219_v8 = vld [vmem:[%s14218_s4 + $0x88] sm:$0xff] }
 0x64a   : > { %4759 = vrot.lane.b32.xlu1 %v11905_v50, %s9080_s15  ;;  %8486 = vmatprep.subr.bf16.mxu1 %v14571_v25 }
 0x64c   : > { %4554 = vrot.lane.b32.xlu0 %v12181_v47, %s9079_s14  ;;  %v4344_v42 = vpop.permute.xlu1 %4343 }
 0x64d   : > { %4420 = vst.msk [vmem:[#allocation5 + $0x1e0] sm:$0xff] %vm4399_vm9, %v4344_v42  ;;  %8488 = vmatpush1.bf16.msra.mxu1 %v8487_v26  ;;  %v4481_v42 = vld [vmem:[#allocation4 + $0x111] sm:$0xff] }
 0x64e   : > { %5017 = vrot.lane.b32.xlu1 %v11903_v18, %s9067_s17  ;;  %v6218_v18 = vld [vmem:[%s14218_s4 + $0x80] sm:$0xff]  ;;  %8489 = vmatprep.subr.bf16.mxu1 %v14571_v25  ;;  %v6220_v26 = vld [vmem:[%s14218_s4 + $0x90] sm:$0xff] }
 0x64f   : > { %v8490_v55 = vpack.c.bf16 %v6219_v8, %v6218_v18  ;;  %v8493_v18 = vpack.c.bf16 %v6221_v30, %v6220_v26  ;;  %v4483_v8 = vld [vmem:[#allocation4 + $0x131] sm:$0xff] }
 0x650   : > { %4558 = vrot.lane.b32.xlu0 %v12195_v57, %s9079_s14  ;;  %v4348_v32 = vpop.permute.xlu1 %4347 }
 0x651   : > { %4422 = vst.msk [vmem:[#allocation5 + $0x210] sm:$0xff] %vm4399_vm9, %v4348_v32  ;;  %8491 = vmatpush1.bf16.msra.mxu1 %v8490_v55  ;;  %v6222_v32 = vld [vmem:[%s14218_s4 + $0xa0] sm:$0xff]  ;;  %v6223_v55 = vld [vmem:[%s14218_s4 + $0xa8] sm:$0xff] }
 0x652   : > { %5468 = vrot.lane.b32.xlu1 %v11918_v49, %s9083_s10  ;;  %8492 = vmatprep.subr.bf16.mxu1 %v14571_v25  ;;  %v8496_v30 = vpack.c.bf16 %v6223_v55, %v6222_v32 }
 0x654   : > { %4562 = vrot.lane.b32.xlu0 %v4481_v42, %s9079_s14  ;;  %v4352_v60 = vpop.permute.xlu1 %4351 }
 0x655   : > { %4424 = vst.msk [vmem:[#allocation5 + $0x240] sm:$0xff] %vm4399_vm9, %v4352_v60  ;;  %8494 = vmatpush1.bf16.msra.mxu1 %v8493_v18  ;;  %v6225_v60 = vld [vmem:[%s14218_s4 + $0xb8] sm:$0xff] }
 0x656   : > { %5693 = vrot.lane.b32.xlu1 %v11916_v36, %s9084_s21  ;;  %8495 = vmatprep.subr.bf16.mxu1 %v14571_v25 }
 0x658   : > { %4566 = vrot.lane.b32.xlu0 %v4483_v8, %s9079_s14  ;;  %v4356_v42 = vpop.permute.xlu1 %4355  ;;  %v6227_v8 = vld [vmem:[%s14218_s4 + $0xc8] sm:$0xff] }
 0x659   : > { %4426 = vst.msk [vmem:[#allocation5 + $0x270] sm:$0xff] %vm4399_vm9, %v4356_v42  ;;  %8497 = vmatpush1.bf16.msra.mxu1 %v8496_v30 }
 0x65a   : > { %5244 = vrot.lane.b32.xlu1 %v11920_v35, %s9081_s16  ;;  %v6224_v35 = vld [vmem:[%s14218_s4 + $0xb0] sm:$0xff]  ;;  %8498 = vmatprep.subr.bf16.mxu1 %v14571_v25 }
 0x65b   : > { %v8499_v18 = vpack.c.bf16 %v6225_v60, %v6224_v35  ;;  %v6231_v35 = vld [vmem:[%s14218_s4 + $0xe8] sm:$0xff] }
 0x65c   : > { %4570 = vrot.lane.b32.xlu0 %v12016_v34, %s9079_s14  ;;  %v4360_v26 = vpop.permute.xlu1 %4359  ;;  %v6226_v34 = vld [vmem:[%s14218_s4 + $0xc0] sm:$0xff] }
 0x65d   : > { %4428 = vst.msk [vmem:[#allocation5 + $0x2a0] sm:$0xff] %vm4399_vm9, %v4360_v26  ;;  %8500 = vmatpush1.bf16.msra.mxu1 %v8499_v18  ;;  %v8502_v55 = vpack.c.bf16 %v6227_v8, %v6226_v34  ;;  %v6233_v34 = vld [vmem:[%s14218_s4 + $0xf8] sm:$0xff] }
 0x65e   : > { %4763 = vrot.lane.b32.xlu1 %v11918_v49, %s9080_s15  ;;  %8501 = vmatprep.subr.bf16.mxu1 %v14571_v25 }
 0x660   : > { %4574 = vrot.lane.b32.xlu0 %v12030_v10, %s9079_s14  ;;  %v4364_v32 = vpop.permute.xlu1 %4363  ;;  %v6229_v10 = vld [vmem:[%s14218_s4 + $0xd8] sm:$0xff] }
 0x661   : > { %4430 = vst.msk [vmem:[#allocation5 + $0x2d0] sm:$0xff] %vm4399_vm9, %v4364_v32  ;;  %8503 = vmatpush1.bf16.msra.mxu1 %v8502_v55 }
 0x662   : > { %5021 = vrot.lane.b32.xlu1 %v11916_v36, %s9067_s17  ;;  %v6228_v36 = vld [vmem:[%s14218_s4 + $0xd0] sm:$0xff]  ;;  %8504 = vmatprep.subr.bf16.mxu1 %v14571_v25 }
 0x663   : > { %v8505_v30 = vpack.c.bf16 %v6229_v10, %v6228_v36 }
 0x664   : > { %4578 = vrot.lane.b32.xlu0 %v12044_v43, %s9079_s14  ;;  %v4529_v42 = vpop.permute.xlu1 %4528  ;;  %v6230_v43 = vld [vmem:[%s14218_s4 + $0xe0] sm:$0xff] }
 0x665   : > { %4625 = vst.msk [vmem:[#allocation5] sm:$0xff] %vm4624_vm10, %v4529_v42  ;;  %8506 = vmatpush1.bf16.msra.mxu1 %v8505_v30  ;;  %v8508_v60 = vpack.c.bf16 %v6231_v35, %v6230_v43 }
 0x666   : > { %5472 = vrot.lane.b32.xlu1 %v11931_v38, %s9083_s10  ;;  %8507 = vmatprep.subr.bf16.mxu1 %v14571_v25 }
 0x668   : > { %4582 = vrot.lane.b32.xlu0 %v12058_v33, %s9079_s14  ;;  %v6232_v33 = vld [vmem:[%s14218_s4 + $0xf0] sm:$0xff] }
 0x669   : > { %8509 = vmatpush1.bf16.msra.mxu1 %v8508_v60  ;;  %v8511_v55 = vpack.c.bf16 %v6233_v34, %v6232_v33 }
 0x66a   : > { %5697 = vrot.lane.b32.xlu1 %v11929_v56, %s9084_s21  ;;  %v4310_v26 = vpop.permute.xlu0 %4309  ;;  %8510 = vmatprep.subr.bf16.mxu1 %v14571_v25 }
 0x66b   : > { %4403 = vst.msk [vmem:[#allocation5 + $0x48] sm:$0xff] %vm4399_vm9, %v4310_v26 }
 0x66c   : > { %v4533_v18 = vpop.permute.xlu1 %4532  ;;  %5011 = vrot.lane.b32.xlu0 %v11693_v1, %s9067_s17 }
 0x66d   : > { %4627 = vst.msk [vmem:[#allocation5 + $0x30] sm:$0xff] %vm4624_vm10, %v4533_v18  ;;  %8512 = vmatpush1.bf16.msra.mxu1 %v8511_v55 }
 0x66e   : > { %5248 = vrot.lane.b32.xlu1 %v11933_v7, %s9081_s16  ;;  %v4314_v8 = vpop.permute.xlu0 %4313 }
 0x66f   : > { %4405 = vst.msk [vmem:[#allocation5 + $0x78] sm:$0xff] %vm4399_vm9, %v4314_v8  ;;  %v5402_v8 = vld [vmem:[#allocation4 + $0x87] sm:$0xff] }
 0x670   : > { %v4537_v32 = vpop.permute.xlu1 %4536  ;;  %5462 = vrot.lane.b32.xlu0 %v11705_v12, %s9083_s10 }
 0x671   : > { %4629 = vst.msk [vmem:[#allocation5 + $0x60] sm:$0xff] %vm4624_vm10, %v4537_v32 }
 0x672   : > { %4767 = vrot.lane.b32.xlu1 %v11931_v38, %s9080_s15  ;;  %v4318_v1 = vpop.permute.xlu0 %4317 }
 0x673   : > { %4407 = vst.msk [vmem:[#allocation5 + $0xa8] sm:$0xff] %vm4399_vm9, %v4318_v1  ;;  %v5627_v1 = vld [vmem:[#allocation4 + $0x88] sm:$0xff] }
 0x674   : > { %v4541_v7 = vpop.permute.xlu1 %4540  ;;  %5687 = vrot.lane.b32.xlu0 %v11703_v28, %s9084_s21 }
 0x675   : > { %4631 = vst.msk [vmem:[#allocation5 + $0x90] sm:$0xff] %vm4624_vm10, %v4541_v7 }
 0x676   : > { %5025 = vrot.lane.b32.xlu1 %v11929_v56, %s9067_s17  ;;  %v4322_v25 = vpop.permute.xlu0 %4321 }
 0x677   : > { %4409 = vst.msk [vmem:[#allocation5 + $0xd8] sm:$0xff] %vm4399_vm9, %v4322_v25 }
 0x678   : > { %v4545_v36 = vpop.permute.xlu1 %4544  ;;  %5238 = vrot.lane.b32.xlu0 %v12111_v0, %s9081_s16 }
 0x679   : > { %4633 = vst.msk [vmem:[#allocation5 + $0xc0] sm:$0xff] %vm4624_vm10, %v4545_v36 }
 0x67a   : > { %5476 = vrot.lane.b32.xlu1 %v11944_v22, %s9083_s10  ;;  %v4326_v10 = vpop.permute.xlu0 %4325 }
 0x67b   : > { %4411 = vst.msk [vmem:[#allocation5 + $0x108] sm:$0xff] %vm4399_vm9, %v4326_v10 }
 0x67c   : > { %v4549_v42 = vpop.permute.xlu1 %4548  ;;  %4757 = vrot.lane.b32.xlu0 %v11705_v12, %s9080_s15 }
 0x67d   : > { %4635 = vst.msk [vmem:[#allocation5 + $0xf0] sm:$0xff] %vm4624_vm10, %v4549_v42 }
 0x67e   : > { %5701 = vrot.lane.b32.xlu1 %v11942_v16, %s9084_s21  ;;  %v4330_v56 = vpop.permute.xlu0 %4329 }
 0x67f   : > { %4413 = vst.msk [vmem:[#allocation5 + $0x138] sm:$0xff] %vm4399_vm9, %v4330_v56 }
 0x680   : > { %v4553_v30 = vpop.permute.xlu1 %4552  ;;  %5015 = vrot.lane.b32.xlu0 %v11703_v28, %s9067_s17 }
 0x681   : > { %4637 = vst.msk [vmem:[#allocation5 + $0x120] sm:$0xff] %vm4624_vm10, %v4553_v30  ;;  %v5404_v30 = vld [vmem:[#allocation4 + $0xa7] sm:$0xff] }
 0x682   : > { %5252 = vrot.lane.b32.xlu1 %v11946_v62, %s9081_s16  ;;  %v4334_v0 = vpop.permute.xlu0 %4333 }
 0x683   : > { %4415 = vst.msk [vmem:[#allocation5 + $0x168] sm:$0xff] %vm4399_vm9, %v4334_v0 }
 0x684   : > { %v4557_v43 = vpop.permute.xlu1 %4556  ;;  %5466 = vrot.lane.b32.xlu0 %v11715_v27, %s9083_s10 }
 0x685   : > { %4639 = vst.msk [vmem:[#allocation5 + $0x150] sm:$0xff] %vm4624_vm10, %v4557_v43 }
 0x686   : > { %4771 = vrot.lane.b32.xlu1 %v11944_v22, %s9080_s15  ;;  %v4338_v35 = vpop.permute.xlu0 %4337 }
 0x687   : > { %4417 = vst.msk [vmem:[#allocation5 + $0x198] sm:$0xff] %vm4399_vm9, %v4338_v35  ;;  %v5629_v35 = vld [vmem:[#allocation4 + $0xa8] sm:$0xff] }
 0x688   : > { %v4561_v60 = vpop.permute.xlu1 %4560  ;;  %5691 = vrot.lane.b32.xlu0 %v11713_v14, %s9084_s21 }
 0x689   : > { %4641 = vst.msk [vmem:[#allocation5 + $0x180] sm:$0xff] %vm4624_vm10, %v4561_v60 }
 0x68a   : > { %5029 = vrot.lane.b32.xlu1 %v11942_v16, %s9067_s17  ;;  %v4342_v28 = vpop.permute.xlu0 %4341 }
 0x68b   : > { %4419 = vst.msk [vmem:[#allocation5 + $0x1c8] sm:$0xff] %vm4399_vm9, %v4342_v28 }
 0x68c   : > { %v4565_v62 = vpop.permute.xlu1 %4564  ;;  %5242 = vrot.lane.b32.xlu0 %v12125_v2, %s9081_s16  ;;  %v4951_v2 = vld [vmem:[#allocation4 + $0x68] sm:$0xff] }
 0x68d   : > { %4643 = vst.msk [vmem:[#allocation5 + $0x1b0] sm:$0xff] %vm4624_vm10, %v4565_v62 }
 0x68e   : > { %5480 = vrot.lane.b32.xlu1 %v11957_v53, %s9083_s10  ;;  %v4346_v26 = vpop.permute.xlu0 %4345 }
 0x68f   : > { %4421 = vst.msk [vmem:[#allocation5 + $0x1f8] sm:$0xff] %vm4399_vm9, %v4346_v26 }
 0x690   : > { %v4569_v18 = vpop.permute.xlu1 %4568  ;;  %4761 = vrot.lane.b32.xlu0 %v11715_v27, %s9080_s15 }
 0x691   : > { %4645 = vst.msk [vmem:[#allocation5 + $0x1e0] sm:$0xff] %vm4624_vm10, %v4569_v18 }
 0x692   : > { %5705 = vrot.lane.b32.xlu1 %v11955_v6, %s9084_s21  ;;  %v4350_v14 = vpop.permute.xlu0 %4349 }
 0x693   : > { %4423 = vst.msk [vmem:[#allocation5 + $0x228] sm:$0xff] %vm4399_vm9, %v4350_v14  ;;  %v5406_v14 = vld [vmem:[#allocation4 + $0xc7] sm:$0xff] }
 0x694   : > { %v4573_v16 = vpop.permute.xlu1 %4572  ;;  %5019 = vrot.lane.b32.xlu0 %v4951_v2, %s9067_s17 }
 0x695   : > { %4647 = vst.msk [vmem:[#allocation5 + $0x210] sm:$0xff] %vm4624_vm10, %v4573_v16 }
 0x696   : > { %5256 = vrot.lane.b32.xlu1 %v11959_v41, %s9081_s16  ;;  %v4354_v33 = vpop.permute.xlu0 %4353 }
 0x697   : > { %4425 = vst.msk [vmem:[#allocation5 + $0x258] sm:$0xff] %vm4399_vm9, %v4354_v33  ;;  %v5631_v33 = vld [vmem:[#allocation4 + $0xc8] sm:$0xff] }
 0x698   : > { %v4577_v34 = vpop.permute.xlu1 %4576  ;;  %5470 = vrot.lane.b32.xlu0 %v5402_v8, %s9083_s10 }
 0x699   : > { %4649 = vst.msk [vmem:[#allocation5 + $0x240] sm:$0xff] %vm4624_vm10, %v4577_v34 }
 0x69a   : > { %4775 = vrot.lane.b32.xlu1 %v11957_v53, %s9080_s15  ;;  %v4358_v32 = vpop.permute.xlu0 %4357 }
 0x69b   : > { %4427 = vst.msk [vmem:[#allocation5 + $0x288] sm:$0xff] %vm4399_vm9, %v4358_v32 }
 0x69c   : > { %v4581_v55 = vpop.permute.xlu1 %4580  ;;  %5695 = vrot.lane.b32.xlu0 %v5627_v1, %s9084_s21 }
 0x69d   : > { %4651 = vst.msk [vmem:[#allocation5 + $0x270] sm:$0xff] %vm4624_vm10, %v4581_v55 }
 0x69e   : > { %5033 = vrot.lane.b32.xlu1 %v11955_v6, %s9067_s17  ;;  %v4362_v41 = vpop.permute.xlu0 %4361 }
 0x69f   : > { %4429 = vst.msk [vmem:[#allocation5 + $0x2b8] sm:$0xff] %vm4399_vm9, %v4362_v41  ;;  %v12445_v41 = vld [vmem:[#allocation4 + $0x147] sm:$0xff] }
 0x6a0   : > { %v4754_v7 = vpop.permute.xlu1 %4753  ;;  %5246 = vrot.lane.b32.xlu0 %v12139_v29, %s9081_s16 }
 0x6a1   : > { %4850 = vst.msk [vmem:[#allocation5] sm:$0xff] %vm4849_vm11, %v4754_v7 }
 0x6a2   : > { %4852 = vst.msk [vmem:[#allocation5 + $0x8] sm:$0xff] %vm4851_vm12, %v4754_v7  ;;  %5484 = vrot.lane.b32.xlu1 %v11970_v63, %s9083_s10  ;;  %v4366_v25 = vpop.permute.xlu0 %4365 }
 0x6a3   : > { %4431 = vst.msk [vmem:[#allocation5 + $0x2e8] sm:$0xff] %vm4399_vm9, %v4366_v25 }
 0x6a4   : > { %v12367_v36 = vpop.permute.xlu1 %5236  ;;  %4765 = vrot.lane.b32.xlu0 %v5402_v8, %s9080_s15 }
 0x6a6   : > { %5709 = vrot.lane.b32.xlu1 %v11968_v23, %s9084_s21  ;;  %v4531_v6 = vpop.permute.xlu0 %4530 }
 0x6a7   : > { %4626 = vst.msk [vmem:[#allocation5 + $0x18] sm:$0xff] %vm4624_vm10, %v4531_v6  ;;  %v4706_v6 = vld [vmem:[#allocation4 + $0x12f] sm:$0xff] }
 0x6a8   : > { %v4756_v10 = vpop.permute.xlu1 %4755  ;;  %5023 = vrot.lane.b32.xlu0 %v5627_v1, %s9067_s17 }
 0x6a9   : > { %4854 = vst.msk [vmem:[#allocation5 + $0x20] sm:$0xff] %vm4851_vm12, %v4756_v10 }
 0x6aa   : > { %4853 = vst.msk [vmem:[#allocation5 + $0x18] sm:$0xff] %vm4849_vm11, %v4756_v10  ;;  %5260 = vrot.lane.b32.xlu1 %v11972_v59, %s9081_s16  ;;  %v4535_v42 = vpop.permute.xlu0 %4534 }
 0x6ab   : > { %4628 = vst.msk [vmem:[#allocation5 + $0x48] sm:$0xff] %vm4624_vm10, %v4535_v42 }
 0x6ac   : > { %v5014_v56 = vpop.permute.xlu1 %5013  ;;  %5474 = vrot.lane.b32.xlu0 %v5404_v30, %s9083_s10 }
 0x6ad   : > { %5109 = vst.msk [vmem:[#allocation5 + $0x20] sm:$0xff] %vm5107_vm13, %v5014_v56  ;;  %v4964_v56 = vld [vmem:[#allocation4 + $0x130] sm:$0xff] }
 0x6ae   : > { %4779 = vrot.lane.b32.xlu1 %v11970_v63, %s9080_s15  ;;  %v4539_v0 = vpop.permute.xlu0 %4538 }
 0x6af   : > { %4630 = vst.msk [vmem:[#allocation5 + $0x78] sm:$0xff] %vm4624_vm10, %v4539_v0 }
 0x6b0   : > { %v12384_v43 = vpop.permute.xlu1 %5464  ;;  %5699 = vrot.lane.b32.xlu0 %v5629_v35, %s9084_s21 }
 0x6b2   : > { %5037 = vrot.lane.b32.xlu1 %v11968_v23, %s9067_s17  ;;  %v4543_v59 = vpop.permute.xlu0 %4542 }
 0x6b3   : > { %4632 = vst.msk [vmem:[#allocation5 + $0xa8] sm:$0xff] %vm4624_vm10, %v4543_v59 }
 0x6b4   : > { %v12390_v60 = vpop.permute.xlu1 %5689  ;;  %5250 = vrot.lane.b32.xlu0 %v12153_v39, %s9081_s16 }
 0x6b5   : > { %5788 = vst.msk [vmem:[#allocation5 + $0x28] sm:$0xff] %vm5785_vm14, %v12390_v60 }
 0x6b6   : > { %5488 = vrot.lane.b32.xlu1 %v11983_v51, %s9083_s10  ;;  %v4547_v28 = vpop.permute.xlu0 %4546 }
 0x6b7   : > { %4634 = vst.msk [vmem:[#allocation5 + $0xd8] sm:$0xff] %vm4624_vm10, %v4547_v28 }
 0x6b8   : > { %v12399_v62 = vpop.permute.xlu1 %5240  ;;  %4769 = vrot.lane.b32.xlu0 %v5404_v30, %s9080_s15 }
 0x6ba   : > { %5713 = vrot.lane.b32.xlu1 %v11981_v9, %s9084_s21  ;;  %v4551_v23 = vpop.permute.xlu0 %4550 }
 0x6bb   : > { %4636 = vst.msk [vmem:[#allocation5 + $0x108] sm:$0xff] %vm4624_vm10, %v4551_v23 }
 0x6bc   : > { %v4760_v26 = vpop.permute.xlu1 %4759  ;;  %5027 = vrot.lane.b32.xlu0 %v5629_v35, %s9067_s17  ;;  %v5883_v35 = vld [vmem:[#allocation4 + $0x69] sm:$0xff] }
 0x6bd   : > { %4857 = vst.msk [vmem:[#allocation5 + $0x48] sm:$0xff] %vm4849_vm11, %v4760_v26 }
 0x6be   : > { %4858 = vst.msk [vmem:[#allocation5 + $0x50] sm:$0xff] %vm4851_vm12, %v4760_v26  ;;  %5264 = vrot.lane.b32.xlu1 %v11985_v61, %s9081_s16  ;;  %v4555_v39 = vpop.permute.xlu0 %4554  ;;  %v5640_v26 = vld [vmem:[#allocation4 + $0x150] sm:$0xff] }
 0x6bf   : > { %4638 = vst.msk [vmem:[#allocation5 + $0x138] sm:$0xff] %vm4624_vm10, %v4555_v39 }
 0x6c0   : > { %v5018_v18 = vpop.permute.xlu1 %5017  ;;  %5478 = vrot.lane.b32.xlu0 %v5406_v14, %s9083_s10 }
 0x6c1   : > { %5111 = vst.msk [vmem:[#allocation5 + $0x50] sm:$0xff] %vm5107_vm13, %v5018_v18 }
 0x6c2   : > { %4783 = vrot.lane.b32.xlu1 %v11983_v51, %s9080_s15  ;;  %v4559_v16 = vpop.permute.xlu0 %4558 }
 0x6c3   : > { %4640 = vst.msk [vmem:[#allocation5 + $0x168] sm:$0xff] %vm4624_vm10, %v4559_v16 }
 0x6c4   : > { %v12416_v2 = vpop.permute.xlu1 %5468  ;;  %5703 = vrot.lane.b32.xlu0 %v5631_v33, %s9084_s21 }
 0x6c6   : > { %5041 = vrot.lane.b32.xlu1 %v11981_v9, %s9067_s17  ;;  %v4563_v61 = vpop.permute.xlu0 %4562 }
 0x6c7   : > { %4642 = vst.msk [vmem:[#allocation5 + $0x198] sm:$0xff] %vm4624_vm10, %v4563_v61 }
 0x6c8   : > { %v12422_v34 = vpop.permute.xlu1 %5693  ;;  %5254 = vrot.lane.b32.xlu0 %v12167_v52, %s9081_s16 }
 0x6c9   : > { %5792 = vst.msk [vmem:[#allocation5 + $0x58] sm:$0xff] %vm5785_vm14, %v12422_v34 }
 0x6ca   : > { %5492 = vrot.lane.b32.xlu1 %v11996_v40, %s9083_s10  ;;  %v4567_v8 = vpop.permute.xlu0 %4566 }
 0x6cb   : > { %4644 = vst.msk [vmem:[#allocation5 + $0x1c8] sm:$0xff] %vm4624_vm10, %v4567_v8 }
 0x6cc   : > { %v12431_v32 = vpop.permute.xlu1 %5244  ;;  %4773 = vrot.lane.b32.xlu0 %v5406_v14, %s9080_s15  ;;  %v12484_v14 = vld [vmem:[#allocation4 + $0x149] sm:$0xff] }
 0x6ce   : > { %5717 = vrot.lane.b32.xlu1 %v11994_v11, %s9084_s21  ;;  %v4571_v9 = vpop.permute.xlu0 %4570  ;;  %v5408_v11 = vld [vmem:[#allocation4 + $0xe7] sm:$0xff] }
 0x6cf   : > { %4646 = vst.msk [vmem:[#allocation5 + $0x1f8] sm:$0xff] %vm4624_vm10, %v4571_v9 }
 0x6d0   : > { %v4764_v55 = vpop.permute.xlu1 %4763  ;;  %5031 = vrot.lane.b32.xlu0 %v5631_v33, %s9067_s17 }
 0x6d1   : > { %4861 = vst.msk [vmem:[#allocation5 + $0x78] sm:$0xff] %vm4849_vm11, %v4764_v55 }
 0x6d2   : > { %4862 = vst.msk [vmem:[#allocation5 + $0x80] sm:$0xff] %vm4851_vm12, %v4764_v55  ;;  %5268 = vrot.lane.b32.xlu1 %v11998_v3, %s9081_s16  ;;  %v4575_v52 = vpop.permute.xlu0 %4574  ;;  %v5633_v3 = vld [vmem:[#allocation4 + $0xe8] sm:$0xff] }
 0x6d3   : > { %4648 = vst.msk [vmem:[#allocation5 + $0x228] sm:$0xff] %vm4624_vm10, %v4575_v52  ;;  %v12508_v55 = vld [vmem:[#allocation4 + $0x14f] sm:$0xff]  ;;  %v6109_v52 = vld [vmem:[#allocation5 + $0x18] sm:$0xff] }
 0x6d4   : > { %v5022_v1 = vpop.permute.xlu1 %5021  ;;  %5482 = vrot.lane.b32.xlu0 %v5408_v11, %s9083_s10 }
 0x6d5   : > { %5113 = vst.msk [vmem:[#allocation5 + $0x80] sm:$0xff] %vm5107_vm13, %v5022_v1 }
 0x6d6   : > { %5494 = vrot.lane.b32.xlu1 %v12445_v41, %s9083_s10  ;;  %v4579_v7 = vpop.permute.xlu0 %4578 }
 0x6d7   : > { %4650 = vst.msk [vmem:[#allocation5 + $0x258] sm:$0xff] %vm4624_vm10, %v4579_v7 }
 0x6d8   : > { %v12450_v25 = vpop.permute.xlu1 %5472  ;;  %5707 = vrot.lane.b32.xlu0 %v5633_v3, %s9084_s21 }
 0x6da   : > { %4787 = vrot.lane.b32.xlu1 %v4706_v6, %s9080_s15  ;;  %v4583_v10 = vpop.permute.xlu0 %4582  ;;  %v5887_v6 = vld [vmem:[#allocation4 + $0xa9] sm:$0xff] }
 0x6db   : > { %4652 = vst.msk [vmem:[#allocation5 + $0x288] sm:$0xff] %vm4624_vm10, %v4583_v10  ;;  %v6234_v10 = vld [vmem:[%s14218_s4 + $0x100] sm:$0xff] }
 0x6dc   : > { %v12455_v42 = vpop.permute.xlu1 %5697  ;;  %5258 = vrot.lane.b32.xlu0 %v12181_v47, %s9081_s16 }
 0x6dd   : > { %5796 = vst.msk [vmem:[#allocation5 + $0x88] sm:$0xff] %vm5785_vm14, %v12455_v42 }
 0x6de   : > { %5045 = vrot.lane.b32.xlu1 %v4964_v56, %s9067_s17  ;;  %v5012_v30 = vpop.permute.xlu0 %5011  ;;  %v6235_v56 = vld [vmem:[%s14218_s4 + $0x108] sm:$0xff] }
 0x6df   : > { %5108 = vst.msk [vmem:[#allocation5 + $0x8] sm:$0xff] %vm5107_vm13, %v5012_v30 }
 0x6e0   : > { %v12463_v0 = vpop.permute.xlu1 %5248  ;;  %4777 = vrot.lane.b32.xlu0 %v5408_v11, %s9080_s15  ;;  %5333 = vst.msk [vmem:[#allocation5 + $0x8] sm:$0xff] %vm5332_vm15, %v12367_v36  ;;  %v5410_v36 = vld [vmem:[#allocation4 + $0x107] sm:$0xff] }
 0x6e2   : > { %5949 = vrot.lane.b32.xlu1 %v5883_v35, %s9069_s19  ;;  %v5463_v59 = vpop.permute.xlu0 %5462 }
 0x6e3   : > { %5559 = vst.msk [vmem:[#allocation5 + $0x8] sm:$0xff] %vm5558_vm1, %v5463_v59  ;;  %v8513_v59 = vpack.c.bf16 %v6235_v56, %v6234_v10 }
 0x6e4   : > { %v4768_v28 = vpop.permute.xlu1 %4767  ;;  %5035 = vrot.lane.b32.xlu0 %v5633_v3, %s9067_s17  ;;  %v5412_v3 = vld [vmem:[#allocation4 + $0x127] sm:$0xff] }
 0x6e5   : > { %4865 = vst.msk [vmem:[#allocation5 + $0xa8] sm:$0xff] %vm4849_vm11, %v4768_v28  ;;  %8514 = vmatprep.subr.bf16.mxu0 %v8513_v59 }
 0x6e6   : > { %4866 = vst.msk [vmem:[#allocation5 + $0xb0] sm:$0xff] %vm4851_vm12, %v4768_v28  ;;  %5951 = vrot.lane.b32.xlu1 %v12139_v29, %s9069_s19  ;;  %v5688_v47 = vpop.permute.xlu0 %5687  ;;  %v5635_v29 = vld [vmem:[#allocation4 + $0x108] sm:$0xff]  ;;  %8516 = vmatpush3.bf16.msra.mxu0 %v8513_v59 }
 0x6e7   : > { %5784 = vst.msk [vmem:[#allocation5 + $0x8] sm:$0xff] %vm5783_vm3, %v5688_v47  ;;  %v5637_v28 = vld [vmem:[#allocation4 + $0x128] sm:$0xff] }
 0x6e8   : > { %v5026_v23 = vpop.permute.xlu1 %5025  ;;  %5786 = vst.msk [vmem:[#allocation5 + $0x10] sm:$0xff] %vm5785_vm14, %v5688_v47  ;;  %5486 = vrot.lane.b32.xlu0 %v5410_v36, %s9083_s10  ;;  %v5888_v47 = vld [vmem:[#allocation4 + $0xb1] sm:$0xff] }
 0x6e9   : > { %5115 = vst.msk [vmem:[#allocation5 + $0xb0] sm:$0xff] %vm5107_vm13, %v5026_v23  ;;  %v12584_v59 = vld [vmem:[#allocation4 + $0x16f] sm:$0xff] }
 0x6ea   : > { %5721 = vrot.lane.b32.xlu1 %v5640_v26, %s9084_s21  ;;  %v5239_v39 = vpop.permute.xlu0 %5238 }
 0x6eb   : > { %5334 = vst.msk [vmem:[#allocation5 + $0x20] sm:$0xff] %vm5332_vm15, %v5239_v39  ;;  %v5642_v39 = vld [vmem:[#allocation4 + $0x170] sm:$0xff] }
 0x6ec   : > { %v12481_v18 = vpop.permute.xlu1 %5476  ;;  %5560 = vst.msk [vmem:[#allocation5 + $0x20] sm:$0xff] %vm5558_vm1, %v12384_v43  ;;  %5711 = vrot.lane.b32.xlu0 %v5635_v29, %s9084_s21  ;;  %v12499_v43 = vld [vmem:[#allocation4 + $0x167] sm:$0xff] }
 0x6ed   : > { %5787 = vst.msk [vmem:[#allocation5 + $0x20] sm:$0xff] %vm5783_vm3, %v12390_v60  ;;  %v6106_v60 = vld [vmem:[#allocation5] sm:$0xff] }
 0x6ee   : > { %5272 = vrot.lane.b32.xlu1 %v12484_v14, %s9081_s16  ;;  %v4758_v16 = vpop.permute.xlu0 %4757  ;;  %v6107_v61 = vld [vmem:[#allocation5 + $0x8] sm:$0xff] }
 0x6ef   : > { %4855 = vst.msk [vmem:[#allocation5 + $0x30] sm:$0xff] %vm4849_vm11, %v4758_v16  ;;  %6405 = vmatprep.mubr.f32.mxu1 %v6107_v61  ;;  %v12554_v61 = vld [vmem:[#allocation4 + $0x169] sm:$0xff] }
 0x6f0   : > { %v12493_v33 = vpop.permute.xlu1 %5701  ;;  %4856 = vst.msk [vmem:[#allocation5 + $0x38] sm:$0xff] %vm4851_vm12, %v4758_v16  ;;  %5262 = vrot.lane.b32.xlu0 %v12195_v57, %s9081_s16  ;;  %6406 = vmatmul.mubr.f32.vlgmr.msra.gmra.mrb[0].mxu1 %v6106_v60  ;;  %v6236_v60 = vld [vmem:[%s14218_s4 + $0x110] sm:$0xff] }
 0x6f1   : > { %5800 = vst.msk [vmem:[#allocation5 + $0xb8] sm:$0xff] %vm5785_vm14, %v12493_v33 }
 0x6f2   : > { %5498 = vrot.lane.b32.xlu1 %v12499_v43, %s9083_s10  ;;  %v5016_v8 = vpop.permute.xlu0 %5015 }
 0x6f3   : > { %5110 = vst.msk [vmem:[#allocation5 + $0x38] sm:$0xff] %vm5107_vm13, %v5016_v8  ;;  %v6237_v8 = vld [vmem:[%s14218_s4 + $0x118] sm:$0xff] }
 0x6f4   : > { %v12505_v9 = vpop.permute.xlu1 %5252  ;;  %5335 = vst.msk [vmem:[#allocation5 + $0x38] sm:$0xff] %vm5332_vm15, %v12399_v62  ;;  %4781 = vrot.lane.b32.xlu0 %v5410_v36, %s9080_s15  ;;  %v6110_v57 = vld [vmem:[#allocation5 + $0x20] sm:$0xff] }
 0x6f5   : > { %6410 = vmatprep.mubr.f32.mxu1 %v6110_v57 }
 0x6f6   : > { %4791 = vrot.lane.b32.xlu1 %v12508_v55, %s9080_s15  ;;  %v5467_v1 = vpop.permute.xlu0 %5466  ;;  %6411 = vmatmul.mubr.f32.gmra.mrb[2].mxu1 %v6109_v52  ;;  %v8517_v52 = vpack.c.bf16 %v6237_v8, %v6236_v60  ;;  %v5891_v60 = vld [vmem:[#allocation4 + $0xe9] sm:$0xff] }
 0x6f7   : > { %5561 = vst.msk [vmem:[#allocation5 + $0x38] sm:$0xff] %vm5558_vm1, %v5467_v1  ;;  %v6115_v1 = vld [vmem:[#allocation5 + $0x48] sm:$0xff] }
 0x6f8   : > { %v4772_v11 = vpop.permute.xlu1 %4771  ;;  %5039 = vrot.lane.b32.xlu0 %v5635_v29, %s9067_s17  ;;  %8518 = vmatprep.subr.bf16.mxu0 %v8517_v52 }
 0x6f9   : > { %4869 = vst.msk [vmem:[#allocation5 + $0xd8] sm:$0xff] %vm4849_vm11, %v4772_v11  ;;  %8520 = vmatpush3.bf16.msra.mxu0 %v8517_v52  ;;  %v5892_v52 = vld [vmem:[#allocation4 + $0xf1] sm:$0xff] }
 0x6fa   : > { %4870 = vst.msk [vmem:[#allocation5 + $0xe0] sm:$0xff] %vm4851_vm12, %v4772_v11  ;;  %5049 = vrot.lane.b32.xlu1 %v5640_v26, %s9067_s17  ;;  %v5692_v62 = vpop.permute.xlu0 %5691 }
 0x6fb   : > { %5789 = vst.msk [vmem:[#allocation5 + $0x38] sm:$0xff] %vm5783_vm3, %v5692_v62 }
 0x6fc   : > { %v5030_v7 = vpop.permute.xlu1 %5029  ;;  %5790 = vst.msk [vmem:[#allocation5 + $0x40] sm:$0xff] %vm5785_vm14, %v5692_v62  ;;  %5490 = vrot.lane.b32.xlu0 %v5412_v3, %s9083_s10 }
 0x6fd   : > { %5117 = vst.msk [vmem:[#allocation5 + $0xe0] sm:$0xff] %vm5107_vm13, %v5030_v7  ;;  %v6238_v7 = vld [vmem:[%s14218_s4 + $0x120] sm:$0xff] }
 0x6fe   : > { %5957 = vrot.lane.b32.xlu1 %v5887_v6, %s9069_s19  ;;  %v5243_v30 = vpop.permute.xlu0 %5242 }
 0x6ff   : > { %5336 = vst.msk [vmem:[#allocation5 + $0x50] sm:$0xff] %vm5332_vm15, %v5243_v30  ;;  %v5881_v30 = vld [vmem:[#allocation4 + $0x49] sm:$0xff] }
 0x700   : > { %v12531_v35 = vpop.permute.xlu1 %5480  ;;  %5562 = vst.msk [vmem:[#allocation5 + $0x50] sm:$0xff] %vm5558_vm1, %v12416_v2  ;;  %5715 = vrot.lane.b32.xlu0 %v5637_v28, %s9084_s21  ;;  %v12546_v2 = vld [vmem:[#allocation4 + $0x111] sm:$0xff] }
 0x701   : > { %5791 = vst.msk [vmem:[#allocation5 + $0x50] sm:$0xff] %vm5783_vm3, %v12422_v34  ;;  %v6112_v34 = vld [vmem:[#allocation5 + $0x30] sm:$0xff] }
 0x702   : > { %5959 = vrot.lane.b32.xlu1 %v5888_v47, %s9069_s19  ;;  %v4762_v23 = vpop.permute.xlu0 %4761  ;;  %v6113_v26 = vld [vmem:[#allocation5 + $0x38] sm:$0xff] }
 0x703   : > { %4859 = vst.msk [vmem:[#allocation5 + $0x60] sm:$0xff] %vm4849_vm11, %v4762_v23  ;;  %6415 = vmatprep.mubr.f32.mxu1 %v6113_v26 }
 0x704   : > { %v12540_v36 = vpop.permute.xlu1 %5705  ;;  %4860 = vst.msk [vmem:[#allocation5 + $0x68] sm:$0xff] %vm4851_vm12, %v4762_v23  ;;  %5266 = vrot.lane.b32.xlu0 %v12546_v2, %s9081_s16  ;;  %6416 = vmatmul.mubr.f32.gmra.mrb[4].mxu1 %v6112_v34  ;;  %v5882_v23 = vld [vmem:[#allocation4 + $0x51] sm:$0xff] }
 0x705   : > { %5804 = vst.msk [vmem:[#allocation5 + $0xe8] sm:$0xff] %vm5785_vm14, %v12540_v36 }
 0x706   : > { %5725 = vrot.lane.b32.xlu1 %v5642_v39, %s9084_s21  ;;  %v5020_v29 = vpop.permute.xlu0 %5019 }
 0x707   : > { %5112 = vst.msk [vmem:[#allocation5 + $0x68] sm:$0xff] %vm5107_vm13, %v5020_v29 }
 0x708   : > { %v12551_v16 = vpop.permute.xlu1 %5256  ;;  %5337 = vst.msk [vmem:[#allocation5 + $0x68] sm:$0xff] %vm5332_vm15, %v12431_v32  ;;  %4785 = vrot.lane.b32.xlu0 %v5412_v3, %s9080_s15  ;;  %v6116_v57 = vld [vmem:[#allocation5 + $0x50] sm:$0xff]  ;;  %v12570_v32 = vld [vmem:[#allocation4 + $0x187] sm:$0xff] }
 0x709   : > { %6420 = vmatprep.mubr.f32.mxu1 %v6116_v57  ;;  %v6239_v3 = vld [vmem:[%s14218_s4 + $0x128] sm:$0x1]  ;;  %v12609_v57 = vld [vmem:[#allocation4 + $0x131] sm:$0xff] }
 0x70a   : > { %5276 = vrot.lane.b32.xlu1 %v12554_v61, %s9081_s16  ;;  %v5471_v11 = vpop.permute.xlu0 %5470  ;;  %6421 = vmatmul.mubr.f32.gmra.mrb[6].mxu1 %v6115_v1  ;;  %v8521_v6 = vpack.c.bf16 %v6239_v3, %v6238_v7  ;;  %v5644_v3 = vld [vmem:[#allocation4 + $0x190] sm:$0xff] }
 0x70b   : > { %5563 = vst.msk [vmem:[#allocation5 + $0x68] sm:$0xff] %vm5558_vm1, %v5471_v11  ;;  %v6121_v11 = vld [vmem:[#allocation5 + $0x78] sm:$0xff] }
 0x70c   : > { %v4776_v62 = vpop.permute.xlu1 %4775  ;;  %5043 = vrot.lane.b32.xlu0 %v5637_v28, %s9067_s17  ;;  %8523 = vmatprep.subr.msk.bf16.mxu0 %vm8522_vm6, %v8521_v6 }
 0x70d   : > { %4873 = vst.msk [vmem:[#allocation5 + $0x108] sm:$0xff] %vm4849_vm11, %v4776_v62  ;;  %8526 = vmatpush3.bf16.msk.msra.mxu0 %vm8522_vm6, %v8521_v6 }
 0x70e   : > { %4874 = vst.msk [vmem:[#allocation5 + $0x110] sm:$0xff] %vm4851_vm12, %v4776_v62  ;;  %5502 = vrot.lane.b32.xlu1 %v12570_v32, %s9083_s10  ;;  %v5696_v10 = vpop.permute.xlu0 %5695 }
 0x70f   : > { %5793 = vst.msk [vmem:[#allocation5 + $0x68] sm:$0xff] %vm5783_vm3, %v5696_v10 }
 0x710   : > { %v5034_v56 = vpop.permute.xlu1 %5033  ;;  %5794 = vst.msk [vmem:[#allocation5 + $0x70] sm:$0xff] %vm5785_vm14, %v5696_v10  ;;  %5945 = vrot.lane.b32.xlu0 %v5881_v30, %s9069_s19  ;;  %v12625_v10 = vld [vmem:[#allocation4 + $0x189] sm:$0xff] }
 0x711   : > { %5119 = vst.msk [vmem:[#allocation5 + $0x110] sm:$0xff] %vm5107_vm13, %v5034_v56  ;;  %v12634_v30 = vld [vmem:[#allocation4 + $0x1a7] sm:$0xff] }
 0x712   : > { %4795 = vrot.lane.b32.xlu1 %v12584_v59, %s9080_s15  ;;  %v5247_v28 = vpop.permute.xlu0 %5246 }
 0x713   : > { %5338 = vst.msk [vmem:[#allocation5 + $0x80] sm:$0xff] %vm5332_vm15, %v5247_v28 }
 0x714   : > { %v12589_v47 = vpop.permute.xlu1 %5484  ;;  %5564 = vst.msk [vmem:[#allocation5 + $0x80] sm:$0xff] %vm5558_vm1, %v12450_v25  ;;  %5947 = vrot.lane.b32.xlu0 %v5882_v23, %s9069_s19  ;;  %v5639_v25 = vld [vmem:[#allocation4 + $0x148] sm:$0xff] }
 0x715   : > { %5795 = vst.msk [vmem:[#allocation5 + $0x80] sm:$0xff] %vm5783_vm3, %v12455_v42 }
 0x716   : > { %5053 = vrot.lane.b32.xlu1 %v5642_v39, %s9067_s17  ;;  %v4766_v26 = vpop.permute.xlu0 %4765  ;;  %v6119_v29 = vld [vmem:[#allocation5 + $0x68] sm:$0xff]  ;;  %v6118_v39 = vld [vmem:[#allocation5 + $0x60] sm:$0xff] }
 0x717   : > { %4863 = vst.msk [vmem:[#allocation5 + $0x90] sm:$0xff] %vm4849_vm11, %v4766_v26  ;;  %6425 = vmatprep.mubr.f32.mxu1 %v6119_v29 }
 0x718   : > { %v12598_v34 = vpop.permute.xlu1 %5709  ;;  %4864 = vst.msk [vmem:[#allocation5 + $0x98] sm:$0xff] %vm4851_vm12, %v4766_v26  ;;  %5719 = vrot.lane.b32.xlu0 %v5639_v25, %s9084_s21  ;;  %6426 = vmatmul.mubr.f32.gmra.mrb[8].mxu1 %v6118_v39  ;;  %v12649_v26 = vld [vmem:[#allocation4 + $0x18f] sm:$0xff] }
 0x719   : > { %5808 = vst.msk [vmem:[#allocation5 + $0x118] sm:$0xff] %vm5785_vm14, %v12598_v34 }
 0x71a   : > { %5965 = vrot.lane.b32.xlu1 %v5891_v60, %s9069_s19  ;;  %v5024_v42 = vpop.permute.xlu0 %5023  ;;  %v5886_v60 = vld [vmem:[#allocation4 + $0x91] sm:$0xff] }
 0x71b   : > { %5114 = vst.msk [vmem:[#allocation5 + $0x98] sm:$0xff] %vm5107_vm13, %v5024_v42  ;;  %v6127_v42 = vld [vmem:[#allocation5 + $0xa8] sm:$0xff] }
 0x71c   : > { %v12606_v8 = vpop.permute.xlu1 %5260  ;;  %5339 = vst.msk [vmem:[#allocation5 + $0x98] sm:$0xff] %vm5332_vm15, %v12463_v0  ;;  %5270 = vrot.lane.b32.xlu0 %v12609_v57, %s9081_s16  ;;  %v6122_v1 = vld [vmem:[#allocation5 + $0x80] sm:$0xff] }
 0x71d   : > { %6430 = vmatprep.mubr.f32.mxu1 %v6122_v1 }
 0x71e   : > { %5967 = vrot.lane.b32.xlu1 %v5892_v52, %s9069_s19  ;;  %v5475_v62 = vpop.permute.xlu0 %5474  ;;  %6431 = vmatmul.mubr.f32.gmra.mrb[10].mxu1 %v6121_v11  ;;  %v5641_v11 = vld [vmem:[#allocation4 + $0x168] sm:$0xff] }
 0x71f   : > { %5565 = vst.msk [vmem:[#allocation5 + $0x98] sm:$0xff] %vm5558_vm1, %v5475_v62  ;;  %v5895_v62 = vld [vmem:[#allocation4 + $0x129] sm:$0xff] }
 0x720   : > { %v4780_v7 = vpop.permute.xlu1 %4779  ;;  %5496 = vrot.lane.b32.xlu0 %v12508_v55, %s9083_s10 }
 0x721   : > { %4877 = vst.msk [vmem:[#allocation5 + $0x138] sm:$0xff] %vm4849_vm11, %v4780_v7 }
 0x722   : > { %4878 = vst.msk [vmem:[#allocation5 + $0x140] sm:$0xff] %vm4851_vm12, %v4780_v7  ;;  %5729 = vrot.lane.b32.xlu1 %v5644_v3, %s9084_s21  ;;  %v5700_v0 = vpop.permute.xlu0 %5699 }
 0x723   : > { %5797 = vst.msk [vmem:[#allocation5 + $0x98] sm:$0xff] %vm5783_vm3, %v5700_v0 }
 0x724   : > { %v5038_v6 = vpop.permute.xlu1 %5037  ;;  %5798 = vst.msk [vmem:[#allocation5 + $0xa0] sm:$0xff] %vm5785_vm14, %v5700_v0  ;;  %4789 = vrot.lane.b32.xlu0 %v12445_v41, %s9080_s15 }
 0x725   : > { %5121 = vst.msk [vmem:[#allocation5 + $0x140] sm:$0xff] %vm5107_vm13, %v5038_v6 }
 0x726   : > { %5280 = vrot.lane.b32.xlu1 %v12625_v10, %s9081_s16  ;;  %v5251_v56 = vpop.permute.xlu0 %5250 }
 0x727   : > { %5340 = vst.msk [vmem:[#allocation5 + $0xb0] sm:$0xff] %vm5332_vm15, %v5251_v56  ;;  %v5646_v56 = vld [vmem:[#allocation4 + $0x1b0] sm:$0xff] }
 0x728   : > { %v12631_v55 = vpop.permute.xlu1 %5488  ;;  %5566 = vst.msk [vmem:[#allocation5 + $0xb0] sm:$0xff] %vm5558_vm1, %v12481_v18  ;;  %5047 = vrot.lane.b32.xlu0 %v5639_v25, %s9067_s17  ;;  %v5885_v18 = vld [vmem:[#allocation4 + $0x89] sm:$0xff] }
 0x729   : > { %5799 = vst.msk [vmem:[#allocation5 + $0xb0] sm:$0xff] %vm5783_vm3, %v12493_v33  ;;  %v6124_v33 = vld [vmem:[#allocation5 + $0x90] sm:$0xff] }
 0x72a   : > { %5506 = vrot.lane.b32.xlu1 %v12634_v30, %s9083_s10  ;;  %v4770_v41 = vpop.permute.xlu0 %4769  ;;  %v6125_v23 = vld [vmem:[#allocation5 + $0x98] sm:$0xff] }
 0x72b   : > { %4867 = vst.msk [vmem:[#allocation5 + $0xc0] sm:$0xff] %vm4849_vm11, %v4770_v41  ;;  %6435 = vmatprep.mubr.f32.mxu1 %v6125_v23 }
 0x72c   : > { %v12643_v28 = vpop.permute.xlu1 %5713  ;;  %4868 = vst.msk [vmem:[#allocation5 + $0xc8] sm:$0xff] %vm4851_vm12, %v4770_v41  ;;  %5953 = vrot.lane.b32.xlu0 %v5885_v18, %s9069_s19  ;;  %6436 = vmatmul.mubr.f32.gmra.mrb[12].mxu1 %v6124_v33  ;;  %v12700_v33 = vld [vmem:[#allocation4 + $0x1c7] sm:$0xff] }
 0x72d   : > { %5812 = vst.msk [vmem:[#allocation5 + $0x148] sm:$0xff] %vm5785_vm14, %v12643_v28 }
 0x72e   : > { %4799 = vrot.lane.b32.xlu1 %v12649_v26, %s9080_s15  ;;  %v5028_v29 = vpop.permute.xlu0 %5027 }
 0x72f   : > { %5116 = vst.msk [vmem:[#allocation5 + $0xc8] sm:$0xff] %vm5107_vm13, %v5028_v29  ;;  %v6133_v29 = vld [vmem:[#allocation5 + $0xd8] sm:$0xff] }
 0x730   : > { %v12654_v25 = vpop.permute.xlu1 %5264  ;;  %5341 = vst.msk [vmem:[#allocation5 + $0xc8] sm:$0xff] %vm5332_vm15, %v12505_v9  ;;  %5955 = vrot.lane.b32.xlu0 %v5886_v60, %s9069_s19  ;;  %v6128_v39 = vld [vmem:[#allocation5 + $0xb0] sm:$0xff] }
 0x731   : > { %6440 = vmatprep.mubr.f32.mxu1 %v6128_v39 }
 0x732   : > { %5057 = vrot.lane.b32.xlu1 %v5644_v3, %s9067_s17  ;;  %v5479_v52 = vpop.permute.xlu0 %5478  ;;  %6441 = vmatmul.mubr.f32.gmra.mrb[14].mxu1 %v6127_v42  ;;  %v12669_v3 = vld [vmem:[#allocation4 + $0x151] sm:$0xff]  ;;  %v5889_v42 = vld [vmem:[#allocation4 + $0xc9] sm:$0xff] }
 0x733   : > { %5567 = vst.msk [vmem:[#allocation5 + $0xc8] sm:$0xff] %vm5558_vm1, %v5479_v52  ;;  %v12710_v52 = vld [vmem:[#allocation4 + $0x1af] sm:$0xff] }
 0x734   : > { %v4784_v1 = vpop.permute.xlu1 %4783  ;;  %5723 = vrot.lane.b32.xlu0 %v5641_v11, %s9084_s21 }
 0x735   : > { %4881 = vst.msk [vmem:[#allocation5 + $0x168] sm:$0xff] %vm4849_vm11, %v4784_v1 }
 0x736   : > { %4882 = vst.msk [vmem:[#allocation5 + $0x170] sm:$0xff] %vm4851_vm12, %v4784_v1  ;;  %5973 = vrot.lane.b32.xlu1 %v5895_v62, %s9069_s19  ;;  %v5704_v9 = vpop.permute.xlu0 %5703 }
 0x737   : > { %5801 = vst.msk [vmem:[#allocation5 + $0xc8] sm:$0xff] %vm5783_vm3, %v5704_v9 }
 0x738   : > { %v5042_v7 = vpop.permute.xlu1 %5041  ;;  %5802 = vst.msk [vmem:[#allocation5 + $0xd0] sm:$0xff] %vm5785_vm14, %v5704_v9  ;;  %5274 = vrot.lane.b32.xlu0 %v12669_v3, %s9081_s16 }
 0x739   : > { %5123 = vst.msk [vmem:[#allocation5 + $0x170] sm:$0xff] %vm5107_vm13, %v5042_v7  ;;  %v5643_v7 = vld [vmem:[#allocation4 + $0x188] sm:$0xff] }
 0x73a   : > { %5975 = vrot.lane.b32.xlu1 %v12609_v57, %s9069_s19  ;;  %v5255_v0 = vpop.permute.xlu0 %5254 }
 0x73b   : > { %5342 = vst.msk [vmem:[#allocation5 + $0xe0] sm:$0xff] %vm5332_vm15, %v5255_v0 }
 0x73c   : > { %v12675_v6 = vpop.permute.xlu1 %5492  ;;  %5568 = vst.msk [vmem:[#allocation5 + $0xe0] sm:$0xff] %vm5558_vm1, %v12531_v35  ;;  %5500 = vrot.lane.b32.xlu0 %v12584_v59, %s9083_s10  ;;  %v12691_v35 = vld [vmem:[#allocation4 + $0x1a9] sm:$0xff] }
 0x73d   : > { %5803 = vst.msk [vmem:[#allocation5 + $0xe0] sm:$0xff] %vm5783_vm3, %v12540_v36  ;;  %v6130_v36 = vld [vmem:[#allocation5 + $0xc0] sm:$0xff] }
 0x73e   : > { %5733 = vrot.lane.b32.xlu1 %v5646_v56, %s9084_s21  ;;  %v4774_v41 = vpop.permute.xlu0 %4773  ;;  %v6131_v57 = vld [vmem:[#allocation5 + $0xc8] sm:$0xff] }
 0x73f   : > { %4871 = vst.msk [vmem:[#allocation5 + $0xf0] sm:$0xff] %vm4849_vm11, %v4774_v41  ;;  %6445 = vmatprep.mubr.f32.mxu1 %v6131_v57 }
 0x740   : > { %v12685_v23 = vpop.permute.xlu1 %5717  ;;  %4872 = vst.msk [vmem:[#allocation5 + $0xf8] sm:$0xff] %vm4851_vm12, %v4774_v41  ;;  %4793 = vrot.lane.b32.xlu0 %v12499_v43, %s9080_s15  ;;  %6446 = vmatmul.mubr.f32.gmra.mrb[16].mxu1 %v6130_v36 }
 0x741   : > { %5816 = vst.msk [vmem:[#allocation5 + $0x178] sm:$0xff] %vm5785_vm14, %v12685_v23 }
 0x742   : > { %5284 = vrot.lane.b32.xlu1 %v12691_v35, %s9081_s16  ;;  %v5032_v59 = vpop.permute.xlu0 %5031 }
 0x743   : > { %5118 = vst.msk [vmem:[#allocation5 + $0xf8] sm:$0xff] %vm5107_vm13, %v5032_v59 }
 0x744   : > { %v12697_v18 = vpop.permute.xlu1 %5268  ;;  %5343 = vst.msk [vmem:[#allocation5 + $0xf8] sm:$0xff] %vm5332_vm15, %v12551_v16  ;;  %5051 = vrot.lane.b32.xlu0 %v5641_v11, %s9067_s17  ;;  %v6134_v43 = vld [vmem:[#allocation5 + $0xe0] sm:$0xff]  ;;  %v5890_v11 = vld [vmem:[#allocation4 + $0xd1] sm:$0xff] }
 0x745   : > { %6450 = vmatprep.mubr.f32.mxu1 %v6134_v43  ;;  %v6139_v43 = vld [vmem:[#allocation5 + $0x108] sm:$0xff] }
 0x746   : > { %5510 = vrot.lane.b32.xlu1 %v12700_v33, %s9083_s10  ;;  %v5483_v60 = vpop.permute.xlu0 %5482  ;;  %6451 = vmatmul.mubr.f32.gmra.mrb[18].mxu1 %v6133_v29 }
 0x747   : > { %5569 = vst.msk [vmem:[#allocation5 + $0xf8] sm:$0xff] %vm5558_vm1, %v5483_v60 }
 0x748   : > { %v12707_v39 = vpop.permute.xlu1 %5494  ;;  %5961 = vrot.lane.b32.xlu0 %v5889_v42, %s9069_s19  ;;  %v12747_v42 = vld [vmem:[#allocation4 + $0x1c9] sm:$0xff] }
 0x74a   : > { %4803 = vrot.lane.b32.xlu1 %v12710_v52, %s9080_s15  ;;  %v5708_v16 = vpop.permute.xlu0 %5707 }
 0x74b   : > { %5805 = vst.msk [vmem:[#allocation5 + $0xf8] sm:$0xff] %vm5783_vm3, %v5708_v16 }
 0x74c   : > { %v4788_v1 = vpop.permute.xlu1 %4787  ;;  %5806 = vst.msk [vmem:[#allocation5 + $0x100] sm:$0xff] %vm5785_vm14, %v5708_v16  ;;  %5963 = vrot.lane.b32.xlu0 %v5890_v11, %s9069_s19  ;;  %v12757_v16 = vld [vmem:[#allocation4 + $0x1e7] sm:$0xff] }
 0x74d   : > { %4885 = vst.msk [vmem:[#allocation5 + $0x198] sm:$0xff] %vm4849_vm11, %v4788_v1 }
 0x74e   : > { %4886 = vst.msk [vmem:[#allocation5 + $0x1a0] sm:$0xff] %vm4851_vm12, %v4788_v1  ;;  %5061 = vrot.lane.b32.xlu1 %v5646_v56, %s9067_s17  ;;  %v5259_v62 = vpop.permute.xlu0 %5258 }
 0x74f   : > { %5344 = vst.msk [vmem:[#allocation5 + $0x110] sm:$0xff] %vm5332_vm15, %v5259_v62  ;;  %v12765_v62 = vld [vmem:[#allocation4 + $0x1cf] sm:$0xff] }
 0x750   : > { %v5046_v9 = vpop.permute.xlu1 %5045  ;;  %5570 = vst.msk [vmem:[#allocation5 + $0x110] sm:$0xff] %vm5558_vm1, %v12589_v47  ;;  %5727 = vrot.lane.b32.xlu0 %v5643_v7, %s9084_s21  ;;  %v5193_v47 = vld [vmem:[#allocation4 + $0x171] sm:$0xff] }
 0x751   : > { %5125 = vst.msk [vmem:[#allocation5 + $0x1a0] sm:$0xff] %vm5107_vm13, %v5046_v9 }
 0x752   : > { %5981 = vrot.lane.b32.xlu1 %v12554_v61, %s9069_s19  ;;  %5807 = vst.msk [vmem:[#allocation5 + $0x110] sm:$0xff] %vm5783_vm3, %v12598_v34  ;;  %v4778_v0 = vpop.permute.xlu0 %4777  ;;  %v6137_v41 = vld [vmem:[#allocation5 + $0xf8] sm:$0xff]  ;;  %v6136_v61 = vld [vmem:[#allocation5 + $0xf0] sm:$0xff] }
 0x753   : > { %4875 = vst.msk [vmem:[#allocation5 + $0x120] sm:$0xff] %vm4849_vm11, %v4778_v0  ;;  %6455 = vmatprep.mubr.f32.mxu1 %v6137_v41  ;;  %v5648_v34 = vld [vmem:[#allocation4 + $0x1d0] sm:$0xff]  ;;  %v5645_v41 = vld [vmem:[#allocation4 + $0x1a8] sm:$0xff] }
 0x754   : > { %v5950_v56 = vpop.permute.xlu1 %5949  ;;  %4876 = vst.msk [vmem:[#allocation5 + $0x128] sm:$0xff] %vm4851_vm12, %v4778_v0  ;;  %5278 = vrot.lane.b32.xlu0 %v5193_v47, %s9081_s16  ;;  %6456 = vmatmul.mubr.f32.gmra.mrb[20].mxu1 %v6136_v61 }
 0x755   : > { %6044 = vst.msk [vmem:[#allocation5 + $0x40] sm:$0xff] %vm6041_vm7, %v5950_v56 }
 0x756   : > { %5983 = vrot.lane.b32.xlu1 %v5193_v47, %s9069_s19  ;;  %v5036_v57 = vpop.permute.xlu0 %5035  ;;  %v6145_v47 = vld [vmem:[#allocation5 + $0x138] sm:$0xff] }
 0x757   : > { %5120 = vst.msk [vmem:[#allocation5 + $0x128] sm:$0xff] %vm5107_vm13, %v5036_v57 }
 0x758   : > { %v5952_v36 = vpop.permute.xlu1 %5951  ;;  %5345 = vst.msk [vmem:[#allocation5 + $0x128] sm:$0xff] %vm5332_vm15, %v12606_v8  ;;  %5504 = vrot.lane.b32.xlu0 %v12649_v26, %s9083_s10 }
 0x759   : > { %6045 = vst.msk [vmem:[#allocation5 + $0x58] sm:$0xff] %vm6041_vm7, %v5952_v36  ;;  %v6140_v59 = vld [vmem:[#allocation5 + $0x110] sm:$0xff] }
 0x75a   : > { %5737 = vrot.lane.b32.xlu1 %v5648_v34, %s9084_s21  ;;  %6460 = vmatprep.mubr.f32.mxu1 %v6140_v59  ;;  %v5487_v29 = vpop.permute.xlu0 %5486  ;;  %v12790_v36 = vld [vmem:[#allocation4 + $0x191] sm:$0xff] }
 0x75b   : > { %6461 = vmatmul.mubr.f32.gmra.mrb[22].mxu1 %v6139_v43  ;;  %5571 = vst.msk [vmem:[#allocation5 + $0x128] sm:$0xff] %vm5558_vm1, %v5487_v29  ;;  %v12801_v59 = vld [vmem:[#allocation4 + $0x1f0] sm:$0xff] }
 0x75c   : > { %v12742_v60 = vpop.permute.xlu1 %5721  ;;  %4797 = vrot.lane.b32.xlu0 %v12570_v32, %s9080_s15  ;;  %v5893_v32 = vld [vmem:[#allocation4 + $0x109] sm:$0xff] }
 0x75d   : > { %5820 = vst.msk [vmem:[#allocation5 + $0x1a8] sm:$0xff] %vm5785_vm14, %v12742_v60 }
 0x75e   : > { %5288 = vrot.lane.b32.xlu1 %v12747_v42, %s9081_s16  ;;  %v5712_v8 = vpop.permute.xlu0 %5711 }
 0x75f   : > { %5809 = vst.msk [vmem:[#allocation5 + $0x128] sm:$0xff] %vm5783_vm3, %v5712_v8 }
 0x760   : > { %v12753_v26 = vpop.permute.xlu1 %5272  ;;  %5810 = vst.msk [vmem:[#allocation5 + $0x130] sm:$0xff] %vm5785_vm14, %v5712_v8  ;;  %5055 = vrot.lane.b32.xlu0 %v5643_v7, %s9067_s17  ;;  %v12812_v8 = vld [vmem:[#allocation4 + $0x1e9] sm:$0xff] }
 0x762   : > { %5514 = vrot.lane.b32.xlu1 %v12757_v16, %s9083_s10  ;;  %v5263_v1 = vpop.permute.xlu0 %5262 }
 0x763   : > { %5346 = vst.msk [vmem:[#allocation5 + $0x140] sm:$0xff] %vm5332_vm15, %v5263_v1 }
 0x764   : > { %v12762_v11 = vpop.permute.xlu1 %5498  ;;  %5572 = vst.msk [vmem:[#allocation5 + $0x140] sm:$0xff] %vm5558_vm1, %v12631_v55  ;;  %5969 = vrot.lane.b32.xlu0 %v5893_v32, %s9069_s19  ;;  %v6142_v55 = vld [vmem:[#allocation5 + $0x120] sm:$0xff] }
 0x765   : > { %5811 = vst.msk [vmem:[#allocation5 + $0x140] sm:$0xff] %vm5783_vm3, %v12643_v28 }
 0x766   : > { %4807 = vrot.lane.b32.xlu1 %v12765_v62, %s9080_s15  ;;  %v4782_v9 = vpop.permute.xlu0 %4781  ;;  %v6143_v0 = vld [vmem:[#allocation5 + $0x128] sm:$0xff] }
 0x767   : > { %4879 = vst.msk [vmem:[#allocation5 + $0x150] sm:$0xff] %vm4849_vm11, %v4782_v9  ;;  %6465 = vmatprep.mubr.f32.mxu1 %v6143_v0  ;;  %v6151_v0 = vld [vmem:[#allocation5 + $0x168] sm:$0xff] }
 0x768   : > { %v4792_v7 = vpop.permute.xlu1 %4791  ;;  %4880 = vst.msk [vmem:[#allocation5 + $0x158] sm:$0xff] %vm4851_vm12, %v4782_v9  ;;  %5971 = vrot.lane.b32.xlu0 %v12546_v2, %s9069_s19  ;;  %6466 = vmatmul.mubr.f32.gmra.mrb[24].mxu1 %v6142_v55  ;;  %v12826_v9 = vld [vmem:[#allocation4 + $0x207] sm:$0xff] }
 0x769   : > { %4889 = vst.msk [vmem:[#allocation5 + $0x1c8] sm:$0xff] %vm4849_vm11, %v4792_v7 }
 0x76a   : > { %4890 = vst.msk [vmem:[#allocation5 + $0x1d0] sm:$0xff] %vm4851_vm12, %v4792_v7  ;;  %5065 = vrot.lane.b32.xlu1 %v5648_v34, %s9067_s17  ;;  %v5040_v28 = vpop.permute.xlu0 %5039  ;;  %v12792_v34 = vld [vmem:[#allocation4 + $0x1b1] sm:$0xff] }
 0x76b   : > { %5122 = vst.msk [vmem:[#allocation5 + $0x158] sm:$0xff] %vm5107_vm13, %v5040_v28 }
 0x76c   : > { %v5050_v56 = vpop.permute.xlu1 %5049  ;;  %5347 = vst.msk [vmem:[#allocation5 + $0x158] sm:$0xff] %vm5332_vm15, %v12654_v25  ;;  %5731 = vrot.lane.b32.xlu0 %v5645_v41, %s9084_s21  ;;  %v6146_v2 = vld [vmem:[#allocation5 + $0x140] sm:$0xff] }
 0x76d   : > { %5127 = vst.msk [vmem:[#allocation5 + $0x1d0] sm:$0xff] %vm5107_vm13, %v5050_v56  ;;  %6470 = vmatprep.mubr.f32.mxu1 %v6146_v2  ;;  %v5647_v56 = vld [vmem:[#allocation4 + $0x1c8] sm:$0xff] }
 0x76e   : > { %5989 = vrot.lane.b32.xlu1 %v12691_v35, %s9069_s19  ;;  %v5491_v61 = vpop.permute.xlu0 %5490  ;;  %6471 = vmatmul.mubr.f32.gmra.mrb[26].mxu1 %v6145_v47 }
 0x76f   : > { %5573 = vst.msk [vmem:[#allocation5 + $0x158] sm:$0xff] %vm5558_vm1, %v5491_v61  ;;  %v12862_v61 = vld [vmem:[#allocation4 + $0x20f] sm:$0xff] }
 0x770   : > { %v5958_v57 = vpop.permute.xlu1 %5957  ;;  %5282 = vrot.lane.b32.xlu0 %v12790_v36, %s9081_s16 }
 0x771   : > { %6048 = vst.msk [vmem:[#allocation5 + $0xa0] sm:$0xff] %vm6041_vm7, %v5958_v57 }
 0x772   : > { %5991 = vrot.lane.b32.xlu1 %v12792_v34, %s9069_s19  ;;  %v5716_v25 = vpop.permute.xlu0 %5715 }
 0x773   : > { %5813 = vst.msk [vmem:[#allocation5 + $0x158] sm:$0xff] %vm5783_vm3, %v5716_v25 }
 0x774   : > { %v5960_v35 = vpop.permute.xlu1 %5959  ;;  %5814 = vst.msk [vmem:[#allocation5 + $0x160] sm:$0xff] %vm5785_vm14, %v5716_v25  ;;  %5508 = vrot.lane.b32.xlu0 %v12710_v52, %s9083_s10 }
 0x775   : > { %6049 = vst.msk [vmem:[#allocation5 + $0xb8] sm:$0xff] %vm6041_vm7, %v5960_v35 }
 0x776   : > { %5741 = vrot.lane.b32.xlu1 %v12801_v59, %s9084_s21  ;;  %v5267_v43 = vpop.permute.xlu0 %5266 }
 0x777   : > { %5348 = vst.msk [vmem:[#allocation5 + $0x170] sm:$0xff] %vm5332_vm15, %v5267_v43  ;;  %v12871_v43 = vld [vmem:[#allocation4 + $0x1d1] sm:$0xff] }
 0x778   : > { %v12807_v29 = vpop.permute.xlu1 %5725  ;;  %5574 = vst.msk [vmem:[#allocation5 + $0x170] sm:$0xff] %vm5558_vm1, %v12675_v6  ;;  %4801 = vrot.lane.b32.xlu0 %v12634_v30, %s9080_s15  ;;  %v6148_v30 = vld [vmem:[#allocation5 + $0x150] sm:$0xff] }
 0x779   : > { %5824 = vst.msk [vmem:[#allocation5 + $0x1d8] sm:$0xff] %vm5785_vm14, %v12807_v29 }
 0x77a   : > { %5292 = vrot.lane.b32.xlu1 %v12812_v8, %s9081_s16  ;;  %5815 = vst.msk [vmem:[#allocation5 + $0x170] sm:$0xff] %vm5783_vm3, %v12685_v23  ;;  %v4786_v52 = vpop.permute.xlu0 %4785  ;;  %v6149_v32 = vld [vmem:[#allocation5 + $0x158] sm:$0xff] }
 0x77b   : > { %4883 = vst.msk [vmem:[#allocation5 + $0x180] sm:$0xff] %vm4849_vm11, %v4786_v52  ;;  %6475 = vmatprep.mubr.f32.mxu1 %v6149_v32 }
 0x77c   : > { %v12822_v1 = vpop.permute.xlu1 %5276  ;;  %4884 = vst.msk [vmem:[#allocation5 + $0x188] sm:$0xff] %vm4851_vm12, %v4786_v52  ;;  %5059 = vrot.lane.b32.xlu0 %v5645_v41, %s9067_s17  ;;  %6476 = vmatmul.mubr.f32.gmra.mrb[28].mxu1 %v6148_v30  ;;  %v12853_v41 = vld [vmem:[#allocation4 + $0x1f1] sm:$0xff] }
 0x77e   : > { %5518 = vrot.lane.b32.xlu1 %v12826_v9, %s9083_s10  ;;  %v5044_v6 = vpop.permute.xlu0 %5043 }
 0x77f   : > { %5124 = vst.msk [vmem:[#allocation5 + $0x188] sm:$0xff] %vm5107_vm13, %v5044_v6  ;;  %v6117_v6 = vld [vmem:[#allocation5 + $0x58] sm:$0xff] }
 0x780   : > { %v12831_v23 = vpop.permute.xlu1 %5502  ;;  %5349 = vst.msk [vmem:[#allocation5 + $0x188] sm:$0xff] %vm5332_vm15, %v12697_v18  ;;  %5977 = vrot.lane.b32.xlu0 %v12484_v14, %s9069_s19  ;;  %v12845_v18 = vld [vmem:[#allocation4 + $0x208] sm:$0xff] }
 0x781   : > { %v6152_v7 = vld [vmem:[#allocation5 + $0x170] sm:$0xff]  ;;  %5575 = vst.msk [vmem:[#allocation5 + $0x188] sm:$0xff] %vm5558_vm1, %v12707_v39 }
 0x782   : > { %4584 = vrot.lane.b32.xlu1 %v12747_v42, %s9079_s14  ;;  %6480 = vmatprep.mubr.f32.mxu1 %v6152_v7  ;;  %v5946_v55 = vpop.permute.xlu0 %5945  ;;  %v6154_v7 = vld [vmem:[#allocation5 + $0x180] sm:$0xff] }
 0x783   : > { %6481 = vmatmul.mubr.f32.gmra.mrb[30].mxu1 %v6151_v0  ;;  %6042 = vst.msk [vmem:[#allocation5 + $0x10] sm:$0xff] %vm6041_vm7, %v5946_v55 }
 0x784   : > { %v4796_v28 = vpop.permute.xlu1 %4795  ;;  %5979 = vrot.lane.b32.xlu0 %v12669_v3, %s9069_s19 }
 0x785   : > { %4893 = vst.msk [vmem:[#allocation5 + $0x1f8] sm:$0xff] %vm4849_vm11, %v4796_v28 }
 0x786   : > { %4894 = vst.msk [vmem:[#allocation5 + $0x200] sm:$0xff] %vm4851_vm12, %v4796_v28  ;;  %5743 = vrot.lane.b32.xlu1 %v12845_v18, %s9084_s21  ;;  %v5948_v14 = vpop.permute.xlu0 %5947  ;;  %v12896_v28 = vld [vmem:[#allocation4 + $0x209] sm:$0xff] }
 0x787   : > { %6043 = vst.msk [vmem:[#allocation5 + $0x28] sm:$0xff] %vm6041_vm7, %v5948_v14  ;;  %v5428_v14 = vld [vmem:[#allocation4 + $0x227] sm:$0xff] }
 0x788   : > { %v5054_v39 = vpop.permute.xlu1 %5053  ;;  %5735 = vrot.lane.b32.xlu0 %v5647_v56, %s9084_s21 }
 0x789   : > { %5129 = vst.msk [vmem:[#allocation5 + $0x200] sm:$0xff] %vm5107_vm13, %v5054_v39 }
 0x78a   : > { %5294 = vrot.lane.b32.xlu1 %v12853_v41, %s9081_s16  ;;  %v5720_v2 = vpop.permute.xlu0 %5719  ;;  %v6108_v47 = vld [vmem:[#allocation5 + $0x10] sm:$0xff] }
 0x78b   : > { %5817 = vst.msk [vmem:[#allocation5 + $0x188] sm:$0xff] %vm5783_vm3, %v5720_v2  ;;  %8357 = vmatprep.mubr.msk.f32.mxu0 %vm6240_vm8, %v6108_v47  ;;  %v5653_v47 = vld [vmem:[#allocation4 + $0x228] sm:$0xff] }
 0x78c   : > { %v5966_v3 = vpop.permute.xlu1 %5965  ;;  %5818 = vst.msk [vmem:[#allocation5 + $0x190] sm:$0xff] %vm5785_vm14, %v5720_v2  ;;  %5286 = vrot.lane.b32.xlu0 %v12792_v34, %s9081_s16  ;;  %v6114_v34 = vld [vmem:[#allocation5 + $0x40] sm:$0xff] }
 0x78d   : > { %6052 = vst.msk [vmem:[#allocation5 + $0x100] sm:$0xff] %vm6041_vm7, %v5966_v3 }
 0x78e   : > { %5520 = vrot.lane.b32.xlu1 %v12862_v61, %s9083_s10  ;;  %v5271_v57 = vpop.permute.xlu0 %5270  ;;  %v6111_v35 = vld [vmem:[#allocation5 + $0x28] sm:$0xff] }
 0x78f   : > { %5350 = vst.msk [vmem:[#allocation5 + $0x1a0] sm:$0xff] %vm5332_vm15, %v5271_v57  ;;  %8358 = vmatmul.mubr.msk.f32.vlgmr.msra.gmra.mrb[32].mxu0 %vm6240_vm8, %v6111_v35 }
 0x790   : > { %v5968_v25 = vpop.permute.xlu1 %5967  ;;  %5512 = vrot.lane.b32.xlu0 %v12765_v62, %s9083_s10  ;;  %8360 = vmatprep.mubr.msk.f32.mxu0 %vm6240_vm8, %v6114_v34  ;;  %v12884_v62 = vld [vmem:[#allocation4 + $0x210] sm:$0xff] }
 0x791   : > { %6053 = vst.msk [vmem:[#allocation5 + $0x118] sm:$0xff] %vm6041_vm7, %v5968_v25 }
 0x792   : > { %4586 = vrot.lane.b32.xlu1 %v12871_v43, %s9079_s14  ;;  %v5497_v52 = vpop.permute.xlu0 %5496  ;;  %v6155_v30 = vld [vmem:[#allocation5 + $0x188] sm:$0xff] }
 0x793   : > { %5576 = vst.msk [vmem:[#allocation5 + $0x1a0] sm:$0xff] %vm5558_vm1, %v5497_v52  ;;  %6485 = vmatprep.mubr.f32.mxu1 %v6155_v30  ;;  %8361 = vmatmul.mubr.msk.f32.gmra.mrb[34].mxu0 %vm6240_vm8, %v6117_v6  ;;  %v5425_v6 = vld [vmem:[#allocation4 + $0x1ef] sm:$0xff] }
 0x794   : > { %v12878_v32 = vpop.permute.xlu1 %5729  ;;  %5819 = vst.msk [vmem:[#allocation5 + $0x1a0] sm:$0xff] %vm5783_vm3, %v12742_v60  ;;  %4805 = vrot.lane.b32.xlu0 %v12700_v33, %s9080_s15  ;;  %6486 = vmatmul.mubr.f32.gmra.mrb[32].mxu1 %v6154_v7  ;;  %v5911_v7 = vld [vmem:[#allocation4 + $0x229] sm:$0xff] }
 0x795   : > { %5828 = vst.msk [vmem:[#allocation5 + $0x208] sm:$0xff] %vm5785_vm14, %v12878_v32 }
 0x796   : > { %5745 = vrot.lane.b32.xlu1 %v12884_v62, %s9084_s21  ;;  %v4790_v0 = vpop.permute.xlu0 %4789 }
 0x797   : > { %4887 = vst.msk [vmem:[#allocation5 + $0x1b0] sm:$0xff] %vm4849_vm11, %v4790_v0 }
 0x798   : > { %v12892_v55 = vpop.permute.xlu1 %5280  ;;  %4888 = vst.msk [vmem:[#allocation5 + $0x1b8] sm:$0xff] %vm4851_vm12, %v4790_v0  ;;  %5063 = vrot.lane.b32.xlu0 %v5647_v56, %s9067_s17  ;;  %v6157_v56 = vld [vmem:[#allocation5 + $0x198] sm:$0xff]  ;;  %v6126_v0 = vld [vmem:[#allocation5 + $0xa0] sm:$0xff] }
 0x79a   : > { %5296 = vrot.lane.b32.xlu1 %v12896_v28, %s9081_s16  ;;  %v5048_v33 = vpop.permute.xlu0 %5047 }
 0x79b   : > { %5126 = vst.msk [vmem:[#allocation5 + $0x1b8] sm:$0xff] %vm5107_vm13, %v5048_v33  ;;  %v6158_v39 = vld [vmem:[#allocation5 + $0x1a0] sm:$0xff] }
 0x79c   : > { %v12901_v60 = vpop.permute.xlu1 %5506  ;;  %5351 = vst.msk [vmem:[#allocation5 + $0x1b8] sm:$0xff] %vm5332_vm15, %v12753_v26  ;;  %5985 = vrot.lane.b32.xlu0 %v12625_v10, %s9069_s19  ;;  %6490 = vmatprep.mubr.f32.mxu1 %v6158_v39 }
 0x79d   : > { %5577 = vst.msk [vmem:[#allocation5 + $0x1b8] sm:$0xff] %vm5558_vm1, %v12762_v11  ;;  %6491 = vmatmul.mubr.f32.gmra.mrb[34].mxu1 %v6157_v56  ;;  %v5649_v11 = vld [vmem:[#allocation4 + $0x1e8] sm:$0xff]  ;;  %v6129_v56 = vld [vmem:[#allocation5 + $0xb8] sm:$0xff] }
 0x79e   : > { %5522 = vrot.lane.b32.xlu1 %v5428_v14, %s9083_s10  ;;  %v5954_v2 = vpop.permute.xlu0 %5953 }
 0x79f   : > { %6046 = vst.msk [vmem:[#allocation5 + $0x70] sm:$0xff] %vm6041_vm7, %v5954_v2  ;;  %v5912_v2 = vld [vmem:[#allocation4 + $0x231] sm:$0xff] }
 0x7a0   : > { %v4800_v3 = vpop.permute.xlu1 %4799  ;;  %5987 = vrot.lane.b32.xlu0 %v12790_v36, %s9069_s19  ;;  %v12926_v36 = vld [vmem:[#allocation4 + $0x211] sm:$0xff] }
 0x7a1   : > { %4897 = vst.msk [vmem:[#allocation5 + $0x228] sm:$0xff] %vm4849_vm11, %v4800_v3 }
 0x7a2   : > { %4898 = vst.msk [vmem:[#allocation5 + $0x230] sm:$0xff] %vm4851_vm12, %v4800_v3  ;;  %4588 = vrot.lane.b32.xlu1 %v12812_v8, %s9079_s14  ;;  %v5956_v10 = vpop.permute.xlu0 %5955  ;;  %v6160_v3 = vld [vmem:[#allocation5 + $0x1b0] sm:$0xff] }
 0x7a3   : > { %6047 = vst.msk [vmem:[#allocation5 + $0x88] sm:$0xff] %vm6041_vm7, %v5956_v10 }
 0x7a4   : > { %v5058_v26 = vpop.permute.xlu1 %5057  ;;  %5739 = vrot.lane.b32.xlu0 %v5649_v11, %s9084_s21 }
 0x7a5   : > { %5131 = vst.msk [vmem:[#allocation5 + $0x230] sm:$0xff] %vm5107_vm13, %v5058_v26 }
 0x7a6   : > { %5747 = vrot.lane.b32.xlu1 %v5653_v47, %s9084_s21  ;;  %v5724_v57 = vpop.permute.xlu0 %5723  ;;  %v6120_v35 = vld [vmem:[#allocation5 + $0x70] sm:$0xff] }
 0x7a7   : > { %5821 = vst.msk [vmem:[#allocation5 + $0x1b8] sm:$0xff] %vm5783_vm3, %v5724_v57  ;;  %8363 = vmatprep.mubr.msk.f32.mxu0 %vm6240_vm8, %v6120_v35 }
 0x7a8   : > { %v5974_v25 = vpop.permute.xlu1 %5973  ;;  %5822 = vst.msk [vmem:[#allocation5 + $0x1c0] sm:$0xff] %vm5785_vm14, %v5724_v57  ;;  %5290 = vrot.lane.b32.xlu0 %v12871_v43, %s9081_s16  ;;  %v6163_v57 = vld [vmem:[#allocation5 + $0x1c8] sm:$0xff] }
 0x7a9   : > { %6056 = vst.msk [vmem:[#allocation5 + $0x160] sm:$0xff] %vm6041_vm7, %v5974_v25 }
 0x7aa   : > { %5298 = vrot.lane.b32.xlu1 %v12926_v36, %s9081_s16  ;;  %v5275_v34 = vpop.permute.xlu0 %5274  ;;  %v6123_v30 = vld [vmem:[#allocation5 + $0x88] sm:$0xff] }
 0x7ab   : > { %5352 = vst.msk [vmem:[#allocation5 + $0x1d0] sm:$0xff] %vm5332_vm15, %v5275_v34  ;;  %8364 = vmatmul.mubr.msk.f32.gmra.mrb[36].mxu0 %vm6240_vm8, %v6123_v30 }
 0x7ac   : > { %v5976_v52 = vpop.permute.xlu1 %5975  ;;  %5516 = vrot.lane.b32.xlu0 %v5425_v6, %s9083_s10  ;;  %8366 = vmatprep.mubr.msk.f32.mxu0 %vm6240_vm8, %v6126_v0 }
 0x7ad   : > { %6057 = vst.msk [vmem:[#allocation5 + $0x178] sm:$0xff] %vm6041_vm7, %v5976_v52 }
 0x7ae   : > { %6005 = vrot.lane.b32.xlu1 %v5911_v7, %s9069_s19  ;;  %v5501_v33 = vpop.permute.xlu0 %5500  ;;  %v6161_v39 = vld [vmem:[#allocation5 + $0x1b8] sm:$0xff]  ;;  %v6138_v7 = vld [vmem:[#allocation5 + $0x100] sm:$0xff] }
 0x7af   : > { %5578 = vst.msk [vmem:[#allocation5 + $0x1d0] sm:$0xff] %vm5558_vm1, %v5501_v33  ;;  %6495 = vmatprep.mubr.f32.mxu1 %v6161_v39  ;;  %8367 = vmatmul.mubr.msk.f32.gmra.mrb[38].mxu0 %vm6240_vm8, %v6129_v56  ;;  %v6141_v56 = vld [vmem:[#allocation5 + $0x118] sm:$0xff] }
 0x7b0   : > { %v12938_v14 = vpop.permute.xlu1 %5733  ;;  %5823 = vst.msk [vmem:[#allocation5 + $0x1d0] sm:$0xff] %vm5783_vm3, %v12807_v29  ;;  %4809 = vrot.lane.b32.xlu0 %v12757_v16, %s9080_s15  ;;  %6496 = vmatmul.mubr.f32.gmra.mrb[36].mxu1 %v6160_v3 }
 0x7b1   : > { %5832 = vst.msk [vmem:[#allocation5 + $0x238] sm:$0xff] %vm5785_vm14, %v12938_v14 }
 0x7b2   : > { %6007 = vrot.lane.b32.xlu1 %v5912_v2, %s9069_s19  ;;  %v4794_v10 = vpop.permute.xlu0 %4793 }
 0x7b3   : > { %4891 = vst.msk [vmem:[#allocation5 + $0x1e0] sm:$0xff] %vm4849_vm11, %v4794_v10 }
 0x7b4   : > { %v12949_v26 = vpop.permute.xlu1 %5284  ;;  %4892 = vst.msk [vmem:[#allocation5 + $0x1e8] sm:$0xff] %vm4851_vm12, %v4794_v10  ;;  %5067 = vrot.lane.b32.xlu0 %v5649_v11, %s9067_s17 }
 0x7b6   : > { %7119 = vrot.lane.b32.xlu1 %v11296_v44, %s9077_s12  ;;  %v5052_v29 = vpop.permute.xlu0 %5051 }
 0x7b7   : > { %5128 = vst.msk [vmem:[#allocation5 + $0x1e8] sm:$0xff] %vm5107_vm13, %v5052_v29  ;;  %v6164_v16 = vld [vmem:[#allocation5 + $0x1d0] sm:$0xff] }
 0x7b8   : > { %v12956_v47 = vpop.permute.xlu1 %5510  ;;  %5353 = vst.msk [vmem:[#allocation5 + $0x1e8] sm:$0xff] %vm5332_vm15, %v12822_v1  ;;  %5993 = vrot.lane.b32.xlu0 %v12747_v42, %s9069_s19  ;;  %6500 = vmatprep.mubr.f32.mxu1 %v6164_v16 }
 0x7b9   : > { %5579 = vst.msk [vmem:[#allocation5 + $0x1e8] sm:$0xff] %vm5558_vm1, %v12831_v23  ;;  %6501 = vmatmul.mubr.f32.gmra.mrb[38].mxu1 %v6163_v57  ;;  %v6169_v57 = vld [vmem:[#allocation5 + $0x1f8] sm:$0xff] }
 0x7ba   : > { %v5962_v11 = vpop.permute.xlu0 %5961  ;;  %v6166_v3 = vld [vmem:[#allocation5 + $0x1e0] sm:$0xff] }
 0x7bb   : > { %6050 = vst.msk [vmem:[#allocation5 + $0xd0] sm:$0xff] %vm6041_vm7, %v5962_v11 }
 0x7bc   : > { %v4804_v44 = vpop.permute.xlu1 %4803  ;;  %5995 = vrot.lane.b32.xlu0 %v12871_v43, %s9069_s19 }
 0x7bd   : > { %4901 = vst.msk [vmem:[#allocation5 + $0x258] sm:$0xff] %vm4849_vm11, %v4804_v44 }
 0x7be   : > { %4902 = vst.msk [vmem:[#allocation5 + $0x260] sm:$0xff] %vm4851_vm12, %v4804_v44  ;;  %v5964_v1 = vpop.permute.xlu0 %5963 }
 0x7bf   : > { %6051 = vst.msk [vmem:[#allocation5 + $0xe8] sm:$0xff] %vm6041_vm7, %v5964_v1 }
 0x7c0   : > { %v5062_v25 = vpop.permute.xlu1 %5061  ;;  %4811 = vrot.lane.b32.xlu0 %v5425_v6, %s9080_s15 }
 0x7c1   : > { %5133 = vst.msk [vmem:[#allocation5 + $0x260] sm:$0xff] %vm5107_vm13, %v5062_v25 }
 0x7c2   : > { %v5728_v42 = vpop.permute.xlu0 %5727  ;;  %v6132_v35 = vld [vmem:[#allocation5 + $0xd0] sm:$0xff] }
 0x7c3   : > { %5825 = vst.msk [vmem:[#allocation5 + $0x1e8] sm:$0xff] %vm5783_vm3, %v5728_v42  ;;  %8369 = vmatprep.mubr.msk.f32.mxu0 %vm6240_vm8, %v6132_v35  ;;  %v12977_v43 = vpop.f32.mrb[0].mxu1 }
 0x7c4   : > { %v5982_v23 = vpop.permute.xlu1 %5981  ;;  %5826 = vst.msk [vmem:[#allocation5 + $0x1f0] sm:$0xff] %vm5785_vm14, %v5728_v42  ;;  %5069 = vrot.lane.b32.xlu0 %v12801_v59, %s9067_s17  ;;  %v6409_v34 = vpop.f32.mrb[1].mxu1 }
 0x7c5   : > { %6060 = vst.msk [vmem:[#allocation5 + $0x1c0] sm:$0xff] %vm6041_vm7, %v5982_v23 }
 0x7c6   : > { %v5279_v52 = vpop.permute.xlu0 %5278  ;;  %v6135_v6 = vld [vmem:[#allocation5 + $0xe8] sm:$0xff] }
 0x7c7   : > { %5354 = vst.msk [vmem:[#allocation5 + $0x200] sm:$0xff] %vm5332_vm15, %v5279_v52  ;;  %8370 = vmatmul.mubr.msk.f32.gmra.mrb[40].mxu0 %vm6240_vm8, %v6135_v6  ;;  %v6150_v52 = vld [vmem:[#allocation5 + $0x160] sm:$0xff] }
 0x7c8   : > { %v5984_v30 = vpop.permute.xlu1 %5983  ;;  %5997 = vrot.lane.b32.xlu0 %v12812_v8, %s9069_s19  ;;  %8372 = vmatprep.mubr.msk.f32.mxu0 %vm6240_vm8, %v6138_v7  ;;  %v6153_v7 = vld [vmem:[#allocation5 + $0x178] sm:$0xff] }
 0x7c9   : > { %6061 = vst.msk [vmem:[#allocation5 + $0x1d8] sm:$0xff] %vm6041_vm7, %v5984_v30  ;;  %v12987_v0 = vpop.f32.mrb[2].mxu1 }
 0x7ca   : > { %v5505_v33 = vpop.permute.xlu0 %5504  ;;  %v6414_v59 = vpop.f32.mrb[3].mxu1  ;;  %v6167_v39 = vld [vmem:[#allocation5 + $0x1e8] sm:$0xff] }
 0x7cb   : > { %5580 = vst.msk [vmem:[#allocation5 + $0x200] sm:$0xff] %vm5558_vm1, %v5505_v33  ;;  %6505 = vmatprep.mubr.f32.mxu1 %v6167_v39  ;;  %8373 = vmatmul.mubr.msk.f32.gmra.mrb[42].mxu0 %vm6240_vm8, %v6141_v56  ;;  %v5654_v33 = vld [vmem:[#allocation4 + $0x230] sm:$0xff] }
 0x7cc   : > { %v12990_v2 = vpop.permute.xlu1 %5737  ;;  %5827 = vst.msk [vmem:[#allocation5 + $0x200] sm:$0xff] %vm5783_vm3, %v12878_v32  ;;  %5999 = vrot.lane.b32.xlu0 %v12853_v41, %s9069_s19  ;;  %6506 = vmatmul.mubr.f32.gmra.mrb[40].mxu1 %v6166_v3  ;;  %v5429_v56 = vld [vmem:[#allocation4 + $0x22f] sm:$0xff] }
 0x7cd   : > { %5836 = vst.msk [vmem:[#allocation5 + $0x268] sm:$0xff] %vm5785_vm14, %v12990_v2 }
 0x7ce   : > { %v4798_v8 = vpop.permute.xlu0 %4797 }
 0x7cf   : > { %4895 = vst.msk [vmem:[#allocation5 + $0x210] sm:$0xff] %vm4849_vm11, %v4798_v8 }
 0x7d0   : > { %4896 = vst.msk [vmem:[#allocation5 + $0x218] sm:$0xff] %vm4851_vm12, %v4798_v8  ;;  %v13001_v10 = vpop.permute.xlu1 %5288  ;;  %4813 = vrot.lane.b32.xlu0 %v12826_v9, %s9080_s15 }
 0x7d2   : > { %v5056_v29 = vpop.permute.xlu0 %5055 }
 0x7d3   : > { %5130 = vst.msk [vmem:[#allocation5 + $0x218] sm:$0xff] %vm5107_vm13, %v5056_v29  ;;  %v6170_v16 = vld [vmem:[#allocation5 + $0x200] sm:$0xff] }
 0x7d4   : > { %v13006_v32 = vpop.permute.xlu1 %5514  ;;  %5355 = vst.msk [vmem:[#allocation5 + $0x218] sm:$0xff] %vm5332_vm15, %v12892_v55  ;;  %5071 = vrot.lane.b32.xlu0 %v12845_v18, %s9067_s17  ;;  %6510 = vmatprep.mubr.f32.mxu1 %v6170_v16 }
 0x7d5   : > { %5581 = vst.msk [vmem:[#allocation5 + $0x218] sm:$0xff] %vm5558_vm1, %v12901_v60  ;;  %6511 = vmatmul.mubr.f32.gmra.mrb[42].mxu1 %v6169_v57  ;;  %v6175_v57 = vld [vmem:[#allocation5 + $0x228] sm:$0xff] }
 0x7d6   : > { %v5970_v11 = vpop.permute.xlu0 %5969  ;;  %v6172_v59 = vld [vmem:[#allocation5 + $0x210] sm:$0xff] }
 0x7d7   : > { %6054 = vst.msk [vmem:[#allocation5 + $0x130] sm:$0xff] %vm6041_vm7, %v5970_v11  ;;  %v13017_v44 = vpop.f32.mrb[4].mxu1 }
 0x7d8   : > { %v4808_v9 = vpop.permute.xlu1 %4807  ;;  %6001 = vrot.lane.b32.xlu0 %v12896_v28, %s9069_s19  ;;  %v6419_v18 = vpop.f32.mrb[5].mxu1 }
 0x7d9   : > { %4905 = vst.msk [vmem:[#allocation5 + $0x288] sm:$0xff] %vm4849_vm11, %v4808_v9 }
 0x7da   : > { %4906 = vst.msk [vmem:[#allocation5 + $0x290] sm:$0xff] %vm4851_vm12, %v4808_v9  ;;  %v5972_v55 = vpop.permute.xlu0 %5971 }
 0x7db   : > { %6055 = vst.msk [vmem:[#allocation5 + $0x148] sm:$0xff] %vm6041_vm7, %v5972_v55 }
 0x7dc   : > { %v5066_v1 = vpop.permute.xlu1 %5065  ;;  %6003 = vrot.lane.b32.xlu0 %v12926_v36, %s9069_s19 }
 0x7dd   : > { %5135 = vst.msk [vmem:[#allocation5 + $0x290] sm:$0xff] %vm5107_vm13, %v5066_v1  ;;  %v13025_v60 = vpop.f32.mrb[6].mxu1 }
 0x7de   : > { %v5732_v25 = vpop.permute.xlu0 %5731  ;;  %v6424_v42 = vpop.f32.mrb[7].mxu1  ;;  %v6144_v23 = vld [vmem:[#allocation5 + $0x130] sm:$0xff] }
 0x7df   : > { %5829 = vst.msk [vmem:[#allocation5 + $0x218] sm:$0xff] %vm5783_vm3, %v5732_v25  ;;  %8375 = vmatprep.mubr.msk.f32.mxu0 %vm6240_vm8, %v6144_v23 }
 0x7e0   : > { %5830 = vst.msk [vmem:[#allocation5 + $0x220] sm:$0xff] %vm5785_vm14, %v5732_v25  ;;  %v5990_v28 = vpop.permute.xlu1 %5989  ;;  %4815 = vrot.lane.b32.xlu0 %v12862_v61, %s9080_s15 }
 0x7e1   : > { %6064 = vst.msk [vmem:[#allocation5 + $0x220] sm:$0xff] %vm6041_vm7, %v5990_v28 }
 0x7e2   : > { %v5283_v35 = vpop.permute.xlu0 %5282  ;;  %v6147_v34 = vld [vmem:[#allocation5 + $0x148] sm:$0xff] }
 0x7e3   : > { %5356 = vst.msk [vmem:[#allocation5 + $0x230] sm:$0xff] %vm5332_vm15, %v5283_v35  ;;  %8376 = vmatmul.mubr.msk.f32.gmra.mrb[44].mxu0 %vm6240_vm8, %v6147_v34  ;;  %v6162_v35 = vld [vmem:[#allocation5 + $0x1c0] sm:$0xff] }
 0x7e4   : > { %v5992_v36 = vpop.permute.xlu1 %5991  ;;  %5073 = vrot.lane.b32.xlu0 %v12884_v62, %s9067_s17  ;;  %8378 = vmatprep.mubr.msk.f32.mxu0 %vm6240_vm8, %v6150_v52 }
 0x7e5   : > { %6065 = vst.msk [vmem:[#allocation5 + $0x238] sm:$0xff] %vm6041_vm7, %v5992_v36 }
 0x7e6   : > { %v5509_v30 = vpop.permute.xlu0 %5508  ;;  %v6173_v6 = vld [vmem:[#allocation5 + $0x218] sm:$0xff] }
 0x7e7   : > { %5582 = vst.msk [vmem:[#allocation5 + $0x230] sm:$0xff] %vm5558_vm1, %v5509_v30  ;;  %6515 = vmatprep.mubr.f32.mxu1 %v6173_v6  ;;  %8379 = vmatmul.mubr.msk.f32.gmra.mrb[46].mxu0 %vm6240_vm8, %v6153_v7  ;;  %v6165_v6 = vld [vmem:[#allocation5 + $0x1d8] sm:$0xff] }
 0x7e8   : > { %v13040_v61 = vpop.permute.xlu1 %5741  ;;  %5831 = vst.msk [vmem:[#allocation5 + $0x230] sm:$0xff] %vm5783_vm3, %v12938_v14  ;;  %5749 = vrot.lane.b32.xlu0 %v5654_v33, %s9084_s21  ;;  %6516 = vmatmul.mubr.f32.gmra.mrb[44].mxu1 %v6172_v59 }
 0x7e9   : > { %5840 = vst.msk [vmem:[#allocation5 + $0x298] sm:$0xff] %vm5785_vm14, %v13040_v61 }
 0x7ea   : > { %v4802_v62 = vpop.permute.xlu0 %4801 }
 0x7eb   : > { %4899 = vst.msk [vmem:[#allocation5 + $0x240] sm:$0xff] %vm4849_vm11, %v4802_v62  ;;  %v13052_v3 = vpop.f32.mrb[8].mxu1 }
 0x7ec   : > { %4900 = vst.msk [vmem:[#allocation5 + $0x248] sm:$0xff] %vm4851_vm12, %v4802_v62  ;;  %v13050_v39 = vpop.permute.xlu1 %5292  ;;  %5524 = vrot.lane.b32.xlu0 %v5429_v56, %s9083_s10  ;;  %v6429_v8 = vpop.f32.mrb[9].mxu1 }
 0x7ee   : > { %v5060_v14 = vpop.permute.xlu0 %5059 }
 0x7ef   : > { %5132 = vst.msk [vmem:[#allocation5 + $0x248] sm:$0xff] %vm5107_vm13, %v5060_v14  ;;  %v6176_v16 = vld [vmem:[#allocation5 + $0x230] sm:$0xff] }
 0x7f0   : > { %v13056_v29 = vpop.permute.xlu1 %5518  ;;  %5357 = vst.msk [vmem:[#allocation5 + $0x248] sm:$0xff] %vm5332_vm15, %v12949_v26  ;;  %4590 = vrot.lane.b32.xlu0 %v12853_v41, %s9079_s14  ;;  %6520 = vmatprep.mubr.f32.mxu1 %v6176_v16 }
 0x7f1   : > { %5583 = vst.msk [vmem:[#allocation5 + $0x248] sm:$0xff] %vm5558_vm1, %v12956_v47  ;;  %v13064_v11 = vpop.f32.mrb[10].mxu1  ;;  %6521 = vmatmul.mubr.f32.gmra.mrb[46].mxu1 %v6175_v57  ;;  %v6181_v57 = vld [vmem:[#allocation5 + $0x258] sm:$0xff] }
 0x7f2   : > { %v5978_v9 = vpop.permute.xlu0 %5977  ;;  %v6434_v18 = vpop.f32.mrb[11].mxu1  ;;  %v6178_v33 = vld [vmem:[#allocation5 + $0x240] sm:$0xff] }
 0x7f3   : > { %6058 = vst.msk [vmem:[#allocation5 + $0x190] sm:$0xff] %vm6041_vm7, %v5978_v9 }
 0x7f4   : > { %v4585_v55 = vpop.permute.xlu1 %4584 }
 0x7f5   : > { %4653 = vst.msk [vmem:[#allocation5 + $0x2a0] sm:$0xff] %vm4624_vm10, %v4585_v55 }
 0x7f6   : > { %v5980_v1 = vpop.permute.xlu0 %5979 }
 0x7f7   : > { %6059 = vst.msk [vmem:[#allocation5 + $0x1a8] sm:$0xff] %vm6041_vm7, %v5980_v1 }
 0x7f8   : > { %v13069_v26 = vpop.permute.xlu1 %5743 }
 0x7f9   : > { %5842 = vst.msk [vmem:[#allocation5 + $0x2b0] sm:$0xff] %vm5785_vm14, %v13069_v26 }
 0x7fa   : > { %v5736_v41 = vpop.permute.xlu0 %5735  ;;  %v6156_v47 = vld [vmem:[#allocation5 + $0x190] sm:$0xff] }
 0x7fb   : > { %5833 = vst.msk [vmem:[#allocation5 + $0x248] sm:$0xff] %vm5783_vm3, %v5736_v41  ;;  %8381 = vmatprep.mubr.msk.f32.mxu0 %vm6240_vm8, %v6156_v47 }
 0x7fc   : > { %5834 = vst.msk [vmem:[#allocation5 + $0x250] sm:$0xff] %vm5785_vm14, %v5736_v41  ;;  %v13075_v25 = vpop.permute.xlu1 %5294 }
 0x7fe   : > { %v5287_v42 = vpop.permute.xlu0 %5286  ;;  %v6159_v23 = vld [vmem:[#allocation5 + $0x1a8] sm:$0xff] }
 0x7ff   : > { %5358 = vst.msk [vmem:[#allocation5 + $0x260] sm:$0xff] %vm5332_vm15, %v5287_v42  ;;  %8382 = vmatmul.mubr.msk.f32.gmra.mrb[48].mxu0 %vm6240_vm8, %v6159_v23  ;;  %v13082_v34 = vpop.f32.mrb[12].mxu1 }
 0x800   : > { %v13079_v28 = vpop.permute.xlu1 %5520  ;;  %8384 = vmatprep.mubr.msk.f32.mxu0 %vm6240_vm8, %v6162_v35  ;;  %v6439_v36 = vpop.f32.mrb[13].mxu1 }
 0x802   : > { %v5513_v52 = vpop.permute.xlu0 %5512  ;;  %v6179_v30 = vld [vmem:[#allocation5 + $0x248] sm:$0xff] }
 0x803   : > { %5584 = vst.msk [vmem:[#allocation5 + $0x260] sm:$0xff] %vm5558_vm1, %v5513_v52  ;;  %6525 = vmatprep.mubr.f32.mxu1 %v6179_v30  ;;  %8385 = vmatmul.mubr.msk.f32.gmra.mrb[50].mxu0 %vm6240_vm8, %v6165_v6  ;;  %v6174_v6 = vld [vmem:[#allocation5 + $0x220] sm:$0xff] }
 0x804   : > { %v4587_v7 = vpop.permute.xlu1 %4586  ;;  %5835 = vst.msk [vmem:[#allocation5 + $0x260] sm:$0xff] %vm5783_vm3, %v12990_v2  ;;  %6526 = vmatmul.mubr.f32.gmra.mrb[48].mxu1 %v6178_v33 }
 0x805   : > { %4654 = vst.msk [vmem:[#allocation5 + $0x2b8] sm:$0xff] %vm4624_vm10, %v4587_v7  ;;  %v13090_v59 = vpop.f32.mrb[14].mxu1 }
 0x806   : > { %v4806_v62 = vpop.permute.xlu0 %4805  ;;  %v6444_v56 = vpop.f32.mrb[15].mxu1 }
 0x807   : > { %4903 = vst.msk [vmem:[#allocation5 + $0x270] sm:$0xff] %vm4849_vm11, %v4806_v62 }
 0x808   : > { %4904 = vst.msk [vmem:[#allocation5 + $0x278] sm:$0xff] %vm4851_vm12, %v4806_v62  ;;  %v13094_v8 = vpop.permute.xlu1 %5745  ;;  %v6177_v62 = vld [vmem:[#allocation5 + $0x238] sm:$0xff] }
 0x809   : > { %5844 = vst.msk [vmem:[#allocation5 + $0x2c8] sm:$0xff] %vm5785_vm14, %v13094_v8 }
 0x80a   : > { %v5064_v14 = vpop.permute.xlu0 %5063 }
 0x80b   : > { %5134 = vst.msk [vmem:[#allocation5 + $0x278] sm:$0xff] %vm5107_vm13, %v5064_v14  ;;  %v6182_v16 = vld [vmem:[#allocation5 + $0x260] sm:$0xff] }
 0x80c   : > { %v13099_v2 = vpop.permute.xlu1 %5296  ;;  %5359 = vst.msk [vmem:[#allocation5 + $0x278] sm:$0xff] %vm5332_vm15, %v13001_v10  ;;  %6530 = vmatprep.mubr.f32.mxu1 %v6182_v16 }
 0x80d   : > { %5585 = vst.msk [vmem:[#allocation5 + $0x278] sm:$0xff] %vm5558_vm1, %v13006_v32  ;;  %6531 = vmatmul.mubr.f32.gmra.mrb[50].mxu1 %v6181_v57 }
 0x80e   : > { %v5986_v9 = vpop.permute.xlu0 %5985  ;;  %v6184_v14 = vld [vmem:[#allocation5 + $0x270] sm:$0xff] }
 0x80f   : > { %6062 = vst.msk [vmem:[#allocation5 + $0x1f0] sm:$0xff] %vm6041_vm7, %v5986_v9 }
 0x810   : > { %v13106_v18 = vpop.permute.xlu1 %5522 }
 0x812   : > { %v5988_v55 = vpop.permute.xlu0 %5987 }
 0x813   : > { %6063 = vst.msk [vmem:[#allocation5 + $0x208] sm:$0xff] %vm6041_vm7, %v5988_v55  ;;  %v13110_v41 = vpop.f32.mrb[16].mxu1 }
 0x814   : > { %v4589_v1 = vpop.permute.xlu1 %4588  ;;  %v6449_v10 = vpop.f32.mrb[17].mxu1 }
 0x815   : > { %4655 = vst.msk [vmem:[#allocation5 + $0x2d0] sm:$0xff] %vm4624_vm10, %v4589_v1  ;;  %v6187_v1 = vld [vmem:[#allocation5 + $0x288] sm:$0xff] }
 0x816   : > { %v5740_v47 = vpop.permute.xlu0 %5739  ;;  %v6168_v42 = vld [vmem:[#allocation5 + $0x1f0] sm:$0xff] }
 0x817   : > { %5837 = vst.msk [vmem:[#allocation5 + $0x278] sm:$0xff] %vm5783_vm3, %v5740_v47  ;;  %8387 = vmatprep.mubr.msk.f32.mxu0 %vm6240_vm8, %v6168_v42 }
 0x818   : > { %5838 = vst.msk [vmem:[#allocation5 + $0x280] sm:$0xff] %vm5785_vm14, %v5740_v47  ;;  %v13114_v32 = vpop.permute.xlu1 %5747 }
 0x819   : > { %5846 = vst.msk [vmem:[#allocation5 + $0x2e0] sm:$0xff] %vm5785_vm14, %v13114_v32  ;;  %v13119_v23 = vpop.f32.mrb[18].mxu1 }
 0x81a   : > { %v5291_v35 = vpop.permute.xlu0 %5290  ;;  %v6454_v36 = vpop.f32.mrb[19].mxu1  ;;  %v6171_v52 = vld [vmem:[#allocation5 + $0x208] sm:$0xff] }
 0x81b   : > { %5360 = vst.msk [vmem:[#allocation5 + $0x290] sm:$0xff] %vm5332_vm15, %v5291_v35  ;;  %8388 = vmatmul.mubr.msk.f32.gmra.mrb[52].mxu0 %vm6240_vm8, %v6171_v52 }
 0x81c   : > { %v13122_v30 = vpop.permute.xlu1 %5298  ;;  %8390 = vmatprep.mubr.msk.f32.mxu0 %vm6240_vm8, %v6174_v6 }
 0x81e   : > { %v5517_v7 = vpop.permute.xlu0 %5516  ;;  %v6185_v33 = vld [vmem:[#allocation5 + $0x278] sm:$0xff] }
 0x81f   : > { %5586 = vst.msk [vmem:[#allocation5 + $0x290] sm:$0xff] %vm5558_vm1, %v5517_v7  ;;  %6535 = vmatprep.mubr.f32.mxu1 %v6185_v33  ;;  %8391 = vmatmul.mubr.msk.f32.gmra.mrb[54].mxu0 %vm6240_vm8, %v6177_v62 }
 0x820   : > { %v6006_v56 = vpop.permute.xlu1 %6005  ;;  %5839 = vst.msk [vmem:[#allocation5 + $0x290] sm:$0xff] %vm5783_vm3, %v13040_v61  ;;  %6536 = vmatmul.mubr.f32.gmra.mrb[52].mxu1 %v6184_v14 }
 0x821   : > { %6072 = vst.msk [vmem:[#allocation5 + $0x2e0] sm:$0xff] %vm6041_vm7, %v6006_v56 }
 0x822   : > { %v4810_v16 = vpop.permute.xlu0 %4809 }
 0x823   : > { %4907 = vst.msk [vmem:[#allocation5 + $0x2a0] sm:$0xff] %vm4849_vm11, %v4810_v16 }
 0x824   : > { %4908 = vst.msk [vmem:[#allocation5 + $0x2a8] sm:$0xff] %vm4851_vm12, %v4810_v16 }
 0x826   : > { %v5068_v57 = vpop.permute.xlu0 %5067 }
 0x827   : > { %5136 = vst.msk [vmem:[#allocation5 + $0x2a8] sm:$0xff] %vm5107_vm13, %v5068_v57  ;;  %v6188_v9 = vld [vmem:[#allocation5 + $0x290] sm:$0xff]  ;;  %v13136_v55 = vpop.f32.mrb[20].mxu1 }
 0x828   : > { %5361 = vst.msk [vmem:[#allocation5 + $0x2a8] sm:$0xff] %vm5332_vm15, %v13050_v39  ;;  %6540 = vmatprep.mubr.f32.mxu1 %v6188_v9  ;;  %v6459_v61 = vpop.f32.mrb[21].mxu1 }
 0x829   : > { %5587 = vst.msk [vmem:[#allocation5 + $0x2a8] sm:$0xff] %vm5558_vm1, %v13056_v29  ;;  %6541 = vmatmul.mubr.f32.gmra.mrb[54].mxu1 %v6187_v1 }
 0x82a   : > { %5841 = vst.msk [vmem:[#allocation5 + $0x2a8] sm:$0xff] %vm5783_vm3, %v13069_v26  ;;  %v5994_v10 = vpop.permute.xlu0 %5993  ;;  %v6190_v52 = vld [vmem:[#allocation5 + $0x2a0] sm:$0xff] }
 0x82b   : > { %6066 = vst.msk [vmem:[#allocation5 + $0x250] sm:$0xff] %vm6041_vm7, %v5994_v10 }
 0x82e   : > { %v13143_v47 = vpop.f32.mrb[22].mxu1  ;;  %v5996_v42 = vpop.permute.xlu0 %5995 }
 0x82f   : > { %v6464_v35 = vpop.f32.mrb[23].mxu1  ;;  %6067 = vst.msk [vmem:[#allocation5 + $0x268] sm:$0xff] %vm6041_vm7, %v5996_v42 }
 0x831   : > { %v6191_v39 = vld [vmem:[#allocation5 + $0x2a8] sm:$0xff] }
 0x832   : > { %v4812_v36 = vpop.permute.xlu0 %4811  ;;  %6545 = vmatprep.mubr.f32.mxu1 %v6191_v39  ;;  %v6180_v6 = vld [vmem:[#allocation5 + $0x250] sm:$0xff] }
 0x833   : > { %4909 = vst.msk [vmem:[#allocation5 + $0x2b8] sm:$0xff] %vm4849_vm11, %v4812_v36  ;;  %6546 = vmatmul.mubr.f32.gmra.mrb[56].mxu1 %v6190_v52  ;;  %8393 = vmatprep.mubr.msk.f32.mxu0 %vm6240_vm8, %v6180_v6 }
 0x834   : > { %4910 = vst.msk [vmem:[#allocation5 + $0x2c0] sm:$0xff] %vm4851_vm12, %v4812_v36 }
 0x836   : > { %v5070_v29 = vpop.permute.xlu0 %5069  ;;  %v6183_v26 = vld [vmem:[#allocation5 + $0x268] sm:$0xff] }
 0x837   : > { %5137 = vst.msk [vmem:[#allocation5 + $0x2c0] sm:$0xff] %vm5107_vm13, %v5070_v29  ;;  %8394 = vmatmul.mubr.msk.f32.gmra.mrb[56].mxu0 %vm6240_vm8, %v6183_v26 }
 0x838   : > { %5362 = vst.msk [vmem:[#allocation5 + $0x2c0] sm:$0xff] %vm5332_vm15, %v13075_v25 }
 0x839   : > { %5588 = vst.msk [vmem:[#allocation5 + $0x2c0] sm:$0xff] %vm5558_vm1, %v13079_v28 }
 0x83a   : > { %5843 = vst.msk [vmem:[#allocation5 + $0x2c0] sm:$0xff] %vm5783_vm3, %v13094_v8  ;;  %v5998_v7 = vpop.permute.xlu0 %5997  ;;  %v6193_v9 = vld [vmem:[#allocation5 + $0x2b8] sm:$0xff] }
 0x83b   : > { %6068 = vst.msk [vmem:[#allocation5 + $0x280] sm:$0xff] %vm6041_vm7, %v5998_v7  ;;  %v13158_v33 = vpop.f32.mrb[24].mxu1 }
 0x83c   : > { %v6469_v62 = vpop.f32.mrb[25].mxu1 }
 0x83d   : > { %v6008_v62 = vpop.permute.xlu1 %6007 }
 0x83e   : > { %v6000_v56 = vpop.permute.xlu0 %5999 }
 0x83f   : > { %6069 = vst.msk [vmem:[#allocation5 + $0x298] sm:$0xff] %vm6041_vm7, %v6000_v56 }
 0x841   : > { %v13161_v14 = vpop.f32.mrb[26].mxu1  ;;  %v6194_v16 = vld [vmem:[#allocation5 + $0x2c0] sm:$0xff] }
 0x842   : > { %v4814_v57 = vpop.permute.xlu0 %4813  ;;  %v6474_v25 = vpop.f32.mrb[27].mxu1  ;;  %6550 = vmatprep.mubr.f32.mxu1 %v6194_v16  ;;  %v6186_v28 = vld [vmem:[#allocation5 + $0x280] sm:$0xff] }
 0x843   : > { %4911 = vst.msk [vmem:[#allocation5 + $0x2d0] sm:$0xff] %vm4849_vm11, %v4814_v57  ;;  %6551 = vmatmul.mubr.f32.gmra.mrb[58].mxu1 %v6193_v9  ;;  %8396 = vmatprep.mubr.msk.f32.mxu0 %vm6240_vm8, %v6186_v28 }
 0x844   : > { %4912 = vst.msk [vmem:[#allocation5 + $0x2d8] sm:$0xff] %vm4851_vm12, %v4814_v57 }
 0x846   : > { %v5072_v8 = vpop.permute.xlu0 %5071  ;;  %v6189_v1 = vld [vmem:[#allocation5 + $0x298] sm:$0xff] }
 0x847   : > { %5138 = vst.msk [vmem:[#allocation5 + $0x2d8] sm:$0xff] %vm5107_vm13, %v5072_v8  ;;  %8397 = vmatmul.mubr.msk.f32.gmra.mrb[58].mxu0 %vm6240_vm8, %v6189_v1 }
 0x848   : > { %5363 = vst.msk [vmem:[#allocation5 + $0x2d8] sm:$0xff] %vm5332_vm15, %v13099_v2 }
 0x849   : > { %5589 = vst.msk [vmem:[#allocation5 + $0x2d8] sm:$0xff] %vm5558_vm1, %v13106_v18 }
 0x84a   : > { %5845 = vst.msk [vmem:[#allocation5 + $0x2d8] sm:$0xff] %vm5783_vm3, %v13114_v32  ;;  %v6002_v61 = vpop.permute.xlu0 %6001  ;;  %v6196_v52 = vld [vmem:[#allocation5 + $0x2d0] sm:$0xff]  ;;  %v6198_v32 = vld [vmem:[#allocation5 + $0x2e0] sm:$0xff] }
 0x84b   : > { %6070 = vst.msk [vmem:[#allocation5 + $0x2b0] sm:$0xff] %vm6041_vm7, %v6002_v61 }
 0x84e   : > { %v6004_v10 = vpop.permute.xlu0 %6003 }
 0x84f   : > { %6071 = vst.msk [vmem:[#allocation5 + $0x2c8] sm:$0xff] %vm6041_vm7, %v6004_v10  ;;  %v13176_v42 = vpop.f32.mrb[28].mxu1 }
 0x850   : > { %v6479_v35 = vpop.f32.mrb[29].mxu1 }
 0x851   : > { %v6197_v39 = vld [vmem:[#allocation5 + $0x2d8] sm:$0xff] }
 0x852   : > { %v4816_v36 = vpop.permute.xlu0 %4815  ;;  %6555 = vmatprep.mubr.f32.mxu1 %v6197_v39  ;;  %v6192_v2 = vld [vmem:[#allocation5 + $0x2b0] sm:$0xff] }
 0x853   : > { %4914 = vst.msk [vmem:[#allocation5 + $0x2f0] sm:$0xff] %vm4851_vm12, %v4816_v36  ;;  %6556 = vmatmul.mubr.f32.gmra.mrb[60].mxu1 %v6196_v52  ;;  %8399 = vmatprep.mubr.msk.f32.mxu0 %vm6240_vm8, %v6192_v2 }
 0x856   : > { %v13180_v18 = vpop.f32.mrb[30].mxu1  ;;  %v5074_v6 = vpop.permute.xlu0 %5073  ;;  %v6195_v26 = vld [vmem:[#allocation5 + $0x2c8] sm:$0xff] }
 0x857   : > { %v6484_v29 = vpop.f32.mrb[31].mxu1  ;;  %5139 = vst.msk [vmem:[#allocation5 + $0x2f0] sm:$0xff] %vm5107_vm13, %v5074_v6  ;;  %8400 = vmatmul.mubr.msk.f32.gmra.mrb[60].mxu0 %vm6240_vm8, %v6195_v26 }
 0x858   : > { %5364 = vst.msk [vmem:[#allocation5 + $0x2f0] sm:$0xff] %vm5332_vm15, %v13122_v30  ;;  %8402 = vmatprep.mubr.msk.f32.mxu0 %vm6240_vm8, %v6198_v32 }
 0x85a   : > { %v5750_v7 = vpop.permute.xlu0 %5749 }
 0x85b   : > { %5848 = vst.msk [vmem:[#allocation5 + $0x2f8] sm:$0xff] %vm5785_vm14, %v5750_v7 }
 0x85c   : > { %6073 = vst.msk [vmem:[#allocation5 + $0x2f8] sm:$0xff] %vm6041_vm7, %v6008_v62  ;;  %v13218_v62 = vld [vmem:[#allocation4 + $0x48] sm:$0xff] }
 0x85e   : > { %v5525_v56 = vpop.permute.xlu0 %5524 }
 0x85f   : > { %5590 = vst.msk [vmem:[#allocation5 + $0x2f0] sm:$0xff] %vm5558_vm1, %v5525_v56 }
 0x860   : > { %5847 = vst.msk [vmem:[#allocation5 + $0x2f0] sm:$0xff] %vm5783_vm3, %v5750_v7 }
 0x862   : > { %v4591_v16 = vpop.permute.xlu0 %4590  ;;  %v8359_v57 = vpop.f32.mrb[32].mxu0 }
 0x863   : > { %4656 = vst.msk [vmem:[#allocation5 + $0x2e8] sm:$0xff] %vm4624_vm10, %v4591_v16  ;;  %v13193_v25 = vadd.f32 %v8359_v57, %v12987_v0  ;;  %v6632_v30 = vpop.f32.mrb[33].mxu0  ;;  %v6201_v9 = vld [vmem:[#allocation5 + $0x2f8] sm:$0xff] }
 0x864   : > { %4913 = vst.msk [vmem:[#allocation5 + $0x2e8] sm:$0xff] %vm4849_vm11, %v4816_v36  ;;  %v13197_v28 = vadd.f32 %v6632_v30, %v12977_v43  ;;  %8403 = vmatmul.mubr.msk.f32.gmra.mrb[62].mxu0 %vm6240_vm8, %v6201_v9  ;;  %v13221_v30 = vpop.permute.xlu1 %7119  ;;  %v8949_v9 = vld [vmem:[#allocation4 + $0x49] sm:$0xff] }
 0x865   : > { %14572 = vst [vmem:[#allocation50_spill] sm:$0xff] %v13193_v25  ;;  %v6792_v8 = vadd.f32 1e-08, %v13193_v25 }
 0x866   : > { %v6791_v1 = vadd.f32 1e-08, %v13197_v28  ;;  %v8362_v61 = vpop.f32.mrb[34].mxu0 }
 0x867   : > { %8668 = vrcp.f32 %v6792_v8  ;;  %v13203_v10 = vadd.f32 %v8362_v61, %v13025_v60  ;;  %v6642_v0 = vpop.f32.mrb[35].mxu0  ;;  %v6200_v35 = vld [vmem:[#allocation5 + $0x2f0] sm:$0xff]  ;;  %v13205_v39 = vpop.f32.mrb[32].mxu1  ;;  %v14575_v60 = vmax.f32 %v11886_v15, %v11883_v48  ;;  %v14321_v8 = vmov 33  }
 0x868   : > { %8670 = vrcp.f32 %v6791_v1  ;;  %v13208_v36 = vadd.f32 %v6642_v0, %v13017_v44  ;;  %6560 = vmatprep.mubr.f32.mxu1 %v6200_v35  ;;  %v6489_v52 = vpop.f32.mrb[33].mxu1  ;;  %v13227_v1 = vld [vmem:[#allocation4 + $0x31] sm:$0xff]  ;;  %v14577_v61 = vmax.f32 %v11881_v20, %v11879_v45 }
 0x869   : > { %14573 = vst [vmem:[#allocation24_spill] sm:$0xff] %v13203_v10  ;;  %v6794_v43 = vadd.f32 1e-08, %v13203_v10  ;;  %v5591_v6 = vmax.f32 %v14575_v60, %v11705_v12  ;;  %v14580_v60 = vmov 32  }
 0x86a   : > { %14574 = vst [vmem:[#allocation51_spill] sm:$0xff] %v13208_v36  ;;  %v6793_v2 = vadd.f32 1e-08, %v13208_v36  ;;  %v4660_v0 = vmax.f32 %v14577_v61, %v13227_v1  ;;  %v13261_v61 = vld [vmem:[#allocation4 + $0x51] sm:$0xff] }
 0x86b   : > { %8672 = vrcp.f32 %v6794_v43  ;;  %v6199_v32 = vld [vmem:[#allocation5 + $0x2e8] sm:$0xff]  ;;  %v5849_v56 = vmax.f32 %v5591_v6, %v13218_v62 }
 0x86c   : > { %8674 = vrcp.f32 %v6793_v2  ;;  %6561 = vmatmul.mubr.f32.gmra.mrb[62].mxu1 %v6199_v32  ;;  %v4918_v2 = vmax.f32 %v4660_v0, %v11905_v50 }
 0x86d   : > { %v6074_v48 = vmax.f32 %v5849_v56, %v8949_v9  ;;  %v13257_v9 = vld [vmem:[#allocation4 + $0x49] sm:$0xff] }
 0x86f   : > { %v13224_v15 = vadd.f32 %v13221_v30, %v6074_v48 }
 0x870   : > { %v13216_v26 = vpop.f32.mrb[34].mxu1 }
 0x871   : > { %v8669_v29 = vpop.eup %8668  ;;  %v6494_v7 = vpop.f32.mrb[35].mxu1  ;;  %14576 = vst [vmem:[#allocation26_spill] sm:$0xff] %v13224_v15 }
 0x872   : > { %v8671_v44 = vpop.eup %8670  ;;  %6862 = vperm.xlu1 %8571, %v8669_v29   ;;  %v13249_v7 = vld [vmem:[#allocation4 + $0x50] sm:$0xff] }
 0x873   : > { %6857 = vperm.xlu0 %8570, %v8671_v44   ;;  %v5143_v56 = vmax.f32 %v4918_v2, %v13249_v7 }
 0x875   : > { %v8673_v16 = vpop.eup %8672  ;;  %v5368_v0 = vmax.f32 %v5143_v56, %v13261_v61 }
 0x876   : > { %v8675_v57 = vpop.eup %8674 }
 0x877   : > { %6872 = vperm.xlu0 %8570, %v8673_v16   ;;  %6867 = vperm.xlu1 %8571, %v8675_v57  }
 0x87b   : > { %8572 = vset.pattern.permute.xlu1 %v14321_v8 }
 0x87c   : > { %7156 = vperm.xlu1 %8572, %v13224_v15   ;;  %v13354_v15 = vld [vmem:[#allocation4 + $0xb1] sm:$0xff] }
 0x87e   : > { %v8365_v35 = vpop.f32.mrb[36].mxu0 }
 0x87f   : > { %v13235_v43 = vadd.f32 %v8365_v35, %v13064_v11  ;;  %v6652_v52 = vpop.f32.mrb[37].mxu0  ;;  %v4436_v11 = vmax.f32 %v11705_v12, %v13218_v62 }
 0x880   : > { %v13239_v32 = vadd.f32 %v6652_v52, %v13052_v3  ;;  %8573 = vset.pattern.permute.xlu1 %v14580_v60  ;;  %v5594_v52 = vmax.f32 %v5368_v0, %v11918_v49 }
 0x881   : > { %14578 = vst [vmem:[#allocation52_spill] sm:$0xff] %v13235_v43  ;;  %v6796_v45 = vadd.f32 1e-08, %v13235_v43 }
 0x882   : > { %14579 = vst [vmem:[#allocation28_spill] sm:$0xff] %v13239_v32  ;;  %v6795_v6 = vadd.f32 1e-08, %v13239_v32  ;;  %v8368_v29 = vpop.f32.mrb[38].mxu0 }
 0x883   : > { %v13245_v20 = vadd.f32 %v8368_v29, %v13090_v59  ;;  %v6662_v44 = vpop.f32.mrb[39].mxu0  ;;  %v13252_v3 = vpop.f32.mrb[36].mxu1  ;;  %v4661_v59 = vmax.f32 %v4436_v11, %v13257_v9  ;;  %v8954_v29 = vld [vmem:[#allocation4 + $0x68] sm:$0xff] }
 0x884   : > { %8676 = vrcp.f32 %v6795_v6  ;;  %v13255_v16 = vadd.f32 %v6662_v44, %v13082_v34  ;;  %v6499_v57 = vpop.f32.mrb[37].mxu1 }
 0x885   : > { %14581 = vst [vmem:[#allocation53_spill] sm:$0xff] %v13245_v20  ;;  %8678 = vrcp.f32 %v6796_v45  ;;  %v4919_v35 = vmax.f32 %v4661_v59, %v11715_v27  ;;  %v6798_v11 = vadd.f32 1e-08, %v13245_v20  ;;  %v13269_v57 = vld [vmem:[#allocation4 + $0x70] sm:$0xff]  ;;  %v14584_v20 = vmov 33  }
 0x886   : > { %14582 = vst [vmem:[#allocation30_spill] sm:$0xff] %v13255_v16  ;;  %v6797_v48 = vadd.f32 1e-08, %v13255_v16  ;;  %v5852_v45 = vmax.f32 %v5594_v52, %v13269_v57  ;;  %v4439_v0 = vmax.f32 %v11918_v49, %v13269_v57 }
 0x887   : > { %v5144_v44 = vmax.f32 %v4919_v35, %v8954_v29  ;;  %v13277_v35 = vld [vmem:[#allocation4 + $0x71] sm:$0xff] }
 0x888   : > { %8680 = vrcp.f32 %v6797_v48  ;;  %v13272_v48 = vld [vmem:[#allocation4 + $0x69] sm:$0xff] }
 0x889   : > { %v5369_v59 = vmax.f32 %v5144_v44, %v13272_v48  ;;  %8682 = vrcp.f32 %v6798_v11  ;;  %v4664_v44 = vmax.f32 %v4439_v0, %v13277_v35  ;;  %v8960_v0 = vld [vmem:[#allocation4 + $0x89] sm:$0xff] }
 0x88c   : > { %v13266_v2 = vpop.f32.mrb[38].mxu1 }
 0x88d   : > { %v6504_v34 = vpop.f32.mrb[39].mxu1 }
 0x88e   : > { %v8677_v6 = vpop.eup %8676  ;;  %v6077_v34 = vmax.f32 %v5852_v45, %v13277_v35 }
 0x88f   : > { %6877 = vperm.xlu1 %8573, %v8677_v6   ;;  %v8679_v8 = vpop.eup %8678  ;;  %v13280_v6 = vld [vmem:[#allocation4 + $0x87] sm:$0xff] }
 0x890   : > { %v5595_v52 = vmax.f32 %v5369_v59, %v13280_v6  ;;  %v13284_v29 = vadd.f32 %v13221_v30, %v6077_v34  ;;  %v4922_v59 = vmax.f32 %v4664_v44, %v11931_v38  ;;  %v13307_v44 = vld [vmem:[#allocation4 + $0x90] sm:$0xff] }
 0x892   : > { %v8681_v56 = vpop.eup %8680  ;;  %14583 = vst [vmem:[#allocation54_spill] sm:$0xff] %v13284_v29 }
 0x893   : > { %6887 = vperm.xlu0 %8570, %v8681_v56   ;;  %6882 = vperm.xlu1 %8573, %v8679_v8   ;;  %v13289_v8 = vld [vmem:[#allocation4 + $0x88] sm:$0xff]  ;;  %v8683_v43 = vpop.eup %8682 }
 0x894   : > { %v5853_v11 = vmax.f32 %v5595_v52, %v13289_v8 }
 0x896   : > { %v6078_v32 = vmax.f32 %v5853_v11, %v8960_v0  ;;  %v13317_v0 = vld [vmem:[#allocation4 + $0x89] sm:$0xff] }
 0x897   : > { %8574 = vset.pattern.permute.xlu1 %v14584_v20 }
 0x898   : > { %7171 = vperm.xlu1 %8574, %v13284_v29   ;;  %v13314_v11 = vadd.f32 %v13221_v30, %v6078_v32  ;;  %v13342_v29 = vld [vmem:[#allocation4 + $0xa9] sm:$0xff] }
 0x89a   : > { %v8371_v56 = vpop.f32.mrb[40].mxu0  ;;  %14589 = vst [vmem:[#allocation36_spill] sm:$0xff] %v13314_v11 }
 0x89b   : > { %v13293_v45 = vadd.f32 %v8371_v56, %v13119_v23  ;;  %v6672_v16 = vpop.f32.mrb[41].mxu0 }
 0x89c   : > { %v13297_v34 = vadd.f32 %v6672_v16, %v13110_v41  ;;  %8575 = vset.pattern.permute.xlu1 %v14580_v60  ;;  %v5147_v41 = vmax.f32 %v4922_v59, %v13307_v44 }
 0x89d   : > { %14585 = vst [vmem:[#allocation32_spill] sm:$0xff] %v13293_v45  ;;  %6892 = vperm.xlu1 %8575, %v8683_v43   ;;  %v6800_v52 = vadd.f32 1e-08, %v13293_v45 }
 0x89e   : > { %14586 = vst [vmem:[#allocation8_spill] sm:$0xff] %v13297_v34  ;;  %v6799_v10 = vadd.f32 1e-08, %v13297_v34  ;;  %v8374_v36 = vpop.f32.mrb[42].mxu0 }
 0x89f   : > { %v13303_v23 = vadd.f32 %v8374_v36, %v13143_v47  ;;  %v13305_v56 = vpop.f32.mrb[40].mxu1  ;;  %v6682_v25 = vpop.f32.mrb[43].mxu0  ;;  %v14590_v47 = vmax.f32 %v11725_v5, %v11723_v58 }
 0x8a0   : > { %8684 = vrcp.f32 %v6799_v10  ;;  %v13311_v43 = vadd.f32 %v6682_v25, %v13136_v55  ;;  %v6509_v16 = vpop.f32.mrb[41].mxu1  ;;  %v13325_v55 = vld [vmem:[#allocation4 + $0x91] sm:$0xff]  ;;  %v13328_v10 = vld [vmem:[#allocation4 + $0xa7] sm:$0xff] }
 0x8a1   : > { %14587 = vst [vmem:[#allocation34_spill] sm:$0xff] %v13303_v23  ;;  %8576 = vset.pattern.permute.xlu1 %v14584_v20  ;;  %v4665_v36 = vmax.f32 %v14590_v47, %v13317_v0  ;;  %8686 = vrcp.f32 %v6800_v52  ;;  %v5372_v25 = vmax.f32 %v5147_v41, %v13325_v55  ;;  %v13335_v47 = vld [vmem:[#allocation4 + $0xa8] sm:$0xff] }
 0x8a2   : > { %14588 = vst [vmem:[#allocation9_spill] sm:$0xff] %v13311_v43  ;;  %v6801_v45 = vadd.f32 1e-08, %v13311_v43  ;;  %7176 = vperm.xlu1 %8576, %v13314_v11   ;;  %14591 = vst [vmem:[#allocation55_spill] sm:$0xff] %v13335_v47  ;;  %v6802_v43 = vadd.f32 1e-08, %v13303_v23 }
 0x8a3   : > { %v4923_v32 = vmax.f32 %v4665_v36, %v13328_v10  ;;  %v5598_v59 = vmax.f32 %v5372_v25, %v11944_v22  ;;  %v13347_v23 = vld [vmem:[#allocation4 + $0xc7] sm:$0xff] }
 0x8a4   : > { %8688 = vrcp.f32 %v6801_v45  ;;  %v13339_v45 = vld [vmem:[#allocation4 + $0xb0] sm:$0xff] }
 0x8a5   : > { %v5148_v52 = vmax.f32 %v4923_v32, %v13335_v47  ;;  %v5856_v41 = vmax.f32 %v5598_v59, %v13339_v45  ;;  %8690 = vrcp.f32 %v6802_v43  ;;  %v8968_v32 = vld [vmem:[#allocation4 + $0xb1] sm:$0xff] }
 0x8a6   : > { %8577 = vset.pattern.permute.xlu1 %v14580_v60 }
 0x8a7   : > { %v5373_v25 = vmax.f32 %v5148_v52, %v13342_v29  ;;  %v6081_v11 = vmax.f32 %v5856_v41, %v8968_v32 }
 0x8a8   : > { %v13333_v58 = vpop.f32.mrb[42].mxu1 }
 0x8a9   : > { %v6514_v5 = vpop.f32.mrb[43].mxu1  ;;  %v13351_v59 = vadd.f32 %v13221_v30, %v6081_v11 }
 0x8aa   : > { %v8685_v16 = vpop.eup %8684  ;;  %v4443_v5 = vmax.f32 %v11944_v22, %v13339_v45 }
 0x8ab   : > { %6897 = vperm.xlu1 %8577, %v8685_v16   ;;  %v8687_v36 = vpop.eup %8686  ;;  %v5599_v16 = vmax.f32 %v5373_v25, %v13347_v23  ;;  %14592 = vst [vmem:[#allocation38_spill] sm:$0xff] %v13351_v59 }
 0x8ac   : > { %v4668_v43 = vmax.f32 %v4443_v5, %v13354_v15  ;;  %v8972_v5 = vld [vmem:[#allocation4 + $0xc9] sm:$0xff] }
 0x8ae   : > { %v8689_v34 = vpop.eup %8688  ;;  %v4926_v11 = vmax.f32 %v4668_v43, %v11957_v53  ;;  %v13376_v43 = vld [vmem:[#allocation4 + $0xd0] sm:$0xff] }
 0x8af   : > { %6907 = vperm.xlu0 %8570, %v8689_v34   ;;  %6902 = vperm.xlu1 %8577, %v8687_v36   ;;  %v13358_v34 = vld [vmem:[#allocation4 + $0xc8] sm:$0xff]  ;;  %v8691_v32 = vpop.eup %8690 }
 0x8b0   : > { %14593 = vst [vmem:[#allocation56_spill] sm:$0xff] %v13358_v34  ;;  %v5857_v52 = vmax.f32 %v5599_v16, %v13358_v34 }
 0x8b3   : > { %8578 = vset.pattern.permute.xlu1 %v14584_v20 }
 0x8b4   : > { %7191 = vperm.xlu1 %8578, %v13351_v59   ;;  %v6082_v59 = vmax.f32 %v5857_v52, %v8972_v5  ;;  %v13386_v5 = vld [vmem:[#allocation4 + $0xc9] sm:$0xff] }
 0x8b5   : > { %14599 = vst [vmem:[#allocation48_spill] sm:$0xff] %v13386_v5 }
 0x8b6   : > { %v8377_v41 = vpop.f32.mrb[44].mxu0 }
 0x8b7   : > { %v13362_v36 = vadd.f32 %v8377_v41, %v13161_v14  ;;  %v6692_v25 = vpop.f32.mrb[45].mxu0 }
 0x8b8   : > { %v13366_v37 = vadd.f32 %v6692_v25, %v13158_v33  ;;  %8579 = vset.pattern.permute.xlu1 %v14580_v60  ;;  %v5151_v33 = vmax.f32 %v4926_v11, %v13376_v43 }
 0x8b9   : > { %14594 = vst [vmem:[#allocation40_spill] sm:$0xff] %v13362_v36  ;;  %6912 = vperm.xlu1 %8579, %v8691_v32   ;;  %v6804_v16 = vadd.f32 1e-08, %v13362_v36  ;;  %v13383_v32 = vadd.f32 %v13221_v30, %v6082_v59  ;;  %v13397_v59 = vld [vmem:[#allocation4 + $0xe7] sm:$0xff] }
 0x8ba   : > { %14595 = vst [vmem:[#allocation57_spill] sm:$0xff] %v13366_v37  ;;  %v6803_v13 = vadd.f32 1e-08, %v13366_v37  ;;  %v8380_v47 = vpop.f32.mrb[46].mxu0  ;;  %14601 = vst [vmem:[#allocation33_spill] sm:$0xff] %v13397_v59 }
 0x8bb   : > { %v13372_v14 = vadd.f32 %v8380_v47, %v13180_v18  ;;  %v13374_v41 = vpop.f32.mrb[44].mxu1  ;;  %v6702_v34 = vpop.f32.mrb[47].mxu0  ;;  %14598 = vst [vmem:[#allocation46_spill] sm:$0xff] %v13383_v32  ;;  %v14600_v18 = vmax.f32 %v11749_v17, %v11747_v4 }
 0x8bc   : > { %8692 = vrcp.f32 %v6803_v13  ;;  %v13380_v25 = vadd.f32 %v6702_v34, %v13176_v42  ;;  %v6519_v52 = vpop.f32.mrb[45].mxu1  ;;  %v13394_v13 = vld [vmem:[#allocation4 + $0xd1] sm:$0xff] }
 0x8bd   : > { %14596 = vst [vmem:[#allocation42_spill] sm:$0xff] %v13372_v14  ;;  %8580 = vset.pattern.permute.xlu1 %v14584_v20  ;;  %v4669_v47 = vmax.f32 %v14600_v18, %v13386_v5  ;;  %8694 = vrcp.f32 %v6804_v16  ;;  %v5376_v42 = vmax.f32 %v5151_v33, %v13394_v13  ;;  %v13404_v18 = vld [vmem:[#allocation4 + $0xe8] sm:$0xff] }
 0x8be   : > { %14597 = vst [vmem:[#allocation44_spill] sm:$0xff] %v13380_v25  ;;  %v6805_v36 = vadd.f32 1e-08, %v13380_v25  ;;  %7196 = vperm.xlu1 %8580, %v13383_v32   ;;  %14602 = vst [vmem:[#allocation35_spill] sm:$0xff] %v13404_v18  ;;  %v6806_v25 = vadd.f32 1e-08, %v13372_v14 }
 0x8bf   : > { %v4927_v34 = vmax.f32 %v4669_v47, %v13397_v59  ;;  %v5602_v11 = vmax.f32 %v5376_v42, %v11970_v63  ;;  %v13411_v32 = vld [vmem:[#allocation4 + $0xe9] sm:$0xff]  ;;  %v13423_v59 = vld [vmem:[#allocation4 + $0xf1] sm:$0xff] }
 0x8c0   : > { %8696 = vrcp.f32 %v6805_v36  ;;  %v13408_v36 = vld [vmem:[#allocation4 + $0xf0] sm:$0xff]  ;;  %v13416_v14 = vld [vmem:[#allocation4 + $0x107] sm:$0xff]  ;;  %14605 = vst [vmem:[#allocation41_spill] sm:$0xff] %v13423_v59 }
 0x8c1   : > { %v5152_v16 = vmax.f32 %v4927_v34, %v13404_v18  ;;  %14603 = vst [vmem:[#allocation37_spill] sm:$0xff] %v13408_v36  ;;  %v5860_v33 = vmax.f32 %v5602_v11, %v13408_v36  ;;  %8698 = vrcp.f32 %v6806_v25  ;;  %v8980_v34 = vld [vmem:[#allocation4 + $0xf1] sm:$0xff] }
 0x8c2   : > { %8581 = vset.pattern.permute.xlu1 %v14580_v60 }
 0x8c3   : > { %v5377_v42 = vmax.f32 %v5152_v16, %v13411_v32  ;;  %v6085_v18 = vmax.f32 %v5860_v33, %v8980_v34 }
 0x8c4   : > { %v13402_v4 = vpop.f32.mrb[46].mxu1 }
 0x8c5   : > { %v6524_v17 = vpop.f32.mrb[47].mxu1  ;;  %v13420_v11 = vadd.f32 %v13221_v30, %v6085_v18 }
 0x8c6   : > { %v8693_v52 = vpop.eup %8692  ;;  %v4447_v17 = vmax.f32 %v11970_v63, %v13408_v36 }
 0x8c7   : > { %6917 = vperm.xlu1 %8581, %v8693_v52   ;;  %v8695_v47 = vpop.eup %8694  ;;  %v5603_v52 = vmax.f32 %v5377_v42, %v13416_v14  ;;  %14604 = vst [vmem:[#allocation39_spill] sm:$0xff] %v13420_v11 }
 0x8c8   : > { %v4672_v25 = vmax.f32 %v4447_v17, %v13423_v59  ;;  %v8984_v17 = vld [vmem:[#allocation4 + $0x109] sm:$0xff] }
 0x8ca   : > { %v8697_v37 = vpop.eup %8696  ;;  %v4930_v18 = vmax.f32 %v4672_v25, %v11983_v51  ;;  %v13445_v25 = vld [vmem:[#allocation4 + $0x110] sm:$0xff] }
 0x8cb   : > { %6927 = vperm.xlu0 %8570, %v8697_v37   ;;  %6922 = vperm.xlu1 %8581, %v8695_v47   ;;  %v13427_v37 = vld [vmem:[#allocation4 + $0x108] sm:$0xff]  ;;  %v8699_v34 = vpop.eup %8698 }
 0x8cc   : > { %14606 = vst [vmem:[#allocation43_spill] sm:$0xff] %v13427_v37  ;;  %v5861_v16 = vmax.f32 %v5603_v52, %v13427_v37 }
 0x8cf   : > { %8582 = vset.pattern.permute.xlu1 %v14584_v20 }
 0x8d0   : > { %7211 = vperm.xlu1 %8582, %v13420_v11   ;;  %v6086_v11 = vmax.f32 %v5861_v16, %v8984_v17  ;;  %v13455_v17 = vld [vmem:[#allocation4 + $0x109] sm:$0xff] }
 0x8d1   : > { %14612 = vst [vmem:[#allocation61_spill] sm:$0xff] %v13455_v17 }
 0x8d2   : > { %v8383_v33 = vpop.f32.mrb[48].mxu0 }
 0x8d3   : > { %v13431_v47 = vadd.f32 %v8383_v33, %v13216_v26  ;;  %v6712_v42 = vpop.f32.mrb[49].mxu0 }
 0x8d4   : > { %v13435_v5 = vadd.f32 %v6712_v42, %v13205_v39  ;;  %8583 = vset.pattern.permute.xlu1 %v14580_v60  ;;  %v5155_v39 = vmax.f32 %v4930_v18, %v13445_v25 }
 0x8d5   : > { %14607 = vst [vmem:[#allocation45_spill] sm:$0xff] %v13431_v47  ;;  %6932 = vperm.xlu1 %8583, %v8699_v34   ;;  %v6808_v52 = vadd.f32 1e-08, %v13431_v47  ;;  %v13452_v34 = vadd.f32 %v13221_v30, %v6086_v11  ;;  %v13466_v11 = vld [vmem:[#allocation4 + $0x127] sm:$0xff] }
 0x8d6   : > { %14608 = vst [vmem:[#allocation47_spill] sm:$0xff] %v13435_v5  ;;  %v6807_v59 = vadd.f32 1e-08, %v13435_v5  ;;  %v8386_v36 = vpop.f32.mrb[50].mxu0  ;;  %14615 = vst [vmem:[#allocation63_spill] sm:$0xff] %v13466_v11 }
 0x8d7   : > { %v13441_v26 = vadd.f32 %v8386_v36, %v13266_v2  ;;  %v13443_v33 = vpop.f32.mrb[48].mxu1  ;;  %v6722_v37 = vpop.f32.mrb[51].mxu0  ;;  %14611 = vst [vmem:[#allocation60_spill] sm:$0xff] %v13452_v34  ;;  %v14613_v2 = vmax.f32 %v11773_v24, %v11771_v31  ;;  %v7346_v24 = vld [vmem:[%s14220_s6] sm:$0xff] }
 0x8d8   : > { %8700 = vrcp.f32 %v6807_v59  ;;  %v13449_v42 = vadd.f32 %v6722_v37, %v13252_v3  ;;  %v6529_v16 = vpop.f32.mrb[49].mxu1  ;;  %v13463_v3 = vld [vmem:[#allocation4 + $0x111] sm:$0xff] }
 0x8d9   : > { %14609 = vst [vmem:[#allocation58_spill] sm:$0xff] %v13441_v26  ;;  %8584 = vset.pattern.permute.xlu1 %v14584_v20  ;;  %v4673_v36 = vmax.f32 %v14613_v2, %v13455_v17  ;;  %8702 = vrcp.f32 %v6808_v52  ;;  %14614 = vst [vmem:[#allocation62_spill] sm:$0xff] %v13463_v3  ;;  %v5380_v59 = vmax.f32 %v5155_v39, %v13463_v3  ;;  %v7347_v52 = vld [vmem:[%s14220_s6 + $0x8] sm:$0xff] }
 0x8da   : > { %14610 = vst [vmem:[#allocation59_spill] sm:$0xff] %v13449_v42  ;;  %v6809_v47 = vadd.f32 1e-08, %v13449_v42  ;;  %7216 = vperm.xlu1 %8584, %v13452_v34   ;;  %v13479_v2 = vld [vmem:[#allocation4 + $0x128] sm:$0xff]  ;;  %v6810_v42 = vadd.f32 1e-08, %v13441_v26 }
 0x8db   : > { %v4931_v37 = vmax.f32 %v4673_v36, %v13466_v11  ;;  %v5606_v18 = vmax.f32 %v5380_v59, %v11996_v40  ;;  %14616 = vst [vmem:[#allocation64_spill] sm:$0xff] %v13479_v2  ;;  %v8990_v59 = vld [vmem:[#allocation4 + $0x130] sm:$0xff] }
 0x8dc   : > { %8704 = vrcp.f32 %v6809_v47  ;;  %v8527_v47 = vpack.c.bf16 %v7347_v52, %v7346_v24  ;;  %v13483_v11 = vld [vmem:[#allocation4 + $0x129] sm:$0xff]  ;;  %v4451_v24 = vmax.f32 %v11996_v40, %v8990_v59  ;;  %v13487_v52 = vld [vmem:[#allocation4 + $0x131] sm:$0xff] }
 0x8dd   : > { %v5156_v36 = vmax.f32 %v4931_v37, %v13479_v2  ;;  %v5864_v5 = vmax.f32 %v5606_v18, %v8990_v59  ;;  %8706 = vrcp.f32 %v6810_v42  ;;  %14617 = vst [vmem:[#allocation65_spill] sm:$0xff] %v13487_v52  ;;  %v8996_v40 = vld [vmem:[#allocation4 + $0x29] sm:$0xff] }
 0x8de   : > { %8585 = vset.pattern.permute.xlu1 %v14580_v60  ;;  %8528 = vmatprep.subr.bf16.mxu0 %v8527_v47  ;;  %v13499_v59 = vld [vmem:[#allocation4 + $0x148] sm:$0xff] }
 0x8df   : > { %8530 = vmatpush3.bf16.msra.mxu0 %v8527_v47  ;;  %v5381_v17 = vmax.f32 %v5156_v36, %v13483_v11  ;;  %v6089_v37 = vmax.f32 %v5864_v5, %v13487_v52 }
 0x8e0   : > { %v13471_v31 = vpop.f32.mrb[50].mxu1 }
 0x8e1   : > { %v6534_v39 = vpop.f32.mrb[51].mxu1  ;;  %v13494_v47 = vadd.f32 %v13221_v30, %v6089_v37 }
 0x8e2   : > { %v8701_v16 = vpop.eup %8700  ;;  %v13490_v39 = vld [vmem:[#allocation4 + $0x147] sm:$0xff] }
 0x8e3   : > { %6937 = vperm.xlu1 %8585, %v8701_v16   ;;  %v8703_v34 = vpop.eup %8702  ;;  %v5607_v18 = vmax.f32 %v5381_v17, %v13490_v39  ;;  %14618 = vst [vmem:[#allocation66_spill] sm:$0xff] %v13494_v47  ;;  %v8994_v16 = vld [vmem:[#allocation4 + $0x28] sm:$0xff]  ;;  %v4437_v17 = vmax.f32 %v11905_v50, %v13249_v7 }
 0x8e4   : > { %v4434_v42 = vmax.f32 %v11695_v21, %v8994_v16  ;;  %v13507_v21 = vld [vmem:[#allocation4 + $0x14f] sm:$0xff] }
 0x8e5   : > { %v5865_v5 = vmax.f32 %v5607_v18, %v13499_v59  ;;  %14620 = vst [vmem:[#allocation68_spill] sm:$0xff] %v13507_v21 }
 0x8e6   : > { %v8705_v3 = vpop.eup %8704  ;;  %v4659_v36 = vmax.f32 %v4434_v42, %v8996_v40  ;;  %v13516_v42 = vld [vmem:[#allocation4 + $0x68] sm:$0xff] }
 0x8e7   : > { %6947 = vperm.xlu0 %8570, %v8705_v3   ;;  %6942 = vperm.xlu1 %8585, %v8703_v34   ;;  %v8995_v3 = vld [vmem:[#allocation4 + $0x131] sm:$0xff]  ;;  %v8707_v52 = vpop.eup %8706 }
 0x8e8   : > { %v4676_v34 = vmax.f32 %v4451_v24, %v8995_v3  ;;  %v13521_v3 = vld [vmem:[#allocation4 + $0x149] sm:$0xff] }
 0x8e9   : > { %14623 = vst [vmem:[#allocation71_spill] sm:$0xff] %v13521_v3  ;;  %v6090_v40 = vmax.f32 %v5865_v5, %v13521_v3 }
 0x8ea   : > { %v4934_v24 = vmax.f32 %v4676_v34, %v13507_v21 }
 0x8eb   : > { %8586 = vset.pattern.permute.xlu1 %v14584_v20 }
 0x8ec   : > { %7231 = vperm.xlu1 %8586, %v13494_v47   ;;  %v4662_v47 = vmax.f32 %v4437_v17, %v13261_v61 }
 0x8ee   : > { %v8389_v26 = vpop.f32.mrb[52].mxu0 }
 0x8ef   : > { %v13505_v37 = vadd.f32 %v8389_v26, %v13333_v58  ;;  %v6732_v2 = vpop.f32.mrb[53].mxu0  ;;  %v4438_v58 = vmax.f32 %v11715_v27, %v13516_v42  ;;  %v4917_v26 = vmax.f32 %v4659_v36, %v11705_v12 }
 0x8f0   : > { %v13511_v16 = vadd.f32 %v6732_v2, %v13305_v56  ;;  %8587 = vset.pattern.permute.xlu1 %v14580_v60 }
 0x8f1   : > { %14619 = vst [vmem:[#allocation67_spill] sm:$0xff] %v13505_v37  ;;  %6952 = vperm.xlu1 %8587, %v8707_v52   ;;  %v13514_v18 = vpop.permute.xlu1 %6862  ;;  %v6812_v52 = vadd.f32 1e-08, %v13505_v37  ;;  %v13545_v37 = vadd.f32 %v13221_v30, %v6090_v40  ;;  %v4920_v40 = vmax.f32 %v4662_v47, %v11918_v49 }
 0x8f2   : > { %14621 = vst [vmem:[#allocation69_spill] sm:$0xff] %v13511_v16  ;;  %14622 = vst [vmem:[#allocation70_spill] sm:$0xff] %v13514_v18  ;;  %v6811_v34 = vadd.f32 1e-08, %v13511_v16  ;;  %v6858_v56 = vpop.permute.xlu0 %6857  ;;  %v8392_v2 = vpop.f32.mrb[54].mxu0  ;;  %v13538_v16 = vld [vmem:[#allocation4 + $0x150] sm:$0xff] }
 0x8f3   : > { %v13530_v18 = vld [vmem:[%s14219_s5] ss:$0 sm:$0xff]  ;;  %v7015_v21 = vmul.f32 %v6858_v56, %v13197_v28  ;;  %v13534_v12 = vadd.f32 %v8392_v2, %v13402_v4  ;;  %v13536_v36 = vpop.f32.mrb[52].mxu1  ;;  %v6742_v5 = vpop.f32.mrb[55].mxu0  ;;  %v5159_v3 = vmax.f32 %v4934_v24, %v13538_v16  ;;  %v4663_v28 = vmax.f32 %v4438_v58, %v13272_v48  ;;  %v13560_v58 = vld [vmem:[#allocation4 + $0x151] sm:$0xff] }
 0x8f4   : > { %8708 = vrcp.f32 %v6811_v34  ;;  %v13542_v61 = vadd.f32 %v6742_v5, %v13374_v41  ;;  %v6539_v17 = vpop.f32.mrb[53].mxu1  ;;  %v4441_v4 = vmax.f32 %v11931_v38, %v13307_v44  ;;  %v5366_v41 = vmax.f32 %v11901_v19, %v13227_v1 }
 0x8f5   : > { %8588 = vset.pattern.permute.xlu1 %v14584_v20  ;;  %v7054_v56 = vadd.f32 %v13530_v18, %v7015_v21  ;;  %8710 = vrcp.f32 %v6812_v52  ;;  %v5142_v48 = vmax.f32 %v4917_v26, %v13218_v62  ;;  %v5384_v34 = vmax.f32 %v5159_v3, %v13560_v58  ;;  %v13565_v17 = vld [vmem:[#allocation4 + $0x167] sm:$0xff]  ;;  %v13573_v26 = vld [vmem:[#allocation4 + $0x16f] sm:$0xff] }
 0x8f6   : > { %14624 = vst [vmem:[#allocation72_spill] sm:$0xff] %v13542_v61  ;;  %v6813_v2 = vadd.f32 1e-08, %v13542_v61  ;;  %7236 = vperm.xlu1 %8588, %v13545_v37   ;;  %v13554_v24 = vpop.permute.xlu1 %6867  ;;  %v4921_v21 = vmax.f32 %v4663_v28, %v13280_v6  ;;  %v4666_v5 = vmax.f32 %v4441_v4, %v13325_v55  ;;  %v4935_v61 = vmax.f32 %v12012_v46, %v13565_v17 }
 0x8f7   : > { %v7086_v19 = vmax.f32 %v7054_v56, 0.0  ;;  %v5592_v49 = vmax.f32 %v5366_v41, %v11905_v50  ;;  %v5145_v1 = vmax.f32 %v4920_v40, %v13269_v57  ;;  %v5367_v47 = vmax.f32 %v5142_v48, %v13257_v9  ;;  %v13580_v56 = vld [vmem:[#allocation4 + $0x168] sm:$0xff]  ;;  %v14625_v9 = vld [vmem:[#allocation10_spill] sm:$0xff] }
 0x8f8   : > { %8712 = vrcp.f32 %v6813_v2  ;;  %v5610_v6 = vmax.f32 %v5384_v34, %v13573_v26  ;;  %v5146_v52 = vmax.f32 %v4921_v21, %v13289_v8  ;;  %v4924_v4 = vmax.f32 %v4666_v5, %v11944_v22 }
 0x8f9   : > { %v5160_v50 = vmax.f32 %v4935_v61, %v13580_v56  ;;  %v6814_v57 = vadd.f32 1e-08, %v13534_v12  ;;  %v14626_v2 = vmax.f32 %v11737_v54, %v14625_v9  ;;  %v4445_v8 = vmax.f32 %v11957_v53, %v13376_v43  ;;  %v13594_v61 = vld [vmem:[#allocation4 + $0x170] sm:$0xff] }
 0x8fa   : > { %8589 = vset.pattern.permute.xlu1 %v14580_v60  ;;  %v5593_v40 = vmax.f32 %v5367_v47, %v11715_v27  ;;  %v5370_v22 = vmax.f32 %v5145_v1, %v13277_v35  ;;  %v5850_v48 = vmax.f32 %v5592_v49, %v13249_v7  ;;  %v5868_v34 = vmax.f32 %v5610_v6, %v13594_v61  ;;  %v7348_v54 = vld [vmem:[%s14220_s6 + $0x10] sm:$0xff] }
 0x8fb   : > { %v7157_v62 = vpop.permute.xlu1 %7156  ;;  %v4667_v41 = vmax.f32 %v14626_v2, %v13342_v29  ;;  %v5371_v5 = vmax.f32 %v5146_v52, %v13317_v0  ;;  %v7349_v29 = vld [vmem:[%s14220_s6 + $0x18] sm:$0xff]  ;;  %v5149_v35 = vmax.f32 %v4924_v4, %v13339_v45  ;;  %8714 = vrcp.f32 %v6814_v57 }
 0x8fc   : > { %v7314_v55 = vmul.f32 %v7157_v62, %v7086_v19  ;;  %v13576_v3 = vpop.f32.mrb[54].mxu1  ;;  %v13605_v19 = vld [vmem:[#allocation4 + $0x169] sm:$0xff]  ;;  %v8531_v49 = vpack.c.bf16 %v7349_v29, %v7348_v54  ;;  %v4670_v62 = vmax.f32 %v4445_v8, %v13394_v13  ;;  %v5851_v1 = vmax.f32 %v5593_v40, %v13516_v42  ;;  %v9008_v6 = vld [vmem:[#allocation4 + $0x51] sm:$0xff] }
 0x8fd   : > { %v6544_v46 = vpop.f32.mrb[55].mxu1  ;;  %v5385_v7 = vmax.f32 %v5160_v50, %v13605_v19  ;;  %v4925_v0 = vmax.f32 %v4667_v41, %v13347_v23  ;;  %v5596_v47 = vmax.f32 %v5370_v22, %v11931_v38  ;;  %v13612_v52 = vld [vmem:[#allocation4 + $0x171] sm:$0xff]  ;;  %v5597_v23 = vmax.f32 %v5371_v5, %v13328_v10  ;;  %v13621_v42 = vld [vmem:[#allocation4 + $0x187] sm:$0xff] }
 0x8fe   : > { %v8709_v28 = vpop.eup %8708  ;;  %8413 = vmatprep.mubr.msk.f32.mxu0 %vm3819_vm2, %v7314_v55  ;;  %v6075_v55 = vmax.f32 %v5850_v48, %v9008_v6  ;;  %v6093_v45 = vmax.f32 %v5868_v34, %v13612_v52  ;;  %8532 = vmatprep.subr.bf16.mxu0 %v8531_v49  ;;  %v14627_v46 = vld [vmem:[#allocation12_spill] sm:$0xff]  ;;  %v5374_v50 = vmax.f32 %v5149_v35, %v13354_v15  ;;  %v14631_v34 = vld [vmem:[#allocation55_spill] sm:$0xff] }
 0x8ff   : > { %6957 = vperm.xlu1 %8589, %v8709_v28   ;;  %v8711_v21 = vpop.eup %8710  ;;  %v14628_v28 = vld [vmem:[#allocation11_spill] sm:$0xff]  ;;  %8534 = vmatpush3.bf16.msra.mxu0 %v8531_v49  ;;  %v5611_v38 = vmax.f32 %v5385_v7, %v13621_v42  ;;  %v4928_v10 = vmax.f32 %v4670_v62, %v11970_v63  ;;  %v14630_v41 = vld [vmem:[#allocation56_spill] sm:$0xff]  ;;  %v5854_v48 = vmax.f32 %v5596_v47, %v13307_v44  ;;  %v9013_v7 = vld [vmem:[#allocation4 + $0x111] sm:$0xff] }
 0x900   : > { %v14629_v4 = vmax.f32 %v14627_v46, %v14628_v28  ;;  %v13627_v9 = vadd.f32 %v13221_v30, %v6075_v55  ;;  %v13630_v2 = vadd.f32 %v13221_v30, %v6093_v45  ;;  %v5150_v8 = vmax.f32 %v4925_v0, %v14630_v41  ;;  %v9011_v40 = vld [vmem:[#allocation4 + $0x69] sm:$0xff]  ;;  %v14632_v49 = vld [vmem:[#allocation37_spill] sm:$0xff] }
 0x901   : > { %v6076_v22 = vmax.f32 %v5851_v1, %v9011_v40  ;;  %v5600_v63 = vmax.f32 %v5374_v50, %v11957_v53  ;;  %v13644_v54 = vld [vmem:[#allocation4 + $0x188] sm:$0xff]  ;;  %v5153_v62 = vmax.f32 %v4928_v10, %v14632_v49  ;;  %v14634_v55 = vld [vmem:[#allocation25_spill] sm:$0xff] }
 0x902   : > { %v8713_v27 = vpop.eup %8712  ;;  %v4671_v13 = vmax.f32 %v14629_v4, %v13411_v32  ;;  %v4449_v32 = vmax.f32 %v11983_v51, %v13445_v25  ;;  %v5869_v29 = vmax.f32 %v5611_v38, %v13644_v54  ;;  %v14633_v0 = vld [vmem:[#allocation48_spill] sm:$0xff]  ;;  %v9015_v46 = vld [vmem:[#allocation4 + $0x91] sm:$0xff]  ;;  %v14636_v38 = vld [vmem:[#allocation14_spill] sm:$0xff] }
 0x903   : > { %6967 = vperm.xlu0 %8570, %v8713_v27   ;;  %6962 = vperm.xlu1 %8589, %v8711_v21   ;;  %v5855_v21 = vmax.f32 %v5597_v23, %v14631_v34  ;;  %v13648_v35 = vadd.f32 %v13221_v30, %v6076_v22  ;;  %v5375_v1 = vmax.f32 %v5150_v8, %v14633_v0  ;;  %v13655_v53 = vld [vmem:[#allocation4 + $0x18f] sm:$0xff] }
 0x904   : > { %v4929_v5 = vmax.f32 %v4671_v13, %v13416_v14  ;;  %v4674_v44 = vmax.f32 %v4449_v32, %v9013_v7  ;;  %v4938_v45 = vmax.f32 %v14634_v55, %v13655_v53  ;;  %v6079_v28 = vmax.f32 %v5854_v48, %v9015_v46  ;;  %v14635_v13 = vld [vmem:[#allocation43_spill] sm:$0xff]  ;;  %v14637_v32 = vld [vmem:[#allocation13_spill] sm:$0xff]  ;;  %v13669_v8 = vld [vmem:[#allocation4 + $0x189] sm:$0xff] }
 0x905   : > { %v8715_v6 = vpop.eup %8714  ;;  %v14638_v10 = vmax.f32 %v14636_v38, %v14637_v32  ;;  %v14639_v22 = vld [vmem:[#allocation33_spill] sm:$0xff]  ;;  %v5858_v7 = vmax.f32 %v5600_v63, %v13376_v43 }
 0x906   : > { %v13624_v57 = vpop.f32.mrb[56].mxu1  ;;  %v5154_v23 = vmax.f32 %v4929_v5, %v14635_v13  ;;  %v13674_v40 = vadd.f32 %v13221_v30, %v6079_v28  ;;  %v5601_v48 = vmax.f32 %v5375_v1, %v14639_v22  ;;  %v9018_v34 = vld [vmem:[#allocation4 + $0x12f] sm:$0xff]  ;;  %v14642_v1 = vld [vmem:[#allocation35_spill] sm:$0xff] }
 0x907   : > { %8591 = vset.pattern.permute.xlu0 %v14584_v20  ;;  %v6549_v15 = vpop.f32.mrb[57].mxu1  ;;  %8590 = vset.pattern.permute.xlu1 %v14584_v20  ;;  %v4675_v41 = vmax.f32 %v14638_v10, %v13483_v11  ;;  %v4932_v5 = vmax.f32 %v4674_v44, %v9018_v34  ;;  %v13679_v49 = vld [vmem:[#allocation4 + $0x190] sm:$0xff] }
 0x908   : > { %7161 = vperm.xlu0 %8591, %v13627_v9   ;;  %7251 = vperm.xlu1 %8590, %v13630_v2   ;;  %v6094_v15 = vmax.f32 %v5869_v29, %v13669_v8  ;;  %v5163_v11 = vmax.f32 %v4938_v45, %v13679_v49  ;;  %v14641_v44 = vld [vmem:[#allocation61_spill] sm:$0xff] }
 0x909   : > { %v4933_v43 = vmax.f32 %v4675_v41, %v13490_v39  ;;  %v9020_v55 = vld [vmem:[#allocation4 + $0x130] sm:$0xff]  ;;  %v14643_v39 = vld [vmem:[#allocation63_spill] sm:$0xff] }
 0x90a   : > { %v8395_v27 = vpop.f32.mrb[56].mxu0  ;;  %v13685_v29 = vadd.f32 %v13221_v30, %v6094_v15  ;;  %v5157_v45 = vmax.f32 %v4932_v5, %v9020_v55  ;;  %v9021_v28 = vld [vmem:[#allocation4 + $0xd1] sm:$0xff]  ;;  %v13711_v15 = vld [vmem:[#allocation4 + $0x1a7] sm:$0xff] }
 0x90b   : > { %v13653_v47 = vadd.f32 %v8395_v27, %v13471_v31  ;;  %v6752_v14 = vpop.f32.mrb[57].mxu0  ;;  %v9016_v31 = vld [vmem:[#allocation4 + $0xa9] sm:$0xff]  ;;  %v6083_v13 = vmax.f32 %v5858_v7, %v9021_v28  ;;  %v14646_v5 = vld [vmem:[#allocation21_spill] sm:$0xff] }
 0x90c   : > { %v13660_v4 = vadd.f32 %v6752_v14, %v13443_v33  ;;  %7166 = vperm.xlu0 %8591, %v13648_v35   ;;  %8592 = vset.pattern.permute.xlu1 %v14580_v60  ;;  %v6080_v50 = vmax.f32 %v5855_v21, %v9016_v31  ;;  %v14640_v21 = vld [vmem:[#allocation41_spill] sm:$0xff] }
 0x90d   : > { %6972 = vperm.xlu1 %8592, %v8715_v6   ;;  %v5378_v27 = vmax.f32 %v5153_v62, %v14640_v21  ;;  %v6816_v0 = vadd.f32 1e-08, %v13653_v47  ;;  %v5379_v62 = vmax.f32 %v5154_v23, %v14641_v44  ;;  %v5859_v6 = vmax.f32 %v5601_v48, %v14642_v1  ;;  %v13698_v31 = vld [vmem:[#allocation4 + $0x191] sm:$0xff]  ;;  %v9024_v21 = vld [vmem:[#allocation4 + $0xe9] sm:$0xff]  ;;  %v14648_v1 = vld [vmem:[#allocation71_spill] sm:$0xff] }
 0x90e   : > { %v6815_v33 = vadd.f32 1e-08, %v13660_v4  ;;  %v13687_v14 = vpop.permute.xlu1 %6877  ;;  %v13694_v63 = vadd.f32 %v13221_v30, %v6080_v50  ;;  %v5388_v38 = vmax.f32 %v5163_v11, %v13698_v31  ;;  %v5158_v50 = vmax.f32 %v4933_v43, %v13499_v59  ;;  %v9025_v11 = vld [vmem:[#allocation4 + $0x1af] sm:$0xff] }
 0x90f   : > { %v5604_v46 = vmax.f32 %v5378_v27, %v11983_v51  ;;  %v5605_v23 = vmax.f32 %v5379_v62, %v14643_v39  ;;  %v13707_v10 = vadd.f32 %v13221_v30, %v6083_v13  ;;  %v14644_v51 = vld [vmem:[#allocation65_spill] sm:$0xff]  ;;  %v4936_v59 = vmax.f32 %v14646_v5, %v13573_v26  ;;  %v14647_v62 = vld [vmem:[#allocation64_spill] sm:$0xff]  ;;  %v14650_v26 = vld [vmem:[#allocation23_spill] sm:$0xff] }
 0x910   : > { %8716 = vrcp.f32 %v6815_v33  ;;  %7181 = vperm.xlu0 %8591, %v13674_v40   ;;  %v5382_v41 = vmax.f32 %v5157_v45, %v14644_v51  ;;  %v14645_v33 = vld [vmem:[#allocation27_spill] sm:$0xff]  ;;  %v6084_v27 = vmax.f32 %v5859_v6, %v9024_v21  ;;  %v5383_v55 = vmax.f32 %v5158_v50, %v14648_v1  ;;  %v14649_v13 = vld [vmem:[#allocation68_spill] sm:$0xff]  ;;  %v14651_v50 = vld [vmem:[#allocation62_spill] sm:$0xff] }
 0x911   : > { %8593 = vset.pattern.permute.xlu1 %v14584_v20  ;;  %8718 = vrcp.f32 %v6816_v0  ;;  %v4939_v22 = vmax.f32 %v14645_v33, %v13711_v15  ;;  %v5862_v7 = vmax.f32 %v5604_v46, %v13445_v25  ;;  %v5614_v0 = vmax.f32 %v5388_v38, %v9025_v11  ;;  %v13729_v51 = vld [vmem:[#allocation4 + $0x1a8] sm:$0xff] }
 0x912   : > { %7256 = vperm.xlu1 %8593, %v13685_v29   ;;  %v13715_v48 = vpop.permute.xlu1 %6882  ;;  %v5863_v43 = vmax.f32 %v5605_v23, %v14647_v62  ;;  %v13724_v28 = vadd.f32 %v13221_v30, %v6084_v27  ;;  %v5608_v39 = vmax.f32 %v5382_v41, %v14649_v13  ;;  %v4937_v6 = vmax.f32 %v14650_v26, %v13621_v42  ;;  %v14652_v62 = vld [vmem:[#allocation29_spill] sm:$0xff] }
 0x913   : > { %v5164_v25 = vmax.f32 %v4939_v22, %v13729_v51  ;;  %v5161_v23 = vmax.f32 %v4936_v59, %v13594_v61  ;;  %v6087_v33 = vmax.f32 %v5862_v7, %v14651_v50  ;;  %v9028_v59 = vld [vmem:[#allocation4 + $0x1a9] sm:$0xff]  ;;  %v4940_v1 = vmax.f32 %v14652_v62, %v9025_v11  ;;  %v9030_v13 = vld [vmem:[#allocation4 + $0x1b1] sm:$0xff] }
 0x914   : > { %7186 = vperm.xlu0 %8591, %v13694_v63   ;;  %v5162_v61 = vmax.f32 %v4937_v6, %v13644_v54  ;;  %v9034_v62 = vld [vmem:[#allocation4 + $0x1c9] sm:$0xff] }
 0x915   : > { %v13746_v27 = vadd.f32 %v13221_v30, %v6087_v33  ;;  %v5389_v7 = vmax.f32 %v5164_v25, %v9028_v59  ;;  %v9032_v33 = vld [vmem:[#allocation4 + $0x1c8] sm:$0xff] }
 0x916   : > { %v13704_v32 = vpop.f32.mrb[58].mxu1  ;;  %8594 = vset.pattern.permute.xlu1 %v14580_v60 }
 0x917   : > { %v6554_v34 = vpop.f32.mrb[59].mxu1  ;;  %v13741_v42 = vpop.permute.xlu1 %7171 }
 0x918   : > { %7201 = vperm.xlu0 %8591, %v13707_v10   ;;  %v9027_v34 = vld [vmem:[#allocation4 + $0x1b0] sm:$0xff] }
 0x919   : > { %v5872_v5 = vmax.f32 %v5614_v0, %v9027_v34  ;;  %v5866_v0 = vmax.f32 %v5608_v39, %v13538_v16  ;;  %v9031_v39 = vld [vmem:[#allocation4 + $0x1c7] sm:$0xff] }
 0x91a   : > { %v8717_v44 = vpop.eup %8716  ;;  %v8398_v45 = vpop.f32.mrb[58].mxu0  ;;  %v5615_v11 = vmax.f32 %v5389_v7, %v9031_v39 }
 0x91b   : > { %v13733_v46 = vadd.f32 %v8398_v45, %v13576_v3  ;;  %v6762_v38 = vpop.f32.mrb[59].mxu0  ;;  %6977 = vperm.xlu1 %8594, %v8717_v44   ;;  %v8719_v21 = vpop.eup %8718  ;;  %v5609_v3 = vmax.f32 %v5383_v55, %v13565_v17  ;;  %v5386_v45 = vmax.f32 %v5161_v23, %v13612_v52  ;;  %v6097_v26 = vmax.f32 %v5872_v5, %v9030_v13 }
 0x91c   : > { %v13738_v41 = vadd.f32 %v6762_v38, %v13536_v36  ;;  %7206 = vperm.xlu0 %8591, %v13724_v28   ;;  %v9029_v36 = vld [vmem:[#allocation4 + $0x129] sm:$0xff]  ;;  %v5387_v55 = vmax.f32 %v5162_v61, %v13669_v8  ;;  %v13762_v6 = vpop.permute.xlu1 %6892  ;;  %v5165_v52 = vmax.f32 %v4940_v1, %v9027_v34  ;;  %v14653_v38 = vld [vmem:[#allocation31_spill] sm:$0xff]  ;;  %v5873_v5 = vmax.f32 %v5615_v11, %v9032_v33 }
 0x91d   : > { %v6818_v22 = vadd.f32 1e-08, %v13733_v46  ;;  %v6088_v44 = vmax.f32 %v5863_v43, %v9029_v36  ;;  %v13757_v54 = vadd.f32 %v13221_v30, %v6097_v26  ;;  %v5867_v16 = vmax.f32 %v5609_v3, %v13580_v56  ;;  %v9035_v11 = vld [vmem:[#allocation4 + $0x1d0] sm:$0xff] }
 0x91e   : > { %v6091_v43 = vmax.f32 %v5866_v0, %v13560_v58  ;;  %v5612_v25 = vmax.f32 %v5386_v45, %v13655_v53  ;;  %v4941_v23 = vmax.f32 %v14653_v38, %v9031_v39  ;;  %v5613_v50 = vmax.f32 %v5387_v55, %v13711_v15  ;;  %v9033_v15 = vld [vmem:[#allocation4 + $0x1cf] sm:$0xff]  ;;  %v14654_v0 = vld [vmem:[#allocation7_spill] sm:$0xff] }
 0x91f   : > { %8720 = vrcp.f32 %v6818_v22  ;;  %6982 = vperm.xlu1 %8594, %v8719_v21   ;;  %v13754_v17 = vadd.f32 %v13221_v30, %v6088_v44  ;;  %v6092_v58 = vmax.f32 %v5867_v16, %v13605_v19  ;;  %v5390_v22 = vmax.f32 %v5165_v52, %v9030_v13 }
 0x920   : > { %7221 = vperm.xlu0 %8591, %v13746_v27   ;;  %v13772_v8 = vadd.f32 %v13221_v30, %v6091_v43  ;;  %v5166_v53 = vmax.f32 %v4941_v23, %v9032_v33  ;;  %v5870_v21 = vmax.f32 %v5612_v25, %v13679_v49  ;;  %v4942_v36 = vmax.f32 %v14654_v0, %v9033_v15  ;;  %v14657_v33 = vld [vmem:[#allocation16_spill] sm:$0xff] }
 0x921   : > { %v13779_v61 = vpop.permute.xlu1 %7176  ;;  %v13782_v19 = vadd.f32 %v13221_v30, %v6092_v58  ;;  %v5871_v44 = vmax.f32 %v5613_v50, %v13729_v51  ;;  %v6098_v1 = vmax.f32 %v5873_v5, %v9034_v62  ;;  %v5616_v13 = vmax.f32 %v5390_v22, %v9033_v15  ;;  %v9037_v58 = vld [vmem:[#allocation4 + $0x1d1] sm:$0xff]  ;;  %v14656_v50 = vld [vmem:[#allocation20_spill] sm:$0xff] }
 0x922   : > { %v5391_v26 = vmax.f32 %v5166_v53, %v9034_v62  ;;  %v6095_v16 = vmax.f32 %v5870_v21, %v13698_v31  ;;  %v5167_v52 = vmax.f32 %v4942_v36, %v9035_v11  ;;  %v14658_v5 = vmax.f32 %v14656_v50, %v14657_v33  ;;  %v9038_v21 = vld [vmem:[#allocation4 + $0x1e8] sm:$0xff] }
 0x923   : > { %8595 = vset.pattern.permute.xlu1 %v14584_v20  ;;  %v13797_v39 = vadd.f32 %v13221_v30, %v6098_v1  ;;  %v6096_v31 = vmax.f32 %v5871_v44, %v9028_v59  ;;  %v5874_v38 = vmax.f32 %v5616_v13, %v9035_v11  ;;  %v6817_v22 = vadd.f32 1e-08, %v13738_v41  ;;  %v9039_v0 = vld [vmem:[#allocation4 + $0x1ef] sm:$0xff]  ;;  %v14660_v13 = vld [vmem:[#allocation15_spill] sm:$0xff] }
 0x924   : > { %7226 = vperm.xlu0 %8591, %v13754_v17   ;;  %7271 = vperm.xlu1 %8595, %v13757_v54   ;;  %v9040_v11 = vld [vmem:[#allocation4 + $0x1e9] sm:$0xff] }
 0x925   : > { %v13812_v53 = vadd.f32 %v13221_v30, %v6096_v31  ;;  %v6099_v15 = vmax.f32 %v5874_v38, %v9037_v58 }
 0x926   : > { %v13769_v56 = vpop.f32.mrb[60].mxu1 }
 0x927   : > { %v6559_v34 = vpop.f32.mrb[61].mxu1  ;;  %v13819_v44 = vadd.f32 %v13221_v30, %v6099_v15 }
 0x928   : > { %7241 = vperm.xlu0 %8591, %v13772_v8   ;;  %8596 = vset.pattern.permute.xlu1 %v14580_v60  ;;  %v4686_v34 = vmax.f32 %v14658_v5, %v9037_v58  ;;  %v14663_v5 = vld [vmem:[#allocation19_spill] sm:$0xff] }
 0x929   : > { %v8721_v3 = vpop.eup %8720 }
 0x92a   : > { %v8401_v7 = vpop.f32.mrb[60].mxu0  ;;  %6992 = vperm.xlu1 %8596, %v8721_v3   ;;  %v13794_v43 = vpop.permute.xlu1 %6897  ;;  %v4944_v36 = vmax.f32 %v4686_v34, %v9039_v0  ;;  %v14664_v34 = vld [vmem:[#allocation18_spill] sm:$0xff] }
 0x92b   : > { %v13787_v49 = vadd.f32 %v8401_v7, %v13704_v32  ;;  %v6772_v45 = vpop.f32.mrb[61].mxu0  ;;  %v13802_v32 = vadd.f32 %v13221_v30, %v6095_v16  ;;  %v5392_v7 = vmax.f32 %v5167_v52, %v9037_v58  ;;  %v9041_v52 = vld [vmem:[#allocation4 + $0x1f0] sm:$0xff] }
 0x92c   : > { %v13791_v55 = vadd.f32 %v6772_v45, %v13624_v57  ;;  %7246 = vperm.xlu0 %8591, %v13782_v19   ;;  %v9036_v57 = vld [vmem:[#allocation4 + $0x1e7] sm:$0xff]  ;;  %v14659_v45 = vld [vmem:[#allocation17_spill] sm:$0xff]  ;;  %v5169_v38 = vmax.f32 %v4944_v36, %v9041_v52 }
 0x92d   : > { %14655 = vst [vmem:[#allocation10_spill] sm:$0xff] %v13787_v49  ;;  %v5617_v25 = vmax.f32 %v5391_v26, %v9036_v57  ;;  %v6820_v23 = vadd.f32 1e-08, %v13787_v49  ;;  %v14661_v26 = vmax.f32 %v14659_v45, %v14660_v13  ;;  %v9043_v45 = vld [vmem:[#allocation4 + $0x207] sm:$0xff] }
 0x92e   : > { %v6819_v51 = vadd.f32 1e-08, %v13791_v55  ;;  %8597 = vset.pattern.permute.xlu1 %v14584_v20  ;;  %v13814_v59 = vpop.permute.xlu1 %6902 }
 0x92f   : > { %7276 = vperm.xlu1 %8597, %v13797_v39   ;;  %v5875_v3 = vmax.f32 %v5617_v25, %v9038_v21  ;;  %v4685_v16 = vmax.f32 %v14661_v26, %v9034_v62  ;;  %v14665_v62 = vmax.f32 %v14663_v5, %v14664_v34 }
 0x930   : > { %8722 = vrcp.f32 %v6819_v51  ;;  %7261 = vperm.xlu0 %8591, %v13802_v32   ;;  %v5618_v51 = vmax.f32 %v5392_v7, %v9039_v0  ;;  %v9042_v0 = vld [vmem:[#allocation4 + $0x1f1] sm:$0xff] }
 0x931   : > { %8724 = vrcp.f32 %v6820_v23  ;;  %v6100_v31 = vmax.f32 %v5875_v3, %v9040_v11  ;;  %v4943_v7 = vmax.f32 %v4685_v16, %v9036_v57  ;;  %v5394_v36 = vmax.f32 %v5169_v38, %v9042_v0 }
 0x932   : > { %8726 = vrcp.f32 %v6817_v22  ;;  %v4687_v22 = vmax.f32 %v14665_v62, %v9040_v11  ;;  %v5876_v15 = vmax.f32 %v5618_v51, %v9041_v52  ;;  %v14666_v62 = vld [vmem:[#allocation22_spill] sm:$0xff]  ;;  %v9044_v52 = vld [vmem:[#allocation4 + $0x20f] sm:$0xff] }
 0x933   : > { %8598 = vset.pattern.permute.xlu1 %v14580_v60  ;;  %v13825_v23 = vpop.permute.xlu1 %7191  ;;  %v13831_v33 = vadd.f32 %v13221_v30, %v6100_v31  ;;  %v5168_v5 = vmax.f32 %v4943_v7, %v9038_v21  ;;  %v5620_v38 = vmax.f32 %v5394_v36, %v9044_v52 }
 0x934   : > { %7266 = vperm.xlu0 %8591, %v13812_v53   ;;  %v4945_v13 = vmax.f32 %v4687_v22, %v9043_v45  ;;  %v6101_v34 = vmax.f32 %v5876_v15, %v9042_v0  ;;  %v14669_v22 = vld [vmem:[#allocation26_spill] sm:$0xff]  ;;  %v9046_v15 = vld [vmem:[#allocation4 + $0x210] sm:$0xff] }
 0x935   : > { %v5393_v21 = vmax.f32 %v5168_v5, %v9040_v11  ;;  %v9048_v11 = vld [vmem:[#allocation4 + $0x211] sm:$0xff]  ;;  %v14670_v5 = vld [vmem:[#allocation36_spill] sm:$0xff] }
 0x937   : > { %v8404_v1 = vpop.f32.mrb[62].mxu0 }
 0x938   : > { %v6782_v25 = vpop.f32.mrb[63].mxu0  ;;  %7281 = vperm.xlu0 %8591, %v13819_v44   ;;  %v13838_v26 = vpop.permute.xlu1 %6912 }
 0x939   : > { %v13828_v58 = vadd.f32 %v6782_v25, %v13769_v56 }
 0x93a   : > { %v8723_v50 = vpop.eup %8722 }
 0x93b   : > { %14662 = vst [vmem:[#allocation12_spill] sm:$0xff] %v13828_v58  ;;  %v6821_v3 = vadd.f32 1e-08, %v13828_v58  ;;  %6997 = vperm.xlu1 %8598, %v8723_v50   ;;  %v8725_v56 = vpop.eup %8724  ;;  %v14667_v58 = vld [vmem:[#allocation49_spill] sm:$0xff] }
 0x93c   : > { %7286 = vperm.xlu0 %8591, %v13831_v33   ;;  %v8727_v25 = vpop.eup %8726  ;;  %v14668_v50 = vmax.f32 %v14666_v62, %v14667_v58  ;;  %v9045_v58 = vld [vmem:[#allocation4 + $0x208] sm:$0xff] }
 0x93d   : > { %8728 = vrcp.f32 %v6821_v3  ;;  %v7671_v3 = vadd.f32 1e-08, %v14669_v22  ;;  %v5170_v7 = vmax.f32 %v4945_v13, %v9045_v58  ;;  %v13853_v36 = vpop.permute.xlu1 %7196  ;;  %v9047_v62 = vld [vmem:[#allocation4 + $0x209] sm:$0xff] }
 0x93e   : > { %v4688_v57 = vmax.f32 %v14668_v50, %v9042_v0  ;;  %v5878_v0 = vmax.f32 %v5620_v38, %v9046_v15  ;;  %v5619_v50 = vmax.f32 %v5393_v21, %v9043_v45  ;;  %v9049_v38 = vld [vmem:[#allocation4 + $0x227] sm:$0xff] }
 0x93f   : > { %v6562_v31 = vpop.f32.mrb[62].mxu1  ;;  %7002 = vperm.xlu1 %8598, %v8725_v56   ;;  %v13849_v56 = vadd.f32 %v13221_v30, %v6101_v34  ;;  %v5395_v34 = vmax.f32 %v5170_v7, %v9047_v62 }
 0x940   : > { %v13843_v16 = vadd.f32 %v8404_v1, %v6562_v31  ;;  %v6564_v51 = vpop.f32.mrb[63].mxu1  ;;  %8599 = vset.pattern.permute.xlu0 %v14580_v60  ;;  %v4946_v1 = vmax.f32 %v4688_v57, %v9044_v52  ;;  %v7673_v31 = vadd.f32 1e-08, %v13648_v35  ;;  %v6103_v13 = vmax.f32 %v5878_v0, %v9048_v11 }
 0x941   : > { %6987 = vperm.xlu0 %8599, %v8727_v25   ;;  %v7675_v57 = vadd.f32 1e-08, %v14670_v5  ;;  %v5621_v35 = vmax.f32 %v5395_v34, %v9049_v38  ;;  %v5877_v22 = vmax.f32 %v5619_v50, %v9045_v58  ;;  %v7672_v58 = vadd.f32 1e-08, %v13627_v9  ;;  %v14671_v34 = vld [vmem:[#allocation46_spill] sm:$0xff] }
 0x942   : > { %v6822_v49 = vadd.f32 1e-08, %v13843_v16  ;;  %v5171_v51 = vmax.f32 %v4946_v1, %v9046_v15  ;;  %v13861_v52 = vadd.f32 %v13221_v30, %v6103_v13  ;;  %v9050_v1 = vld [vmem:[#allocation4 + $0x228] sm:$0xff]  ;;  %v7679_v50 = vadd.f32 1e-08, %v14671_v34  ;;  %v9053_v13 = vld [vmem:[#allocation4 + $0x230] sm:$0xff] }
 0x943   : > { %8600 = vset.pattern.permute.xlu1 %v14584_v20  ;;  %v5879_v15 = vmax.f32 %v5621_v35, %v9050_v1  ;;  %v6102_v0 = vmax.f32 %v5877_v22, %v9047_v62  ;;  %v7681_v35 = vadd.f32 1e-08, %v13724_v28 }
 0x944   : > { %8730 = vrcp.f32 %v6822_v49  ;;  %7291 = vperm.xlu1 %8600, %v13849_v56  }
 0x945   : > { %8732 = vrcp.f32 %v7671_v3  ;;  %v5396_v3 = vmax.f32 %v5171_v51, %v9048_v11  ;;  %v13872_v51 = vadd.f32 %v13221_v30, %v6102_v0  ;;  %v9052_v11 = vld [vmem:[#allocation4 + $0x229] sm:$0xff] }
 0x946   : > { %v13857_v49 = vpop.permute.xlu1 %6917  ;;  %8734 = vrcp.f32 %v7673_v31  ;;  %v9051_v31 = vld [vmem:[#allocation4 + $0x22f] sm:$0xff]  ;;  %v6104_v62 = vmax.f32 %v5879_v15, %v9052_v11 }
 0x947   : > { %v8729_v25 = vpop.eup %8728  ;;  %8736 = vrcp.f32 %v7675_v57  ;;  %v14672_v57 = vld [vmem:[#allocation54_spill] sm:$0xff] }
 0x948   : > { %7007 = vperm.xlu0 %8599, %v8729_v25   ;;  %8601 = vset.pattern.permute.xlu1 %v14580_v60  ;;  %v7677_v60 = vadd.f32 1e-08, %v13694_v63  ;;  %v5622_v25 = vmax.f32 %v5396_v3, %v9051_v31  ;;  %v7674_v9 = vadd.f32 1e-08, %v14672_v57  ;;  %v13882_v22 = vadd.f32 %v13221_v30, %v6104_v62  ;;  %v9054_v3 = vld [vmem:[#allocation4 + $0x231] sm:$0xff]  ;;  %v14674_v31 = vld [vmem:[#allocation38_spill] sm:$0xff] }
 0x94a   : > { %v13866_v21 = vpop.permute.xlu1 %6922  ;;  %8738 = vrcp.f32 %v7677_v60  ;;  %v5880_v5 = vmax.f32 %v5622_v25, %v9053_v13  ;;  %v7676_v60 = vadd.f32 1e-08, %v13674_v40  ;;  %v7678_v25 = vadd.f32 1e-08, %v14674_v31  ;;  %v14675_v13 = vld [vmem:[#allocation39_spill] sm:$0xff] }
 0x94b   : > { %8740 = vrcp.f32 %v7672_v58  ;;  %v7685_v40 = vadd.f32 1e-08, %v13754_v17  ;;  %v7682_v17 = vadd.f32 1e-08, %v14675_v13  ;;  %v7699_v13 = vadd.f32 1e-08, %v13872_v51 }
 0x94c   : > { %8603 = vset.pattern.permute.xlu0 %v14584_v20  ;;  %8742 = vrcp.f32 %v7679_v50 }
 0x94d   : > { %7301 = vperm.xlu0 %8603, %v13861_v52   ;;  %8744 = vrcp.f32 %v7674_v9 }
 0x94e   : > { %v8731_v45 = vpop.eup %8730  ;;  %8746 = vrcp.f32 %v7681_v35  ;;  %v7691_v35 = vadd.f32 1e-08, %v13685_v29  ;;  %v7688_v29 = vadd.f32 1e-08, %v13772_v8  ;;  %v7697_v8 = vadd.f32 1e-08, %v13831_v33 }
 0x94f   : > { %7012 = vperm.xlu1 %8601, %v8731_v45   ;;  %v8733_v7 = vpop.eup %8732  ;;  %v13877_v38 = vpop.permute.xlu1 %7211  ;;  %v6105_v45 = vmax.f32 %v5880_v5, %v9054_v3  ;;  %8748 = vrcp.f32 %v7676_v60  ;;  %v14676_v60 = vld [vmem:[#allocation66_spill] sm:$0xff]  ;;  %v7694_v33 = vadd.f32 1e-08, %v13757_v54  ;;  %v7696_v54 = vadd.f32 1e-08, %v13819_v44 }
 0x950   : > { %v8735_v63 = vpop.eup %8734  ;;  %v7698_v44 = vadd.f32 1e-08, %v13849_v56  ;;  %v7700_v56 = vadd.f32 1e-08, %v13861_v52 }
 0x951   : > { %7767 = vrot.lane.b32.xlu0 %v8733_v7, %s9087_s13  ;;  %v14673_v7 = vld [vmem:[#allocation60_spill] sm:$0xff]  ;;  %v13889_v15 = vadd.f32 %v13221_v30, %v6105_v45  ;;  %v7680_v30 = vadd.f32 1e-08, %v13707_v10  ;;  %v7689_v10 = vadd.f32 1e-08, %v13782_v19 }
 0x952   : > { %v7683_v1 = vadd.f32 1e-08, %v14673_v7  ;;  %v7686_v19 = vadd.f32 1e-08, %v14676_v60  ;;  %v6873_v7 = vpop.permute.xlu0 %6872 }
 0x953   : > { %8602 = vset.pattern.permute.xlu1 %v14584_v20  ;;  %v8737_v20 = vpop.eup %8736 }
 0x954   : > { %7296 = vperm.xlu1 %8602, %v13872_v51   ;;  %v13891_v28 = vpop.permute.xlu1 %6932  ;;  %v8739_v0 = vpop.eup %8738  ;;  %8750 = vrcp.f32 %v7683_v1 }
 0x955   : > { %7771 = vrot.lane.b32.xlu0 %v8735_v63, %s9087_s13  ;;  %v8741_v58 = vpop.eup %8740  ;;  %8752 = vrcp.f32 %v7678_v25  ;;  %v7687_v63 = vadd.f32 1e-08, %v13545_v37  ;;  %v7684_v37 = vadd.f32 1e-08, %v13746_v27  ;;  %v7693_v27 = vadd.f32 1e-08, %v13812_v53 }
 0x956   : > { %v8743_v34 = vpop.eup %8742  ;;  %8754 = vrcp.f32 %v7685_v40  ;;  %v13924_v25 = vpop.permute.xlu0 %6887  ;;  %v7695_v40 = vadd.f32 1e-08, %v13797_v39  ;;  %v7690_v53 = vadd.f32 1e-08, %v13630_v2  ;;  %v7692_v39 = vadd.f32 1e-08, %v13802_v32 }
 0x957   : > { %v8745_v11 = vpop.eup %8744  ;;  %8756 = vrcp.f32 %v7680_v30  ;;  %v14678_v32 = vld [vmem:[#allocation70_spill] sm:$0xff] }
 0x958   : > { %7306 = vperm.xlu1 %8602, %v13882_v22   ;;  %v8747_v62 = vpop.eup %8746  ;;  %8758 = vrcp.f32 %v7687_v63 }
 0x959   : > { %7775 = vrot.lane.b32.xlu0 %v8737_v20, %s9087_s13  ;;  %v13899_v50 = vpop.permute.xlu1 %7216  ;;  %v8749_v57 = vpop.eup %8748  ;;  %8760 = vrcp.f32 %v7682_v17 }
 0x95a   : > { %8762 = vrcp.f32 %v7689_v10  ;;  %v13930_v30 = vpop.permute.xlu0 %6907 }
 0x95b   : > { %8764 = vrcp.f32 %v7684_v37 }
 0x95c   : > { %7311 = vperm.xlu1 %8602, %v13889_v15   ;;  %8766 = vrcp.f32 %v7691_v35  ;;  %v7701_v35 = vadd.f32 1e-08, %v13882_v22 }
 0x95d   : > { %7779 = vrot.lane.b32.xlu0 %v8739_v0, %s9087_s13  ;;  %8768 = vrcp.f32 %v7686_v19  ;;  %v14679_v19 = vld [vmem:[#allocation51_spill] sm:$0xff] }
 0x95e   : > { %v8751_v9 = vpop.eup %8750  ;;  %8770 = vrcp.f32 %v7693_v27  ;;  %v13938_v2 = vpop.permute.xlu0 %6927  ;;  %v7017_v27 = vmul.f32 %v13554_v24, %v14679_v19  ;;  %v14682_v24 = vld [vmem:[#allocation52_spill] sm:$0xff] }
 0x95f   : > { %v8753_v20 = vpop.eup %8752  ;;  %8772 = vrcp.f32 %v7688_v29  ;;  %v14680_v29 = vld [vmem:[#allocation24_spill] sm:$0xff] }
 0x960   : > { %7769 = vrot.lane.b32.xlu1 %v8741_v58, %s9087_s13  ;;  %v8755_v45 = vpop.eup %8754  ;;  %8774 = vrcp.f32 %v7695_v40  ;;  %v7018_v40 = vmul.f32 %v6873_v7, %v14680_v29 }
 0x961   : > { %7783 = vrot.lane.b32.xlu0 %v8743_v34, %s9087_s13  ;;  %v8757_v1 = vpop.eup %8756  ;;  %8776 = vrcp.f32 %v7690_v53 }
 0x962   : > { %v13905_v5 = vpop.permute.xlu1 %6937  ;;  %v8759_v0 = vpop.eup %8758  ;;  %8778 = vrcp.f32 %v7697_v8  ;;  %v7020_v8 = vmul.f32 %v13715_v48, %v14682_v24  ;;  %v7057_v7 = vadd.f32 %v13530_v18, %v7018_v40  ;;  %v14683_v48 = vld [vmem:[#allocation30_spill] sm:$0xff]  ;;  %v7702_v40 = vadd.f32 1e-08, %v13889_v15 }
 0x963   : > { %v8761_v58 = vpop.eup %8760  ;;  %8780 = vrcp.f32 %v7692_v39 }
 0x964   : > { %7773 = vrot.lane.b32.xlu1 %v8745_v11, %s9087_s13  ;;  %v8763_v34 = vpop.eup %8762  ;;  %8782 = vrcp.f32 %v7699_v13 }
 0x965   : > { %7787 = vrot.lane.b32.xlu0 %v8747_v62, %s9087_s13  ;;  %v8765_v63 = vpop.eup %8764  ;;  %8784 = vrcp.f32 %v7694_v33 }
 0x966   : > { %v13913_v3 = vpop.permute.xlu1 %6942  ;;  %v8767_v62 = vpop.eup %8766  ;;  %8786 = vrcp.f32 %v7701_v35 }
 0x967   : > { %v8769_v17 = vpop.eup %8768  ;;  %8788 = vrcp.f32 %v7696_v54 }
 0x968   : > { %7777 = vrot.lane.b32.xlu1 %v8749_v57, %s9087_s13  ;;  %v8771_v10 = vpop.eup %8770  ;;  %8790 = vrcp.f32 %v7698_v44 }
 0x969   : > { %7791 = vrot.lane.b32.xlu0 %v8751_v9, %s9087_s13  ;;  %v14677_v9 = vld [vmem:[#allocation50_spill] sm:$0xff]  ;;  %v8773_v51 = vpop.eup %8772  ;;  %8792 = vrcp.f32 %v7700_v56 }
 0x96a   : > { %v7016_v37 = vmul.f32 %v14678_v32, %v14677_v9  ;;  %v7021_v9 = vmul.f32 %v13924_v25, %v14683_v48  ;;  %8794 = vrcp.f32 %v7702_v40 }
 0x96b   : > { %v13921_v31 = vpop.permute.xlu1 %7231 }
 0x96c   : > { %7781 = vrot.lane.b32.xlu1 %v8753_v20, %s9087_s13  ;;  %v13949_v20 = vpop.permute.xlu0 %6947  ;;  %v7055_v22 = vadd.f32 %v13530_v18, %v7016_v37  ;;  %v7059_v37 = vadd.f32 %v13530_v18, %v7020_v8 }
 0x96d   : > { %7795 = vrot.lane.b32.xlu0 %v8755_v45, %s9087_s13  ;;  %v8775_v45 = vpop.eup %8774 }
 0x970   : > { %7785 = vrot.lane.b32.xlu1 %v8757_v1, %s9087_s13  ;;  %v13933_v11 = vpop.permute.xlu1 %6952 }
 0x971   : > { %7799 = vrot.lane.b32.xlu0 %v8759_v0, %s9087_s13  ;;  %v8777_v0 = vpop.eup %8776 }
 0x974   : > { %7789 = vrot.lane.b32.xlu1 %v8761_v58, %s9087_s13  ;;  %v8779_v58 = vpop.eup %8778 }
 0x975   : > { %7803 = vrot.lane.b32.xlu0 %v8763_v34, %s9087_s13  ;;  %v13943_v57 = vpop.permute.xlu1 %7236  ;;  %v14681_v34 = vld [vmem:[#allocation28_spill] sm:$0xff]  ;;  %v8781_v39 = vpop.eup %8780 }
 0x976   : > { %v7019_v53 = vmul.f32 %v13687_v14, %v14681_v34  ;;  %v8783_v14 = vpop.eup %8782 }
 0x977   : > { %v8785_v35 = vpop.eup %8784 }
 0x978   : > { %7793 = vrot.lane.b32.xlu1 %v8765_v63, %s9087_s13  ;;  %v7087_v63 = vmax.f32 %v7055_v22, 0.0 }
 0x979   : > { %7807 = vrot.lane.b32.xlu0 %v8767_v62, %s9087_s13  ;;  %v7056_v62 = vadd.f32 %v13530_v18, %v7017_v27  ;;  %v8787_v27 = vpop.eup %8786 }
 0x97a   : > { %v8789_v24 = vpop.eup %8788 }
 0x97b   : > { %v7088_v32 = vmax.f32 %v7056_v62, 0.0 }
 0x97c   : > { %7797 = vrot.lane.b32.xlu1 %v8769_v17, %s9087_s13 }
 0x97d   : > { %7811 = vrot.lane.b32.xlu0 %v8771_v10, %s9087_s13  ;;  %v7058_v10 = vadd.f32 %v13530_v18, %v7019_v53  ;;  %v14686_v53 = vld [vmem:[#allocation32_spill] sm:$0xff] }
 0x97e   : > { %v13953_v60 = vpop.permute.xlu1 %6957  ;;  %v7024_v44 = vmul.f32 %v13814_v59, %v14686_v53 }
 0x97f   : > { %v7090_v22 = vmax.f32 %v7058_v10, 0.0 }
 0x980   : > { %7801 = vrot.lane.b32.xlu1 %v8773_v51, %s9087_s13  ;;  %v7089_v51 = vmax.f32 %v7057_v7, 0.0  ;;  %v7063_v62 = vadd.f32 %v13530_v18, %v7024_v44  ;;  %v8791_v7 = vpop.eup %8790 }
 0x981   : > { %7815 = vrot.lane.b32.xlu0 %v8775_v45, %s9087_s13  ;;  %v14684_v45 = vld [vmem:[#allocation53_spill] sm:$0xff]  ;;  %v7318_v34 = vmul.f32 %v13779_v61, %v7090_v22 }
 0x982   : > { %v13958_v1 = vpop.permute.xlu0 %6967  ;;  %v13971_v13 = vpop.permute.xlu1 %6962  ;;  %v7022_v54 = vmul.f32 %v13762_v6, %v14684_v45  ;;  %v7317_v25 = vmul.f32 %v13741_v42, %v7089_v51  ;;  %v7060_v6 = vadd.f32 %v13530_v18, %v7021_v9  ;;  %v14687_v61 = vld [vmem:[#allocation9_spill] sm:$0xff]  ;;  %v14690_v45 = vld [vmem:[#allocation40_spill] sm:$0xff] }
 0x983   : > { %v7025_v59 = vmul.f32 %v13930_v30, %v14687_v61  ;;  %v14689_v9 = vld [vmem:[#allocation57_spill] sm:$0xff] }
 0x984   : > { %7805 = vrot.lane.b32.xlu1 %v8777_v0, %s9087_s13  ;;  %v14685_v0 = vld [vmem:[#allocation8_spill] sm:$0xff]  ;;  %v7061_v42 = vadd.f32 %v13530_v18, %v7022_v54  ;;  %v7095_v54 = vmax.f32 %v7063_v62, 0.0  ;;  %v14694_v61 = vld [vmem:[#allocation45_spill] sm:$0xff] }
 0x985   : > { %7819 = vrot.lane.b32.xlu0 %v8779_v58, %s9087_s13  ;;  %v7023_v52 = vmul.f32 %v13794_v43, %v14685_v0  ;;  %v7091_v43 = vmax.f32 %v7059_v37, 0.0 }
 0x987   : > { %v7162_v17 = vpop.permute.xlu0 %7161  ;;  %v13988_v58 = vpop.permute.xlu1 %7251  ;;  %v7062_v15 = vadd.f32 %v13530_v18, %v7023_v52  ;;  %v14030_v52 = vld [vmem:[%s14219_s5] ss:$0 sm:$0xff] }
 0x988   : > { %v7315_v33 = vmul.f32 %v7162_v17, %v7087_v63  ;;  %7809 = vrot.lane.b32.xlu1 %v8781_v39, %s9087_s13  ;;  %v7092_v39 = vmax.f32 %v7060_v6, 0.0  ;;  %v7093_v17 = vmax.f32 %v7061_v42, 0.0  ;;  %v14692_v6 = vld [vmem:[#allocation42_spill] sm:$0xff] }
 0x989   : > { %7823 = vrot.lane.b32.xlu0 %v8783_v14, %s9087_s13  ;;  %v14688_v14 = vld [vmem:[#allocation34_spill] sm:$0xff]  ;;  %v7094_v48 = vmax.f32 %v7062_v15, 0.0 }
 0x98a   : > { %8414 = vmatmul.mubr.msk.f32.vlgmr.msra.gmra.mrb[64].mxu0 %vm3819_vm2, %v7315_v33  ;;  %v7026_v10 = vmul.f32 %v13838_v26, %v14688_v14  ;;  %v7321_v30 = vmul.f32 %v13825_v23, %v7093_v17  ;;  %v7028_v26 = vmul.f32 %v13866_v21, %v14690_v45 }
 0x98b   : > { %v7167_v19 = vpop.permute.xlu0 %7166  ;;  %v7322_v51 = vmul.f32 %v13853_v36, %v7094_v48  ;;  %v14691_v36 = vld [vmem:[#allocation44_spill] sm:$0xff] }
 0x98c   : > { %v7316_v29 = vmul.f32 %v7167_v19, %v7088_v32  ;;  %7813 = vrot.lane.b32.xlu1 %v8785_v35, %s9087_s13  ;;  %v14006_v33 = vpop.permute.xlu1 %6972  ;;  %v7027_v32 = vmul.f32 %v13857_v49, %v14689_v9  ;;  %v7064_v35 = vadd.f32 %v13530_v18, %v7025_v59  ;;  %v8793_v19 = vpop.eup %8792  ;;  %v7029_v21 = vmul.f32 %v13938_v2, %v14691_v36 }
 0x98d   : > { %7827 = vrot.lane.b32.xlu0 %v8787_v27, %s9087_s13  ;;  %v7065_v27 = vadd.f32 %v13530_v18, %v7026_v10  ;;  %v8795_v40 = vpop.eup %8794  ;;  %v14696_v10 = vld [vmem:[#allocation58_spill] sm:$0xff] }
 0x98e   : > { %8416 = vmatprep.mubr.msk.f32.mxu0 %vm3819_vm2, %v7316_v29  ;;  %v7066_v49 = vadd.f32 %v13530_v18, %v7027_v32  ;;  %v7067_v29 = vadd.f32 %v14030_v52, %v7028_v26  ;;  %v7068_v15 = vadd.f32 %v14030_v52, %v7029_v21  ;;  %v14698_v26 = vld [vmem:[#allocation67_spill] sm:$0xff]  ;;  %v7038_v21 = vmul.f32 %v14006_v33, %v13534_v12 }
 0x98f   : > { %v7182_v8 = vpop.permute.xlu0 %7181  ;;  %8417 = vmatmul.mubr.msk.f32.gmra.mrb[66].mxu0 %vm3819_vm2, %v7317_v25  ;;  %v7096_v25 = vmax.f32 %v7064_v35, 0.0  ;;  %v7097_v18 = vmax.f32 %v7065_v27, 0.0 }
 0x990   : > { %v7319_v63 = vmul.f32 %v7182_v8, %v7091_v43  ;;  %7817 = vrot.lane.b32.xlu1 %v8789_v24, %s9087_s13  ;;  %8419 = vmatprep.mubr.msk.f32.mxu0 %vm3819_vm2, %v7318_v34  ;;  %v7030_v34 = vmul.f32 %v13891_v28, %v14692_v6  ;;  %v7098_v44 = vmax.f32 %v7066_v49, 0.0  ;;  %v14693_v43 = vld [vmem:[#allocation47_spill] sm:$0xff]  ;;  %v7032_v28 = vmul.f32 %v13913_v3, %v14694_v61  ;;  %v14699_v49 = vld [vmem:[#allocation72_spill] sm:$0xff] }
 0x991   : > { %v14023_v23 = vpop.permute.xlu1 %7256  ;;  %v7031_v2 = vmul.f32 %v13905_v5, %v14693_v43  ;;  %v7325_v42 = vmul.f32 %v13877_v38, %v7097_v18  ;;  %v7099_v59 = vmax.f32 %v7067_v29, 0.0  ;;  %v14695_v38 = vld [vmem:[#allocation59_spill] sm:$0xff]  ;;  %v7100_v14 = vmax.f32 %v7068_v15, 0.0 }
 0x992   : > { %v7069_v62 = vadd.f32 %v14030_v52, %v7030_v34  ;;  %v7033_v17 = vmul.f32 %v13949_v20, %v14695_v38  ;;  %v7077_v12 = vadd.f32 %v14030_v52, %v7038_v21 }
 0x993   : > { %v7187_v56 = vpop.permute.xlu0 %7186  ;;  %8420 = vmatmul.mubr.msk.f32.gmra.mrb[68].mxu0 %vm3819_vm2, %v7319_v63  ;;  %v7326_v63 = vmul.f32 %v13899_v50, %v7098_v44  ;;  %v7070_v5 = vadd.f32 %v14030_v52, %v7031_v2  ;;  %v7071_v50 = vadd.f32 %v14030_v52, %v7032_v28 }
 0x994   : > { %v7320_v37 = vmul.f32 %v7187_v56, %v7092_v39  ;;  %7821 = vrot.lane.b32.xlu1 %v8791_v7, %s9087_s13  ;;  %v7101_v3 = vmax.f32 %v7069_v62, 0.0  ;;  %v7034_v56 = vmul.f32 %v13933_v11, %v14696_v10  ;;  %v7072_v20 = vadd.f32 %v14030_v52, %v7033_v17 }
 0x995   : > { %v7102_v32 = vmax.f32 %v7070_v5, 0.0  ;;  %v7103_v11 = vmax.f32 %v7071_v50, 0.0 }
 0x996   : > { %8422 = vmatprep.mubr.msk.f32.mxu0 %vm3819_vm2, %v7320_v37  ;;  %v14697_v37 = vld [vmem:[#allocation69_spill] sm:$0xff] }
 0x997   : > { %v7202_v22 = vpop.permute.xlu0 %7201  ;;  %8423 = vmatmul.mubr.msk.f32.gmra.mrb[70].mxu0 %vm3819_vm2, %v7321_v30  ;;  %v7035_v30 = vmul.f32 %v13953_v60, %v14697_v37  ;;  %v7330_v45 = vmul.f32 %v13943_v57, %v7102_v32  ;;  %v7037_v57 = vmul.f32 %v13958_v1, %v14699_v49 }
 0x998   : > { %v7323_v0 = vmul.f32 %v7202_v22, %v7095_v54  ;;  %7825 = vrot.lane.b32.xlu1 %v8793_v19, %s9087_s13  ;;  %8425 = vmatprep.mubr.msk.f32.mxu0 %vm3819_vm2, %v7322_v51  ;;  %v7329_v51 = vmul.f32 %v13921_v31, %v7101_v3  ;;  %v7036_v54 = vmul.f32 %v13971_v13, %v14698_v26  ;;  %v7104_v13 = vmax.f32 %v7072_v20, 0.0 }
 0x999   : > { %v7073_v19 = vadd.f32 %v14030_v52, %v7034_v56  ;;  %v7074_v60 = vadd.f32 %v14030_v52, %v7035_v30 }
 0x99a   : > { %v6978_v8 = vpop.permute.xlu1 %6977 }
 0x99b   : > { %v7207_v53 = vpop.permute.xlu0 %7206  ;;  %8426 = vmatmul.mubr.msk.f32.gmra.mrb[72].mxu0 %vm3819_vm2, %v7323_v0  ;;  %v7075_v0 = vadd.f32 %v14030_v52, %v7036_v54  ;;  %v7105_v36 = vmax.f32 %v7073_v19, 0.0 }
 0x99c   : > { %v7324_v24 = vmul.f32 %v7207_v53, %v7096_v25  ;;  %7829 = vrot.lane.b32.xlu1 %v8795_v40, %s9087_s13  ;;  %v7106_v25 = vmax.f32 %v7074_v60, 0.0  ;;  %v7039_v40 = vmul.f32 %v6978_v8, %v13660_v4  ;;  %v7076_v53 = vadd.f32 %v14030_v52, %v7037_v57 }
 0x99d   : > { %v7333_v6 = vmul.f32 %v13988_v58, %v7105_v36  ;;  %v7107_v43 = vmax.f32 %v7075_v0, 0.0 }
 0x99e   : > { %8428 = vmatprep.mubr.msk.f32.mxu0 %vm3819_vm2, %v7324_v24  ;;  %v6983_v48 = vpop.permute.xlu1 %6982  ;;  %v7334_v1 = vmul.f32 %v14023_v23, %v7106_v25  ;;  %v7078_v4 = vadd.f32 %v14030_v52, %v7039_v40  ;;  %v7108_v24 = vmax.f32 %v7076_v53, 0.0 }
 0x99f   : > { %v7222_v39 = vpop.permute.xlu0 %7221  ;;  %8429 = vmatmul.mubr.msk.f32.gmra.mrb[74].mxu0 %vm3819_vm2, %v7325_v42  ;;  %v7040_v44 = vmul.f32 %v6983_v48, %v13653_v47  ;;  %v7109_v42 = vmax.f32 %v7077_v12, 0.0 }
 0x9a0   : > { %v7327_v7 = vmul.f32 %v7222_v39, %v7099_v59  ;;  %8431 = vmatprep.mubr.msk.f32.mxu0 %vm3819_vm2, %v7326_v63  ;;  %v7110_v47 = vmax.f32 %v7078_v4, 0.0 }
 0x9a1   : > { %v7079_v58 = vadd.f32 %v14030_v52, %v7040_v44  ;;  %v14107_v44 = vld [vmem:[#allocation6] ss:$0 sm:$0xff] }
 0x9a3   : > { %v7227_v9 = vpop.permute.xlu0 %7226  ;;  %8432 = vmatmul.mubr.msk.f32.gmra.mrb[76].mxu0 %vm3819_vm2, %v7327_v7  ;;  %v7272_v31 = vpop.permute.xlu1 %7271  ;;  %v7111_v28 = vmax.f32 %v7079_v58, 0.0 }
 0x9a4   : > { %v7328_v35 = vmul.f32 %v7227_v9, %v7100_v14  ;;  %v7337_v63 = vmul.f32 %v7272_v31, %v7109_v42 }
 0x9a6   : > { %8434 = vmatprep.mubr.msk.f32.mxu0 %vm3819_vm2, %v7328_v35 }
 0x9a7   : > { %v7242_v27 = vpop.permute.xlu0 %7241  ;;  %8435 = vmatmul.mubr.msk.f32.gmra.mrb[78].mxu0 %vm3819_vm2, %v7329_v51  ;;  %v14701_v51 = vld [vmem:[#allocation12_spill] sm:$0xff] }
 0x9a8   : > { %v7331_v22 = vmul.f32 %v7242_v27, %v7103_v11  ;;  %8437 = vmatprep.mubr.msk.f32.mxu0 %vm3819_vm2, %v7330_v45 }
 0x9a9   : > { %v6993_v34 = vpop.permute.xlu1 %6992 }
 0x9aa   : > { %v7042_v7 = vmul.f32 %v6993_v34, %v13733_v46  ;;  %v14700_v46 = vld [vmem:[#allocation10_spill] sm:$0xff] }
 0x9ab   : > { %v7247_v29 = vpop.permute.xlu0 %7246  ;;  %8438 = vmatmul.mubr.msk.f32.gmra.mrb[80].mxu0 %vm3819_vm2, %v7331_v22 }
 0x9ac   : > { %v7332_v18 = vmul.f32 %v7247_v29, %v7104_v13  ;;  %v7081_v14 = vadd.f32 %v14030_v52, %v7042_v7 }
 0x9ae   : > { %8440 = vmatprep.mubr.msk.f32.mxu0 %vm3819_vm2, %v7332_v18  ;;  %v7277_v23 = vpop.permute.xlu1 %7276  ;;  %v7113_v48 = vmax.f32 %v7081_v14, 0.0 }
 0x9af   : > { %v7262_v33 = vpop.permute.xlu0 %7261  ;;  %8441 = vmatmul.mubr.msk.f32.gmra.mrb[82].mxu0 %vm3819_vm2, %v7333_v6  ;;  %v7338_v61 = vmul.f32 %v7277_v23, %v7110_v47 }
 0x9b0   : > { %v7335_v2 = vmul.f32 %v7262_v33, %v7107_v43  ;;  %8443 = vmatprep.mubr.msk.f32.mxu0 %vm3819_vm2, %v7334_v1 }
 0x9b3   : > { %v7267_v8 = vpop.permute.xlu0 %7266  ;;  %8444 = vmatmul.mubr.msk.f32.gmra.mrb[84].mxu0 %vm3819_vm2, %v7335_v2 }
 0x9b4   : > { %v7336_v15 = vmul.f32 %v7267_v8, %v7108_v24 }
 0x9b6   : > { %8446 = vmatprep.mubr.msk.f32.mxu0 %vm3819_vm2, %v7336_v15 }
 0x9b7   : > { %v7282_v59 = vpop.permute.xlu0 %7281  ;;  %8447 = vmatmul.mubr.msk.f32.gmra.mrb[86].mxu0 %vm3819_vm2, %v7337_v63 }
 0x9b8   : > { %v7339_v62 = vmul.f32 %v7282_v59, %v7111_v28  ;;  %8449 = vmatprep.mubr.msk.f32.mxu0 %vm3819_vm2, %v7338_v61 }
 0x9ba   : > { %v6998_v39 = vpop.permute.xlu1 %6997 }
 0x9bb   : > { %v7287_v5 = vpop.permute.xlu0 %7286  ;;  %8450 = vmatmul.mubr.msk.f32.gmra.mrb[88].mxu0 %vm3819_vm2, %v7339_v62  ;;  %v7043_v37 = vmul.f32 %v6998_v39, %v13791_v55 }
 0x9be   : > { %v7003_v38 = vpop.permute.xlu1 %7002 }
 0x9bf   : > { %v7044_v30 = vmul.f32 %v7003_v38, %v14700_v46 }
 0x9c0   : > { %v6988_v17 = vpop.permute.xlu0 %6987 }
 0x9c1   : > { %v7041_v50 = vmul.f32 %v6988_v17, %v13738_v41  ;;  %v7082_v41 = vadd.f32 %v14030_v52, %v7043_v37  ;;  %v7083_v26 = vadd.f32 %v14030_v52, %v7044_v30 }
 0x9c3   : > { %v7080_v3 = vadd.f32 %v14030_v52, %v7041_v50  ;;  %v7292_v56 = vpop.permute.xlu1 %7291  ;;  %v7114_v27 = vmax.f32 %v7082_v41, 0.0  ;;  %v7115_v60 = vmax.f32 %v7083_v26, 0.0 }
 0x9c4   : > { %v7341_v32 = vmul.f32 %v7292_v56, %v7113_v48 }
 0x9c5   : > { %v7112_v10 = vmax.f32 %v7080_v3, 0.0 }
 0x9c7   : > { %v7340_v9 = vmul.f32 %v7287_v5, %v7112_v10  ;;  %v7008_v35 = vpop.permute.xlu0 %7007 }
 0x9c8   : > { %v7045_v20 = vmul.f32 %v7008_v35, %v14701_v51 }
 0x9c9   : > { %8452 = vmatprep.mubr.msk.f32.mxu0 %vm3819_vm2, %v7340_v9 }
 0x9ca   : > { %8453 = vmatmul.mubr.msk.f32.gmra.mrb[90].mxu0 %vm3819_vm2, %v7341_v32  ;;  %v7084_v54 = vadd.f32 %v14030_v52, %v7045_v20 }
 0x9cc   : > { %v7302_v11 = vpop.permute.xlu0 %7301  ;;  %v7116_v57 = vmax.f32 %v7084_v54, 0.0 }
 0x9cd   : > { %v7343_v31 = vmul.f32 %v7302_v11, %v7115_v60 }
 0x9ce   : > { %v7013_v45 = vpop.permute.xlu1 %7012 }
 0x9cf   : > { %v7046_v19 = vmul.f32 %v7013_v45, %v13843_v16 }
 0x9d0   : > { %v7768_v25 = vpop.permute.xlu0 %7767 }
 0x9d1   : > { %v7085_v49 = vadd.f32 %v14030_v52, %v7046_v19 }
 0x9d3   : > { %v7297_v55 = vpop.permute.xlu1 %7296  ;;  %v7117_v36 = vmax.f32 %v7085_v49, 0.0 }
 0x9d4   : > { %v7342_v22 = vmul.f32 %v7297_v55, %v7114_v27  ;;  %v7772_v18 = vpop.permute.xlu0 %7771 }
 0x9d6   : > { %8455 = vmatprep.mubr.msk.f32.mxu0 %vm3819_vm2, %v7342_v22 }
 0x9d7   : > { %8456 = vmatmul.mubr.msk.f32.gmra.mrb[92].mxu0 %vm3819_vm2, %v7343_v31  ;;  %v7307_v0 = vpop.permute.xlu1 %7306 }
 0x9d8   : > { %v7344_v13 = vmul.f32 %v7307_v0, %v7116_v57  ;;  %v7776_v6 = vpop.permute.xlu0 %7775 }
 0x9da   : > { %8458 = vmatprep.mubr.msk.f32.mxu0 %vm3819_vm2, %v7344_v13 }
 0x9db   : > { %v7312_v21 = vpop.permute.xlu1 %7311 }
 0x9dc   : > { %v7345_v29 = vmul.f32 %v7312_v21, %v7117_v36  ;;  %v7780_v53 = vpop.permute.xlu0 %7779 }
 0x9de   : > { %8459 = vmatmul.mubr.msk.f32.gmra.mrb[94].mxu0 %vm3819_vm2, %v7345_v29 }
 0x9df   : > { %v7770_v16 = vpop.permute.xlu1 %7769 }
 0x9e0   : > { %v7784_v4 = vpop.permute.xlu0 %7783 }
 0x9e3   : > { %v7774_v40 = vpop.permute.xlu1 %7773 }
 0x9e4   : > { %v7788_v28 = vpop.permute.xlu0 %7787 }
 0x9e7   : > { %v7778_v52 = vpop.permute.xlu1 %7777 }
 0x9e8   : > { %v7792_v48 = vpop.permute.xlu0 %7791 }
 0x9eb   : > { %v7782_v34 = vpop.permute.xlu1 %7781 }
 0x9ec   : > { %v7796_v27 = vpop.permute.xlu0 %7795 }
 0x9ef   : > { %v7786_v43 = vpop.permute.xlu1 %7785 }
 0x9f3   : > { %v7790_v63 = vpop.permute.xlu1 %7789 }
 0x9f7   : > { %v7794_v3 = vpop.permute.xlu1 %7793 }
 0x9fb   : > { %v7798_v54 = vpop.permute.xlu1 %7797 }
 0x9ff   : > { %v7802_v21 = vpop.permute.xlu1 %7801 }
 0xa5d   : > { %v8415_v1 = vpop.f32.mrb[64].mxu0 }
 0xa5e   : > { %v7864_v12 = vmul.f32 %v8415_v1, %v7770_v16  ;;  %v7512_v33 = vpop.f32.mrb[65].mxu0 }
 0xa5f   : > { %v7863_v2 = vmul.f32 %v7768_v25, %v7512_v33  ;;  %v7800_v25 = vpop.permute.xlu0 %7799 }
 0xa60   : > { %v7903_v58 = vadd.f32 %v14107_v44, %v7864_v12 }
 0xa61   : > { %v7902_v24 = vadd.f32 %v14107_v44, %v7863_v2  ;;  %v7806_v2 = vpop.permute.xlu1 %7805 }
 0xa62   : > { %v7935_v42 = vmax.f32 %v7903_v58, 0.0  ;;  %v8418_v23 = vpop.f32.mrb[66].mxu0 }
 0xa63   : > { %v7934_v8 = vmax.f32 %v7902_v24, 0.0  ;;  %v7866_v47 = vmul.f32 %v8418_v23, %v7774_v40  ;;  %v7522_v15 = vpop.f32.mrb[67].mxu0 }
 0xa64   : > { %7967 = vst.msk [vmem:[%s14114_s24 + $0x8] sm:$0xff] %vm360_vm0, %v7935_v42  ;;  %v7865_v61 = vmul.f32 %v7772_v18, %v7522_v15  ;;  %v7804_v42 = vpop.permute.xlu0 %7803 }
 0xa65   : > { %7966 = vst.msk [vmem:[%s14114_s24] sm:$0xff] %vm360_vm0, %v7934_v8  ;;  %v7905_v59 = vadd.f32 %v14107_v44, %v7866_v47 }
 0xa66   : > { %v7904_v62 = vadd.f32 %v14107_v44, %v7865_v61  ;;  %v8421_v39 = vpop.f32.mrb[68].mxu0 }
 0xa67   : > { %v7937_v5 = vmax.f32 %v7905_v59, 0.0  ;;  %v7868_v7 = vmul.f32 %v8421_v39, %v7778_v52  ;;  %v7532_v38 = vpop.f32.mrb[69].mxu0  ;;  %v7810_v39 = vpop.permute.xlu1 %7809 }
 0xa68   : > { %v7936_v17 = vmax.f32 %v7904_v62, 0.0  ;;  %v7867_v50 = vmul.f32 %v7776_v6, %v7532_v38  ;;  %v7808_v38 = vpop.permute.xlu0 %7807 }
 0xa69   : > { %7969 = vst.msk [vmem:[%s14114_s24 + $0x18] sm:$0xff] %vm360_vm0, %v7937_v5  ;;  %v7907_v14 = vadd.f32 %v14107_v44, %v7868_v7 }
 0xa6a   : > { %7968 = vst.msk [vmem:[%s14114_s24 + $0x10] sm:$0xff] %vm360_vm0, %v7936_v17  ;;  %v7906_v10 = vadd.f32 %v14107_v44, %v7867_v50  ;;  %v8424_v56 = vpop.f32.mrb[70].mxu0 }
 0xa6b   : > { %v7939_v9 = vmax.f32 %v7907_v14, 0.0  ;;  %v7870_v32 = vmul.f32 %v8424_v56, %v7782_v34  ;;  %v7542_v37 = vpop.f32.mrb[71].mxu0 }
 0xa6c   : > { %v7938_v46 = vmax.f32 %v7906_v10, 0.0  ;;  %v7869_v30 = vmul.f32 %v7780_v53, %v7542_v37 }
 0xa6d   : > { %7971 = vst.msk [vmem:[%s14114_s24 + $0x28] sm:$0xff] %vm360_vm0, %v7939_v9  ;;  %v7909_v35 = vadd.f32 %v14107_v44, %v7870_v32 }
 0xa6e   : > { %7970 = vst.msk [vmem:[%s14114_s24 + $0x20] sm:$0xff] %vm360_vm0, %v7938_v46  ;;  %v7908_v41 = vadd.f32 %v14107_v44, %v7869_v30  ;;  %v8427_v51 = vpop.f32.mrb[72].mxu0  ;;  %v7814_v30 = vpop.permute.xlu1 %7813 }
 0xa6f   : > { %v7941_v20 = vmax.f32 %v7909_v35, 0.0  ;;  %v7872_v45 = vmul.f32 %v8427_v51, %v7786_v43  ;;  %v7552_v26 = vpop.f32.mrb[73].mxu0  ;;  %v7812_v51 = vpop.permute.xlu0 %7811 }
 0xa70   : > { %v7940_v11 = vmax.f32 %v7908_v41, 0.0  ;;  %v7871_v19 = vmul.f32 %v7784_v4, %v7552_v26 }
 0xa71   : > { %7973 = vst.msk [vmem:[%s14114_s24 + $0x38] sm:$0xff] %vm360_vm0, %v7941_v20  ;;  %v7911_v60 = vadd.f32 %v14107_v44, %v7872_v45 }
 0xa72   : > { %7972 = vst.msk [vmem:[%s14114_s24 + $0x30] sm:$0xff] %vm360_vm0, %v7940_v11  ;;  %v7910_v55 = vadd.f32 %v14107_v44, %v7871_v19  ;;  %v8430_v22 = vpop.f32.mrb[74].mxu0 }
 0xa73   : > { %v7943_v31 = vmax.f32 %v7911_v60, 0.0  ;;  %v7874_v49 = vmul.f32 %v8430_v22, %v7790_v63  ;;  %v7562_v57 = vpop.f32.mrb[75].mxu0  ;;  %v7818_v22 = vpop.permute.xlu1 %7817 }
 0xa74   : > { %v7942_v0 = vmax.f32 %v7910_v55, 0.0  ;;  %v7873_v13 = vmul.f32 %v7788_v28, %v7562_v57  ;;  %v7816_v57 = vpop.permute.xlu0 %7815 }
 0xa75   : > { %7975 = vst.msk [vmem:[%s14114_s24 + $0x48] sm:$0xff] %vm360_vm0, %v7943_v31  ;;  %v7913_v36 = vadd.f32 %v14107_v44, %v7874_v49 }
 0xa76   : > { %7974 = vst.msk [vmem:[%s14114_s24 + $0x40] sm:$0xff] %vm360_vm0, %v7942_v0  ;;  %v7912_v29 = vadd.f32 %v14107_v44, %v7873_v13  ;;  %v8433_v16 = vpop.f32.mrb[76].mxu0 }
 0xa77   : > { %v7945_v40 = vmax.f32 %v7913_v36, 0.0  ;;  %v7876_v18 = vmul.f32 %v8433_v16, %v7794_v3  ;;  %v7572_v52 = vpop.f32.mrb[77].mxu0 }
 0xa78   : > { %v7944_v6 = vmax.f32 %v7912_v29, 0.0  ;;  %v7875_v34 = vmul.f32 %v7792_v48, %v7572_v52  ;;  %v7822_v52 = vpop.permute.xlu1 %7821 }
 0xa79   : > { %7977 = vst.msk [vmem:[%s14114_s24 + $0x58] sm:$0xff] %vm360_vm0, %v7945_v40  ;;  %v7915_v53 = vadd.f32 %v14107_v44, %v7876_v18 }
 0xa7a   : > { %7976 = vst.msk [vmem:[%s14114_s24 + $0x50] sm:$0xff] %vm360_vm0, %v7944_v6  ;;  %v7914_v1 = vadd.f32 %v14107_v44, %v7875_v34  ;;  %v8436_v43 = vpop.f32.mrb[78].mxu0  ;;  %v7820_v34 = vpop.permute.xlu0 %7819 }
 0xa7b   : > { %v7947_v12 = vmax.f32 %v7915_v53, 0.0  ;;  %v7878_v33 = vmul.f32 %v8436_v43, %v7798_v54  ;;  %v7582_v4 = vpop.f32.mrb[79].mxu0 }
 0xa7c   : > { %v7946_v58 = vmax.f32 %v7914_v1, 0.0  ;;  %v7877_v24 = vmul.f32 %v7796_v27, %v7582_v4 }
 0xa7d   : > { %7979 = vst.msk [vmem:[%s14114_s24 + $0x68] sm:$0xff] %vm360_vm0, %v7947_v12  ;;  %v7917_v23 = vadd.f32 %v14107_v44, %v7878_v33 }
 0xa7e   : > { %7978 = vst.msk [vmem:[%s14114_s24 + $0x60] sm:$0xff] %vm360_vm0, %v7946_v58  ;;  %v7916_v8 = vadd.f32 %v14107_v44, %v7877_v24  ;;  %v8439_v47 = vpop.f32.mrb[80].mxu0  ;;  %v7826_v58 = vpop.permute.xlu1 %7825 }
 0xa7f   : > { %v7949_v15 = vmax.f32 %v7917_v23, 0.0  ;;  %v7880_v63 = vmul.f32 %v8439_v47, %v7802_v21  ;;  %v7592_v61 = vpop.f32.mrb[81].mxu0 }
 0xa80   : > { %v7948_v28 = vmax.f32 %v7916_v8, 0.0  ;;  %v7879_v59 = vmul.f32 %v7800_v25, %v7592_v61 }
 0xa81   : > { %7981 = vst.msk [vmem:[%s14114_s24 + $0x78] sm:$0xff] %vm360_vm0, %v7949_v15  ;;  %v7919_v62 = vadd.f32 %v14107_v44, %v7880_v63 }
 0xa82   : > { %7980 = vst.msk [vmem:[%s14114_s24 + $0x70] sm:$0xff] %vm360_vm0, %v7948_v28  ;;  %v7918_v5 = vadd.f32 %v14107_v44, %v7879_v59  ;;  %v8442_v7 = vpop.f32.mrb[82].mxu0  ;;  %v7830_v59 = vpop.permute.xlu1 %7829 }
 0xa83   : > { %v7951_v17 = vmax.f32 %v7919_v62, 0.0  ;;  %v7882_v50 = vmul.f32 %v8442_v7, %v7806_v2  ;;  %v7602_v14 = vpop.f32.mrb[83].mxu0 }
 0xa84   : > { %v7950_v3 = vmax.f32 %v7918_v5, 0.0  ;;  %v7881_v10 = vmul.f32 %v7804_v42, %v7602_v14  ;;  %v7824_v42 = vpop.permute.xlu0 %7823 }
 0xa85   : > { %7983 = vst.msk [vmem:[%s14114_s24 + $0x88] sm:$0xff] %vm360_vm0, %v7951_v17  ;;  %v7921_v56 = vadd.f32 %v14107_v44, %v7882_v50 }
 0xa86   : > { %7982 = vst.msk [vmem:[%s14114_s24 + $0x80] sm:$0xff] %vm360_vm0, %v7950_v3  ;;  %v7920_v48 = vadd.f32 %v14107_v44, %v7881_v10  ;;  %v8445_v9 = vpop.f32.mrb[84].mxu0 }
 0xa87   : > { %v7953_v32 = vmax.f32 %v7921_v56, 0.0  ;;  %v7884_v37 = vmul.f32 %v8445_v9, %v7810_v39  ;;  %v7612_v46 = vpop.f32.mrb[85].mxu0 }
 0xa88   : > { %v7952_v35 = vmax.f32 %v7920_v48, 0.0  ;;  %v7883_v41 = vmul.f32 %v7808_v38, %v7612_v46  ;;  %v7828_v39 = vpop.permute.xlu0 %7827 }
 0xa89   : > { %7985 = vst.msk [vmem:[%s14114_s24 + $0x98] sm:$0xff] %vm360_vm0, %v7953_v32  ;;  %v7923_v20 = vadd.f32 %v14107_v44, %v7884_v37 }
 0xa8a   : > { %7984 = vst.msk [vmem:[%s14114_s24 + $0x90] sm:$0xff] %vm360_vm0, %v7952_v35  ;;  %v7922_v45 = vadd.f32 %v14107_v44, %v7883_v41  ;;  %v8448_v26 = vpop.f32.mrb[86].mxu0 }
 0xa8b   : > { %v7955_v54 = vmax.f32 %v7923_v20, 0.0  ;;  %v7886_v11 = vmul.f32 %v8448_v26, %v7814_v30  ;;  %v7622_v19 = vpop.f32.mrb[87].mxu0 }
 0xa8c   : > { %v7954_v27 = vmax.f32 %v7922_v45, 0.0  ;;  %v7885_v60 = vmul.f32 %v7812_v51, %v7622_v19 }
 0xa8d   : > { %7987 = vst.msk [vmem:[%s14114_s24 + $0xa8] sm:$0xff] %vm360_vm0, %v7955_v54  ;;  %v7925_v55 = vadd.f32 %v14107_v44, %v7886_v11 }
 0xa8e   : > { %7986 = vst.msk [vmem:[%s14114_s24 + $0xa0] sm:$0xff] %vm360_vm0, %v7954_v27  ;;  %v7924_v31 = vadd.f32 %v14107_v44, %v7885_v60  ;;  %v8451_v49 = vpop.f32.mrb[88].mxu0 }
 0xa8f   : > { %v7957_v0 = vmax.f32 %v7925_v55, 0.0  ;;  %v7888_v13 = vmul.f32 %v8451_v49, %v7818_v22  ;;  %v7632_v36 = vpop.f32.mrb[89].mxu0 }
 0xa90   : > { %v7956_v21 = vmax.f32 %v7924_v31, 0.0  ;;  %v7887_v29 = vmul.f32 %v7816_v57, %v7632_v36 }
 0xa91   : > { %7989 = vst.msk [vmem:[%s14114_s24 + $0xb8] sm:$0xff] %vm360_vm0, %v7957_v0  ;;  %v7927_v16 = vadd.f32 %v14107_v44, %v7888_v13 }
 0xa92   : > { %7988 = vst.msk [vmem:[%s14114_s24 + $0xb0] sm:$0xff] %vm360_vm0, %v7956_v21  ;;  %v7926_v25 = vadd.f32 %v14107_v44, %v7887_v29 }
 0xa93   : > { %v7959_v40 = vmax.f32 %v7927_v16, 0.0 }
 0xa94   : > { %v7958_v18 = vmax.f32 %v7926_v25, 0.0 }
 0xa95   : > { %7991 = vst.msk [vmem:[%s14114_s24 + $0xc8] sm:$0xff] %vm360_vm0, %v7959_v40 }
 0xa96   : > { %7990 = vst.msk [vmem:[%s14114_s24 + $0xc0] sm:$0xff] %vm360_vm0, %v7958_v18 }
 0xa9d   : > { %v8454_v6 = vpop.f32.mrb[90].mxu0 }
 0xa9e   : > { %v7890_v53 = vmul.f32 %v8454_v6, %v7822_v52  ;;  %v7642_v1 = vpop.f32.mrb[91].mxu0 }
 0xa9f   : > { %v7889_v43 = vmul.f32 %v7820_v34, %v7642_v1 }
 0xaa0   : > { %v7929_v12 = vadd.f32 %v14107_v44, %v7890_v53 }
 0xaa1   : > { %v7928_v33 = vadd.f32 %v14107_v44, %v7889_v43 }
 0xaa2   : > { %v7961_v4 = vmax.f32 %v7929_v12, 0.0 }
 0xaa3   : > { %v7960_v2 = vmax.f32 %v7928_v33, 0.0 }
 0xaa4   : > { %7993 = vst.msk [vmem:[%s14114_s24 + $0xd8] sm:$0xff] %vm360_vm0, %v7961_v4 }
 0xaa5   : > { %7992 = vst.msk [vmem:[%s14114_s24 + $0xd0] sm:$0xff] %vm360_vm0, %v7960_v2 }
 0xaaa   : > { %v8457_v24 = vpop.f32.mrb[92].mxu0 }
 0xaab   : > { %v7892_v23 = vmul.f32 %v8457_v24, %v7826_v58  ;;  %v7652_v8 = vpop.f32.mrb[93].mxu0 }
 0xaac   : > { %v7891_v47 = vmul.f32 %v7824_v42, %v7652_v8 }
 0xaad   : > { %v7931_v15 = vadd.f32 %v14107_v44, %v7892_v23 }
 0xaae   : > { %v7930_v63 = vadd.f32 %v14107_v44, %v7891_v47 }
 0xaaf   : > { %v7963_v61 = vmax.f32 %v7931_v15, 0.0 }
 0xab0   : > { %v7962_v28 = vmax.f32 %v7930_v63, 0.0 }
 0xab1   : > { %7995 = vst.msk [vmem:[%s14114_s24 + $0xe8] sm:$0xff] %vm360_vm0, %v7963_v61  ;;  %v8460_v62 = vpop.f32.mrb[94].mxu0 }
 0xab2   : > { %7994 = vst.msk [vmem:[%s14114_s24 + $0xe0] sm:$0xff] %vm360_vm0, %v7962_v28  ;;  %v7894_v5 = vmul.f32 %v8460_v62, %v7830_v59  ;;  %v7662_v7 = vpop.f32.mrb[95].mxu0 }
 0xab3   : > { %v7893_v38 = vmul.f32 %v7828_v39, %v7662_v7 }
 0xab4   : > { %v7933_v17 = vadd.f32 %v14107_v44, %v7894_v5 }
 0xab5   : > { %v7932_v50 = vadd.f32 %v14107_v44, %v7893_v38 }
 0xab6   : > { %v7965_v14 = vmax.f32 %v7933_v17, 0.0 }
 0xab7   : > { %v7964_v3 = vmax.f32 %v7932_v50, 0.0 }
 0xab8   : > { %7997 = vst.msk [vmem:[%s14114_s24 + $0xf8] sm:$0xff] %vm360_vm0, %v7965_v14 }
 0xab9   : > { %7996 = vst.msk [vmem:[%s14114_s24 + $0xf0] sm:$0xff] %vm360_vm0, %v7964_v3 }
 0xaba PF: > { %s20_s29 = sadd.s32 1, %s9062_s29  }
 0xabb   : > { %p17_p4 = scmp.ge.s32.totalorder %s20_s29, 4  }
 0xabd   :  { %19 = sbr.rel (!%p17_p4) target bundleno = 3 (0x3), region = 91 }

</bundles_post_ra>
